<compile_context>
chip_gen: v6e
topology: v6e:2x2x1
jax: 0.10.0
libtpu: 0.0.40
codegen_flags: <defaults>
</compile_context>

<pallas_src>
import math

import jax
import jax.numpy as jnp
from jax.experimental import pallas as pl
from jax.experimental.pallas import tpu as pltpu

EPS = 1e-5
CMAX = 16                                    # every channel dim is padded to 16 sublanes
RSBU_CFGS = [(4, 4, True), (4, 4, False), (4, 8, True),
             (8, 8, False), (8, 16, True), (16, 16, False)]


# ---------------------------------------------------------------------------
# static parameter-slab layout (shared by the packer and the kernel)
# ---------------------------------------------------------------------------
def _param_order():
    vec = ['conv1.b']
    mat = ['conv1.A', 'conv1.B']
    for i in range(len(RSBU_CFGS)):
        p = f'b{i}.'
        vec += [p + n for n in ('bn1.g', 'bn1.b', 'c1.b', 'bn2.g', 'bn2.b',
                                'c2.b', 'fc1.b', 'fcbn.g', 'fcbn.b', 'fc2.b')]
        mat += [p + n for n in ('c1.W0', 'c1.W1', 'c1.W2',
                                'c2.W0', 'c2.W1', 'c2.W2', 'fc1.W', 'fc2.W')]
    vec += ['head.bn.g', 'head.bn.b', 'head.lin.b', 'head.cls.b']
    mat += ['head.lin.W', 'head.cls.W']
    return vec, mat


VEC_NAMES, MAT_NAMES = _param_order()
VEC_IDX = {n: i for i, n in enumerate(VEC_NAMES)}
MAT_IDX = {n: i for i, n in enumerate(MAT_NAMES)}


def _pad_vec(v):
    v = jnp.asarray(v, jnp.float32).reshape(-1)
    return jnp.pad(v, (0, CMAX - v.shape[0])).reshape(CMAX, 1)


def _pad_mat(m):
    m = jnp.asarray(m, jnp.float32)
    r, c = m.shape
    return jnp.pad(m, ((0, CMAX - r), (0, CMAX - c)))


def pack_params(params):
    """Pack every weight into two slabs: vecs (16, NV) of per-channel columns and
    mats (16, 16*NM) of zero-padded 16x16 weight blocks at static column offsets."""
    vec_d, mat_d = {}, {}
    cw, cb = params['conv1']['w'], params['conv1']['b']            # (4,1,3), (4,)
    # stride-2 conv1 rewritten as  A @ [xe; xo]  +  B @ shift_right([xe; xo]):
    #   tap k=1 hits x[2l]   -> column 0 (xe row)
    #   tap k=2 hits x[2l+1] -> column 1 (xo row)
    #   tap k=0 hits x[2l-1] -> column 1 of the right-shifted tile
    A = jnp.zeros((CMAX, CMAX), jnp.float32)
    A = A.at[0:4, 0].set(cw[:, 0, 1]).at[0:4, 1].set(cw[:, 0, 2])
    B = jnp.zeros((CMAX, CMAX), jnp.float32).at[0:4, 1].set(cw[:, 0, 0])
    mat_d['conv1.A'], mat_d['conv1.B'] = A, B
    vec_d['conv1.b'] = cb
    for i, bp in enumerate(params['rsbu']):
        p = f'b{i}.'
        vec_d[p + 'bn1.g'], vec_d[p + 'bn1.b'] = bp['bn1']['g'], bp['bn1']['b']
        vec_d[p + 'c1.b'] = bp['conv1']['b']
        vec_d[p + 'bn2.g'], vec_d[p + 'bn2.b'] = bp['bn2']['g'], bp['bn2']['b']
        vec_d[p + 'c2.b'] = bp['conv2']['b']
        vec_d[p + 'fc1.b'] = bp['fc1']['b']
        vec_d[p + 'fcbn.g'], vec_d[p + 'fcbn.b'] = bp['fcbn']['g'], bp['fcbn']['b']
        vec_d[p + 'fc2.b'] = bp['fc2']['b']
        w1, w2 = bp['conv1']['w'], bp['conv2']['w']
        for k in range(3):
            mat_d[p + f'c1.W{k}'] = w1[:, :, k]
            mat_d[p + f'c2.W{k}'] = w2[:, :, k]
        mat_d[p + 'fc1.W'] = bp['fc1']['w']
        mat_d[p + 'fc2.W'] = bp['fc2']['w']
    mat_d['head.lin.W'] = params['head']['lin']['w']
    mat_d['head.cls.W'] = params['head']['cls']['w']
    vec_d['head.bn.g'] = params['head']['bn']['g']
    vec_d['head.bn.b'] = params['head']['bn']['b']
    vec_d['head.lin.b'] = params['head']['lin']['b']
    vec_d['head.cls.b'] = params['head']['cls']['b']
    vecs = jnp.concatenate([_pad_vec(vec_d[n]) for n in VEC_NAMES], axis=1)
    mats = jnp.concatenate([_pad_mat(mat_d[n]) for n in MAT_NAMES], axis=1)
    return vecs, mats


# ---------------------------------------------------------------------------
# the fused kernel
# ---------------------------------------------------------------------------
def _mm(a, b):
    return jnp.dot(a, b, preferred_element_type=jnp.float32)


def make_fused_kernel(N, L0):
    """Whole DRSNet forward in one kernel.  Activations are (16, N*L) f32 tiles:
    channels (padded to 16) on sublanes, batch folded into the lane axis."""

    def kernel(x0_ref, vecs_ref, mats_ref, out_ref):
        def vcol(name):
            c = VEC_IDX[name]
            return vecs_ref[:, c:c + 1]                        # (16, 1)

        def wmat(name):
            c = CMAX * MAT_IDX[name]
            return mats_ref[:, c:c + CMAX]                     # (16, 16)

        def iota(shape, dim):
            return jax.lax.broadcasted_iota(jnp.int32, shape, dim)

        # per-sample-segment shifts along the lane axis (segment length L is a power of two)
        def shift_right_seg(x, L):
            r = pltpu.roll(x, shift=1, axis=1)
            pos = iota(x.shape, 1) & (L - 1)
            return jnp.where(pos != 0, r, 0.0)

        def shift_left_seg(x, L):
            M = x.shape[1]
            r = pltpu.roll(x, shift=M - 1, axis=1)
            pos = iota(x.shape, 1) & (L - 1)
            return jnp.where(pos != L - 1, r, 0.0)

        def conv3(h, L, w0, w1, w2):
            # Conv1d(k=3, stride=1, pad=1) over every batch segment at once (MXU).
            return (_mm(w0, shift_right_seg(h, L)) + _mm(w1, h)
                    + _mm(w2, shift_left_seg(h, L)))

        def bn_relu(x, g, b):
            # training-mode BatchNorm (biased batch variance, eps=1e-5) + ReLU;
            # per-channel statistics over every lane (= batch x length, or batch for FC).
            m = jnp.mean(x, axis=1, keepdims=True)
            v = jnp.mean(x * x, axis=1, keepdims=True) - m * m
            sc = jax.lax.rsqrt(v + EPS) * g
            return jnp.maximum(x * sc + (b - m * sc), 0.0)

        def seg_mean(x, L):
            # per-sample global average pool: (16, N*L) @ (N*L, N) -> (16, N)
            M = x.shape[1]
            r, c = iota((M, N), 0), iota((M, N), 1)
            g = jnp.where((r >= c * L) & (r < c * L + L), 1.0 / L, 0.0)
            return _mm(x, g)

        def seg_bcast(x, L, M):
            # broadcast per-sample values back over that sample's lanes: (16, N) -> (16, M)
            r, c = iota((N, M), 0), iota((N, M), 1)
            g = jnp.where((c >= r * L) & (c < r * L + L), 1.0, 0.0)
            return _mm(x, g)

        # ---- initial Conv1d(1 -> 4, k=3, stride=2, pad=1) -----------------------
        # x0 row 0 = even input samples, row 1 = odd input samples (per batch segment).
        x0 = x0_ref[...]                                        # (16, N*L0/2)
        L = L0 // 2
        x = (_mm(wmat('conv1.A'), x0)
             + _mm(wmat('conv1.B'), shift_right_seg(x0, L))
             + vcol('conv1.b'))                                 # (16, N*L)

        # ---- 6 RSBU_CW blocks ----------------------------------------------------
        for i, (cin, cout, ds) in enumerate(RSBU_CFGS):
            p = f'b{i}.'
            h = bn_relu(x, vcol(p + 'bn1.g'), vcol(p + 'bn1.b'))
            y = conv3(h, L, wmat(p + 'c1.W0'), wmat(p + 'c1.W1'), wmat(p + 'c1.W2'))
            if ds:
                # stride-2 == keep even positions of the stride-1 result; realised as a
                # matmul with a 0/1 selection matrix (no strided lane access needed).
                M = x.shape[1]
                sel = jnp.where(iota((M, M // 2), 0) == 2 * iota((M, M // 2), 1), 1.0, 0.0)
                y = _mm(y, sel)
                res = _mm(x, sel)       # AvgPool1d(kernel=1, stride=2) of the block input
                L = L // 2
            else:
                res = x
            y = y + vcol(p + 'c1.b')
            h2 = bn_relu(y, vcol(p + 'bn2.g'), vcol(p + 'bn2.b'))
            z = conv3(h2, L, wmat(p + 'c2.W0'), wmat(p + 'c2.W1'), wmat(p + 'c2.W2')) \
                + vcol(p + 'c2.b')

            # channel-wise soft-threshold attention, batched over N via lane segments
            zabs = jnp.abs(z)
            gap = seg_mean(zabs, L)                                          # (16, N)
            a = _mm(wmat(p + 'fc1.W'), gap) + vcol(p + 'fc1.b')
            af = bn_relu(a, vcol(p + 'fcbn.g'), vcol(p + 'fcbn.b'))
            logit = _mm(wmat(p + 'fc2.W'), af) + vcol(p + 'fc2.b')
            alpha = 1.0 / (1.0 + jnp.exp(-logit))            # saturates cleanly in f32
            thr = seg_bcast(gap * alpha, L, N * L)                           # (16, N*L)
            # sign(z) * max(|z| - thr, 0)  ==  z - clip(z, -thr, thr)   (thr >= 0)
            x = z - jnp.minimum(jnp.maximum(z, -thr), thr) + res

        # ---- head: BN(16) + ReLU + GAP + Linear(16->8) + Linear(8->3) + softmax ---
        h = bn_relu(x, vcol('head.bn.g'), vcol('head.bn.b'))
        gap = seg_mean(h, L)                                                 # (16, N)
        l1 = _mm(wmat('head.lin.W'), gap) + vcol('head.lin.b')               # rows 0..7 live
        logits = _mm(wmat('head.cls.W'), l1) + vcol('head.cls.b')            # rows 0..2 live
        logits = logits[0:3, :]                                              # (3, N)
        mx = jnp.max(logits, axis=0, keepdims=True)
        e = jnp.exp(logits - mx)
        out_ref[...] = (e / jnp.sum(e, axis=0, keepdims=True)).astype(out_ref.dtype)

    return kernel


# ---------------------------------------------------------------------------
# wrapper
# ---------------------------------------------------------------------------
_VSPEC = pl.BlockSpec(memory_space=pltpu.MemorySpace.VMEM)


def drsnet_forward(x, params):
    N, _, L0 = x.shape
    Lh = L0 // 2
    # de-interleave even/odd raw-input samples once (feeds the single fused kernel);
    # rows 2..15 are zero so every in-kernel activation is a uniform (16, lanes) slab.
    xe = x[:, 0, 0::2].reshape(1, N * Lh)
    xo = x[:, 0, 1::2].reshape(1, N * Lh)
    x0 = jnp.concatenate([xe, xo, jnp.zeros((CMAX - 2, N * Lh), x.dtype)], axis=0)
    vecs, mats = pack_params(params)
    probs = pl.pallas_call(
        make_fused_kernel(N, L0),
        out_shape=jax.ShapeDtypeStruct((3, N), jnp.float32),
        in_specs=[_VSPEC, _VSPEC, _VSPEC],
        out_specs=_VSPEC,
    )(x0.astype(jnp.float32), vecs, mats)
    return probs.T                                              # (N, 3) softmax probabilities


# ---------------------------------------------------------------------------
# deterministic parameter initialization (PyTorch-default-like)
# ---------------------------------------------------------------------------
def init_params(key):
    ks = jax.random.split(key, 64)
    it = iter(range(64))

    def nxt():
        return ks[next(it)]

    def conv_p(cin, cout, k=3):
        bound = 1.0 / math.sqrt(cin * k)
        return dict(w=jax.random.uniform(nxt(), (cout, cin, k), jnp.float32, -bound, bound),
                    b=jax.random.uniform(nxt(), (cout,), jnp.float32, -bound, bound))

    def lin_p(fin, fout):
        bound = 1.0 / math.sqrt(fin)
        return dict(w=jax.random.uniform(nxt(), (fout, fin), jnp.float32, -bound, bound),
                    b=jax.random.uniform(nxt(), (fout,), jnp.float32, -bound, bound))

    def bn_p(c):
        return dict(g=jnp.ones((c,), jnp.float32), b=jnp.zeros((c,), jnp.float32))

    params = {'conv1': conv_p(1, 4)}
    blocks = []
    for cin, cout, _ in RSBU_CFGS:
        blocks.append(dict(bn1=bn_p(cin), conv1=conv_p(cin, cout),
                           bn2=bn_p(cout), conv2=conv_p(cout, cout),
                           fc1=lin_p(cout, cout), fcbn=bn_p(cout), fc2=lin_p(cout, cout)))
    params['rsbu'] = blocks
    params['head'] = dict(bn=bn_p(16), lin=lin_p(16, 8), cls=lin_p(8, 3))
    # TODO(synk): DRSNet.__init__ also defines linear6_8/linear8_4/linear4_2/output_center_pos/
    # output_width, but they are never used in forward(), so they are not materialized here.
    return params


if __name__ == "__main__":
    key = jax.random.PRNGKey(0)
    kx, kp = jax.random.split(key)
    # input: (batch=2, channels=1, length=256) -> after 4 stride-2 stages the length is 16,
    # consistent with the module's 16-channel head.
    x = jax.random.normal(kx, (2, 1, 256), jnp.float32)
    params = init_params(kp)

    fwd = jax.jit(drsnet_forward)
    out = jax.block_until_ready(fwd(x, params))

    assert out.shape == (2, 3)
    assert bool(jnp.all(jnp.isfinite(out)))
    assert bool(jnp.allclose(jnp.sum(out, axis=1), 1.0, atol=1e-5))
    print("KERNEL_OK")
</pallas_src>

<mosaic_0001>
module attributes {stable_mosaic.version = 11 : i64} {
  func.func @kernel(%arg0: memref<16x256xf32, #tpu.memory_space<vmem>>, %arg1: memref<16x65xf32, #tpu.memory_space<vmem>>, %arg2: memref<16x832xf32, #tpu.memory_space<vmem>>, %arg3: memref<3x2xf32, #tpu.memory_space<vmem>>) attributes {dimension_semantics = [], scalar_prefetch = 0 : i64, scratch_operands = 0 : i64, tpu.core_type = #tpu.core_type<tc>} {
    %c0 = arith.constant 0 : index
    %c0_0 = arith.constant 0 : index
    %0 = vector.load %arg0[%c0, %c0_0] : memref<16x256xf32, #tpu.memory_space<vmem>>, vector<16x256xf32>
    %c0_1 = arith.constant 0 : index
    %c0_2 = arith.constant 0 : index
    %1 = vector.load %arg2[%c0_1, %c0_2] : memref<16x832xf32, #tpu.memory_space<vmem>>, vector<16x16xf32>
    %cst = arith.constant dense<0.000000e+00> : vector<16x256xf32>
    %2 = tpu.matmul %1, %0, %cst {dimension_numbers = #tpu.dot_dimension_numbers<[1], [0], [0], [1], [0, 0, 1, 1], [], []>} : vector<16x16xf32>, vector<16x256xf32>, vector<16x256xf32> -> vector<16x256xf32>
    %c0_3 = arith.constant 0 : index
    %c16 = arith.constant 16 : index
    %3 = vector.load %arg2[%c0_3, %c16] : memref<16x832xf32, #tpu.memory_space<vmem>>, vector<16x16xf32>
    %c1_i32 = arith.constant 1 : i32
    %4 = tpu.dynamic_rotate %0 by %c1_i32 dim 1 : vector<16x256xf32>, i32 -> vector<16x256xf32>
    %5 = tpu.iota {dimensions = array<i32: 1>} : vector<16x256xi32>
    %c127_i32 = arith.constant 127 : i32
    %6 = vector.broadcast %c127_i32 : i32 to vector<16x256xi32>
    %7 = arith.andi %5, %6 : vector<16x256xi32>
    %c0_i32 = arith.constant 0 : i32
    %8 = vector.broadcast %c0_i32 : i32 to vector<16x256xi32>
    %9 = arith.cmpi ne, %7, %8 : vector<16x256xi32>
    %cst_4 = arith.constant 0.000000e+00 : f32
    %10 = vector.broadcast %cst_4 : f32 to vector<16x256xf32>
    %11 = arith.select %9, %4, %10 : vector<16x256xi1>, vector<16x256xf32>
    %cst_5 = arith.constant dense<0.000000e+00> : vector<16x256xf32>
    %12 = tpu.matmul %3, %11, %cst_5 {dimension_numbers = #tpu.dot_dimension_numbers<[1], [0], [0], [1], [0, 0, 1, 1], [], []>} : vector<16x16xf32>, vector<16x256xf32>, vector<16x256xf32> -> vector<16x256xf32>
    %13 = arith.addf %2, %12 : vector<16x256xf32>
    %c0_6 = arith.constant 0 : index
    %c0_7 = arith.constant 0 : index
    %14 = vector.load %arg1[%c0_6, %c0_7] : memref<16x65xf32, #tpu.memory_space<vmem>>, vector<16x1xf32>
    %15 = vector.broadcast %14 : vector<16x1xf32> to vector<16x256xf32>
    %16 = arith.addf %13, %15 : vector<16x256xf32>
    %c0_8 = arith.constant 0 : index
    %c1 = arith.constant 1 : index
    %17 = vector.load %arg1[%c0_8, %c1] : memref<16x65xf32, #tpu.memory_space<vmem>>, vector<16x1xf32>
    %c0_9 = arith.constant 0 : index
    %c2 = arith.constant 2 : index
    %18 = vector.load %arg1[%c0_9, %c2] : memref<16x65xf32, #tpu.memory_space<vmem>>, vector<16x1xf32>
    %cst_10 = arith.constant dense<0.000000e+00> : vector<16xf32>
    %19 = vector.multi_reduction <add>, %16, %cst_10 [1] : vector<16x256xf32> to vector<16xf32>
    %20 = vector.shape_cast %19 : vector<16xf32> to vector<16x1xf32>
    %cst_11 = arith.constant 2.560000e+02 : f32
    %21 = vector.broadcast %cst_11 : f32 to vector<16x1xf32>
    %22 = arith.divf %20, %21 : vector<16x1xf32>
    %23 = arith.mulf %16, %16 : vector<16x256xf32>
    %cst_12 = arith.constant dense<0.000000e+00> : vector<16xf32>
    %24 = vector.multi_reduction <add>, %23, %cst_12 [1] : vector<16x256xf32> to vector<16xf32>
    %25 = vector.shape_cast %24 : vector<16xf32> to vector<16x1xf32>
    %cst_13 = arith.constant 2.560000e+02 : f32
    %26 = vector.broadcast %cst_13 : f32 to vector<16x1xf32>
    %27 = arith.divf %25, %26 : vector<16x1xf32>
    %28 = arith.mulf %22, %22 : vector<16x1xf32>
    %29 = arith.subf %27, %28 : vector<16x1xf32>
    %cst_14 = arith.constant 9.99999974E-6 : f32
    %30 = vector.broadcast %cst_14 : f32 to vector<16x1xf32>
    %31 = arith.addf %29, %30 : vector<16x1xf32>
    %32 = math.rsqrt %31 : vector<16x1xf32>
    %33 = arith.mulf %32, %17 : vector<16x1xf32>
    %34 = vector.broadcast %33 : vector<16x1xf32> to vector<16x256xf32>
    %35 = arith.mulf %16, %34 : vector<16x256xf32>
    %36 = arith.mulf %22, %33 : vector<16x1xf32>
    %37 = arith.subf %18, %36 : vector<16x1xf32>
    %38 = vector.broadcast %37 : vector<16x1xf32> to vector<16x256xf32>
    %39 = arith.addf %35, %38 : vector<16x256xf32>
    %cst_15 = arith.constant 0.000000e+00 : f32
    %40 = vector.broadcast %cst_15 : f32 to vector<16x256xf32>
    %41 = arith.maximumf %39, %40 : vector<16x256xf32>
    %c0_16 = arith.constant 0 : index
    %c32 = arith.constant 32 : index
    %42 = vector.load %arg2[%c0_16, %c32] : memref<16x832xf32, #tpu.memory_space<vmem>>, vector<16x16xf32>
    %c0_17 = arith.constant 0 : index
    %c48 = arith.constant 48 : index
    %43 = vector.load %arg2[%c0_17, %c48] : memref<16x832xf32, #tpu.memory_space<vmem>>, vector<16x16xf32>
    %c0_18 = arith.constant 0 : index
    %c64 = arith.constant 64 : index
    %44 = vector.load %arg2[%c0_18, %c64] : memref<16x832xf32, #tpu.memory_space<vmem>>, vector<16x16xf32>
    %c1_i32_19 = arith.constant 1 : i32
    %45 = tpu.dynamic_rotate %41 by %c1_i32_19 dim 1 : vector<16x256xf32>, i32 -> vector<16x256xf32>
    %46 = tpu.iota {dimensions = array<i32: 1>} : vector<16x256xi32>
    %c127_i32_20 = arith.constant 127 : i32
    %47 = vector.broadcast %c127_i32_20 : i32 to vector<16x256xi32>
    %48 = arith.andi %46, %47 : vector<16x256xi32>
    %c0_i32_21 = arith.constant 0 : i32
    %49 = vector.broadcast %c0_i32_21 : i32 to vector<16x256xi32>
    %50 = arith.cmpi ne, %48, %49 : vector<16x256xi32>
    %cst_22 = arith.constant 0.000000e+00 : f32
    %51 = vector.broadcast %cst_22 : f32 to vector<16x256xf32>
    %52 = arith.select %50, %45, %51 : vector<16x256xi1>, vector<16x256xf32>
    %cst_23 = arith.constant dense<0.000000e+00> : vector<16x256xf32>
    %53 = tpu.matmul %42, %52, %cst_23 {dimension_numbers = #tpu.dot_dimension_numbers<[1], [0], [0], [1], [0, 0, 1, 1], [], []>} : vector<16x16xf32>, vector<16x256xf32>, vector<16x256xf32> -> vector<16x256xf32>
    %cst_24 = arith.constant dense<0.000000e+00> : vector<16x256xf32>
    %54 = tpu.matmul %43, %41, %cst_24 {dimension_numbers = #tpu.dot_dimension_numbers<[1], [0], [0], [1], [0, 0, 1, 1], [], []>} : vector<16x16xf32>, vector<16x256xf32>, vector<16x256xf32> -> vector<16x256xf32>
    %55 = arith.addf %53, %54 : vector<16x256xf32>
    %c255_i32 = arith.constant 255 : i32
    %56 = tpu.dynamic_rotate %41 by %c255_i32 dim 1 : vector<16x256xf32>, i32 -> vector<16x256xf32>
    %57 = tpu.iota {dimensions = array<i32: 1>} : vector<16x256xi32>
    %c127_i32_25 = arith.constant 127 : i32
    %58 = vector.broadcast %c127_i32_25 : i32 to vector<16x256xi32>
    %59 = arith.andi %57, %58 : vector<16x256xi32>
    %c127_i32_26 = arith.constant 127 : i32
    %60 = vector.broadcast %c127_i32_26 : i32 to vector<16x256xi32>
    %61 = arith.cmpi ne, %59, %60 : vector<16x256xi32>
    %cst_27 = arith.constant 0.000000e+00 : f32
    %62 = vector.broadcast %cst_27 : f32 to vector<16x256xf32>
    %63 = arith.select %61, %56, %62 : vector<16x256xi1>, vector<16x256xf32>
    %cst_28 = arith.constant dense<0.000000e+00> : vector<16x256xf32>
    %64 = tpu.matmul %44, %63, %cst_28 {dimension_numbers = #tpu.dot_dimension_numbers<[1], [0], [0], [1], [0, 0, 1, 1], [], []>} : vector<16x16xf32>, vector<16x256xf32>, vector<16x256xf32> -> vector<16x256xf32>
    %65 = arith.addf %55, %64 : vector<16x256xf32>
    %66 = tpu.iota {dimensions = array<i32: 0>} : vector<256x128xi32>
    %67 = tpu.iota {dimensions = array<i32: 1>} : vector<256x128xi32>
    %c2_i32 = arith.constant 2 : i32
    %68 = vector.broadcast %c2_i32 : i32 to vector<256x128xi32>
    %69 = arith.muli %68, %67 : vector<256x128xi32>
    %70 = arith.cmpi eq, %66, %69 : vector<256x128xi32>
    %cst_29 = arith.constant 1.000000e+00 : f32
    %cst_30 = arith.constant 0.000000e+00 : f32
    %71 = vector.broadcast %cst_29 : f32 to vector<256x128xf32>
    %72 = vector.broadcast %cst_30 : f32 to vector<256x128xf32>
    %73 = arith.select %70, %71, %72 : vector<256x128xi1>, vector<256x128xf32>
    %cst_31 = arith.constant dense<0.000000e+00> : vector<16x128xf32>
    %74 = tpu.matmul %65, %73, %cst_31 {dimension_numbers = #tpu.dot_dimension_numbers<[1], [0], [0], [1], [0, 0, 1, 1], [], []>} : vector<16x256xf32>, vector<256x128xf32>, vector<16x128xf32> -> vector<16x128xf32>
    %cst_32 = arith.constant dense<0.000000e+00> : vector<16x128xf32>
    %75 = tpu.matmul %16, %73, %cst_32 {dimension_numbers = #tpu.dot_dimension_numbers<[1], [0], [0], [1], [0, 0, 1, 1], [], []>} : vector<16x256xf32>, vector<256x128xf32>, vector<16x128xf32> -> vector<16x128xf32>
    %c0_33 = arith.constant 0 : index
    %c3 = arith.constant 3 : index
    %76 = vector.load %arg1[%c0_33, %c3] : memref<16x65xf32, #tpu.memory_space<vmem>>, vector<16x1xf32>
    %77 = vector.broadcast %76 : vector<16x1xf32> to vector<16x128xf32>
    %78 = arith.addf %74, %77 : vector<16x128xf32>
    %c0_34 = arith.constant 0 : index
    %c4 = arith.constant 4 : index
    %79 = vector.load %arg1[%c0_34, %c4] : memref<16x65xf32, #tpu.memory_space<vmem>>, vector<16x1xf32>
    %c0_35 = arith.constant 0 : index
    %c5 = arith.constant 5 : index
    %80 = vector.load %arg1[%c0_35, %c5] : memref<16x65xf32, #tpu.memory_space<vmem>>, vector<16x1xf32>
    %cst_36 = arith.constant dense<0.000000e+00> : vector<16xf32>
    %81 = vector.multi_reduction <add>, %78, %cst_36 [1] : vector<16x128xf32> to vector<16xf32>
    %82 = vector.shape_cast %81 : vector<16xf32> to vector<16x1xf32>
    %cst_37 = arith.constant 1.280000e+02 : f32
    %83 = vector.broadcast %cst_37 : f32 to vector<16x1xf32>
    %84 = arith.divf %82, %83 : vector<16x1xf32>
    %85 = arith.mulf %78, %78 : vector<16x128xf32>
    %cst_38 = arith.constant dense<0.000000e+00> : vector<16xf32>
    %86 = vector.multi_reduction <add>, %85, %cst_38 [1] : vector<16x128xf32> to vector<16xf32>
    %87 = vector.shape_cast %86 : vector<16xf32> to vector<16x1xf32>
    %cst_39 = arith.constant 1.280000e+02 : f32
    %88 = vector.broadcast %cst_39 : f32 to vector<16x1xf32>
    %89 = arith.divf %87, %88 : vector<16x1xf32>
    %90 = arith.mulf %84, %84 : vector<16x1xf32>
    %91 = arith.subf %89, %90 : vector<16x1xf32>
    %cst_40 = arith.constant 9.99999974E-6 : f32
    %92 = vector.broadcast %cst_40 : f32 to vector<16x1xf32>
    %93 = arith.addf %91, %92 : vector<16x1xf32>
    %94 = math.rsqrt %93 : vector<16x1xf32>
    %95 = arith.mulf %94, %79 : vector<16x1xf32>
    %96 = vector.broadcast %95 : vector<16x1xf32> to vector<16x128xf32>
    %97 = arith.mulf %78, %96 : vector<16x128xf32>
    %98 = arith.mulf %84, %95 : vector<16x1xf32>
    %99 = arith.subf %80, %98 : vector<16x1xf32>
    %100 = vector.broadcast %99 : vector<16x1xf32> to vector<16x128xf32>
    %101 = arith.addf %97, %100 : vector<16x128xf32>
    %cst_41 = arith.constant 0.000000e+00 : f32
    %102 = vector.broadcast %cst_41 : f32 to vector<16x128xf32>
    %103 = arith.maximumf %101, %102 : vector<16x128xf32>
    %c0_42 = arith.constant 0 : index
    %c80 = arith.constant 80 : index
    %104 = vector.load %arg2[%c0_42, %c80] : memref<16x832xf32, #tpu.memory_space<vmem>>, vector<16x16xf32>
    %c0_43 = arith.constant 0 : index
    %c96 = arith.constant 96 : index
    %105 = vector.load %arg2[%c0_43, %c96] : memref<16x832xf32, #tpu.memory_space<vmem>>, vector<16x16xf32>
    %c0_44 = arith.constant 0 : index
    %c112 = arith.constant 112 : index
    %106 = vector.load %arg2[%c0_44, %c112] : memref<16x832xf32, #tpu.memory_space<vmem>>, vector<16x16xf32>
    %c1_i32_45 = arith.constant 1 : i32
    %107 = tpu.dynamic_rotate %103 by %c1_i32_45 dim 1 : vector<16x128xf32>, i32 -> vector<16x128xf32>
    %108 = tpu.iota {dimensions = array<i32: 1>} : vector<16x128xi32>
    %c63_i32 = arith.constant 63 : i32
    %109 = vector.broadcast %c63_i32 : i32 to vector<16x128xi32>
    %110 = arith.andi %108, %109 : vector<16x128xi32>
    %c0_i32_46 = arith.constant 0 : i32
    %111 = vector.broadcast %c0_i32_46 : i32 to vector<16x128xi32>
    %112 = arith.cmpi ne, %110, %111 : vector<16x128xi32>
    %cst_47 = arith.constant 0.000000e+00 : f32
    %113 = vector.broadcast %cst_47 : f32 to vector<16x128xf32>
    %114 = arith.select %112, %107, %113 : vector<16x128xi1>, vector<16x128xf32>
    %cst_48 = arith.constant dense<0.000000e+00> : vector<16x128xf32>
    %115 = tpu.matmul %104, %114, %cst_48 {dimension_numbers = #tpu.dot_dimension_numbers<[1], [0], [0], [1], [0, 0, 1, 1], [], []>} : vector<16x16xf32>, vector<16x128xf32>, vector<16x128xf32> -> vector<16x128xf32>
    %cst_49 = arith.constant dense<0.000000e+00> : vector<16x128xf32>
    %116 = tpu.matmul %105, %103, %cst_49 {dimension_numbers = #tpu.dot_dimension_numbers<[1], [0], [0], [1], [0, 0, 1, 1], [], []>} : vector<16x16xf32>, vector<16x128xf32>, vector<16x128xf32> -> vector<16x128xf32>
    %117 = arith.addf %115, %116 : vector<16x128xf32>
    %c127_i32_50 = arith.constant 127 : i32
    %118 = tpu.dynamic_rotate %103 by %c127_i32_50 dim 1 : vector<16x128xf32>, i32 -> vector<16x128xf32>
    %119 = tpu.iota {dimensions = array<i32: 1>} : vector<16x128xi32>
    %c63_i32_51 = arith.constant 63 : i32
    %120 = vector.broadcast %c63_i32_51 : i32 to vector<16x128xi32>
    %121 = arith.andi %119, %120 : vector<16x128xi32>
    %c63_i32_52 = arith.constant 63 : i32
    %122 = vector.broadcast %c63_i32_52 : i32 to vector<16x128xi32>
    %123 = arith.cmpi ne, %121, %122 : vector<16x128xi32>
    %cst_53 = arith.constant 0.000000e+00 : f32
    %124 = vector.broadcast %cst_53 : f32 to vector<16x128xf32>
    %125 = arith.select %123, %118, %124 : vector<16x128xi1>, vector<16x128xf32>
    %cst_54 = arith.constant dense<0.000000e+00> : vector<16x128xf32>
    %126 = tpu.matmul %106, %125, %cst_54 {dimension_numbers = #tpu.dot_dimension_numbers<[1], [0], [0], [1], [0, 0, 1, 1], [], []>} : vector<16x16xf32>, vector<16x128xf32>, vector<16x128xf32> -> vector<16x128xf32>
    %127 = arith.addf %117, %126 : vector<16x128xf32>
    %c0_55 = arith.constant 0 : index
    %c6 = arith.constant 6 : index
    %128 = vector.load %arg1[%c0_55, %c6] : memref<16x65xf32, #tpu.memory_space<vmem>>, vector<16x1xf32>
    %129 = vector.broadcast %128 : vector<16x1xf32> to vector<16x128xf32>
    %130 = arith.addf %127, %129 : vector<16x128xf32>
    %131 = math.absf %130 : vector<16x128xf32>
    %132 = tpu.iota {dimensions = array<i32: 0>} : vector<128x2xi32>
    %133 = tpu.iota {dimensions = array<i32: 1>} : vector<128x2xi32>
    %c64_i32 = arith.constant 64 : i32
    %134 = vector.broadcast %c64_i32 : i32 to vector<128x2xi32>
    %135 = arith.muli %133, %134 : vector<128x2xi32>
    %136 = arith.cmpi sge, %132, %135 : vector<128x2xi32>
    %c64_i32_56 = arith.constant 64 : i32
    %137 = vector.broadcast %c64_i32_56 : i32 to vector<128x2xi32>
    %138 = arith.muli %133, %137 : vector<128x2xi32>
    %c64_i32_57 = arith.constant 64 : i32
    %139 = vector.broadcast %c64_i32_57 : i32 to vector<128x2xi32>
    %140 = arith.addi %138, %139 : vector<128x2xi32>
    %141 = arith.cmpi slt, %132, %140 : vector<128x2xi32>
    %142 = arith.andi %136, %141 : vector<128x2xi1>
    %cst_58 = arith.constant 1.562500e-02 : f32
    %cst_59 = arith.constant 0.000000e+00 : f32
    %143 = vector.broadcast %cst_58 : f32 to vector<128x2xf32>
    %144 = vector.broadcast %cst_59 : f32 to vector<128x2xf32>
    %145 = arith.select %142, %143, %144 : vector<128x2xi1>, vector<128x2xf32>
    %cst_60 = arith.constant dense<0.000000e+00> : vector<16x2xf32>
    %146 = tpu.matmul %131, %145, %cst_60 {dimension_numbers = #tpu.dot_dimension_numbers<[1], [0], [0], [1], [0, 0, 1, 1], [], []>} : vector<16x128xf32>, vector<128x2xf32>, vector<16x2xf32> -> vector<16x2xf32>
    %c0_61 = arith.constant 0 : index
    %c128 = arith.constant 128 : index
    %147 = vector.load %arg2[%c0_61, %c128] : memref<16x832xf32, #tpu.memory_space<vmem>>, vector<16x16xf32>
    %cst_62 = arith.constant dense<0.000000e+00> : vector<16x2xf32>
    %148 = tpu.matmul %147, %146, %cst_62 {dimension_numbers = #tpu.dot_dimension_numbers<[1], [0], [0], [1], [0, 0, 1, 1], [], []>} : vector<16x16xf32>, vector<16x2xf32>, vector<16x2xf32> -> vector<16x2xf32>
    %c0_63 = arith.constant 0 : index
    %c7 = arith.constant 7 : index
    %149 = vector.load %arg1[%c0_63, %c7] : memref<16x65xf32, #tpu.memory_space<vmem>>, vector<16x1xf32>
    %150 = vector.broadcast %149 : vector<16x1xf32> to vector<16x2xf32>
    %151 = arith.addf %148, %150 : vector<16x2xf32>
    %c0_64 = arith.constant 0 : index
    %c8 = arith.constant 8 : index
    %152 = vector.load %arg1[%c0_64, %c8] : memref<16x65xf32, #tpu.memory_space<vmem>>, vector<16x1xf32>
    %c0_65 = arith.constant 0 : index
    %c9 = arith.constant 9 : index
    %153 = vector.load %arg1[%c0_65, %c9] : memref<16x65xf32, #tpu.memory_space<vmem>>, vector<16x1xf32>
    %cst_66 = arith.constant dense<0.000000e+00> : vector<16xf32>
    %154 = vector.multi_reduction <add>, %151, %cst_66 [1] : vector<16x2xf32> to vector<16xf32>
    %155 = vector.shape_cast %154 : vector<16xf32> to vector<16x1xf32>
    %cst_67 = arith.constant 2.000000e+00 : f32
    %156 = vector.broadcast %cst_67 : f32 to vector<16x1xf32>
    %157 = arith.divf %155, %156 : vector<16x1xf32>
    %158 = arith.mulf %151, %151 : vector<16x2xf32>
    %cst_68 = arith.constant dense<0.000000e+00> : vector<16xf32>
    %159 = vector.multi_reduction <add>, %158, %cst_68 [1] : vector<16x2xf32> to vector<16xf32>
    %160 = vector.shape_cast %159 : vector<16xf32> to vector<16x1xf32>
    %cst_69 = arith.constant 2.000000e+00 : f32
    %161 = vector.broadcast %cst_69 : f32 to vector<16x1xf32>
    %162 = arith.divf %160, %161 : vector<16x1xf32>
    %163 = arith.mulf %157, %157 : vector<16x1xf32>
    %164 = arith.subf %162, %163 : vector<16x1xf32>
    %cst_70 = arith.constant 9.99999974E-6 : f32
    %165 = vector.broadcast %cst_70 : f32 to vector<16x1xf32>
    %166 = arith.addf %164, %165 : vector<16x1xf32>
    %167 = math.rsqrt %166 : vector<16x1xf32>
    %168 = arith.mulf %167, %152 : vector<16x1xf32>
    %169 = vector.broadcast %168 : vector<16x1xf32> to vector<16x2xf32>
    %170 = arith.mulf %151, %169 : vector<16x2xf32>
    %171 = arith.mulf %157, %168 : vector<16x1xf32>
    %172 = arith.subf %153, %171 : vector<16x1xf32>
    %173 = vector.broadcast %172 : vector<16x1xf32> to vector<16x2xf32>
    %174 = arith.addf %170, %173 : vector<16x2xf32>
    %cst_71 = arith.constant 0.000000e+00 : f32
    %175 = vector.broadcast %cst_71 : f32 to vector<16x2xf32>
    %176 = arith.maximumf %174, %175 : vector<16x2xf32>
    %c0_72 = arith.constant 0 : index
    %c144 = arith.constant 144 : index
    %177 = vector.load %arg2[%c0_72, %c144] : memref<16x832xf32, #tpu.memory_space<vmem>>, vector<16x16xf32>
    %cst_73 = arith.constant dense<0.000000e+00> : vector<16x2xf32>
    %178 = tpu.matmul %177, %176, %cst_73 {dimension_numbers = #tpu.dot_dimension_numbers<[1], [0], [0], [1], [0, 0, 1, 1], [], []>} : vector<16x16xf32>, vector<16x2xf32>, vector<16x2xf32> -> vector<16x2xf32>
    %c0_74 = arith.constant 0 : index
    %c10 = arith.constant 10 : index
    %179 = vector.load %arg1[%c0_74, %c10] : memref<16x65xf32, #tpu.memory_space<vmem>>, vector<16x1xf32>
    %180 = vector.broadcast %179 : vector<16x1xf32> to vector<16x2xf32>
    %181 = arith.addf %178, %180 : vector<16x2xf32>
    %cst_75 = arith.constant 0.000000e+00 : f32
    %182 = vector.broadcast %cst_75 : f32 to vector<16x2xf32>
    %183 = arith.subf %182, %181 : vector<16x2xf32>
    %184 = math.exp %183 : vector<16x2xf32>
    %cst_76 = arith.constant 1.000000e+00 : f32
    %185 = vector.broadcast %cst_76 : f32 to vector<16x2xf32>
    %186 = arith.addf %185, %184 : vector<16x2xf32>
    %cst_77 = arith.constant 1.000000e+00 : f32
    %187 = vector.broadcast %cst_77 : f32 to vector<16x2xf32>
    %188 = arith.divf %187, %186 : vector<16x2xf32>
    %189 = arith.mulf %146, %188 : vector<16x2xf32>
    %190 = tpu.iota {dimensions = array<i32: 0>} : vector<2x128xi32>
    %191 = tpu.iota {dimensions = array<i32: 1>} : vector<2x128xi32>
    %c64_i32_78 = arith.constant 64 : i32
    %192 = vector.broadcast %c64_i32_78 : i32 to vector<2x128xi32>
    %193 = arith.muli %190, %192 : vector<2x128xi32>
    %194 = arith.cmpi sge, %191, %193 : vector<2x128xi32>
    %c64_i32_79 = arith.constant 64 : i32
    %195 = vector.broadcast %c64_i32_79 : i32 to vector<2x128xi32>
    %196 = arith.muli %190, %195 : vector<2x128xi32>
    %c64_i32_80 = arith.constant 64 : i32
    %197 = vector.broadcast %c64_i32_80 : i32 to vector<2x128xi32>
    %198 = arith.addi %196, %197 : vector<2x128xi32>
    %199 = arith.cmpi slt, %191, %198 : vector<2x128xi32>
    %200 = arith.andi %194, %199 : vector<2x128xi1>
    %cst_81 = arith.constant 1.000000e+00 : f32
    %cst_82 = arith.constant 0.000000e+00 : f32
    %201 = vector.broadcast %cst_81 : f32 to vector<2x128xf32>
    %202 = vector.broadcast %cst_82 : f32 to vector<2x128xf32>
    %203 = arith.select %200, %201, %202 : vector<2x128xi1>, vector<2x128xf32>
    %cst_83 = arith.constant dense<0.000000e+00> : vector<16x128xf32>
    %204 = tpu.matmul %189, %203, %cst_83 {dimension_numbers = #tpu.dot_dimension_numbers<[1], [0], [0], [1], [0, 0, 1, 1], [], []>} : vector<16x2xf32>, vector<2x128xf32>, vector<16x128xf32> -> vector<16x128xf32>
    %cst_84 = arith.constant 0.000000e+00 : f32
    %205 = vector.broadcast %cst_84 : f32 to vector<16x128xf32>
    %206 = arith.subf %205, %204 : vector<16x128xf32>
    %207 = arith.maximumf %130, %206 : vector<16x128xf32>
    %208 = arith.minimumf %207, %204 : vector<16x128xf32>
    %209 = arith.subf %130, %208 : vector<16x128xf32>
    %210 = arith.addf %209, %75 : vector<16x128xf32>
    %c0_85 = arith.constant 0 : index
    %c11 = arith.constant 11 : index
    %211 = vector.load %arg1[%c0_85, %c11] : memref<16x65xf32, #tpu.memory_space<vmem>>, vector<16x1xf32>
    %c0_86 = arith.constant 0 : index
    %c12 = arith.constant 12 : index
    %212 = vector.load %arg1[%c0_86, %c12] : memref<16x65xf32, #tpu.memory_space<vmem>>, vector<16x1xf32>
    %cst_87 = arith.constant dense<0.000000e+00> : vector<16xf32>
    %213 = vector.multi_reduction <add>, %210, %cst_87 [1] : vector<16x128xf32> to vector<16xf32>
    %214 = vector.shape_cast %213 : vector<16xf32> to vector<16x1xf32>
    %cst_88 = arith.constant 1.280000e+02 : f32
    %215 = vector.broadcast %cst_88 : f32 to vector<16x1xf32>
    %216 = arith.divf %214, %215 : vector<16x1xf32>
    %217 = arith.mulf %210, %210 : vector<16x128xf32>
    %cst_89 = arith.constant dense<0.000000e+00> : vector<16xf32>
    %218 = vector.multi_reduction <add>, %217, %cst_89 [1] : vector<16x128xf32> to vector<16xf32>
    %219 = vector.shape_cast %218 : vector<16xf32> to vector<16x1xf32>
    %cst_90 = arith.constant 1.280000e+02 : f32
    %220 = vector.broadcast %cst_90 : f32 to vector<16x1xf32>
    %221 = arith.divf %219, %220 : vector<16x1xf32>
    %222 = arith.mulf %216, %216 : vector<16x1xf32>
    %223 = arith.subf %221, %222 : vector<16x1xf32>
    %cst_91 = arith.constant 9.99999974E-6 : f32
    %224 = vector.broadcast %cst_91 : f32 to vector<16x1xf32>
    %225 = arith.addf %223, %224 : vector<16x1xf32>
    %226 = math.rsqrt %225 : vector<16x1xf32>
    %227 = arith.mulf %226, %211 : vector<16x1xf32>
    %228 = vector.broadcast %227 : vector<16x1xf32> to vector<16x128xf32>
    %229 = arith.mulf %210, %228 : vector<16x128xf32>
    %230 = arith.mulf %216, %227 : vector<16x1xf32>
    %231 = arith.subf %212, %230 : vector<16x1xf32>
    %232 = vector.broadcast %231 : vector<16x1xf32> to vector<16x128xf32>
    %233 = arith.addf %229, %232 : vector<16x128xf32>
    %cst_92 = arith.constant 0.000000e+00 : f32
    %234 = vector.broadcast %cst_92 : f32 to vector<16x128xf32>
    %235 = arith.maximumf %233, %234 : vector<16x128xf32>
    %c0_93 = arith.constant 0 : index
    %c160 = arith.constant 160 : index
    %236 = vector.load %arg2[%c0_93, %c160] : memref<16x832xf32, #tpu.memory_space<vmem>>, vector<16x16xf32>
    %c0_94 = arith.constant 0 : index
    %c176 = arith.constant 176 : index
    %237 = vector.load %arg2[%c0_94, %c176] : memref<16x832xf32, #tpu.memory_space<vmem>>, vector<16x16xf32>
    %c0_95 = arith.constant 0 : index
    %c192 = arith.constant 192 : index
    %238 = vector.load %arg2[%c0_95, %c192] : memref<16x832xf32, #tpu.memory_space<vmem>>, vector<16x16xf32>
    %c1_i32_96 = arith.constant 1 : i32
    %239 = tpu.dynamic_rotate %235 by %c1_i32_96 dim 1 : vector<16x128xf32>, i32 -> vector<16x128xf32>
    %240 = tpu.iota {dimensions = array<i32: 1>} : vector<16x128xi32>
    %c63_i32_97 = arith.constant 63 : i32
    %241 = vector.broadcast %c63_i32_97 : i32 to vector<16x128xi32>
    %242 = arith.andi %240, %241 : vector<16x128xi32>
    %c0_i32_98 = arith.constant 0 : i32
    %243 = vector.broadcast %c0_i32_98 : i32 to vector<16x128xi32>
    %244 = arith.cmpi ne, %242, %243 : vector<16x128xi32>
    %cst_99 = arith.constant 0.000000e+00 : f32
    %245 = vector.broadcast %cst_99 : f32 to vector<16x128xf32>
    %246 = arith.select %244, %239, %245 : vector<16x128xi1>, vector<16x128xf32>
    %cst_100 = arith.constant dense<0.000000e+00> : vector<16x128xf32>
    %247 = tpu.matmul %236, %246, %cst_100 {dimension_numbers = #tpu.dot_dimension_numbers<[1], [0], [0], [1], [0, 0, 1, 1], [], []>} : vector<16x16xf32>, vector<16x128xf32>, vector<16x128xf32> -> vector<16x128xf32>
    %cst_101 = arith.constant dense<0.000000e+00> : vector<16x128xf32>
    %248 = tpu.matmul %237, %235, %cst_101 {dimension_numbers = #tpu.dot_dimension_numbers<[1], [0], [0], [1], [0, 0, 1, 1], [], []>} : vector<16x16xf32>, vector<16x128xf32>, vector<16x128xf32> -> vector<16x128xf32>
    %249 = arith.addf %247, %248 : vector<16x128xf32>
    %c127_i32_102 = arith.constant 127 : i32
    %250 = tpu.dynamic_rotate %235 by %c127_i32_102 dim 1 : vector<16x128xf32>, i32 -> vector<16x128xf32>
    %251 = tpu.iota {dimensions = array<i32: 1>} : vector<16x128xi32>
    %c63_i32_103 = arith.constant 63 : i32
    %252 = vector.broadcast %c63_i32_103 : i32 to vector<16x128xi32>
    %253 = arith.andi %251, %252 : vector<16x128xi32>
    %c63_i32_104 = arith.constant 63 : i32
    %254 = vector.broadcast %c63_i32_104 : i32 to vector<16x128xi32>
    %255 = arith.cmpi ne, %253, %254 : vector<16x128xi32>
    %cst_105 = arith.constant 0.000000e+00 : f32
    %256 = vector.broadcast %cst_105 : f32 to vector<16x128xf32>
    %257 = arith.select %255, %250, %256 : vector<16x128xi1>, vector<16x128xf32>
    %cst_106 = arith.constant dense<0.000000e+00> : vector<16x128xf32>
    %258 = tpu.matmul %238, %257, %cst_106 {dimension_numbers = #tpu.dot_dimension_numbers<[1], [0], [0], [1], [0, 0, 1, 1], [], []>} : vector<16x16xf32>, vector<16x128xf32>, vector<16x128xf32> -> vector<16x128xf32>
    %259 = arith.addf %249, %258 : vector<16x128xf32>
    %c0_107 = arith.constant 0 : index
    %c13 = arith.constant 13 : index
    %260 = vector.load %arg1[%c0_107, %c13] : memref<16x65xf32, #tpu.memory_space<vmem>>, vector<16x1xf32>
    %261 = vector.broadcast %260 : vector<16x1xf32> to vector<16x128xf32>
    %262 = arith.addf %259, %261 : vector<16x128xf32>
    %c0_108 = arith.constant 0 : index
    %c14 = arith.constant 14 : index
    %263 = vector.load %arg1[%c0_108, %c14] : memref<16x65xf32, #tpu.memory_space<vmem>>, vector<16x1xf32>
    %c0_109 = arith.constant 0 : index
    %c15 = arith.constant 15 : index
    %264 = vector.load %arg1[%c0_109, %c15] : memref<16x65xf32, #tpu.memory_space<vmem>>, vector<16x1xf32>
    %cst_110 = arith.constant dense<0.000000e+00> : vector<16xf32>
    %265 = vector.multi_reduction <add>, %262, %cst_110 [1] : vector<16x128xf32> to vector<16xf32>
    %266 = vector.shape_cast %265 : vector<16xf32> to vector<16x1xf32>
    %cst_111 = arith.constant 1.280000e+02 : f32
    %267 = vector.broadcast %cst_111 : f32 to vector<16x1xf32>
    %268 = arith.divf %266, %267 : vector<16x1xf32>
    %269 = arith.mulf %262, %262 : vector<16x128xf32>
    %cst_112 = arith.constant dense<0.000000e+00> : vector<16xf32>
    %270 = vector.multi_reduction <add>, %269, %cst_112 [1] : vector<16x128xf32> to vector<16xf32>
    %271 = vector.shape_cast %270 : vector<16xf32> to vector<16x1xf32>
    %cst_113 = arith.constant 1.280000e+02 : f32
    %272 = vector.broadcast %cst_113 : f32 to vector<16x1xf32>
    %273 = arith.divf %271, %272 : vector<16x1xf32>
    %274 = arith.mulf %268, %268 : vector<16x1xf32>
    %275 = arith.subf %273, %274 : vector<16x1xf32>
    %cst_114 = arith.constant 9.99999974E-6 : f32
    %276 = vector.broadcast %cst_114 : f32 to vector<16x1xf32>
    %277 = arith.addf %275, %276 : vector<16x1xf32>
    %278 = math.rsqrt %277 : vector<16x1xf32>
    %279 = arith.mulf %278, %263 : vector<16x1xf32>
    %280 = vector.broadcast %279 : vector<16x1xf32> to vector<16x128xf32>
    %281 = arith.mulf %262, %280 : vector<16x128xf32>
    %282 = arith.mulf %268, %279 : vector<16x1xf32>
    %283 = arith.subf %264, %282 : vector<16x1xf32>
    %284 = vector.broadcast %283 : vector<16x1xf32> to vector<16x128xf32>
    %285 = arith.addf %281, %284 : vector<16x128xf32>
    %cst_115 = arith.constant 0.000000e+00 : f32
    %286 = vector.broadcast %cst_115 : f32 to vector<16x128xf32>
    %287 = arith.maximumf %285, %286 : vector<16x128xf32>
    %c0_116 = arith.constant 0 : index
    %c208 = arith.constant 208 : index
    %288 = vector.load %arg2[%c0_116, %c208] : memref<16x832xf32, #tpu.memory_space<vmem>>, vector<16x16xf32>
    %c0_117 = arith.constant 0 : index
    %c224 = arith.constant 224 : index
    %289 = vector.load %arg2[%c0_117, %c224] : memref<16x832xf32, #tpu.memory_space<vmem>>, vector<16x16xf32>
    %c0_118 = arith.constant 0 : index
    %c240 = arith.constant 240 : index
    %290 = vector.load %arg2[%c0_118, %c240] : memref<16x832xf32, #tpu.memory_space<vmem>>, vector<16x16xf32>
    %c1_i32_119 = arith.constant 1 : i32
    %291 = tpu.dynamic_rotate %287 by %c1_i32_119 dim 1 : vector<16x128xf32>, i32 -> vector<16x128xf32>
    %292 = tpu.iota {dimensions = array<i32: 1>} : vector<16x128xi32>
    %c63_i32_120 = arith.constant 63 : i32
    %293 = vector.broadcast %c63_i32_120 : i32 to vector<16x128xi32>
    %294 = arith.andi %292, %293 : vector<16x128xi32>
    %c0_i32_121 = arith.constant 0 : i32
    %295 = vector.broadcast %c0_i32_121 : i32 to vector<16x128xi32>
    %296 = arith.cmpi ne, %294, %295 : vector<16x128xi32>
    %cst_122 = arith.constant 0.000000e+00 : f32
    %297 = vector.broadcast %cst_122 : f32 to vector<16x128xf32>
    %298 = arith.select %296, %291, %297 : vector<16x128xi1>, vector<16x128xf32>
    %cst_123 = arith.constant dense<0.000000e+00> : vector<16x128xf32>
    %299 = tpu.matmul %288, %298, %cst_123 {dimension_numbers = #tpu.dot_dimension_numbers<[1], [0], [0], [1], [0, 0, 1, 1], [], []>} : vector<16x16xf32>, vector<16x128xf32>, vector<16x128xf32> -> vector<16x128xf32>
    %cst_124 = arith.constant dense<0.000000e+00> : vector<16x128xf32>
    %300 = tpu.matmul %289, %287, %cst_124 {dimension_numbers = #tpu.dot_dimension_numbers<[1], [0], [0], [1], [0, 0, 1, 1], [], []>} : vector<16x16xf32>, vector<16x128xf32>, vector<16x128xf32> -> vector<16x128xf32>
    %301 = arith.addf %299, %300 : vector<16x128xf32>
    %c127_i32_125 = arith.constant 127 : i32
    %302 = tpu.dynamic_rotate %287 by %c127_i32_125 dim 1 : vector<16x128xf32>, i32 -> vector<16x128xf32>
    %303 = tpu.iota {dimensions = array<i32: 1>} : vector<16x128xi32>
    %c63_i32_126 = arith.constant 63 : i32
    %304 = vector.broadcast %c63_i32_126 : i32 to vector<16x128xi32>
    %305 = arith.andi %303, %304 : vector<16x128xi32>
    %c63_i32_127 = arith.constant 63 : i32
    %306 = vector.broadcast %c63_i32_127 : i32 to vector<16x128xi32>
    %307 = arith.cmpi ne, %305, %306 : vector<16x128xi32>
    %cst_128 = arith.constant 0.000000e+00 : f32
    %308 = vector.broadcast %cst_128 : f32 to vector<16x128xf32>
    %309 = arith.select %307, %302, %308 : vector<16x128xi1>, vector<16x128xf32>
    %cst_129 = arith.constant dense<0.000000e+00> : vector<16x128xf32>
    %310 = tpu.matmul %290, %309, %cst_129 {dimension_numbers = #tpu.dot_dimension_numbers<[1], [0], [0], [1], [0, 0, 1, 1], [], []>} : vector<16x16xf32>, vector<16x128xf32>, vector<16x128xf32> -> vector<16x128xf32>
    %311 = arith.addf %301, %310 : vector<16x128xf32>
    %c0_130 = arith.constant 0 : index
    %c16_131 = arith.constant 16 : index
    %312 = vector.load %arg1[%c0_130, %c16_131] : memref<16x65xf32, #tpu.memory_space<vmem>>, vector<16x1xf32>
    %313 = vector.broadcast %312 : vector<16x1xf32> to vector<16x128xf32>
    %314 = arith.addf %311, %313 : vector<16x128xf32>
    %315 = math.absf %314 : vector<16x128xf32>
    %316 = tpu.iota {dimensions = array<i32: 0>} : vector<128x2xi32>
    %317 = tpu.iota {dimensions = array<i32: 1>} : vector<128x2xi32>
    %c64_i32_132 = arith.constant 64 : i32
    %318 = vector.broadcast %c64_i32_132 : i32 to vector<128x2xi32>
    %319 = arith.muli %317, %318 : vector<128x2xi32>
    %320 = arith.cmpi sge, %316, %319 : vector<128x2xi32>
    %c64_i32_133 = arith.constant 64 : i32
    %321 = vector.broadcast %c64_i32_133 : i32 to vector<128x2xi32>
    %322 = arith.muli %317, %321 : vector<128x2xi32>
    %c64_i32_134 = arith.constant 64 : i32
    %323 = vector.broadcast %c64_i32_134 : i32 to vector<128x2xi32>
    %324 = arith.addi %322, %323 : vector<128x2xi32>
    %325 = arith.cmpi slt, %316, %324 : vector<128x2xi32>
    %326 = arith.andi %320, %325 : vector<128x2xi1>
    %cst_135 = arith.constant 1.562500e-02 : f32
    %cst_136 = arith.constant 0.000000e+00 : f32
    %327 = vector.broadcast %cst_135 : f32 to vector<128x2xf32>
    %328 = vector.broadcast %cst_136 : f32 to vector<128x2xf32>
    %329 = arith.select %326, %327, %328 : vector<128x2xi1>, vector<128x2xf32>
    %cst_137 = arith.constant dense<0.000000e+00> : vector<16x2xf32>
    %330 = tpu.matmul %315, %329, %cst_137 {dimension_numbers = #tpu.dot_dimension_numbers<[1], [0], [0], [1], [0, 0, 1, 1], [], []>} : vector<16x128xf32>, vector<128x2xf32>, vector<16x2xf32> -> vector<16x2xf32>
    %c0_138 = arith.constant 0 : index
    %c256 = arith.constant 256 : index
    %331 = vector.load %arg2[%c0_138, %c256] : memref<16x832xf32, #tpu.memory_space<vmem>>, vector<16x16xf32>
    %cst_139 = arith.constant dense<0.000000e+00> : vector<16x2xf32>
    %332 = tpu.matmul %331, %330, %cst_139 {dimension_numbers = #tpu.dot_dimension_numbers<[1], [0], [0], [1], [0, 0, 1, 1], [], []>} : vector<16x16xf32>, vector<16x2xf32>, vector<16x2xf32> -> vector<16x2xf32>
    %c0_140 = arith.constant 0 : index
    %c17 = arith.constant 17 : index
    %333 = vector.load %arg1[%c0_140, %c17] : memref<16x65xf32, #tpu.memory_space<vmem>>, vector<16x1xf32>
    %334 = vector.broadcast %333 : vector<16x1xf32> to vector<16x2xf32>
    %335 = arith.addf %332, %334 : vector<16x2xf32>
    %c0_141 = arith.constant 0 : index
    %c18 = arith.constant 18 : index
    %336 = vector.load %arg1[%c0_141, %c18] : memref<16x65xf32, #tpu.memory_space<vmem>>, vector<16x1xf32>
    %c0_142 = arith.constant 0 : index
    %c19 = arith.constant 19 : index
    %337 = vector.load %arg1[%c0_142, %c19] : memref<16x65xf32, #tpu.memory_space<vmem>>, vector<16x1xf32>
    %cst_143 = arith.constant dense<0.000000e+00> : vector<16xf32>
    %338 = vector.multi_reduction <add>, %335, %cst_143 [1] : vector<16x2xf32> to vector<16xf32>
    %339 = vector.shape_cast %338 : vector<16xf32> to vector<16x1xf32>
    %cst_144 = arith.constant 2.000000e+00 : f32
    %340 = vector.broadcast %cst_144 : f32 to vector<16x1xf32>
    %341 = arith.divf %339, %340 : vector<16x1xf32>
    %342 = arith.mulf %335, %335 : vector<16x2xf32>
    %cst_145 = arith.constant dense<0.000000e+00> : vector<16xf32>
    %343 = vector.multi_reduction <add>, %342, %cst_145 [1] : vector<16x2xf32> to vector<16xf32>
    %344 = vector.shape_cast %343 : vector<16xf32> to vector<16x1xf32>
    %cst_146 = arith.constant 2.000000e+00 : f32
    %345 = vector.broadcast %cst_146 : f32 to vector<16x1xf32>
    %346 = arith.divf %344, %345 : vector<16x1xf32>
    %347 = arith.mulf %341, %341 : vector<16x1xf32>
    %348 = arith.subf %346, %347 : vector<16x1xf32>
    %cst_147 = arith.constant 9.99999974E-6 : f32
    %349 = vector.broadcast %cst_147 : f32 to vector<16x1xf32>
    %350 = arith.addf %348, %349 : vector<16x1xf32>
    %351 = math.rsqrt %350 : vector<16x1xf32>
    %352 = arith.mulf %351, %336 : vector<16x1xf32>
    %353 = vector.broadcast %352 : vector<16x1xf32> to vector<16x2xf32>
    %354 = arith.mulf %335, %353 : vector<16x2xf32>
    %355 = arith.mulf %341, %352 : vector<16x1xf32>
    %356 = arith.subf %337, %355 : vector<16x1xf32>
    %357 = vector.broadcast %356 : vector<16x1xf32> to vector<16x2xf32>
    %358 = arith.addf %354, %357 : vector<16x2xf32>
    %cst_148 = arith.constant 0.000000e+00 : f32
    %359 = vector.broadcast %cst_148 : f32 to vector<16x2xf32>
    %360 = arith.maximumf %358, %359 : vector<16x2xf32>
    %c0_149 = arith.constant 0 : index
    %c272 = arith.constant 272 : index
    %361 = vector.load %arg2[%c0_149, %c272] : memref<16x832xf32, #tpu.memory_space<vmem>>, vector<16x16xf32>
    %cst_150 = arith.constant dense<0.000000e+00> : vector<16x2xf32>
    %362 = tpu.matmul %361, %360, %cst_150 {dimension_numbers = #tpu.dot_dimension_numbers<[1], [0], [0], [1], [0, 0, 1, 1], [], []>} : vector<16x16xf32>, vector<16x2xf32>, vector<16x2xf32> -> vector<16x2xf32>
    %c0_151 = arith.constant 0 : index
    %c20 = arith.constant 20 : index
    %363 = vector.load %arg1[%c0_151, %c20] : memref<16x65xf32, #tpu.memory_space<vmem>>, vector<16x1xf32>
    %364 = vector.broadcast %363 : vector<16x1xf32> to vector<16x2xf32>
    %365 = arith.addf %362, %364 : vector<16x2xf32>
    %cst_152 = arith.constant 0.000000e+00 : f32
    %366 = vector.broadcast %cst_152 : f32 to vector<16x2xf32>
    %367 = arith.subf %366, %365 : vector<16x2xf32>
    %368 = math.exp %367 : vector<16x2xf32>
    %cst_153 = arith.constant 1.000000e+00 : f32
    %369 = vector.broadcast %cst_153 : f32 to vector<16x2xf32>
    %370 = arith.addf %369, %368 : vector<16x2xf32>
    %cst_154 = arith.constant 1.000000e+00 : f32
    %371 = vector.broadcast %cst_154 : f32 to vector<16x2xf32>
    %372 = arith.divf %371, %370 : vector<16x2xf32>
    %373 = arith.mulf %330, %372 : vector<16x2xf32>
    %374 = tpu.iota {dimensions = array<i32: 0>} : vector<2x128xi32>
    %375 = tpu.iota {dimensions = array<i32: 1>} : vector<2x128xi32>
    %c64_i32_155 = arith.constant 64 : i32
    %376 = vector.broadcast %c64_i32_155 : i32 to vector<2x128xi32>
    %377 = arith.muli %374, %376 : vector<2x128xi32>
    %378 = arith.cmpi sge, %375, %377 : vector<2x128xi32>
    %c64_i32_156 = arith.constant 64 : i32
    %379 = vector.broadcast %c64_i32_156 : i32 to vector<2x128xi32>
    %380 = arith.muli %374, %379 : vector<2x128xi32>
    %c64_i32_157 = arith.constant 64 : i32
    %381 = vector.broadcast %c64_i32_157 : i32 to vector<2x128xi32>
    %382 = arith.addi %380, %381 : vector<2x128xi32>
    %383 = arith.cmpi slt, %375, %382 : vector<2x128xi32>
    %384 = arith.andi %378, %383 : vector<2x128xi1>
    %cst_158 = arith.constant 1.000000e+00 : f32
    %cst_159 = arith.constant 0.000000e+00 : f32
    %385 = vector.broadcast %cst_158 : f32 to vector<2x128xf32>
    %386 = vector.broadcast %cst_159 : f32 to vector<2x128xf32>
    %387 = arith.select %384, %385, %386 : vector<2x128xi1>, vector<2x128xf32>
    %cst_160 = arith.constant dense<0.000000e+00> : vector<16x128xf32>
    %388 = tpu.matmul %373, %387, %cst_160 {dimension_numbers = #tpu.dot_dimension_numbers<[1], [0], [0], [1], [0, 0, 1, 1], [], []>} : vector<16x2xf32>, vector<2x128xf32>, vector<16x128xf32> -> vector<16x128xf32>
    %cst_161 = arith.constant 0.000000e+00 : f32
    %389 = vector.broadcast %cst_161 : f32 to vector<16x128xf32>
    %390 = arith.subf %389, %388 : vector<16x128xf32>
    %391 = arith.maximumf %314, %390 : vector<16x128xf32>
    %392 = arith.minimumf %391, %388 : vector<16x128xf32>
    %393 = arith.subf %314, %392 : vector<16x128xf32>
    %394 = arith.addf %393, %210 : vector<16x128xf32>
    %c0_162 = arith.constant 0 : index
    %c21 = arith.constant 21 : index
    %395 = vector.load %arg1[%c0_162, %c21] : memref<16x65xf32, #tpu.memory_space<vmem>>, vector<16x1xf32>
    %c0_163 = arith.constant 0 : index
    %c22 = arith.constant 22 : index
    %396 = vector.load %arg1[%c0_163, %c22] : memref<16x65xf32, #tpu.memory_space<vmem>>, vector<16x1xf32>
    %cst_164 = arith.constant dense<0.000000e+00> : vector<16xf32>
    %397 = vector.multi_reduction <add>, %394, %cst_164 [1] : vector<16x128xf32> to vector<16xf32>
    %398 = vector.shape_cast %397 : vector<16xf32> to vector<16x1xf32>
    %cst_165 = arith.constant 1.280000e+02 : f32
    %399 = vector.broadcast %cst_165 : f32 to vector<16x1xf32>
    %400 = arith.divf %398, %399 : vector<16x1xf32>
    %401 = arith.mulf %394, %394 : vector<16x128xf32>
    %cst_166 = arith.constant dense<0.000000e+00> : vector<16xf32>
    %402 = vector.multi_reduction <add>, %401, %cst_166 [1] : vector<16x128xf32> to vector<16xf32>
    %403 = vector.shape_cast %402 : vector<16xf32> to vector<16x1xf32>
    %cst_167 = arith.constant 1.280000e+02 : f32
    %404 = vector.broadcast %cst_167 : f32 to vector<16x1xf32>
    %405 = arith.divf %403, %404 : vector<16x1xf32>
    %406 = arith.mulf %400, %400 : vector<16x1xf32>
    %407 = arith.subf %405, %406 : vector<16x1xf32>
    %cst_168 = arith.constant 9.99999974E-6 : f32
    %408 = vector.broadcast %cst_168 : f32 to vector<16x1xf32>
    %409 = arith.addf %407, %408 : vector<16x1xf32>
    %410 = math.rsqrt %409 : vector<16x1xf32>
    %411 = arith.mulf %410, %395 : vector<16x1xf32>
    %412 = vector.broadcast %411 : vector<16x1xf32> to vector<16x128xf32>
    %413 = arith.mulf %394, %412 : vector<16x128xf32>
    %414 = arith.mulf %400, %411 : vector<16x1xf32>
    %415 = arith.subf %396, %414 : vector<16x1xf32>
    %416 = vector.broadcast %415 : vector<16x1xf32> to vector<16x128xf32>
    %417 = arith.addf %413, %416 : vector<16x128xf32>
    %cst_169 = arith.constant 0.000000e+00 : f32
    %418 = vector.broadcast %cst_169 : f32 to vector<16x128xf32>
    %419 = arith.maximumf %417, %418 : vector<16x128xf32>
    %c0_170 = arith.constant 0 : index
    %c288 = arith.constant 288 : index
    %420 = vector.load %arg2[%c0_170, %c288] : memref<16x832xf32, #tpu.memory_space<vmem>>, vector<16x16xf32>
    %c0_171 = arith.constant 0 : index
    %c304 = arith.constant 304 : index
    %421 = vector.load %arg2[%c0_171, %c304] : memref<16x832xf32, #tpu.memory_space<vmem>>, vector<16x16xf32>
    %c0_172 = arith.constant 0 : index
    %c320 = arith.constant 320 : index
    %422 = vector.load %arg2[%c0_172, %c320] : memref<16x832xf32, #tpu.memory_space<vmem>>, vector<16x16xf32>
    %c1_i32_173 = arith.constant 1 : i32
    %423 = tpu.dynamic_rotate %419 by %c1_i32_173 dim 1 : vector<16x128xf32>, i32 -> vector<16x128xf32>
    %424 = tpu.iota {dimensions = array<i32: 1>} : vector<16x128xi32>
    %c63_i32_174 = arith.constant 63 : i32
    %425 = vector.broadcast %c63_i32_174 : i32 to vector<16x128xi32>
    %426 = arith.andi %424, %425 : vector<16x128xi32>
    %c0_i32_175 = arith.constant 0 : i32
    %427 = vector.broadcast %c0_i32_175 : i32 to vector<16x128xi32>
    %428 = arith.cmpi ne, %426, %427 : vector<16x128xi32>
    %cst_176 = arith.constant 0.000000e+00 : f32
    %429 = vector.broadcast %cst_176 : f32 to vector<16x128xf32>
    %430 = arith.select %428, %423, %429 : vector<16x128xi1>, vector<16x128xf32>
    %cst_177 = arith.constant dense<0.000000e+00> : vector<16x128xf32>
    %431 = tpu.matmul %420, %430, %cst_177 {dimension_numbers = #tpu.dot_dimension_numbers<[1], [0], [0], [1], [0, 0, 1, 1], [], []>} : vector<16x16xf32>, vector<16x128xf32>, vector<16x128xf32> -> vector<16x128xf32>
    %cst_178 = arith.constant dense<0.000000e+00> : vector<16x128xf32>
    %432 = tpu.matmul %421, %419, %cst_178 {dimension_numbers = #tpu.dot_dimension_numbers<[1], [0], [0], [1], [0, 0, 1, 1], [], []>} : vector<16x16xf32>, vector<16x128xf32>, vector<16x128xf32> -> vector<16x128xf32>
    %433 = arith.addf %431, %432 : vector<16x128xf32>
    %c127_i32_179 = arith.constant 127 : i32
    %434 = tpu.dynamic_rotate %419 by %c127_i32_179 dim 1 : vector<16x128xf32>, i32 -> vector<16x128xf32>
    %435 = tpu.iota {dimensions = array<i32: 1>} : vector<16x128xi32>
    %c63_i32_180 = arith.constant 63 : i32
    %436 = vector.broadcast %c63_i32_180 : i32 to vector<16x128xi32>
    %437 = arith.andi %435, %436 : vector<16x128xi32>
    %c63_i32_181 = arith.constant 63 : i32
    %438 = vector.broadcast %c63_i32_181 : i32 to vector<16x128xi32>
    %439 = arith.cmpi ne, %437, %438 : vector<16x128xi32>
    %cst_182 = arith.constant 0.000000e+00 : f32
    %440 = vector.broadcast %cst_182 : f32 to vector<16x128xf32>
    %441 = arith.select %439, %434, %440 : vector<16x128xi1>, vector<16x128xf32>
    %cst_183 = arith.constant dense<0.000000e+00> : vector<16x128xf32>
    %442 = tpu.matmul %422, %441, %cst_183 {dimension_numbers = #tpu.dot_dimension_numbers<[1], [0], [0], [1], [0, 0, 1, 1], [], []>} : vector<16x16xf32>, vector<16x128xf32>, vector<16x128xf32> -> vector<16x128xf32>
    %443 = arith.addf %433, %442 : vector<16x128xf32>
    %444 = tpu.iota {dimensions = array<i32: 0>} : vector<128x64xi32>
    %445 = tpu.iota {dimensions = array<i32: 1>} : vector<128x64xi32>
    %c2_i32_184 = arith.constant 2 : i32
    %446 = vector.broadcast %c2_i32_184 : i32 to vector<128x64xi32>
    %447 = arith.muli %446, %445 : vector<128x64xi32>
    %448 = arith.cmpi eq, %444, %447 : vector<128x64xi32>
    %cst_185 = arith.constant 1.000000e+00 : f32
    %cst_186 = arith.constant 0.000000e+00 : f32
    %449 = vector.broadcast %cst_185 : f32 to vector<128x64xf32>
    %450 = vector.broadcast %cst_186 : f32 to vector<128x64xf32>
    %451 = arith.select %448, %449, %450 : vector<128x64xi1>, vector<128x64xf32>
    %cst_187 = arith.constant dense<0.000000e+00> : vector<16x64xf32>
    %452 = tpu.matmul %443, %451, %cst_187 {dimension_numbers = #tpu.dot_dimension_numbers<[1], [0], [0], [1], [0, 0, 1, 1], [], []>} : vector<16x128xf32>, vector<128x64xf32>, vector<16x64xf32> -> vector<16x64xf32>
    %cst_188 = arith.constant dense<0.000000e+00> : vector<16x64xf32>
    %453 = tpu.matmul %394, %451, %cst_188 {dimension_numbers = #tpu.dot_dimension_numbers<[1], [0], [0], [1], [0, 0, 1, 1], [], []>} : vector<16x128xf32>, vector<128x64xf32>, vector<16x64xf32> -> vector<16x64xf32>
    %c0_189 = arith.constant 0 : index
    %c23 = arith.constant 23 : index
    %454 = vector.load %arg1[%c0_189, %c23] : memref<16x65xf32, #tpu.memory_space<vmem>>, vector<16x1xf32>
    %455 = vector.broadcast %454 : vector<16x1xf32> to vector<16x64xf32>
    %456 = arith.addf %452, %455 : vector<16x64xf32>
    %c0_190 = arith.constant 0 : index
    %c24 = arith.constant 24 : index
    %457 = vector.load %arg1[%c0_190, %c24] : memref<16x65xf32, #tpu.memory_space<vmem>>, vector<16x1xf32>
    %c0_191 = arith.constant 0 : index
    %c25 = arith.constant 25 : index
    %458 = vector.load %arg1[%c0_191, %c25] : memref<16x65xf32, #tpu.memory_space<vmem>>, vector<16x1xf32>
    %cst_192 = arith.constant dense<0.000000e+00> : vector<16xf32>
    %459 = vector.multi_reduction <add>, %456, %cst_192 [1] : vector<16x64xf32> to vector<16xf32>
    %460 = vector.shape_cast %459 : vector<16xf32> to vector<16x1xf32>
    %cst_193 = arith.constant 6.400000e+01 : f32
    %461 = vector.broadcast %cst_193 : f32 to vector<16x1xf32>
    %462 = arith.divf %460, %461 : vector<16x1xf32>
    %463 = arith.mulf %456, %456 : vector<16x64xf32>
    %cst_194 = arith.constant dense<0.000000e+00> : vector<16xf32>
    %464 = vector.multi_reduction <add>, %463, %cst_194 [1] : vector<16x64xf32> to vector<16xf32>
    %465 = vector.shape_cast %464 : vector<16xf32> to vector<16x1xf32>
    %cst_195 = arith.constant 6.400000e+01 : f32
    %466 = vector.broadcast %cst_195 : f32 to vector<16x1xf32>
    %467 = arith.divf %465, %466 : vector<16x1xf32>
    %468 = arith.mulf %462, %462 : vector<16x1xf32>
    %469 = arith.subf %467, %468 : vector<16x1xf32>
    %cst_196 = arith.constant 9.99999974E-6 : f32
    %470 = vector.broadcast %cst_196 : f32 to vector<16x1xf32>
    %471 = arith.addf %469, %470 : vector<16x1xf32>
    %472 = math.rsqrt %471 : vector<16x1xf32>
    %473 = arith.mulf %472, %457 : vector<16x1xf32>
    %474 = vector.broadcast %473 : vector<16x1xf32> to vector<16x64xf32>
    %475 = arith.mulf %456, %474 : vector<16x64xf32>
    %476 = arith.mulf %462, %473 : vector<16x1xf32>
    %477 = arith.subf %458, %476 : vector<16x1xf32>
    %478 = vector.broadcast %477 : vector<16x1xf32> to vector<16x64xf32>
    %479 = arith.addf %475, %478 : vector<16x64xf32>
    %cst_197 = arith.constant 0.000000e+00 : f32
    %480 = vector.broadcast %cst_197 : f32 to vector<16x64xf32>
    %481 = arith.maximumf %479, %480 : vector<16x64xf32>
    %c0_198 = arith.constant 0 : index
    %c336 = arith.constant 336 : index
    %482 = vector.load %arg2[%c0_198, %c336] : memref<16x832xf32, #tpu.memory_space<vmem>>, vector<16x16xf32>
    %c0_199 = arith.constant 0 : index
    %c352 = arith.constant 352 : index
    %483 = vector.load %arg2[%c0_199, %c352] : memref<16x832xf32, #tpu.memory_space<vmem>>, vector<16x16xf32>
    %c0_200 = arith.constant 0 : index
    %c368 = arith.constant 368 : index
    %484 = vector.load %arg2[%c0_200, %c368] : memref<16x832xf32, #tpu.memory_space<vmem>>, vector<16x16xf32>
    %c1_i32_201 = arith.constant 1 : i32
    %485 = tpu.dynamic_rotate %481 by %c1_i32_201 dim 1 : vector<16x64xf32>, i32 -> vector<16x64xf32>
    %486 = tpu.iota {dimensions = array<i32: 1>} : vector<16x64xi32>
    %c31_i32 = arith.constant 31 : i32
    %487 = vector.broadcast %c31_i32 : i32 to vector<16x64xi32>
    %488 = arith.andi %486, %487 : vector<16x64xi32>
    %c0_i32_202 = arith.constant 0 : i32
    %489 = vector.broadcast %c0_i32_202 : i32 to vector<16x64xi32>
    %490 = arith.cmpi ne, %488, %489 : vector<16x64xi32>
    %cst_203 = arith.constant 0.000000e+00 : f32
    %491 = vector.broadcast %cst_203 : f32 to vector<16x64xf32>
    %492 = arith.select %490, %485, %491 : vector<16x64xi1>, vector<16x64xf32>
    %cst_204 = arith.constant dense<0.000000e+00> : vector<16x64xf32>
    %493 = tpu.matmul %482, %492, %cst_204 {dimension_numbers = #tpu.dot_dimension_numbers<[1], [0], [0], [1], [0, 0, 1, 1], [], []>} : vector<16x16xf32>, vector<16x64xf32>, vector<16x64xf32> -> vector<16x64xf32>
    %cst_205 = arith.constant dense<0.000000e+00> : vector<16x64xf32>
    %494 = tpu.matmul %483, %481, %cst_205 {dimension_numbers = #tpu.dot_dimension_numbers<[1], [0], [0], [1], [0, 0, 1, 1], [], []>} : vector<16x16xf32>, vector<16x64xf32>, vector<16x64xf32> -> vector<16x64xf32>
    %495 = arith.addf %493, %494 : vector<16x64xf32>
    %c63_i32_206 = arith.constant 63 : i32
    %496 = tpu.dynamic_rotate %481 by %c63_i32_206 dim 1 : vector<16x64xf32>, i32 -> vector<16x64xf32>
    %497 = tpu.iota {dimensions = array<i32: 1>} : vector<16x64xi32>
    %c31_i32_207 = arith.constant 31 : i32
    %498 = vector.broadcast %c31_i32_207 : i32 to vector<16x64xi32>
    %499 = arith.andi %497, %498 : vector<16x64xi32>
    %c31_i32_208 = arith.constant 31 : i32
    %500 = vector.broadcast %c31_i32_208 : i32 to vector<16x64xi32>
    %501 = arith.cmpi ne, %499, %500 : vector<16x64xi32>
    %cst_209 = arith.constant 0.000000e+00 : f32
    %502 = vector.broadcast %cst_209 : f32 to vector<16x64xf32>
    %503 = arith.select %501, %496, %502 : vector<16x64xi1>, vector<16x64xf32>
    %cst_210 = arith.constant dense<0.000000e+00> : vector<16x64xf32>
    %504 = tpu.matmul %484, %503, %cst_210 {dimension_numbers = #tpu.dot_dimension_numbers<[1], [0], [0], [1], [0, 0, 1, 1], [], []>} : vector<16x16xf32>, vector<16x64xf32>, vector<16x64xf32> -> vector<16x64xf32>
    %505 = arith.addf %495, %504 : vector<16x64xf32>
    %c0_211 = arith.constant 0 : index
    %c26 = arith.constant 26 : index
    %506 = vector.load %arg1[%c0_211, %c26] : memref<16x65xf32, #tpu.memory_space<vmem>>, vector<16x1xf32>
    %507 = vector.broadcast %506 : vector<16x1xf32> to vector<16x64xf32>
    %508 = arith.addf %505, %507 : vector<16x64xf32>
    %509 = math.absf %508 : vector<16x64xf32>
    %510 = tpu.iota {dimensions = array<i32: 0>} : vector<64x2xi32>
    %511 = tpu.iota {dimensions = array<i32: 1>} : vector<64x2xi32>
    %c32_i32 = arith.constant 32 : i32
    %512 = vector.broadcast %c32_i32 : i32 to vector<64x2xi32>
    %513 = arith.muli %511, %512 : vector<64x2xi32>
    %514 = arith.cmpi sge, %510, %513 : vector<64x2xi32>
    %c32_i32_212 = arith.constant 32 : i32
    %515 = vector.broadcast %c32_i32_212 : i32 to vector<64x2xi32>
    %516 = arith.muli %511, %515 : vector<64x2xi32>
    %c32_i32_213 = arith.constant 32 : i32
    %517 = vector.broadcast %c32_i32_213 : i32 to vector<64x2xi32>
    %518 = arith.addi %516, %517 : vector<64x2xi32>
    %519 = arith.cmpi slt, %510, %518 : vector<64x2xi32>
    %520 = arith.andi %514, %519 : vector<64x2xi1>
    %cst_214 = arith.constant 3.125000e-02 : f32
    %cst_215 = arith.constant 0.000000e+00 : f32
    %521 = vector.broadcast %cst_214 : f32 to vector<64x2xf32>
    %522 = vector.broadcast %cst_215 : f32 to vector<64x2xf32>
    %523 = arith.select %520, %521, %522 : vector<64x2xi1>, vector<64x2xf32>
    %cst_216 = arith.constant dense<0.000000e+00> : vector<16x2xf32>
    %524 = tpu.matmul %509, %523, %cst_216 {dimension_numbers = #tpu.dot_dimension_numbers<[1], [0], [0], [1], [0, 0, 1, 1], [], []>} : vector<16x64xf32>, vector<64x2xf32>, vector<16x2xf32> -> vector<16x2xf32>
    %c0_217 = arith.constant 0 : index
    %c384 = arith.constant 384 : index
    %525 = vector.load %arg2[%c0_217, %c384] : memref<16x832xf32, #tpu.memory_space<vmem>>, vector<16x16xf32>
    %cst_218 = arith.constant dense<0.000000e+00> : vector<16x2xf32>
    %526 = tpu.matmul %525, %524, %cst_218 {dimension_numbers = #tpu.dot_dimension_numbers<[1], [0], [0], [1], [0, 0, 1, 1], [], []>} : vector<16x16xf32>, vector<16x2xf32>, vector<16x2xf32> -> vector<16x2xf32>
    %c0_219 = arith.constant 0 : index
    %c27 = arith.constant 27 : index
    %527 = vector.load %arg1[%c0_219, %c27] : memref<16x65xf32, #tpu.memory_space<vmem>>, vector<16x1xf32>
    %528 = vector.broadcast %527 : vector<16x1xf32> to vector<16x2xf32>
    %529 = arith.addf %526, %528 : vector<16x2xf32>
    %c0_220 = arith.constant 0 : index
    %c28 = arith.constant 28 : index
    %530 = vector.load %arg1[%c0_220, %c28] : memref<16x65xf32, #tpu.memory_space<vmem>>, vector<16x1xf32>
    %c0_221 = arith.constant 0 : index
    %c29 = arith.constant 29 : index
    %531 = vector.load %arg1[%c0_221, %c29] : memref<16x65xf32, #tpu.memory_space<vmem>>, vector<16x1xf32>
    %cst_222 = arith.constant dense<0.000000e+00> : vector<16xf32>
    %532 = vector.multi_reduction <add>, %529, %cst_222 [1] : vector<16x2xf32> to vector<16xf32>
    %533 = vector.shape_cast %532 : vector<16xf32> to vector<16x1xf32>
    %cst_223 = arith.constant 2.000000e+00 : f32
    %534 = vector.broadcast %cst_223 : f32 to vector<16x1xf32>
    %535 = arith.divf %533, %534 : vector<16x1xf32>
    %536 = arith.mulf %529, %529 : vector<16x2xf32>
    %cst_224 = arith.constant dense<0.000000e+00> : vector<16xf32>
    %537 = vector.multi_reduction <add>, %536, %cst_224 [1] : vector<16x2xf32> to vector<16xf32>
    %538 = vector.shape_cast %537 : vector<16xf32> to vector<16x1xf32>
    %cst_225 = arith.constant 2.000000e+00 : f32
    %539 = vector.broadcast %cst_225 : f32 to vector<16x1xf32>
    %540 = arith.divf %538, %539 : vector<16x1xf32>
    %541 = arith.mulf %535, %535 : vector<16x1xf32>
    %542 = arith.subf %540, %541 : vector<16x1xf32>
    %cst_226 = arith.constant 9.99999974E-6 : f32
    %543 = vector.broadcast %cst_226 : f32 to vector<16x1xf32>
    %544 = arith.addf %542, %543 : vector<16x1xf32>
    %545 = math.rsqrt %544 : vector<16x1xf32>
    %546 = arith.mulf %545, %530 : vector<16x1xf32>
    %547 = vector.broadcast %546 : vector<16x1xf32> to vector<16x2xf32>
    %548 = arith.mulf %529, %547 : vector<16x2xf32>
    %549 = arith.mulf %535, %546 : vector<16x1xf32>
    %550 = arith.subf %531, %549 : vector<16x1xf32>
    %551 = vector.broadcast %550 : vector<16x1xf32> to vector<16x2xf32>
    %552 = arith.addf %548, %551 : vector<16x2xf32>
    %cst_227 = arith.constant 0.000000e+00 : f32
    %553 = vector.broadcast %cst_227 : f32 to vector<16x2xf32>
    %554 = arith.maximumf %552, %553 : vector<16x2xf32>
    %c0_228 = arith.constant 0 : index
    %c400 = arith.constant 400 : index
    %555 = vector.load %arg2[%c0_228, %c400] : memref<16x832xf32, #tpu.memory_space<vmem>>, vector<16x16xf32>
    %cst_229 = arith.constant dense<0.000000e+00> : vector<16x2xf32>
    %556 = tpu.matmul %555, %554, %cst_229 {dimension_numbers = #tpu.dot_dimension_numbers<[1], [0], [0], [1], [0, 0, 1, 1], [], []>} : vector<16x16xf32>, vector<16x2xf32>, vector<16x2xf32> -> vector<16x2xf32>
    %c0_230 = arith.constant 0 : index
    %c30 = arith.constant 30 : index
    %557 = vector.load %arg1[%c0_230, %c30] : memref<16x65xf32, #tpu.memory_space<vmem>>, vector<16x1xf32>
    %558 = vector.broadcast %557 : vector<16x1xf32> to vector<16x2xf32>
    %559 = arith.addf %556, %558 : vector<16x2xf32>
    %cst_231 = arith.constant 0.000000e+00 : f32
    %560 = vector.broadcast %cst_231 : f32 to vector<16x2xf32>
    %561 = arith.subf %560, %559 : vector<16x2xf32>
    %562 = math.exp %561 : vector<16x2xf32>
    %cst_232 = arith.constant 1.000000e+00 : f32
    %563 = vector.broadcast %cst_232 : f32 to vector<16x2xf32>
    %564 = arith.addf %563, %562 : vector<16x2xf32>
    %cst_233 = arith.constant 1.000000e+00 : f32
    %565 = vector.broadcast %cst_233 : f32 to vector<16x2xf32>
    %566 = arith.divf %565, %564 : vector<16x2xf32>
    %567 = arith.mulf %524, %566 : vector<16x2xf32>
    %568 = tpu.iota {dimensions = array<i32: 0>} : vector<2x64xi32>
    %569 = tpu.iota {dimensions = array<i32: 1>} : vector<2x64xi32>
    %c32_i32_234 = arith.constant 32 : i32
    %570 = vector.broadcast %c32_i32_234 : i32 to vector<2x64xi32>
    %571 = arith.muli %568, %570 : vector<2x64xi32>
    %572 = arith.cmpi sge, %569, %571 : vector<2x64xi32>
    %c32_i32_235 = arith.constant 32 : i32
    %573 = vector.broadcast %c32_i32_235 : i32 to vector<2x64xi32>
    %574 = arith.muli %568, %573 : vector<2x64xi32>
    %c32_i32_236 = arith.constant 32 : i32
    %575 = vector.broadcast %c32_i32_236 : i32 to vector<2x64xi32>
    %576 = arith.addi %574, %575 : vector<2x64xi32>
    %577 = arith.cmpi slt, %569, %576 : vector<2x64xi32>
    %578 = arith.andi %572, %577 : vector<2x64xi1>
    %cst_237 = arith.constant 1.000000e+00 : f32
    %cst_238 = arith.constant 0.000000e+00 : f32
    %579 = vector.broadcast %cst_237 : f32 to vector<2x64xf32>
    %580 = vector.broadcast %cst_238 : f32 to vector<2x64xf32>
    %581 = arith.select %578, %579, %580 : vector<2x64xi1>, vector<2x64xf32>
    %cst_239 = arith.constant dense<0.000000e+00> : vector<16x64xf32>
    %582 = tpu.matmul %567, %581, %cst_239 {dimension_numbers = #tpu.dot_dimension_numbers<[1], [0], [0], [1], [0, 0, 1, 1], [], []>} : vector<16x2xf32>, vector<2x64xf32>, vector<16x64xf32> -> vector<16x64xf32>
    %cst_240 = arith.constant 0.000000e+00 : f32
    %583 = vector.broadcast %cst_240 : f32 to vector<16x64xf32>
    %584 = arith.subf %583, %582 : vector<16x64xf32>
    %585 = arith.maximumf %508, %584 : vector<16x64xf32>
    %586 = arith.minimumf %585, %582 : vector<16x64xf32>
    %587 = arith.subf %508, %586 : vector<16x64xf32>
    %588 = arith.addf %587, %453 : vector<16x64xf32>
    %c0_241 = arith.constant 0 : index
    %c31 = arith.constant 31 : index
    %589 = vector.load %arg1[%c0_241, %c31] : memref<16x65xf32, #tpu.memory_space<vmem>>, vector<16x1xf32>
    %c0_242 = arith.constant 0 : index
    %c32_243 = arith.constant 32 : index
    %590 = vector.load %arg1[%c0_242, %c32_243] : memref<16x65xf32, #tpu.memory_space<vmem>>, vector<16x1xf32>
    %cst_244 = arith.constant dense<0.000000e+00> : vector<16xf32>
    %591 = vector.multi_reduction <add>, %588, %cst_244 [1] : vector<16x64xf32> to vector<16xf32>
    %592 = vector.shape_cast %591 : vector<16xf32> to vector<16x1xf32>
    %cst_245 = arith.constant 6.400000e+01 : f32
    %593 = vector.broadcast %cst_245 : f32 to vector<16x1xf32>
    %594 = arith.divf %592, %593 : vector<16x1xf32>
    %595 = arith.mulf %588, %588 : vector<16x64xf32>
    %cst_246 = arith.constant dense<0.000000e+00> : vector<16xf32>
    %596 = vector.multi_reduction <add>, %595, %cst_246 [1] : vector<16x64xf32> to vector<16xf32>
    %597 = vector.shape_cast %596 : vector<16xf32> to vector<16x1xf32>
    %cst_247 = arith.constant 6.400000e+01 : f32
    %598 = vector.broadcast %cst_247 : f32 to vector<16x1xf32>
    %599 = arith.divf %597, %598 : vector<16x1xf32>
    %600 = arith.mulf %594, %594 : vector<16x1xf32>
    %601 = arith.subf %599, %600 : vector<16x1xf32>
    %cst_248 = arith.constant 9.99999974E-6 : f32
    %602 = vector.broadcast %cst_248 : f32 to vector<16x1xf32>
    %603 = arith.addf %601, %602 : vector<16x1xf32>
    %604 = math.rsqrt %603 : vector<16x1xf32>
    %605 = arith.mulf %604, %589 : vector<16x1xf32>
    %606 = vector.broadcast %605 : vector<16x1xf32> to vector<16x64xf32>
    %607 = arith.mulf %588, %606 : vector<16x64xf32>
    %608 = arith.mulf %594, %605 : vector<16x1xf32>
    %609 = arith.subf %590, %608 : vector<16x1xf32>
    %610 = vector.broadcast %609 : vector<16x1xf32> to vector<16x64xf32>
    %611 = arith.addf %607, %610 : vector<16x64xf32>
    %cst_249 = arith.constant 0.000000e+00 : f32
    %612 = vector.broadcast %cst_249 : f32 to vector<16x64xf32>
    %613 = arith.maximumf %611, %612 : vector<16x64xf32>
    %c0_250 = arith.constant 0 : index
    %c416 = arith.constant 416 : index
    %614 = vector.load %arg2[%c0_250, %c416] : memref<16x832xf32, #tpu.memory_space<vmem>>, vector<16x16xf32>
    %c0_251 = arith.constant 0 : index
    %c432 = arith.constant 432 : index
    %615 = vector.load %arg2[%c0_251, %c432] : memref<16x832xf32, #tpu.memory_space<vmem>>, vector<16x16xf32>
    %c0_252 = arith.constant 0 : index
    %c448 = arith.constant 448 : index
    %616 = vector.load %arg2[%c0_252, %c448] : memref<16x832xf32, #tpu.memory_space<vmem>>, vector<16x16xf32>
    %c1_i32_253 = arith.constant 1 : i32
    %617 = tpu.dynamic_rotate %613 by %c1_i32_253 dim 1 : vector<16x64xf32>, i32 -> vector<16x64xf32>
    %618 = tpu.iota {dimensions = array<i32: 1>} : vector<16x64xi32>
    %c31_i32_254 = arith.constant 31 : i32
    %619 = vector.broadcast %c31_i32_254 : i32 to vector<16x64xi32>
    %620 = arith.andi %618, %619 : vector<16x64xi32>
    %c0_i32_255 = arith.constant 0 : i32
    %621 = vector.broadcast %c0_i32_255 : i32 to vector<16x64xi32>
    %622 = arith.cmpi ne, %620, %621 : vector<16x64xi32>
    %cst_256 = arith.constant 0.000000e+00 : f32
    %623 = vector.broadcast %cst_256 : f32 to vector<16x64xf32>
    %624 = arith.select %622, %617, %623 : vector<16x64xi1>, vector<16x64xf32>
    %cst_257 = arith.constant dense<0.000000e+00> : vector<16x64xf32>
    %625 = tpu.matmul %614, %624, %cst_257 {dimension_numbers = #tpu.dot_dimension_numbers<[1], [0], [0], [1], [0, 0, 1, 1], [], []>} : vector<16x16xf32>, vector<16x64xf32>, vector<16x64xf32> -> vector<16x64xf32>
    %cst_258 = arith.constant dense<0.000000e+00> : vector<16x64xf32>
    %626 = tpu.matmul %615, %613, %cst_258 {dimension_numbers = #tpu.dot_dimension_numbers<[1], [0], [0], [1], [0, 0, 1, 1], [], []>} : vector<16x16xf32>, vector<16x64xf32>, vector<16x64xf32> -> vector<16x64xf32>
    %627 = arith.addf %625, %626 : vector<16x64xf32>
    %c63_i32_259 = arith.constant 63 : i32
    %628 = tpu.dynamic_rotate %613 by %c63_i32_259 dim 1 : vector<16x64xf32>, i32 -> vector<16x64xf32>
    %629 = tpu.iota {dimensions = array<i32: 1>} : vector<16x64xi32>
    %c31_i32_260 = arith.constant 31 : i32
    %630 = vector.broadcast %c31_i32_260 : i32 to vector<16x64xi32>
    %631 = arith.andi %629, %630 : vector<16x64xi32>
    %c31_i32_261 = arith.constant 31 : i32
    %632 = vector.broadcast %c31_i32_261 : i32 to vector<16x64xi32>
    %633 = arith.cmpi ne, %631, %632 : vector<16x64xi32>
    %cst_262 = arith.constant 0.000000e+00 : f32
    %634 = vector.broadcast %cst_262 : f32 to vector<16x64xf32>
    %635 = arith.select %633, %628, %634 : vector<16x64xi1>, vector<16x64xf32>
    %cst_263 = arith.constant dense<0.000000e+00> : vector<16x64xf32>
    %636 = tpu.matmul %616, %635, %cst_263 {dimension_numbers = #tpu.dot_dimension_numbers<[1], [0], [0], [1], [0, 0, 1, 1], [], []>} : vector<16x16xf32>, vector<16x64xf32>, vector<16x64xf32> -> vector<16x64xf32>
    %637 = arith.addf %627, %636 : vector<16x64xf32>
    %c0_264 = arith.constant 0 : index
    %c33 = arith.constant 33 : index
    %638 = vector.load %arg1[%c0_264, %c33] : memref<16x65xf32, #tpu.memory_space<vmem>>, vector<16x1xf32>
    %639 = vector.broadcast %638 : vector<16x1xf32> to vector<16x64xf32>
    %640 = arith.addf %637, %639 : vector<16x64xf32>
    %c0_265 = arith.constant 0 : index
    %c34 = arith.constant 34 : index
    %641 = vector.load %arg1[%c0_265, %c34] : memref<16x65xf32, #tpu.memory_space<vmem>>, vector<16x1xf32>
    %c0_266 = arith.constant 0 : index
    %c35 = arith.constant 35 : index
    %642 = vector.load %arg1[%c0_266, %c35] : memref<16x65xf32, #tpu.memory_space<vmem>>, vector<16x1xf32>
    %cst_267 = arith.constant dense<0.000000e+00> : vector<16xf32>
    %643 = vector.multi_reduction <add>, %640, %cst_267 [1] : vector<16x64xf32> to vector<16xf32>
    %644 = vector.shape_cast %643 : vector<16xf32> to vector<16x1xf32>
    %cst_268 = arith.constant 6.400000e+01 : f32
    %645 = vector.broadcast %cst_268 : f32 to vector<16x1xf32>
    %646 = arith.divf %644, %645 : vector<16x1xf32>
    %647 = arith.mulf %640, %640 : vector<16x64xf32>
    %cst_269 = arith.constant dense<0.000000e+00> : vector<16xf32>
    %648 = vector.multi_reduction <add>, %647, %cst_269 [1] : vector<16x64xf32> to vector<16xf32>
    %649 = vector.shape_cast %648 : vector<16xf32> to vector<16x1xf32>
    %cst_270 = arith.constant 6.400000e+01 : f32
    %650 = vector.broadcast %cst_270 : f32 to vector<16x1xf32>
    %651 = arith.divf %649, %650 : vector<16x1xf32>
    %652 = arith.mulf %646, %646 : vector<16x1xf32>
    %653 = arith.subf %651, %652 : vector<16x1xf32>
    %cst_271 = arith.constant 9.99999974E-6 : f32
    %654 = vector.broadcast %cst_271 : f32 to vector<16x1xf32>
    %655 = arith.addf %653, %654 : vector<16x1xf32>
    %656 = math.rsqrt %655 : vector<16x1xf32>
    %657 = arith.mulf %656, %641 : vector<16x1xf32>
    %658 = vector.broadcast %657 : vector<16x1xf32> to vector<16x64xf32>
    %659 = arith.mulf %640, %658 : vector<16x64xf32>
    %660 = arith.mulf %646, %657 : vector<16x1xf32>
    %661 = arith.subf %642, %660 : vector<16x1xf32>
    %662 = vector.broadcast %661 : vector<16x1xf32> to vector<16x64xf32>
    %663 = arith.addf %659, %662 : vector<16x64xf32>
    %cst_272 = arith.constant 0.000000e+00 : f32
    %664 = vector.broadcast %cst_272 : f32 to vector<16x64xf32>
    %665 = arith.maximumf %663, %664 : vector<16x64xf32>
    %c0_273 = arith.constant 0 : index
    %c464 = arith.constant 464 : index
    %666 = vector.load %arg2[%c0_273, %c464] : memref<16x832xf32, #tpu.memory_space<vmem>>, vector<16x16xf32>
    %c0_274 = arith.constant 0 : index
    %c480 = arith.constant 480 : index
    %667 = vector.load %arg2[%c0_274, %c480] : memref<16x832xf32, #tpu.memory_space<vmem>>, vector<16x16xf32>
    %c0_275 = arith.constant 0 : index
    %c496 = arith.constant 496 : index
    %668 = vector.load %arg2[%c0_275, %c496] : memref<16x832xf32, #tpu.memory_space<vmem>>, vector<16x16xf32>
    %c1_i32_276 = arith.constant 1 : i32
    %669 = tpu.dynamic_rotate %665 by %c1_i32_276 dim 1 : vector<16x64xf32>, i32 -> vector<16x64xf32>
    %670 = tpu.iota {dimensions = array<i32: 1>} : vector<16x64xi32>
    %c31_i32_277 = arith.constant 31 : i32
    %671 = vector.broadcast %c31_i32_277 : i32 to vector<16x64xi32>
    %672 = arith.andi %670, %671 : vector<16x64xi32>
    %c0_i32_278 = arith.constant 0 : i32
    %673 = vector.broadcast %c0_i32_278 : i32 to vector<16x64xi32>
    %674 = arith.cmpi ne, %672, %673 : vector<16x64xi32>
    %cst_279 = arith.constant 0.000000e+00 : f32
    %675 = vector.broadcast %cst_279 : f32 to vector<16x64xf32>
    %676 = arith.select %674, %669, %675 : vector<16x64xi1>, vector<16x64xf32>
    %cst_280 = arith.constant dense<0.000000e+00> : vector<16x64xf32>
    %677 = tpu.matmul %666, %676, %cst_280 {dimension_numbers = #tpu.dot_dimension_numbers<[1], [0], [0], [1], [0, 0, 1, 1], [], []>} : vector<16x16xf32>, vector<16x64xf32>, vector<16x64xf32> -> vector<16x64xf32>
    %cst_281 = arith.constant dense<0.000000e+00> : vector<16x64xf32>
    %678 = tpu.matmul %667, %665, %cst_281 {dimension_numbers = #tpu.dot_dimension_numbers<[1], [0], [0], [1], [0, 0, 1, 1], [], []>} : vector<16x16xf32>, vector<16x64xf32>, vector<16x64xf32> -> vector<16x64xf32>
    %679 = arith.addf %677, %678 : vector<16x64xf32>
    %c63_i32_282 = arith.constant 63 : i32
    %680 = tpu.dynamic_rotate %665 by %c63_i32_282 dim 1 : vector<16x64xf32>, i32 -> vector<16x64xf32>
    %681 = tpu.iota {dimensions = array<i32: 1>} : vector<16x64xi32>
    %c31_i32_283 = arith.constant 31 : i32
    %682 = vector.broadcast %c31_i32_283 : i32 to vector<16x64xi32>
    %683 = arith.andi %681, %682 : vector<16x64xi32>
    %c31_i32_284 = arith.constant 31 : i32
    %684 = vector.broadcast %c31_i32_284 : i32 to vector<16x64xi32>
    %685 = arith.cmpi ne, %683, %684 : vector<16x64xi32>
    %cst_285 = arith.constant 0.000000e+00 : f32
    %686 = vector.broadcast %cst_285 : f32 to vector<16x64xf32>
    %687 = arith.select %685, %680, %686 : vector<16x64xi1>, vector<16x64xf32>
    %cst_286 = arith.constant dense<0.000000e+00> : vector<16x64xf32>
    %688 = tpu.matmul %668, %687, %cst_286 {dimension_numbers = #tpu.dot_dimension_numbers<[1], [0], [0], [1], [0, 0, 1, 1], [], []>} : vector<16x16xf32>, vector<16x64xf32>, vector<16x64xf32> -> vector<16x64xf32>
    %689 = arith.addf %679, %688 : vector<16x64xf32>
    %c0_287 = arith.constant 0 : index
    %c36 = arith.constant 36 : index
    %690 = vector.load %arg1[%c0_287, %c36] : memref<16x65xf32, #tpu.memory_space<vmem>>, vector<16x1xf32>
    %691 = vector.broadcast %690 : vector<16x1xf32> to vector<16x64xf32>
    %692 = arith.addf %689, %691 : vector<16x64xf32>
    %693 = math.absf %692 : vector<16x64xf32>
    %694 = tpu.iota {dimensions = array<i32: 0>} : vector<64x2xi32>
    %695 = tpu.iota {dimensions = array<i32: 1>} : vector<64x2xi32>
    %c32_i32_288 = arith.constant 32 : i32
    %696 = vector.broadcast %c32_i32_288 : i32 to vector<64x2xi32>
    %697 = arith.muli %695, %696 : vector<64x2xi32>
    %698 = arith.cmpi sge, %694, %697 : vector<64x2xi32>
    %c32_i32_289 = arith.constant 32 : i32
    %699 = vector.broadcast %c32_i32_289 : i32 to vector<64x2xi32>
    %700 = arith.muli %695, %699 : vector<64x2xi32>
    %c32_i32_290 = arith.constant 32 : i32
    %701 = vector.broadcast %c32_i32_290 : i32 to vector<64x2xi32>
    %702 = arith.addi %700, %701 : vector<64x2xi32>
    %703 = arith.cmpi slt, %694, %702 : vector<64x2xi32>
    %704 = arith.andi %698, %703 : vector<64x2xi1>
    %cst_291 = arith.constant 3.125000e-02 : f32
    %cst_292 = arith.constant 0.000000e+00 : f32
    %705 = vector.broadcast %cst_291 : f32 to vector<64x2xf32>
    %706 = vector.broadcast %cst_292 : f32 to vector<64x2xf32>
    %707 = arith.select %704, %705, %706 : vector<64x2xi1>, vector<64x2xf32>
    %cst_293 = arith.constant dense<0.000000e+00> : vector<16x2xf32>
    %708 = tpu.matmul %693, %707, %cst_293 {dimension_numbers = #tpu.dot_dimension_numbers<[1], [0], [0], [1], [0, 0, 1, 1], [], []>} : vector<16x64xf32>, vector<64x2xf32>, vector<16x2xf32> -> vector<16x2xf32>
    %c0_294 = arith.constant 0 : index
    %c512 = arith.constant 512 : index
    %709 = vector.load %arg2[%c0_294, %c512] : memref<16x832xf32, #tpu.memory_space<vmem>>, vector<16x16xf32>
    %cst_295 = arith.constant dense<0.000000e+00> : vector<16x2xf32>
    %710 = tpu.matmul %709, %708, %cst_295 {dimension_numbers = #tpu.dot_dimension_numbers<[1], [0], [0], [1], [0, 0, 1, 1], [], []>} : vector<16x16xf32>, vector<16x2xf32>, vector<16x2xf32> -> vector<16x2xf32>
    %c0_296 = arith.constant 0 : index
    %c37 = arith.constant 37 : index
    %711 = vector.load %arg1[%c0_296, %c37] : memref<16x65xf32, #tpu.memory_space<vmem>>, vector<16x1xf32>
    %712 = vector.broadcast %711 : vector<16x1xf32> to vector<16x2xf32>
    %713 = arith.addf %710, %712 : vector<16x2xf32>
    %c0_297 = arith.constant 0 : index
    %c38 = arith.constant 38 : index
    %714 = vector.load %arg1[%c0_297, %c38] : memref<16x65xf32, #tpu.memory_space<vmem>>, vector<16x1xf32>
    %c0_298 = arith.constant 0 : index
    %c39 = arith.constant 39 : index
    %715 = vector.load %arg1[%c0_298, %c39] : memref<16x65xf32, #tpu.memory_space<vmem>>, vector<16x1xf32>
    %cst_299 = arith.constant dense<0.000000e+00> : vector<16xf32>
    %716 = vector.multi_reduction <add>, %713, %cst_299 [1] : vector<16x2xf32> to vector<16xf32>
    %717 = vector.shape_cast %716 : vector<16xf32> to vector<16x1xf32>
    %cst_300 = arith.constant 2.000000e+00 : f32
    %718 = vector.broadcast %cst_300 : f32 to vector<16x1xf32>
    %719 = arith.divf %717, %718 : vector<16x1xf32>
    %720 = arith.mulf %713, %713 : vector<16x2xf32>
    %cst_301 = arith.constant dense<0.000000e+00> : vector<16xf32>
    %721 = vector.multi_reduction <add>, %720, %cst_301 [1] : vector<16x2xf32> to vector<16xf32>
    %722 = vector.shape_cast %721 : vector<16xf32> to vector<16x1xf32>
    %cst_302 = arith.constant 2.000000e+00 : f32
    %723 = vector.broadcast %cst_302 : f32 to vector<16x1xf32>
    %724 = arith.divf %722, %723 : vector<16x1xf32>
    %725 = arith.mulf %719, %719 : vector<16x1xf32>
    %726 = arith.subf %724, %725 : vector<16x1xf32>
    %cst_303 = arith.constant 9.99999974E-6 : f32
    %727 = vector.broadcast %cst_303 : f32 to vector<16x1xf32>
    %728 = arith.addf %726, %727 : vector<16x1xf32>
    %729 = math.rsqrt %728 : vector<16x1xf32>
    %730 = arith.mulf %729, %714 : vector<16x1xf32>
    %731 = vector.broadcast %730 : vector<16x1xf32> to vector<16x2xf32>
    %732 = arith.mulf %713, %731 : vector<16x2xf32>
    %733 = arith.mulf %719, %730 : vector<16x1xf32>
    %734 = arith.subf %715, %733 : vector<16x1xf32>
    %735 = vector.broadcast %734 : vector<16x1xf32> to vector<16x2xf32>
    %736 = arith.addf %732, %735 : vector<16x2xf32>
    %cst_304 = arith.constant 0.000000e+00 : f32
    %737 = vector.broadcast %cst_304 : f32 to vector<16x2xf32>
    %738 = arith.maximumf %736, %737 : vector<16x2xf32>
    %c0_305 = arith.constant 0 : index
    %c528 = arith.constant 528 : index
    %739 = vector.load %arg2[%c0_305, %c528] : memref<16x832xf32, #tpu.memory_space<vmem>>, vector<16x16xf32>
    %cst_306 = arith.constant dense<0.000000e+00> : vector<16x2xf32>
    %740 = tpu.matmul %739, %738, %cst_306 {dimension_numbers = #tpu.dot_dimension_numbers<[1], [0], [0], [1], [0, 0, 1, 1], [], []>} : vector<16x16xf32>, vector<16x2xf32>, vector<16x2xf32> -> vector<16x2xf32>
    %c0_307 = arith.constant 0 : index
    %c40 = arith.constant 40 : index
    %741 = vector.load %arg1[%c0_307, %c40] : memref<16x65xf32, #tpu.memory_space<vmem>>, vector<16x1xf32>
    %742 = vector.broadcast %741 : vector<16x1xf32> to vector<16x2xf32>
    %743 = arith.addf %740, %742 : vector<16x2xf32>
    %cst_308 = arith.constant 0.000000e+00 : f32
    %744 = vector.broadcast %cst_308 : f32 to vector<16x2xf32>
    %745 = arith.subf %744, %743 : vector<16x2xf32>
    %746 = math.exp %745 : vector<16x2xf32>
    %cst_309 = arith.constant 1.000000e+00 : f32
    %747 = vector.broadcast %cst_309 : f32 to vector<16x2xf32>
    %748 = arith.addf %747, %746 : vector<16x2xf32>
    %cst_310 = arith.constant 1.000000e+00 : f32
    %749 = vector.broadcast %cst_310 : f32 to vector<16x2xf32>
    %750 = arith.divf %749, %748 : vector<16x2xf32>
    %751 = arith.mulf %708, %750 : vector<16x2xf32>
    %752 = tpu.iota {dimensions = array<i32: 0>} : vector<2x64xi32>
    %753 = tpu.iota {dimensions = array<i32: 1>} : vector<2x64xi32>
    %c32_i32_311 = arith.constant 32 : i32
    %754 = vector.broadcast %c32_i32_311 : i32 to vector<2x64xi32>
    %755 = arith.muli %752, %754 : vector<2x64xi32>
    %756 = arith.cmpi sge, %753, %755 : vector<2x64xi32>
    %c32_i32_312 = arith.constant 32 : i32
    %757 = vector.broadcast %c32_i32_312 : i32 to vector<2x64xi32>
    %758 = arith.muli %752, %757 : vector<2x64xi32>
    %c32_i32_313 = arith.constant 32 : i32
    %759 = vector.broadcast %c32_i32_313 : i32 to vector<2x64xi32>
    %760 = arith.addi %758, %759 : vector<2x64xi32>
    %761 = arith.cmpi slt, %753, %760 : vector<2x64xi32>
    %762 = arith.andi %756, %761 : vector<2x64xi1>
    %cst_314 = arith.constant 1.000000e+00 : f32
    %cst_315 = arith.constant 0.000000e+00 : f32
    %763 = vector.broadcast %cst_314 : f32 to vector<2x64xf32>
    %764 = vector.broadcast %cst_315 : f32 to vector<2x64xf32>
    %765 = arith.select %762, %763, %764 : vector<2x64xi1>, vector<2x64xf32>
    %cst_316 = arith.constant dense<0.000000e+00> : vector<16x64xf32>
    %766 = tpu.matmul %751, %765, %cst_316 {dimension_numbers = #tpu.dot_dimension_numbers<[1], [0], [0], [1], [0, 0, 1, 1], [], []>} : vector<16x2xf32>, vector<2x64xf32>, vector<16x64xf32> -> vector<16x64xf32>
    %cst_317 = arith.constant 0.000000e+00 : f32
    %767 = vector.broadcast %cst_317 : f32 to vector<16x64xf32>
    %768 = arith.subf %767, %766 : vector<16x64xf32>
    %769 = arith.maximumf %692, %768 : vector<16x64xf32>
    %770 = arith.minimumf %769, %766 : vector<16x64xf32>
    %771 = arith.subf %692, %770 : vector<16x64xf32>
    %772 = arith.addf %771, %588 : vector<16x64xf32>
    %c0_318 = arith.constant 0 : index
    %c41 = arith.constant 41 : index
    %773 = vector.load %arg1[%c0_318, %c41] : memref<16x65xf32, #tpu.memory_space<vmem>>, vector<16x1xf32>
    %c0_319 = arith.constant 0 : index
    %c42 = arith.constant 42 : index
    %774 = vector.load %arg1[%c0_319, %c42] : memref<16x65xf32, #tpu.memory_space<vmem>>, vector<16x1xf32>
    %cst_320 = arith.constant dense<0.000000e+00> : vector<16xf32>
    %775 = vector.multi_reduction <add>, %772, %cst_320 [1] : vector<16x64xf32> to vector<16xf32>
    %776 = vector.shape_cast %775 : vector<16xf32> to vector<16x1xf32>
    %cst_321 = arith.constant 6.400000e+01 : f32
    %777 = vector.broadcast %cst_321 : f32 to vector<16x1xf32>
    %778 = arith.divf %776, %777 : vector<16x1xf32>
    %779 = arith.mulf %772, %772 : vector<16x64xf32>
    %cst_322 = arith.constant dense<0.000000e+00> : vector<16xf32>
    %780 = vector.multi_reduction <add>, %779, %cst_322 [1] : vector<16x64xf32> to vector<16xf32>
    %781 = vector.shape_cast %780 : vector<16xf32> to vector<16x1xf32>
    %cst_323 = arith.constant 6.400000e+01 : f32
    %782 = vector.broadcast %cst_323 : f32 to vector<16x1xf32>
    %783 = arith.divf %781, %782 : vector<16x1xf32>
    %784 = arith.mulf %778, %778 : vector<16x1xf32>
    %785 = arith.subf %783, %784 : vector<16x1xf32>
    %cst_324 = arith.constant 9.99999974E-6 : f32
    %786 = vector.broadcast %cst_324 : f32 to vector<16x1xf32>
    %787 = arith.addf %785, %786 : vector<16x1xf32>
    %788 = math.rsqrt %787 : vector<16x1xf32>
    %789 = arith.mulf %788, %773 : vector<16x1xf32>
    %790 = vector.broadcast %789 : vector<16x1xf32> to vector<16x64xf32>
    %791 = arith.mulf %772, %790 : vector<16x64xf32>
    %792 = arith.mulf %778, %789 : vector<16x1xf32>
    %793 = arith.subf %774, %792 : vector<16x1xf32>
    %794 = vector.broadcast %793 : vector<16x1xf32> to vector<16x64xf32>
    %795 = arith.addf %791, %794 : vector<16x64xf32>
    %cst_325 = arith.constant 0.000000e+00 : f32
    %796 = vector.broadcast %cst_325 : f32 to vector<16x64xf32>
    %797 = arith.maximumf %795, %796 : vector<16x64xf32>
    %c0_326 = arith.constant 0 : index
    %c544 = arith.constant 544 : index
    %798 = vector.load %arg2[%c0_326, %c544] : memref<16x832xf32, #tpu.memory_space<vmem>>, vector<16x16xf32>
    %c0_327 = arith.constant 0 : index
    %c560 = arith.constant 560 : index
    %799 = vector.load %arg2[%c0_327, %c560] : memref<16x832xf32, #tpu.memory_space<vmem>>, vector<16x16xf32>
    %c0_328 = arith.constant 0 : index
    %c576 = arith.constant 576 : index
    %800 = vector.load %arg2[%c0_328, %c576] : memref<16x832xf32, #tpu.memory_space<vmem>>, vector<16x16xf32>
    %c1_i32_329 = arith.constant 1 : i32
    %801 = tpu.dynamic_rotate %797 by %c1_i32_329 dim 1 : vector<16x64xf32>, i32 -> vector<16x64xf32>
    %802 = tpu.iota {dimensions = array<i32: 1>} : vector<16x64xi32>
    %c31_i32_330 = arith.constant 31 : i32
    %803 = vector.broadcast %c31_i32_330 : i32 to vector<16x64xi32>
    %804 = arith.andi %802, %803 : vector<16x64xi32>
    %c0_i32_331 = arith.constant 0 : i32
    %805 = vector.broadcast %c0_i32_331 : i32 to vector<16x64xi32>
    %806 = arith.cmpi ne, %804, %805 : vector<16x64xi32>
    %cst_332 = arith.constant 0.000000e+00 : f32
    %807 = vector.broadcast %cst_332 : f32 to vector<16x64xf32>
    %808 = arith.select %806, %801, %807 : vector<16x64xi1>, vector<16x64xf32>
    %cst_333 = arith.constant dense<0.000000e+00> : vector<16x64xf32>
    %809 = tpu.matmul %798, %808, %cst_333 {dimension_numbers = #tpu.dot_dimension_numbers<[1], [0], [0], [1], [0, 0, 1, 1], [], []>} : vector<16x16xf32>, vector<16x64xf32>, vector<16x64xf32> -> vector<16x64xf32>
    %cst_334 = arith.constant dense<0.000000e+00> : vector<16x64xf32>
    %810 = tpu.matmul %799, %797, %cst_334 {dimension_numbers = #tpu.dot_dimension_numbers<[1], [0], [0], [1], [0, 0, 1, 1], [], []>} : vector<16x16xf32>, vector<16x64xf32>, vector<16x64xf32> -> vector<16x64xf32>
    %811 = arith.addf %809, %810 : vector<16x64xf32>
    %c63_i32_335 = arith.constant 63 : i32
    %812 = tpu.dynamic_rotate %797 by %c63_i32_335 dim 1 : vector<16x64xf32>, i32 -> vector<16x64xf32>
    %813 = tpu.iota {dimensions = array<i32: 1>} : vector<16x64xi32>
    %c31_i32_336 = arith.constant 31 : i32
    %814 = vector.broadcast %c31_i32_336 : i32 to vector<16x64xi32>
    %815 = arith.andi %813, %814 : vector<16x64xi32>
    %c31_i32_337 = arith.constant 31 : i32
    %816 = vector.broadcast %c31_i32_337 : i32 to vector<16x64xi32>
    %817 = arith.cmpi ne, %815, %816 : vector<16x64xi32>
    %cst_338 = arith.constant 0.000000e+00 : f32
    %818 = vector.broadcast %cst_338 : f32 to vector<16x64xf32>
    %819 = arith.select %817, %812, %818 : vector<16x64xi1>, vector<16x64xf32>
    %cst_339 = arith.constant dense<0.000000e+00> : vector<16x64xf32>
    %820 = tpu.matmul %800, %819, %cst_339 {dimension_numbers = #tpu.dot_dimension_numbers<[1], [0], [0], [1], [0, 0, 1, 1], [], []>} : vector<16x16xf32>, vector<16x64xf32>, vector<16x64xf32> -> vector<16x64xf32>
    %821 = arith.addf %811, %820 : vector<16x64xf32>
    %822 = tpu.iota {dimensions = array<i32: 0>} : vector<64x32xi32>
    %823 = tpu.iota {dimensions = array<i32: 1>} : vector<64x32xi32>
    %c2_i32_340 = arith.constant 2 : i32
    %824 = vector.broadcast %c2_i32_340 : i32 to vector<64x32xi32>
    %825 = arith.muli %824, %823 : vector<64x32xi32>
    %826 = arith.cmpi eq, %822, %825 : vector<64x32xi32>
    %cst_341 = arith.constant 1.000000e+00 : f32
    %cst_342 = arith.constant 0.000000e+00 : f32
    %827 = vector.broadcast %cst_341 : f32 to vector<64x32xf32>
    %828 = vector.broadcast %cst_342 : f32 to vector<64x32xf32>
    %829 = arith.select %826, %827, %828 : vector<64x32xi1>, vector<64x32xf32>
    %cst_343 = arith.constant dense<0.000000e+00> : vector<16x32xf32>
    %830 = tpu.matmul %821, %829, %cst_343 {dimension_numbers = #tpu.dot_dimension_numbers<[1], [0], [0], [1], [0, 0, 1, 1], [], []>} : vector<16x64xf32>, vector<64x32xf32>, vector<16x32xf32> -> vector<16x32xf32>
    %cst_344 = arith.constant dense<0.000000e+00> : vector<16x32xf32>
    %831 = tpu.matmul %772, %829, %cst_344 {dimension_numbers = #tpu.dot_dimension_numbers<[1], [0], [0], [1], [0, 0, 1, 1], [], []>} : vector<16x64xf32>, vector<64x32xf32>, vector<16x32xf32> -> vector<16x32xf32>
    %c0_345 = arith.constant 0 : index
    %c43 = arith.constant 43 : index
    %832 = vector.load %arg1[%c0_345, %c43] : memref<16x65xf32, #tpu.memory_space<vmem>>, vector<16x1xf32>
    %833 = vector.broadcast %832 : vector<16x1xf32> to vector<16x32xf32>
    %834 = arith.addf %830, %833 : vector<16x32xf32>
    %c0_346 = arith.constant 0 : index
    %c44 = arith.constant 44 : index
    %835 = vector.load %arg1[%c0_346, %c44] : memref<16x65xf32, #tpu.memory_space<vmem>>, vector<16x1xf32>
    %c0_347 = arith.constant 0 : index
    %c45 = arith.constant 45 : index
    %836 = vector.load %arg1[%c0_347, %c45] : memref<16x65xf32, #tpu.memory_space<vmem>>, vector<16x1xf32>
    %cst_348 = arith.constant dense<0.000000e+00> : vector<16xf32>
    %837 = vector.multi_reduction <add>, %834, %cst_348 [1] : vector<16x32xf32> to vector<16xf32>
    %838 = vector.shape_cast %837 : vector<16xf32> to vector<16x1xf32>
    %cst_349 = arith.constant 3.200000e+01 : f32
    %839 = vector.broadcast %cst_349 : f32 to vector<16x1xf32>
    %840 = arith.divf %838, %839 : vector<16x1xf32>
    %841 = arith.mulf %834, %834 : vector<16x32xf32>
    %cst_350 = arith.constant dense<0.000000e+00> : vector<16xf32>
    %842 = vector.multi_reduction <add>, %841, %cst_350 [1] : vector<16x32xf32> to vector<16xf32>
    %843 = vector.shape_cast %842 : vector<16xf32> to vector<16x1xf32>
    %cst_351 = arith.constant 3.200000e+01 : f32
    %844 = vector.broadcast %cst_351 : f32 to vector<16x1xf32>
    %845 = arith.divf %843, %844 : vector<16x1xf32>
    %846 = arith.mulf %840, %840 : vector<16x1xf32>
    %847 = arith.subf %845, %846 : vector<16x1xf32>
    %cst_352 = arith.constant 9.99999974E-6 : f32
    %848 = vector.broadcast %cst_352 : f32 to vector<16x1xf32>
    %849 = arith.addf %847, %848 : vector<16x1xf32>
    %850 = math.rsqrt %849 : vector<16x1xf32>
    %851 = arith.mulf %850, %835 : vector<16x1xf32>
    %852 = vector.broadcast %851 : vector<16x1xf32> to vector<16x32xf32>
    %853 = arith.mulf %834, %852 : vector<16x32xf32>
    %854 = arith.mulf %840, %851 : vector<16x1xf32>
    %855 = arith.subf %836, %854 : vector<16x1xf32>
    %856 = vector.broadcast %855 : vector<16x1xf32> to vector<16x32xf32>
    %857 = arith.addf %853, %856 : vector<16x32xf32>
    %cst_353 = arith.constant 0.000000e+00 : f32
    %858 = vector.broadcast %cst_353 : f32 to vector<16x32xf32>
    %859 = arith.maximumf %857, %858 : vector<16x32xf32>
    %c0_354 = arith.constant 0 : index
    %c592 = arith.constant 592 : index
    %860 = vector.load %arg2[%c0_354, %c592] : memref<16x832xf32, #tpu.memory_space<vmem>>, vector<16x16xf32>
    %c0_355 = arith.constant 0 : index
    %c608 = arith.constant 608 : index
    %861 = vector.load %arg2[%c0_355, %c608] : memref<16x832xf32, #tpu.memory_space<vmem>>, vector<16x16xf32>
    %c0_356 = arith.constant 0 : index
    %c624 = arith.constant 624 : index
    %862 = vector.load %arg2[%c0_356, %c624] : memref<16x832xf32, #tpu.memory_space<vmem>>, vector<16x16xf32>
    %c1_i32_357 = arith.constant 1 : i32
    %863 = tpu.dynamic_rotate %859 by %c1_i32_357 dim 1 : vector<16x32xf32>, i32 -> vector<16x32xf32>
    %864 = tpu.iota {dimensions = array<i32: 1>} : vector<16x32xi32>
    %c15_i32 = arith.constant 15 : i32
    %865 = vector.broadcast %c15_i32 : i32 to vector<16x32xi32>
    %866 = arith.andi %864, %865 : vector<16x32xi32>
    %c0_i32_358 = arith.constant 0 : i32
    %867 = vector.broadcast %c0_i32_358 : i32 to vector<16x32xi32>
    %868 = arith.cmpi ne, %866, %867 : vector<16x32xi32>
    %cst_359 = arith.constant 0.000000e+00 : f32
    %869 = vector.broadcast %cst_359 : f32 to vector<16x32xf32>
    %870 = arith.select %868, %863, %869 : vector<16x32xi1>, vector<16x32xf32>
    %cst_360 = arith.constant dense<0.000000e+00> : vector<16x32xf32>
    %871 = tpu.matmul %860, %870, %cst_360 {dimension_numbers = #tpu.dot_dimension_numbers<[1], [0], [0], [1], [0, 0, 1, 1], [], []>} : vector<16x16xf32>, vector<16x32xf32>, vector<16x32xf32> -> vector<16x32xf32>
    %cst_361 = arith.constant dense<0.000000e+00> : vector<16x32xf32>
    %872 = tpu.matmul %861, %859, %cst_361 {dimension_numbers = #tpu.dot_dimension_numbers<[1], [0], [0], [1], [0, 0, 1, 1], [], []>} : vector<16x16xf32>, vector<16x32xf32>, vector<16x32xf32> -> vector<16x32xf32>
    %873 = arith.addf %871, %872 : vector<16x32xf32>
    %c31_i32_362 = arith.constant 31 : i32
    %874 = tpu.dynamic_rotate %859 by %c31_i32_362 dim 1 : vector<16x32xf32>, i32 -> vector<16x32xf32>
    %875 = tpu.iota {dimensions = array<i32: 1>} : vector<16x32xi32>
    %c15_i32_363 = arith.constant 15 : i32
    %876 = vector.broadcast %c15_i32_363 : i32 to vector<16x32xi32>
    %877 = arith.andi %875, %876 : vector<16x32xi32>
    %c15_i32_364 = arith.constant 15 : i32
    %878 = vector.broadcast %c15_i32_364 : i32 to vector<16x32xi32>
    %879 = arith.cmpi ne, %877, %878 : vector<16x32xi32>
    %cst_365 = arith.constant 0.000000e+00 : f32
    %880 = vector.broadcast %cst_365 : f32 to vector<16x32xf32>
    %881 = arith.select %879, %874, %880 : vector<16x32xi1>, vector<16x32xf32>
    %cst_366 = arith.constant dense<0.000000e+00> : vector<16x32xf32>
    %882 = tpu.matmul %862, %881, %cst_366 {dimension_numbers = #tpu.dot_dimension_numbers<[1], [0], [0], [1], [0, 0, 1, 1], [], []>} : vector<16x16xf32>, vector<16x32xf32>, vector<16x32xf32> -> vector<16x32xf32>
    %883 = arith.addf %873, %882 : vector<16x32xf32>
    %c0_367 = arith.constant 0 : index
    %c46 = arith.constant 46 : index
    %884 = vector.load %arg1[%c0_367, %c46] : memref<16x65xf32, #tpu.memory_space<vmem>>, vector<16x1xf32>
    %885 = vector.broadcast %884 : vector<16x1xf32> to vector<16x32xf32>
    %886 = arith.addf %883, %885 : vector<16x32xf32>
    %887 = math.absf %886 : vector<16x32xf32>
    %888 = tpu.iota {dimensions = array<i32: 0>} : vector<32x2xi32>
    %889 = tpu.iota {dimensions = array<i32: 1>} : vector<32x2xi32>
    %c16_i32 = arith.constant 16 : i32
    %890 = vector.broadcast %c16_i32 : i32 to vector<32x2xi32>
    %891 = arith.muli %889, %890 : vector<32x2xi32>
    %892 = arith.cmpi sge, %888, %891 : vector<32x2xi32>
    %c16_i32_368 = arith.constant 16 : i32
    %893 = vector.broadcast %c16_i32_368 : i32 to vector<32x2xi32>
    %894 = arith.muli %889, %893 : vector<32x2xi32>
    %c16_i32_369 = arith.constant 16 : i32
    %895 = vector.broadcast %c16_i32_369 : i32 to vector<32x2xi32>
    %896 = arith.addi %894, %895 : vector<32x2xi32>
    %897 = arith.cmpi slt, %888, %896 : vector<32x2xi32>
    %898 = arith.andi %892, %897 : vector<32x2xi1>
    %cst_370 = arith.constant 6.250000e-02 : f32
    %cst_371 = arith.constant 0.000000e+00 : f32
    %899 = vector.broadcast %cst_370 : f32 to vector<32x2xf32>
    %900 = vector.broadcast %cst_371 : f32 to vector<32x2xf32>
    %901 = arith.select %898, %899, %900 : vector<32x2xi1>, vector<32x2xf32>
    %cst_372 = arith.constant dense<0.000000e+00> : vector<16x2xf32>
    %902 = tpu.matmul %887, %901, %cst_372 {dimension_numbers = #tpu.dot_dimension_numbers<[1], [0], [0], [1], [0, 0, 1, 1], [], []>} : vector<16x32xf32>, vector<32x2xf32>, vector<16x2xf32> -> vector<16x2xf32>
    %c0_373 = arith.constant 0 : index
    %c640 = arith.constant 640 : index
    %903 = vector.load %arg2[%c0_373, %c640] : memref<16x832xf32, #tpu.memory_space<vmem>>, vector<16x16xf32>
    %cst_374 = arith.constant dense<0.000000e+00> : vector<16x2xf32>
    %904 = tpu.matmul %903, %902, %cst_374 {dimension_numbers = #tpu.dot_dimension_numbers<[1], [0], [0], [1], [0, 0, 1, 1], [], []>} : vector<16x16xf32>, vector<16x2xf32>, vector<16x2xf32> -> vector<16x2xf32>
    %c0_375 = arith.constant 0 : index
    %c47 = arith.constant 47 : index
    %905 = vector.load %arg1[%c0_375, %c47] : memref<16x65xf32, #tpu.memory_space<vmem>>, vector<16x1xf32>
    %906 = vector.broadcast %905 : vector<16x1xf32> to vector<16x2xf32>
    %907 = arith.addf %904, %906 : vector<16x2xf32>
    %c0_376 = arith.constant 0 : index
    %c48_377 = arith.constant 48 : index
    %908 = vector.load %arg1[%c0_376, %c48_377] : memref<16x65xf32, #tpu.memory_space<vmem>>, vector<16x1xf32>
    %c0_378 = arith.constant 0 : index
    %c49 = arith.constant 49 : index
    %909 = vector.load %arg1[%c0_378, %c49] : memref<16x65xf32, #tpu.memory_space<vmem>>, vector<16x1xf32>
    %cst_379 = arith.constant dense<0.000000e+00> : vector<16xf32>
    %910 = vector.multi_reduction <add>, %907, %cst_379 [1] : vector<16x2xf32> to vector<16xf32>
    %911 = vector.shape_cast %910 : vector<16xf32> to vector<16x1xf32>
    %cst_380 = arith.constant 2.000000e+00 : f32
    %912 = vector.broadcast %cst_380 : f32 to vector<16x1xf32>
    %913 = arith.divf %911, %912 : vector<16x1xf32>
    %914 = arith.mulf %907, %907 : vector<16x2xf32>
    %cst_381 = arith.constant dense<0.000000e+00> : vector<16xf32>
    %915 = vector.multi_reduction <add>, %914, %cst_381 [1] : vector<16x2xf32> to vector<16xf32>
    %916 = vector.shape_cast %915 : vector<16xf32> to vector<16x1xf32>
    %cst_382 = arith.constant 2.000000e+00 : f32
    %917 = vector.broadcast %cst_382 : f32 to vector<16x1xf32>
    %918 = arith.divf %916, %917 : vector<16x1xf32>
    %919 = arith.mulf %913, %913 : vector<16x1xf32>
    %920 = arith.subf %918, %919 : vector<16x1xf32>
    %cst_383 = arith.constant 9.99999974E-6 : f32
    %921 = vector.broadcast %cst_383 : f32 to vector<16x1xf32>
    %922 = arith.addf %920, %921 : vector<16x1xf32>
    %923 = math.rsqrt %922 : vector<16x1xf32>
    %924 = arith.mulf %923, %908 : vector<16x1xf32>
    %925 = vector.broadcast %924 : vector<16x1xf32> to vector<16x2xf32>
    %926 = arith.mulf %907, %925 : vector<16x2xf32>
    %927 = arith.mulf %913, %924 : vector<16x1xf32>
    %928 = arith.subf %909, %927 : vector<16x1xf32>
    %929 = vector.broadcast %928 : vector<16x1xf32> to vector<16x2xf32>
    %930 = arith.addf %926, %929 : vector<16x2xf32>
    %cst_384 = arith.constant 0.000000e+00 : f32
    %931 = vector.broadcast %cst_384 : f32 to vector<16x2xf32>
    %932 = arith.maximumf %930, %931 : vector<16x2xf32>
    %c0_385 = arith.constant 0 : index
    %c656 = arith.constant 656 : index
    %933 = vector.load %arg2[%c0_385, %c656] : memref<16x832xf32, #tpu.memory_space<vmem>>, vector<16x16xf32>
    %cst_386 = arith.constant dense<0.000000e+00> : vector<16x2xf32>
    %934 = tpu.matmul %933, %932, %cst_386 {dimension_numbers = #tpu.dot_dimension_numbers<[1], [0], [0], [1], [0, 0, 1, 1], [], []>} : vector<16x16xf32>, vector<16x2xf32>, vector<16x2xf32> -> vector<16x2xf32>
    %c0_387 = arith.constant 0 : index
    %c50 = arith.constant 50 : index
    %935 = vector.load %arg1[%c0_387, %c50] : memref<16x65xf32, #tpu.memory_space<vmem>>, vector<16x1xf32>
    %936 = vector.broadcast %935 : vector<16x1xf32> to vector<16x2xf32>
    %937 = arith.addf %934, %936 : vector<16x2xf32>
    %cst_388 = arith.constant 0.000000e+00 : f32
    %938 = vector.broadcast %cst_388 : f32 to vector<16x2xf32>
    %939 = arith.subf %938, %937 : vector<16x2xf32>
    %940 = math.exp %939 : vector<16x2xf32>
    %cst_389 = arith.constant 1.000000e+00 : f32
    %941 = vector.broadcast %cst_389 : f32 to vector<16x2xf32>
    %942 = arith.addf %941, %940 : vector<16x2xf32>
    %cst_390 = arith.constant 1.000000e+00 : f32
    %943 = vector.broadcast %cst_390 : f32 to vector<16x2xf32>
    %944 = arith.divf %943, %942 : vector<16x2xf32>
    %945 = arith.mulf %902, %944 : vector<16x2xf32>
    %946 = tpu.iota {dimensions = array<i32: 0>} : vector<2x32xi32>
    %947 = tpu.iota {dimensions = array<i32: 1>} : vector<2x32xi32>
    %c16_i32_391 = arith.constant 16 : i32
    %948 = vector.broadcast %c16_i32_391 : i32 to vector<2x32xi32>
    %949 = arith.muli %946, %948 : vector<2x32xi32>
    %950 = arith.cmpi sge, %947, %949 : vector<2x32xi32>
    %c16_i32_392 = arith.constant 16 : i32
    %951 = vector.broadcast %c16_i32_392 : i32 to vector<2x32xi32>
    %952 = arith.muli %946, %951 : vector<2x32xi32>
    %c16_i32_393 = arith.constant 16 : i32
    %953 = vector.broadcast %c16_i32_393 : i32 to vector<2x32xi32>
    %954 = arith.addi %952, %953 : vector<2x32xi32>
    %955 = arith.cmpi slt, %947, %954 : vector<2x32xi32>
    %956 = arith.andi %950, %955 : vector<2x32xi1>
    %cst_394 = arith.constant 1.000000e+00 : f32
    %cst_395 = arith.constant 0.000000e+00 : f32
    %957 = vector.broadcast %cst_394 : f32 to vector<2x32xf32>
    %958 = vector.broadcast %cst_395 : f32 to vector<2x32xf32>
    %959 = arith.select %956, %957, %958 : vector<2x32xi1>, vector<2x32xf32>
    %cst_396 = arith.constant dense<0.000000e+00> : vector<16x32xf32>
    %960 = tpu.matmul %945, %959, %cst_396 {dimension_numbers = #tpu.dot_dimension_numbers<[1], [0], [0], [1], [0, 0, 1, 1], [], []>} : vector<16x2xf32>, vector<2x32xf32>, vector<16x32xf32> -> vector<16x32xf32>
    %cst_397 = arith.constant 0.000000e+00 : f32
    %961 = vector.broadcast %cst_397 : f32 to vector<16x32xf32>
    %962 = arith.subf %961, %960 : vector<16x32xf32>
    %963 = arith.maximumf %886, %962 : vector<16x32xf32>
    %964 = arith.minimumf %963, %960 : vector<16x32xf32>
    %965 = arith.subf %886, %964 : vector<16x32xf32>
    %966 = arith.addf %965, %831 : vector<16x32xf32>
    %c0_398 = arith.constant 0 : index
    %c51 = arith.constant 51 : index
    %967 = vector.load %arg1[%c0_398, %c51] : memref<16x65xf32, #tpu.memory_space<vmem>>, vector<16x1xf32>
    %c0_399 = arith.constant 0 : index
    %c52 = arith.constant 52 : index
    %968 = vector.load %arg1[%c0_399, %c52] : memref<16x65xf32, #tpu.memory_space<vmem>>, vector<16x1xf32>
    %cst_400 = arith.constant dense<0.000000e+00> : vector<16xf32>
    %969 = vector.multi_reduction <add>, %966, %cst_400 [1] : vector<16x32xf32> to vector<16xf32>
    %970 = vector.shape_cast %969 : vector<16xf32> to vector<16x1xf32>
    %cst_401 = arith.constant 3.200000e+01 : f32
    %971 = vector.broadcast %cst_401 : f32 to vector<16x1xf32>
    %972 = arith.divf %970, %971 : vector<16x1xf32>
    %973 = arith.mulf %966, %966 : vector<16x32xf32>
    %cst_402 = arith.constant dense<0.000000e+00> : vector<16xf32>
    %974 = vector.multi_reduction <add>, %973, %cst_402 [1] : vector<16x32xf32> to vector<16xf32>
    %975 = vector.shape_cast %974 : vector<16xf32> to vector<16x1xf32>
    %cst_403 = arith.constant 3.200000e+01 : f32
    %976 = vector.broadcast %cst_403 : f32 to vector<16x1xf32>
    %977 = arith.divf %975, %976 : vector<16x1xf32>
    %978 = arith.mulf %972, %972 : vector<16x1xf32>
    %979 = arith.subf %977, %978 : vector<16x1xf32>
    %cst_404 = arith.constant 9.99999974E-6 : f32
    %980 = vector.broadcast %cst_404 : f32 to vector<16x1xf32>
    %981 = arith.addf %979, %980 : vector<16x1xf32>
    %982 = math.rsqrt %981 : vector<16x1xf32>
    %983 = arith.mulf %982, %967 : vector<16x1xf32>
    %984 = vector.broadcast %983 : vector<16x1xf32> to vector<16x32xf32>
    %985 = arith.mulf %966, %984 : vector<16x32xf32>
    %986 = arith.mulf %972, %983 : vector<16x1xf32>
    %987 = arith.subf %968, %986 : vector<16x1xf32>
    %988 = vector.broadcast %987 : vector<16x1xf32> to vector<16x32xf32>
    %989 = arith.addf %985, %988 : vector<16x32xf32>
    %cst_405 = arith.constant 0.000000e+00 : f32
    %990 = vector.broadcast %cst_405 : f32 to vector<16x32xf32>
    %991 = arith.maximumf %989, %990 : vector<16x32xf32>
    %c0_406 = arith.constant 0 : index
    %c672 = arith.constant 672 : index
    %992 = vector.load %arg2[%c0_406, %c672] : memref<16x832xf32, #tpu.memory_space<vmem>>, vector<16x16xf32>
    %c0_407 = arith.constant 0 : index
    %c688 = arith.constant 688 : index
    %993 = vector.load %arg2[%c0_407, %c688] : memref<16x832xf32, #tpu.memory_space<vmem>>, vector<16x16xf32>
    %c0_408 = arith.constant 0 : index
    %c704 = arith.constant 704 : index
    %994 = vector.load %arg2[%c0_408, %c704] : memref<16x832xf32, #tpu.memory_space<vmem>>, vector<16x16xf32>
    %c1_i32_409 = arith.constant 1 : i32
    %995 = tpu.dynamic_rotate %991 by %c1_i32_409 dim 1 : vector<16x32xf32>, i32 -> vector<16x32xf32>
    %996 = tpu.iota {dimensions = array<i32: 1>} : vector<16x32xi32>
    %c15_i32_410 = arith.constant 15 : i32
    %997 = vector.broadcast %c15_i32_410 : i32 to vector<16x32xi32>
    %998 = arith.andi %996, %997 : vector<16x32xi32>
    %c0_i32_411 = arith.constant 0 : i32
    %999 = vector.broadcast %c0_i32_411 : i32 to vector<16x32xi32>
    %1000 = arith.cmpi ne, %998, %999 : vector<16x32xi32>
    %cst_412 = arith.constant 0.000000e+00 : f32
    %1001 = vector.broadcast %cst_412 : f32 to vector<16x32xf32>
    %1002 = arith.select %1000, %995, %1001 : vector<16x32xi1>, vector<16x32xf32>
    %cst_413 = arith.constant dense<0.000000e+00> : vector<16x32xf32>
    %1003 = tpu.matmul %992, %1002, %cst_413 {dimension_numbers = #tpu.dot_dimension_numbers<[1], [0], [0], [1], [0, 0, 1, 1], [], []>} : vector<16x16xf32>, vector<16x32xf32>, vector<16x32xf32> -> vector<16x32xf32>
    %cst_414 = arith.constant dense<0.000000e+00> : vector<16x32xf32>
    %1004 = tpu.matmul %993, %991, %cst_414 {dimension_numbers = #tpu.dot_dimension_numbers<[1], [0], [0], [1], [0, 0, 1, 1], [], []>} : vector<16x16xf32>, vector<16x32xf32>, vector<16x32xf32> -> vector<16x32xf32>
    %1005 = arith.addf %1003, %1004 : vector<16x32xf32>
    %c31_i32_415 = arith.constant 31 : i32
    %1006 = tpu.dynamic_rotate %991 by %c31_i32_415 dim 1 : vector<16x32xf32>, i32 -> vector<16x32xf32>
    %1007 = tpu.iota {dimensions = array<i32: 1>} : vector<16x32xi32>
    %c15_i32_416 = arith.constant 15 : i32
    %1008 = vector.broadcast %c15_i32_416 : i32 to vector<16x32xi32>
    %1009 = arith.andi %1007, %1008 : vector<16x32xi32>
    %c15_i32_417 = arith.constant 15 : i32
    %1010 = vector.broadcast %c15_i32_417 : i32 to vector<16x32xi32>
    %1011 = arith.cmpi ne, %1009, %1010 : vector<16x32xi32>
    %cst_418 = arith.constant 0.000000e+00 : f32
    %1012 = vector.broadcast %cst_418 : f32 to vector<16x32xf32>
    %1013 = arith.select %1011, %1006, %1012 : vector<16x32xi1>, vector<16x32xf32>
    %cst_419 = arith.constant dense<0.000000e+00> : vector<16x32xf32>
    %1014 = tpu.matmul %994, %1013, %cst_419 {dimension_numbers = #tpu.dot_dimension_numbers<[1], [0], [0], [1], [0, 0, 1, 1], [], []>} : vector<16x16xf32>, vector<16x32xf32>, vector<16x32xf32> -> vector<16x32xf32>
    %1015 = arith.addf %1005, %1014 : vector<16x32xf32>
    %c0_420 = arith.constant 0 : index
    %c53 = arith.constant 53 : index
    %1016 = vector.load %arg1[%c0_420, %c53] : memref<16x65xf32, #tpu.memory_space<vmem>>, vector<16x1xf32>
    %1017 = vector.broadcast %1016 : vector<16x1xf32> to vector<16x32xf32>
    %1018 = arith.addf %1015, %1017 : vector<16x32xf32>
    %c0_421 = arith.constant 0 : index
    %c54 = arith.constant 54 : index
    %1019 = vector.load %arg1[%c0_421, %c54] : memref<16x65xf32, #tpu.memory_space<vmem>>, vector<16x1xf32>
    %c0_422 = arith.constant 0 : index
    %c55 = arith.constant 55 : index
    %1020 = vector.load %arg1[%c0_422, %c55] : memref<16x65xf32, #tpu.memory_space<vmem>>, vector<16x1xf32>
    %cst_423 = arith.constant dense<0.000000e+00> : vector<16xf32>
    %1021 = vector.multi_reduction <add>, %1018, %cst_423 [1] : vector<16x32xf32> to vector<16xf32>
    %1022 = vector.shape_cast %1021 : vector<16xf32> to vector<16x1xf32>
    %cst_424 = arith.constant 3.200000e+01 : f32
    %1023 = vector.broadcast %cst_424 : f32 to vector<16x1xf32>
    %1024 = arith.divf %1022, %1023 : vector<16x1xf32>
    %1025 = arith.mulf %1018, %1018 : vector<16x32xf32>
    %cst_425 = arith.constant dense<0.000000e+00> : vector<16xf32>
    %1026 = vector.multi_reduction <add>, %1025, %cst_425 [1] : vector<16x32xf32> to vector<16xf32>
    %1027 = vector.shape_cast %1026 : vector<16xf32> to vector<16x1xf32>
    %cst_426 = arith.constant 3.200000e+01 : f32
    %1028 = vector.broadcast %cst_426 : f32 to vector<16x1xf32>
    %1029 = arith.divf %1027, %1028 : vector<16x1xf32>
    %1030 = arith.mulf %1024, %1024 : vector<16x1xf32>
    %1031 = arith.subf %1029, %1030 : vector<16x1xf32>
    %cst_427 = arith.constant 9.99999974E-6 : f32
    %1032 = vector.broadcast %cst_427 : f32 to vector<16x1xf32>
    %1033 = arith.addf %1031, %1032 : vector<16x1xf32>
    %1034 = math.rsqrt %1033 : vector<16x1xf32>
    %1035 = arith.mulf %1034, %1019 : vector<16x1xf32>
    %1036 = vector.broadcast %1035 : vector<16x1xf32> to vector<16x32xf32>
    %1037 = arith.mulf %1018, %1036 : vector<16x32xf32>
    %1038 = arith.mulf %1024, %1035 : vector<16x1xf32>
    %1039 = arith.subf %1020, %1038 : vector<16x1xf32>
    %1040 = vector.broadcast %1039 : vector<16x1xf32> to vector<16x32xf32>
    %1041 = arith.addf %1037, %1040 : vector<16x32xf32>
    %cst_428 = arith.constant 0.000000e+00 : f32
    %1042 = vector.broadcast %cst_428 : f32 to vector<16x32xf32>
    %1043 = arith.maximumf %1041, %1042 : vector<16x32xf32>
    %c0_429 = arith.constant 0 : index
    %c720 = arith.constant 720 : index
    %1044 = vector.load %arg2[%c0_429, %c720] : memref<16x832xf32, #tpu.memory_space<vmem>>, vector<16x16xf32>
    %c0_430 = arith.constant 0 : index
    %c736 = arith.constant 736 : index
    %1045 = vector.load %arg2[%c0_430, %c736] : memref<16x832xf32, #tpu.memory_space<vmem>>, vector<16x16xf32>
    %c0_431 = arith.constant 0 : index
    %c752 = arith.constant 752 : index
    %1046 = vector.load %arg2[%c0_431, %c752] : memref<16x832xf32, #tpu.memory_space<vmem>>, vector<16x16xf32>
    %c1_i32_432 = arith.constant 1 : i32
    %1047 = tpu.dynamic_rotate %1043 by %c1_i32_432 dim 1 : vector<16x32xf32>, i32 -> vector<16x32xf32>
    %1048 = tpu.iota {dimensions = array<i32: 1>} : vector<16x32xi32>
    %c15_i32_433 = arith.constant 15 : i32
    %1049 = vector.broadcast %c15_i32_433 : i32 to vector<16x32xi32>
    %1050 = arith.andi %1048, %1049 : vector<16x32xi32>
    %c0_i32_434 = arith.constant 0 : i32
    %1051 = vector.broadcast %c0_i32_434 : i32 to vector<16x32xi32>
    %1052 = arith.cmpi ne, %1050, %1051 : vector<16x32xi32>
    %cst_435 = arith.constant 0.000000e+00 : f32
    %1053 = vector.broadcast %cst_435 : f32 to vector<16x32xf32>
    %1054 = arith.select %1052, %1047, %1053 : vector<16x32xi1>, vector<16x32xf32>
    %cst_436 = arith.constant dense<0.000000e+00> : vector<16x32xf32>
    %1055 = tpu.matmul %1044, %1054, %cst_436 {dimension_numbers = #tpu.dot_dimension_numbers<[1], [0], [0], [1], [0, 0, 1, 1], [], []>} : vector<16x16xf32>, vector<16x32xf32>, vector<16x32xf32> -> vector<16x32xf32>
    %cst_437 = arith.constant dense<0.000000e+00> : vector<16x32xf32>
    %1056 = tpu.matmul %1045, %1043, %cst_437 {dimension_numbers = #tpu.dot_dimension_numbers<[1], [0], [0], [1], [0, 0, 1, 1], [], []>} : vector<16x16xf32>, vector<16x32xf32>, vector<16x32xf32> -> vector<16x32xf32>
    %1057 = arith.addf %1055, %1056 : vector<16x32xf32>
    %c31_i32_438 = arith.constant 31 : i32
    %1058 = tpu.dynamic_rotate %1043 by %c31_i32_438 dim 1 : vector<16x32xf32>, i32 -> vector<16x32xf32>
    %1059 = tpu.iota {dimensions = array<i32: 1>} : vector<16x32xi32>
    %c15_i32_439 = arith.constant 15 : i32
    %1060 = vector.broadcast %c15_i32_439 : i32 to vector<16x32xi32>
    %1061 = arith.andi %1059, %1060 : vector<16x32xi32>
    %c15_i32_440 = arith.constant 15 : i32
    %1062 = vector.broadcast %c15_i32_440 : i32 to vector<16x32xi32>
    %1063 = arith.cmpi ne, %1061, %1062 : vector<16x32xi32>
    %cst_441 = arith.constant 0.000000e+00 : f32
    %1064 = vector.broadcast %cst_441 : f32 to vector<16x32xf32>
    %1065 = arith.select %1063, %1058, %1064 : vector<16x32xi1>, vector<16x32xf32>
    %cst_442 = arith.constant dense<0.000000e+00> : vector<16x32xf32>
    %1066 = tpu.matmul %1046, %1065, %cst_442 {dimension_numbers = #tpu.dot_dimension_numbers<[1], [0], [0], [1], [0, 0, 1, 1], [], []>} : vector<16x16xf32>, vector<16x32xf32>, vector<16x32xf32> -> vector<16x32xf32>
    %1067 = arith.addf %1057, %1066 : vector<16x32xf32>
    %c0_443 = arith.constant 0 : index
    %c56 = arith.constant 56 : index
    %1068 = vector.load %arg1[%c0_443, %c56] : memref<16x65xf32, #tpu.memory_space<vmem>>, vector<16x1xf32>
    %1069 = vector.broadcast %1068 : vector<16x1xf32> to vector<16x32xf32>
    %1070 = arith.addf %1067, %1069 : vector<16x32xf32>
    %1071 = math.absf %1070 : vector<16x32xf32>
    %1072 = tpu.iota {dimensions = array<i32: 0>} : vector<32x2xi32>
    %1073 = tpu.iota {dimensions = array<i32: 1>} : vector<32x2xi32>
    %c16_i32_444 = arith.constant 16 : i32
    %1074 = vector.broadcast %c16_i32_444 : i32 to vector<32x2xi32>
    %1075 = arith.muli %1073, %1074 : vector<32x2xi32>
    %1076 = arith.cmpi sge, %1072, %1075 : vector<32x2xi32>
    %c16_i32_445 = arith.constant 16 : i32
    %1077 = vector.broadcast %c16_i32_445 : i32 to vector<32x2xi32>
    %1078 = arith.muli %1073, %1077 : vector<32x2xi32>
    %c16_i32_446 = arith.constant 16 : i32
    %1079 = vector.broadcast %c16_i32_446 : i32 to vector<32x2xi32>
    %1080 = arith.addi %1078, %1079 : vector<32x2xi32>
    %1081 = arith.cmpi slt, %1072, %1080 : vector<32x2xi32>
    %1082 = arith.andi %1076, %1081 : vector<32x2xi1>
    %cst_447 = arith.constant 6.250000e-02 : f32
    %cst_448 = arith.constant 0.000000e+00 : f32
    %1083 = vector.broadcast %cst_447 : f32 to vector<32x2xf32>
    %1084 = vector.broadcast %cst_448 : f32 to vector<32x2xf32>
    %1085 = arith.select %1082, %1083, %1084 : vector<32x2xi1>, vector<32x2xf32>
    %cst_449 = arith.constant dense<0.000000e+00> : vector<16x2xf32>
    %1086 = tpu.matmul %1071, %1085, %cst_449 {dimension_numbers = #tpu.dot_dimension_numbers<[1], [0], [0], [1], [0, 0, 1, 1], [], []>} : vector<16x32xf32>, vector<32x2xf32>, vector<16x2xf32> -> vector<16x2xf32>
    %c0_450 = arith.constant 0 : index
    %c768 = arith.constant 768 : index
    %1087 = vector.load %arg2[%c0_450, %c768] : memref<16x832xf32, #tpu.memory_space<vmem>>, vector<16x16xf32>
    %cst_451 = arith.constant dense<0.000000e+00> : vector<16x2xf32>
    %1088 = tpu.matmul %1087, %1086, %cst_451 {dimension_numbers = #tpu.dot_dimension_numbers<[1], [0], [0], [1], [0, 0, 1, 1], [], []>} : vector<16x16xf32>, vector<16x2xf32>, vector<16x2xf32> -> vector<16x2xf32>
    %c0_452 = arith.constant 0 : index
    %c57 = arith.constant 57 : index
    %1089 = vector.load %arg1[%c0_452, %c57] : memref<16x65xf32, #tpu.memory_space<vmem>>, vector<16x1xf32>
    %1090 = vector.broadcast %1089 : vector<16x1xf32> to vector<16x2xf32>
    %1091 = arith.addf %1088, %1090 : vector<16x2xf32>
    %c0_453 = arith.constant 0 : index
    %c58 = arith.constant 58 : index
    %1092 = vector.load %arg1[%c0_453, %c58] : memref<16x65xf32, #tpu.memory_space<vmem>>, vector<16x1xf32>
    %c0_454 = arith.constant 0 : index
    %c59 = arith.constant 59 : index
    %1093 = vector.load %arg1[%c0_454, %c59] : memref<16x65xf32, #tpu.memory_space<vmem>>, vector<16x1xf32>
    %cst_455 = arith.constant dense<0.000000e+00> : vector<16xf32>
    %1094 = vector.multi_reduction <add>, %1091, %cst_455 [1] : vector<16x2xf32> to vector<16xf32>
    %1095 = vector.shape_cast %1094 : vector<16xf32> to vector<16x1xf32>
    %cst_456 = arith.constant 2.000000e+00 : f32
    %1096 = vector.broadcast %cst_456 : f32 to vector<16x1xf32>
    %1097 = arith.divf %1095, %1096 : vector<16x1xf32>
    %1098 = arith.mulf %1091, %1091 : vector<16x2xf32>
    %cst_457 = arith.constant dense<0.000000e+00> : vector<16xf32>
    %1099 = vector.multi_reduction <add>, %1098, %cst_457 [1] : vector<16x2xf32> to vector<16xf32>
    %1100 = vector.shape_cast %1099 : vector<16xf32> to vector<16x1xf32>
    %cst_458 = arith.constant 2.000000e+00 : f32
    %1101 = vector.broadcast %cst_458 : f32 to vector<16x1xf32>
    %1102 = arith.divf %1100, %1101 : vector<16x1xf32>
    %1103 = arith.mulf %1097, %1097 : vector<16x1xf32>
    %1104 = arith.subf %1102, %1103 : vector<16x1xf32>
    %cst_459 = arith.constant 9.99999974E-6 : f32
    %1105 = vector.broadcast %cst_459 : f32 to vector<16x1xf32>
    %1106 = arith.addf %1104, %1105 : vector<16x1xf32>
    %1107 = math.rsqrt %1106 : vector<16x1xf32>
    %1108 = arith.mulf %1107, %1092 : vector<16x1xf32>
    %1109 = vector.broadcast %1108 : vector<16x1xf32> to vector<16x2xf32>
    %1110 = arith.mulf %1091, %1109 : vector<16x2xf32>
    %1111 = arith.mulf %1097, %1108 : vector<16x1xf32>
    %1112 = arith.subf %1093, %1111 : vector<16x1xf32>
    %1113 = vector.broadcast %1112 : vector<16x1xf32> to vector<16x2xf32>
    %1114 = arith.addf %1110, %1113 : vector<16x2xf32>
    %cst_460 = arith.constant 0.000000e+00 : f32
    %1115 = vector.broadcast %cst_460 : f32 to vector<16x2xf32>
    %1116 = arith.maximumf %1114, %1115 : vector<16x2xf32>
    %c0_461 = arith.constant 0 : index
    %c784 = arith.constant 784 : index
    %1117 = vector.load %arg2[%c0_461, %c784] : memref<16x832xf32, #tpu.memory_space<vmem>>, vector<16x16xf32>
    %cst_462 = arith.constant dense<0.000000e+00> : vector<16x2xf32>
    %1118 = tpu.matmul %1117, %1116, %cst_462 {dimension_numbers = #tpu.dot_dimension_numbers<[1], [0], [0], [1], [0, 0, 1, 1], [], []>} : vector<16x16xf32>, vector<16x2xf32>, vector<16x2xf32> -> vector<16x2xf32>
    %c0_463 = arith.constant 0 : index
    %c60 = arith.constant 60 : index
    %1119 = vector.load %arg1[%c0_463, %c60] : memref<16x65xf32, #tpu.memory_space<vmem>>, vector<16x1xf32>
    %1120 = vector.broadcast %1119 : vector<16x1xf32> to vector<16x2xf32>
    %1121 = arith.addf %1118, %1120 : vector<16x2xf32>
    %cst_464 = arith.constant 0.000000e+00 : f32
    %1122 = vector.broadcast %cst_464 : f32 to vector<16x2xf32>
    %1123 = arith.subf %1122, %1121 : vector<16x2xf32>
    %1124 = math.exp %1123 : vector<16x2xf32>
    %cst_465 = arith.constant 1.000000e+00 : f32
    %1125 = vector.broadcast %cst_465 : f32 to vector<16x2xf32>
    %1126 = arith.addf %1125, %1124 : vector<16x2xf32>
    %cst_466 = arith.constant 1.000000e+00 : f32
    %1127 = vector.broadcast %cst_466 : f32 to vector<16x2xf32>
    %1128 = arith.divf %1127, %1126 : vector<16x2xf32>
    %1129 = arith.mulf %1086, %1128 : vector<16x2xf32>
    %1130 = tpu.iota {dimensions = array<i32: 0>} : vector<2x32xi32>
    %1131 = tpu.iota {dimensions = array<i32: 1>} : vector<2x32xi32>
    %c16_i32_467 = arith.constant 16 : i32
    %1132 = vector.broadcast %c16_i32_467 : i32 to vector<2x32xi32>
    %1133 = arith.muli %1130, %1132 : vector<2x32xi32>
    %1134 = arith.cmpi sge, %1131, %1133 : vector<2x32xi32>
    %c16_i32_468 = arith.constant 16 : i32
    %1135 = vector.broadcast %c16_i32_468 : i32 to vector<2x32xi32>
    %1136 = arith.muli %1130, %1135 : vector<2x32xi32>
    %c16_i32_469 = arith.constant 16 : i32
    %1137 = vector.broadcast %c16_i32_469 : i32 to vector<2x32xi32>
    %1138 = arith.addi %1136, %1137 : vector<2x32xi32>
    %1139 = arith.cmpi slt, %1131, %1138 : vector<2x32xi32>
    %1140 = arith.andi %1134, %1139 : vector<2x32xi1>
    %cst_470 = arith.constant 1.000000e+00 : f32
    %cst_471 = arith.constant 0.000000e+00 : f32
    %1141 = vector.broadcast %cst_470 : f32 to vector<2x32xf32>
    %1142 = vector.broadcast %cst_471 : f32 to vector<2x32xf32>
    %1143 = arith.select %1140, %1141, %1142 : vector<2x32xi1>, vector<2x32xf32>
    %cst_472 = arith.constant dense<0.000000e+00> : vector<16x32xf32>
    %1144 = tpu.matmul %1129, %1143, %cst_472 {dimension_numbers = #tpu.dot_dimension_numbers<[1], [0], [0], [1], [0, 0, 1, 1], [], []>} : vector<16x2xf32>, vector<2x32xf32>, vector<16x32xf32> -> vector<16x32xf32>
    %cst_473 = arith.constant 0.000000e+00 : f32
    %1145 = vector.broadcast %cst_473 : f32 to vector<16x32xf32>
    %1146 = arith.subf %1145, %1144 : vector<16x32xf32>
    %1147 = arith.maximumf %1070, %1146 : vector<16x32xf32>
    %1148 = arith.minimumf %1147, %1144 : vector<16x32xf32>
    %1149 = arith.subf %1070, %1148 : vector<16x32xf32>
    %1150 = arith.addf %1149, %966 : vector<16x32xf32>
    %c0_474 = arith.constant 0 : index
    %c61 = arith.constant 61 : index
    %1151 = vector.load %arg1[%c0_474, %c61] : memref<16x65xf32, #tpu.memory_space<vmem>>, vector<16x1xf32>
    %c0_475 = arith.constant 0 : index
    %c62 = arith.constant 62 : index
    %1152 = vector.load %arg1[%c0_475, %c62] : memref<16x65xf32, #tpu.memory_space<vmem>>, vector<16x1xf32>
    %cst_476 = arith.constant dense<0.000000e+00> : vector<16xf32>
    %1153 = vector.multi_reduction <add>, %1150, %cst_476 [1] : vector<16x32xf32> to vector<16xf32>
    %1154 = vector.shape_cast %1153 : vector<16xf32> to vector<16x1xf32>
    %cst_477 = arith.constant 3.200000e+01 : f32
    %1155 = vector.broadcast %cst_477 : f32 to vector<16x1xf32>
    %1156 = arith.divf %1154, %1155 : vector<16x1xf32>
    %1157 = arith.mulf %1150, %1150 : vector<16x32xf32>
    %cst_478 = arith.constant dense<0.000000e+00> : vector<16xf32>
    %1158 = vector.multi_reduction <add>, %1157, %cst_478 [1] : vector<16x32xf32> to vector<16xf32>
    %1159 = vector.shape_cast %1158 : vector<16xf32> to vector<16x1xf32>
    %cst_479 = arith.constant 3.200000e+01 : f32
    %1160 = vector.broadcast %cst_479 : f32 to vector<16x1xf32>
    %1161 = arith.divf %1159, %1160 : vector<16x1xf32>
    %1162 = arith.mulf %1156, %1156 : vector<16x1xf32>
    %1163 = arith.subf %1161, %1162 : vector<16x1xf32>
    %cst_480 = arith.constant 9.99999974E-6 : f32
    %1164 = vector.broadcast %cst_480 : f32 to vector<16x1xf32>
    %1165 = arith.addf %1163, %1164 : vector<16x1xf32>
    %1166 = math.rsqrt %1165 : vector<16x1xf32>
    %1167 = arith.mulf %1166, %1151 : vector<16x1xf32>
    %1168 = vector.broadcast %1167 : vector<16x1xf32> to vector<16x32xf32>
    %1169 = arith.mulf %1150, %1168 : vector<16x32xf32>
    %1170 = arith.mulf %1156, %1167 : vector<16x1xf32>
    %1171 = arith.subf %1152, %1170 : vector<16x1xf32>
    %1172 = vector.broadcast %1171 : vector<16x1xf32> to vector<16x32xf32>
    %1173 = arith.addf %1169, %1172 : vector<16x32xf32>
    %cst_481 = arith.constant 0.000000e+00 : f32
    %1174 = vector.broadcast %cst_481 : f32 to vector<16x32xf32>
    %1175 = arith.maximumf %1173, %1174 : vector<16x32xf32>
    %1176 = tpu.iota {dimensions = array<i32: 0>} : vector<32x2xi32>
    %1177 = tpu.iota {dimensions = array<i32: 1>} : vector<32x2xi32>
    %c16_i32_482 = arith.constant 16 : i32
    %1178 = vector.broadcast %c16_i32_482 : i32 to vector<32x2xi32>
    %1179 = arith.muli %1177, %1178 : vector<32x2xi32>
    %1180 = arith.cmpi sge, %1176, %1179 : vector<32x2xi32>
    %c16_i32_483 = arith.constant 16 : i32
    %1181 = vector.broadcast %c16_i32_483 : i32 to vector<32x2xi32>
    %1182 = arith.muli %1177, %1181 : vector<32x2xi32>
    %c16_i32_484 = arith.constant 16 : i32
    %1183 = vector.broadcast %c16_i32_484 : i32 to vector<32x2xi32>
    %1184 = arith.addi %1182, %1183 : vector<32x2xi32>
    %1185 = arith.cmpi slt, %1176, %1184 : vector<32x2xi32>
    %1186 = arith.andi %1180, %1185 : vector<32x2xi1>
    %cst_485 = arith.constant 6.250000e-02 : f32
    %cst_486 = arith.constant 0.000000e+00 : f32
    %1187 = vector.broadcast %cst_485 : f32 to vector<32x2xf32>
    %1188 = vector.broadcast %cst_486 : f32 to vector<32x2xf32>
    %1189 = arith.select %1186, %1187, %1188 : vector<32x2xi1>, vector<32x2xf32>
    %cst_487 = arith.constant dense<0.000000e+00> : vector<16x2xf32>
    %1190 = tpu.matmul %1175, %1189, %cst_487 {dimension_numbers = #tpu.dot_dimension_numbers<[1], [0], [0], [1], [0, 0, 1, 1], [], []>} : vector<16x32xf32>, vector<32x2xf32>, vector<16x2xf32> -> vector<16x2xf32>
    %c0_488 = arith.constant 0 : index
    %c800 = arith.constant 800 : index
    %1191 = vector.load %arg2[%c0_488, %c800] : memref<16x832xf32, #tpu.memory_space<vmem>>, vector<16x16xf32>
    %cst_489 = arith.constant dense<0.000000e+00> : vector<16x2xf32>
    %1192 = tpu.matmul %1191, %1190, %cst_489 {dimension_numbers = #tpu.dot_dimension_numbers<[1], [0], [0], [1], [0, 0, 1, 1], [], []>} : vector<16x16xf32>, vector<16x2xf32>, vector<16x2xf32> -> vector<16x2xf32>
    %c0_490 = arith.constant 0 : index
    %c63 = arith.constant 63 : index
    %1193 = vector.load %arg1[%c0_490, %c63] : memref<16x65xf32, #tpu.memory_space<vmem>>, vector<16x1xf32>
    %1194 = vector.broadcast %1193 : vector<16x1xf32> to vector<16x2xf32>
    %1195 = arith.addf %1192, %1194 : vector<16x2xf32>
    %c0_491 = arith.constant 0 : index
    %c816 = arith.constant 816 : index
    %1196 = vector.load %arg2[%c0_491, %c816] : memref<16x832xf32, #tpu.memory_space<vmem>>, vector<16x16xf32>
    %cst_492 = arith.constant dense<0.000000e+00> : vector<16x2xf32>
    %1197 = tpu.matmul %1196, %1195, %cst_492 {dimension_numbers = #tpu.dot_dimension_numbers<[1], [0], [0], [1], [0, 0, 1, 1], [], []>} : vector<16x16xf32>, vector<16x2xf32>, vector<16x2xf32> -> vector<16x2xf32>
    %c0_493 = arith.constant 0 : index
    %c64_494 = arith.constant 64 : index
    %1198 = vector.load %arg1[%c0_493, %c64_494] : memref<16x65xf32, #tpu.memory_space<vmem>>, vector<16x1xf32>
    %1199 = vector.broadcast %1198 : vector<16x1xf32> to vector<16x2xf32>
    %1200 = arith.addf %1197, %1199 : vector<16x2xf32>
    %1201 = vector.extract_strided_slice %1200 {offsets = [0, 0], sizes = [3, 2], strides = [1, 1]} : vector<16x2xf32> to vector<3x2xf32>
    %cst_495 = arith.constant dense<0xFF800000> : vector<2xf32>
    %1202 = vector.multi_reduction <maximumf>, %1201, %cst_495 [0] : vector<3x2xf32> to vector<2xf32>
    %1203 = vector.shape_cast %1202 : vector<2xf32> to vector<1x2xf32>
    %1204 = vector.broadcast %1203 : vector<1x2xf32> to vector<3x2xf32>
    %1205 = arith.subf %1201, %1204 : vector<3x2xf32>
    %1206 = math.exp %1205 : vector<3x2xf32>
    %cst_496 = arith.constant dense<0.000000e+00> : vector<2xf32>
    %1207 = vector.multi_reduction <add>, %1206, %cst_496 [0] : vector<3x2xf32> to vector<2xf32>
    %1208 = vector.shape_cast %1207 : vector<2xf32> to vector<1x2xf32>
    %1209 = vector.broadcast %1208 : vector<1x2xf32> to vector<3x2xf32>
    %1210 = arith.divf %1206, %1209 : vector<3x2xf32>
    %c0_497 = arith.constant 0 : index
    %c0_498 = arith.constant 0 : index
    %1211 = vector.load %arg3[%c0_497, %c0_498] : memref<3x2xf32, #tpu.memory_space<vmem>>, vector<3x2xf32>
    tpu.vector_store %arg3[%c0_497, %c0_498], %1210 {strides = array<i32>} : memref<3x2xf32, #tpu.memory_space<vmem>>, vector<3x2xf32>,
    return
  }
}

</mosaic_0001>

<bundles_post_ra>
// kernel: drsnet_forward.1
= control target key start
LH: loop header
LB: loop body
LE: loop exit
PB: predicated region body
PF: predicated region fallthrough
CT: control target
= control target key end

     0   :  { %v12593_v2 = vmov 0.0   ;;  %s9830_s16 = smov 1   ;;  %v9831_v5 = vmov 0   ;;  %vm12538_vm0 = vcmask 130048   ;;  %v28_v10 = vlaneseq  ;;  %s9835_s29 = smov 80   ;;  %s12534_s0 = inlined_call_operand.vmem [shape: f32[16,256], index: 0, kind: input, shape index: {}]   ;;  %s12535_s2 = inlined_call_operand.vmem [shape: f32[16,832], index: 2, kind: input, shape index: {}]   ;;  %s12536_s1 = inlined_call_operand.vmem [shape: f32[16,65], index: 1, kind: input, shape index: {}]   ;;  %s12537_s3 = inlined_call_operand.vmem [shape: f32[3,2], index: 3, kind: output, shape index: {}]  }
   0x1   :  { %v16_v0 = vld [vmem:[%s12534_s0 + $0x10] sm:$0xff]  ;;  %v14_v1 = vld [vmem:[%s12534_s0] sm:$0xff]  ;;  %200 = vmatprep.mubr.f32.mxu1 %v12593_v2  ;;  %119 = vmatprep.mubr.f32.mxu0 %v12593_v2  ;;  %v17_v3 = vld [vmem:[%s12534_s0 + $0x18] sm:$0xff]  ;;  %v9833_v51 = vmov 1   ;;  %s9836_s30 = smov 127   ;;  %s9837_s4 = smov 96  }
   0x2   :  { %22 = vrot.lane.b32.xlu0 %v16_v0, %s9830_s16  ;;  %20 = vrot.lane.b32.xlu1 %v14_v1, %s9830_s16  ;;  %v15_v4 = vld [vmem:[%s12534_s0 + $0x8] sm:$0xff]  ;;  %v9951_v6 = vld [vmem:[%s12535_s2] sm:$0xff]  ;;  %s9832_s0 = smov 112   ;;  %v9981_v11 = vand.u32 127, %v28_v10  ;;  %s9838_s5 = smov 64   ;;  %v12589_v16 = vmov 1.0  }
   0x3   :  { %164 = vmatprep.subr.mxu1 %v17_v3  ;;  %9587 = vset.pattern.permute.xlu1 %v9831_v5  ;;  %v9956_v7 = vld [vmem:[%s12535_s2 + $0x38] sm:$0xff]  ;;  %v9968_v8 = vld [vmem:[%s12536_s1] sm:$0xff]  ;;  %v9973_v9 = vld [vmem:[%s12536_s1 + $0x8] sm:$0xff]  ;;  %s9842_s6 = smov 32   ;;  %s9844_s7 = smov 48  }
   0x4   :  { %165 = vmatpush1.msra.mxu1 %v16_v0  ;;  %9586 = vset.pattern.permute.xlu0 %v9831_v5  ;;  %v9984_v12 = vadd.s32 128, %v9981_v11  ;;  %vm30_vm1 = vcmp.lt.s32.totalorder %v9981_v11, 1  ;;  %vm38_vm3 = vcmp.ne.s32.totalorder %v9981_v11, 0  ;;  %vm498_vm4 = vcmp.lt.s32.totalorder %v9981_v11, 127  ;;  %s9845_s8 = smov 16   ;;  %s9867_s26 = smov 65  }
   0x5   :  { %166 = vmatprep.subr.mxu1 %v15_v4  ;;  %vm503_vm7 = vcmp.ne.s32.totalorder %v9981_v11, 127  ;;  %s9889_s24 = smov 97  }
   0x6   :  { %26 = vrot.lane.b32.xlu0 %v17_v3, %s9830_s16  ;;  %24 = vrot.lane.b32.xlu1 %v15_v4, %s9830_s16  ;;  %v37_v13 = vand.u32 127, %v9984_v12 }
   0x7   :  { %167 = vmatpush1.msra.mxu1 %v14_v1 }
   0x8   :  { %8127 = vmatmul.mubr.msk.f32.vlgmr.msra.gmra.mxu1 %vm12538_vm0, %v9951_v6  ;;  %vm9990_vm2 = vcmp.ne.s32.totalorder %v37_v13, 0  ;;  %vm10087_vm5 = vcmp.ne.s32.totalorder %v37_v13, 127 }
   0x9   :  { %206 = vmatprep.mubr.f32.mxu1 %v12593_v2 }
   0xa   :  { %46 = vrot.lane.b32.xlu0 %v9951_v6, %s9832_s0  ;;  %48 = vrot.lane.b32.xlu1 %v9956_v7, %s9832_s0 }
   0xc   :  { %8128 = vmatmul.mubr.msk.f32.gmra.mxu1 %vm12538_vm0, %v9956_v7 }
   0xd   :  { %477 = vmatprep.mubr.f32.mxu1 %v12593_v2 }
   0xe   :  { %217 = vperm.xlu1 %9587, %v9968_v8   ;;  %222 = vperm.xlu0 %9586, %v9973_v9  }
  0x12   :  { %9589 = vset.pattern.permute.xlu0 %v9833_v51  ;;  %9588 = vset.pattern.permute.xlu1 %v9833_v51 }
  0x74   :  { %v23_v14 = vpop.permute.xlu0 %22  ;;  %v21_v15 = vpop.permute.xlu1 %20 }
  0x78   :  { %v27_v17 = vpop.permute.xlu0 %26  ;;  %v25_v18 = vpop.permute.xlu1 %24 }
  0x79   :  { %v32_v19 = vsel %vm30_vm1, %v23_v14, %v27_v17  ;;  %v34_v20 = vsel %vm30_vm1, %v27_v17, %v23_v14  ;;  %v31_v21 = vsel %vm30_vm1, %v21_v15, %v25_v18  ;;  %v33_v23 = vsel %vm30_vm1, %v25_v18, %v21_v15 }
  0x7a   :  { %8121 = vmatprep.subr.msk.mxu0 %vm9990_vm2, %v32_v19  ;;  %v9834_v18 = vmov 2  }
  0x7b   :  { %8122 = vmatpush1.msk.msra.mxu0 %vm38_vm3, %v34_v20 }
  0x7c   :  { %8123 = vmatprep.subr.msk.mxu0 %vm9990_vm2, %v31_v21  ;;  %v47_v22 = vpop.permute.xlu0 %46  ;;  %v49_v24 = vpop.permute.xlu1 %48 }
  0x7d   :  { %8124 = vmatpush1.msk.msra.mxu0 %vm38_vm3, %v33_v23 }
  0x7e   :  { %8125 = vmatmul.mubr.msk.f32.vlgmr.msra.gmra.mxu0 %vm12538_vm0, %v47_v22 }
  0x7f   :  { %125 = vmatprep.mubr.f32.mxu0 %v12593_v2 }
  0x82   :  { %8126 = vmatmul.mubr.msk.f32.gmra.mxu0 %vm12538_vm0, %v49_v24 }
  0x83   :  { %392 = vmatprep.mubr.f32.mxu0 %v12593_v2 }
  0x89   :  { %v218_v29 = vpop.permute.xlu1 %217  ;;  %v223_v34 = vpop.permute.xlu0 %222 }
  0xc8   :  { %v202_v25 = vpop.f32.mrf.mxu1 }
  0xca   :  { %v204_v26 = vpop.f32.mrf.mxu1 }
  0xcc   :  { %v208_v31 = vpop.f32.mrf.mxu1 }
  0xce   :  { %v210_v38 = vpop.f32.mrf.mxu1 }
 0x13e   :  { %v121_v27 = vpop.f32.mrf.mxu0 }
 0x13f   :  { %v203_v28 = vadd.f32 %v202_v25, %v121_v27 }
 0x140   :  { %v123_v30 = vpop.f32.mrf.mxu0 }
 0x141   :  { %v205_v32 = vadd.f32 %v204_v26, %v123_v30  ;;  %v10015_v35 = vadd.f32 %v218_v29, %v203_v28 }
 0x142   :  { %v127_v33 = vpop.f32.mrf.mxu0 }
 0x143   :  { %v10017_v36 = vadd.f32 %v218_v29, %v205_v32  ;;  %v209_v37 = vadd.f32 %v208_v31, %v127_v33  ;;  %v238_v49 = vmul.f32 %v10015_v35, %v10015_v35 }
 0x144   :  { %v129_v39 = vpop.f32.mrf.mxu0 }
 0x145   :  { %v10019_v40 = vadd.f32 %v223_v34, %v209_v37  ;;  %v211_v41 = vadd.f32 %v210_v38, %v129_v39  ;;  %v229_v42 = vadd.f32 %v10017_v36, %v10015_v35  ;;  %v239_v47 = vmul.f32 %v10017_v36, %v10017_v36 }
 0x147   :  { %v10023_v43 = vadd.f32 %v223_v34, %v211_v41  ;;  %230 = vadd.xlane.f32.xlu0 %v229_v42  ;;  %v240_v45 = vmul.f32 %v10019_v40, %v10019_v40  ;;  %v242_v50 = vadd.f32 %v239_v47, %v238_v49  ;;  %v10070_v47 = vshrl.u32 %v28_v10, 7 }
 0x149   :  { %v232_v44 = vadd.f32 %v10023_v43, %v10019_v40  ;;  %v241_v46 = vmul.f32 %v10023_v43, %v10023_v43  ;;  %v10076_v51 = vadd.s32 248, %v10070_v47  ;;  %v629_v13 = vadd.s32 240, %v10070_v47 }
 0x14a   :  { %v616_v10 = vadd.s32 136, %v10070_v47 }
 0x14b   :  { %233 = vadd.xlane.f32.xlu1 %v232_v44  ;;  %v245_v48 = vadd.f32 %v241_v46, %v240_v45 }
 0x14d   :  { %246 = vadd.xlane.f32.xlu0 %v245_v48 }
 0x14f   :  { %243 = vadd.xlane.f32.xlu1 %v242_v50  ;;  %v10073_v50 = vmul.u32 2, %v9981_v11 }
 0x151   :  { %vm663_vm6 = vcmp.eq.s32.totalorder %v10076_v51, %v10073_v50  ;;  %vm662_vm9 = vcmp.eq.s32.totalorder %v629_v13, %v10073_v50  ;;  %v12668_v51 = vmov 0  ;;  %v12678_v13 = vmov 0 }
 0x1d0   :  { %v231_v52 = vpop.xlane.xlu0 %230 }
 0x1d1   :  { %v236_v54 = vmul.f32 0.00390625, %v231_v52 }
 0x1d3   :  { %v250_v60 = vmul.f32 %v236_v54, %v236_v54 }
 0x1d4   :  { %v234_v53 = vpop.xlane.xlu1 %233 }
 0x1d5   :  { %v237_v55 = vmul.f32 0.00390625, %v234_v53 }
 0x1d6   :  { %v247_v56 = vpop.xlane.xlu0 %246 }
 0x1d7   :  { %v251_v57 = vmul.f32 %v237_v55, %v237_v55  ;;  %v249_v58 = vmul.f32 0.00390625, %v247_v56 }
 0x1d8   :  { %v244_v59 = vpop.xlane.xlu1 %243 }
 0x1d9   :  { %v253_v61 = vsub.f32 %v249_v58, %v251_v57  ;;  %v248_v62 = vmul.f32 0.00390625, %v244_v59  ;;  %v10098_v57 = vadd.s32 120, %v10070_v47 }
 0x1db   :  { %v255_v63 = vadd.f32 1e-05, %v253_v61  ;;  %v252_v0 = vsub.f32 %v248_v62, %v250_v60  ;;  %v10113_v62 = vadd.s32 112, %v10070_v47  ;;  %vm10128_vm8 = vcmp.eq.s32.totalorder %v10098_v57, %v10073_v50 }
 0x1dd   :  { %9691 = vrsqrt.f32 %v255_v63  ;;  %v254_v1 = vadd.f32 1e-05, %v252_v0  ;;  %v628_v63 = vadd.s32 232, %v10070_v47  ;;  %vm10146_vm10 = vcmp.eq.s32.totalorder %v10113_v62, %v10073_v50 }
 0x1df   :  { %9693 = vrsqrt.f32 %v254_v1  ;;  %v12644_v1 = vmov 0  ;;  %vm661_vm11 = vcmp.eq.s32.totalorder %v628_v63, %v10073_v50 }
 0x1e0   :  { %v12645_v1 = vsel %vm10128_vm8, 4294967295, %v12644_v1 }
 0x1ea   :  { %v9692_v3 = vpop.eup %9691 }
 0x1eb   :  { %v259_v4 = vmul.f32 %v9692_v3, %v9973_v9  ;;  %v10133_v3 = vadd.s32 104, %v10070_v47 }
 0x1ec   :  { %v9694_v5 = vpop.eup %9693 }
 0x1ed   :  { %v275_v14 = vmul.f32 %v259_v4, %v237_v55  ;;  %v258_v15 = vmul.f32 %v9694_v5, %v9968_v8  ;;  %vm10165_vm12 = vcmp.eq.s32.totalorder %v10133_v3, %v10073_v50 }
 0x1ef   :  { %280 = vrot.lane.b32.xlu0 %v275_v14, %s9830_s16  ;;  %v274_v17 = vmul.f32 %v258_v15, %v236_v54  ;;  %v627_v14 = vadd.s32 224, %v10070_v47 }
 0x1f1   :  { %278 = vrot.lane.b32.xlu1 %v274_v17, %s9830_s16  ;;  %v12646_v17 = vmov 0  ;;  %vm660_vm13 = vcmp.eq.s32.totalorder %v627_v14, %v10073_v50 }
 0x1f2   :  { %v12647_v17 = vsel %vm10146_vm10, 4294967295, %v12646_v17 }
 0x1f3   :  { %262 = vperm.xlu0 %9589, %v258_v15  }
 0x1f5   :  { %267 = vperm.xlu1 %9588, %v259_v4  }
 0x1f7   :  { %320 = vrot.lane.b32.xlu0 %v9951_v6, %s9835_s29 }
 0x1f9   :  { %9590 = vset.pattern.permute.xlu1 %v9834_v18  ;;  %v10151_v18 = vadd.s32 96, %v10070_v47 }
 0x1fb   :  { %vm10184_vm14 = vcmp.eq.s32.totalorder %v10151_v18, %v10073_v50 }
 0x261   :  { %v281_v19 = vpop.permute.xlu0 %280 }
 0x262   :  { %v285_v20 = vsub.f32 %v9973_v9, %v281_v19  ;;  %v626_v19 = vadd.s32 216, %v10070_v47 }
 0x263   :  { %v279_v21 = vpop.permute.xlu1 %278 }
 0x264   :  { %293 = vperm.xlu1 %9590, %v285_v20   ;;  %v284_v22 = vsub.f32 %v9968_v8, %v279_v21  ;;  %v12648_v20 = vmov 0  ;;  %v10170_v21 = vadd.s32 88, %v10070_v47  ;;  %vm659_vm15 = vcmp.eq.s32.totalorder %v626_v19, %v10073_v50 }
 0x265   :  { %v12649_v20 = vsel %vm10165_vm12, 4294967295, %v12648_v20 }
 0x268   :  { %288 = vperm.xlu1 %9590, %v284_v22  }
 0x26c   :  { %322 = vrot.lane.b32.xlu1 %v9956_v7, %s9835_s29 }
 0x26e   :  { %v263_v26 = vpop.permute.xlu0 %262 }
 0x26f   :  { %v270_v30 = vmul.f32 %v263_v26, %v10015_v35  ;;  %v271_v31 = vmul.f32 %v263_v26, %v10017_v36  ;;  %v10189_v26 = vadd.s32 80, %v10070_v47 }
 0x270   :  { %v268_v23 = vpop.permute.xlu1 %267 }
 0x271   :  { %v272_v24 = vmul.f32 %v268_v23, %v10019_v40  ;;  %v273_v25 = vmul.f32 %v268_v23, %v10023_v43  ;;  %v625_v23 = vadd.s32 208, %v10070_v47 }
 0x272   :  { %v321_v42 = vpop.permute.xlu0 %320 }
 0x2df   :  { %v294_v27 = vpop.permute.xlu1 %293 }
 0x2e0   :  { %v298_v28 = vadd.f32 %v294_v27, %v272_v24  ;;  %v299_v29 = vadd.f32 %v294_v27, %v273_v25  ;;  %v12650_v25 = vmov 0  ;;  %v624_v27 = vadd.s32 200, %v10070_v47 }
 0x2e1   :  { %v12651_v25 = vsel %vm10184_vm14, 4294967295, %v12650_v25 }
 0x2e2   :  { %v302_v32 = vmax.f32 %v298_v28, 0.0  ;;  %v303_v33 = vmax.f32 %v299_v29, 0.0  ;;  %v12652_v28 = vmov 0  ;;  %v10208_v29 = vadd.s32 72, %v10070_v47 }
 0x2e3   :  { %v289_v34 = vpop.permute.xlu1 %288 }
 0x2e4   :  { %v296_v37 = vadd.f32 %v289_v34, %v270_v30  ;;  %v297_v38 = vadd.f32 %v289_v34, %v271_v31  ;;  %356 = vmatprep.subr.mxu0 %v303_v33  ;;  %v12654_v30 = vmov 0  ;;  %v10229_v31 = vadd.s32 64, %v10070_v47 }
 0x2e5   :  { %357 = vmatpush1.msra.mxu0 %v302_v32  ;;  %v10252_v34 = vadd.s32 56, %v10070_v47 }
 0x2e6   :  { %v301_v39 = vmax.f32 %v297_v38, 0.0  ;;  %v300_v41 = vmax.f32 %v296_v37, 0.0  ;;  %v621_v37 = vadd.s32 176, %v10070_v47  ;;  %v12659_v38 = vmov 0 }
 0x2e7   :  { %v323_v44 = vpop.permute.xlu1 %322  ;;  %12658 = vst [vmem:[#allocation2_spill] sm:$0xff] %v10252_v34 }
 0x2e8   :  { %308 = vrot.lane.b32.xlu0 %v301_v39, %s9830_s16  ;;  %358 = vmatprep.subr.mxu0 %v301_v39 }
 0x2e9   :  { %304 = vrot.lane.b32.xlu1 %v300_v41, %s9830_s16  ;;  %359 = vmatpush1.msra.mxu0 %v300_v41 }
 0x2ea   :  { %8129 = vmatmul.mubr.msk.f32.vlgmr.msra.gmra.mxu0 %vm12538_vm0, %v321_v42  ;;  %v12662_v42 = vmov 0 }
 0x2eb   :  { %398 = vmatprep.mubr.f32.mxu0 %v12593_v2 }
 0x2ec   :  { %490 = vrot.lane.b32.xlu0 %v300_v41, %s9836_s30  ;;  %v620_v41 = vadd.s32 168, %v10070_v47 }
 0x2ed   :  { %306 = vrot.lane.b32.xlu1 %v302_v32, %s9830_s16 }
 0x2ee   :  { %8130 = vmatmul.mubr.msk.f32.gmra.mxu0 %vm12538_vm0, %v323_v44  ;;  %v10298_v44 = vadd.s32 40, %v10070_v47 }
 0x2ef   :  { %581 = vmatprep.mubr.f32.mxu0 %v12593_v2 }
 0x2f0   :  { %310 = vrot.lane.b32.xlu0 %v303_v33, %s9830_s16  ;;  %12664 = vst [vmem:[#allocation4_spill] sm:$0xff] %v10298_v44 }
 0x2f1   :  { %492 = vrot.lane.b32.xlu1 %v302_v32, %s9836_s30  ;;  %v622_v32 = vadd.s32 184, %v10070_v47 }
 0x2f4   :  { %496 = vrot.lane.b32.xlu0 %v303_v33, %s9836_s30  ;;  %v12656_v33 = vmov 0 }
 0x2f5   :  { %494 = vrot.lane.b32.xlu1 %v301_v39, %s9836_s30  ;;  %v10275_v39 = vadd.s32 48, %v10070_v47 }
 0x2f7   :  { %12661 = vst [vmem:[#allocation3_spill] sm:$0xff] %v10275_v39 }
 0x2f8   :  { %405 = vrot.lane.b32.xlu0 %v9951_v6, %s9837_s4 }
 0x2f9   :  { %509 = vrot.lane.b32.xlu1 %v9951_v6, %s9838_s5 }
 0x2fc   :  { %407 = vrot.lane.b32.xlu0 %v9956_v7, %s9837_s4 }
 0x2fd   :  { %511 = vrot.lane.b32.xlu1 %v9956_v7, %s9838_s5 }
 0x35a   :  { %v309_v45 = vpop.permute.xlu0 %308 }
 0x35b   :  { %v305_v46 = vpop.permute.xlu1 %304 }
 0x35c   :  { %v312_v56 = vsel %vm30_vm1, %v305_v46, %v309_v45  ;;  %v314_v58 = vsel %vm30_vm1, %v309_v45, %v305_v46  ;;  %v619_v45 = vadd.s32 160, %v10070_v47  ;;  %v12665_v46 = vmov 0 }
 0x35e   :  { %v491_v48 = vpop.permute.xlu0 %490 }
 0x35f   :  { %v307_v49 = vpop.permute.xlu1 %306 }
 0x362   :  { %v311_v52 = vpop.permute.xlu0 %310 }
 0x363   :  { %v493_v53 = vpop.permute.xlu1 %492  ;;  %v315_v54 = vsel %vm30_vm1, %v311_v52, %v307_v49  ;;  %v313_v55 = vsel %vm30_vm1, %v307_v49, %v311_v52  ;;  %vm10203_vm1 = vcmp.eq.s32.totalorder %v10170_v21, %v10073_v50  ;;  %v618_v49 = vadd.s32 152, %v10070_v47 }
 0x364   :  { %8131 = vmatprep.subr.msk.mxu1 %vm9990_vm2, %v313_v55  ;;  %v12653_v28 = vsel %vm10203_vm1, 4294967295, %v12652_v28  ;;  %v10344_v52 = vadd.s32 24, %v10070_v47  ;;  %v10367_v55 = vadd.s32 16, %v10070_v47 }
 0x365   :  { %8132 = vmatpush1.msk.msra.mxu1 %vm38_vm3, %v315_v54  ;;  %v12671_v54 = vmov 0 }
 0x366   :  { %8133 = vmatprep.subr.msk.mxu1 %vm9990_vm2, %v312_v56  ;;  %v497_v12 = vpop.permute.xlu0 %496  ;;  %vm658_vm2 = vcmp.eq.s32.totalorder %v625_v23, %v10073_v50  ;;  %12670 = vst [vmem:[#allocation6_spill] sm:$0xff] %v10344_v52  ;;  %12673 = vst [vmem:[#allocation7_spill] sm:$0xff] %v10367_v55  ;;  %v12674_v56 = vmov 0 }
 0x367   :  { %v495_v59 = vpop.permute.xlu1 %494  ;;  %v500_v60 = vsel %vm498_vm4, %v493_v53, %v497_v12  ;;  %8134 = vmatpush1.msk.msra.mxu1 %vm38_vm3, %v314_v58  ;;  %v502_v61 = vsel %vm498_vm4, %v497_v12, %v493_v53  ;;  %vm10224_vm3 = vcmp.eq.s32.totalorder %v10189_v26, %v10073_v50  ;;  %v617_v53 = vadd.s32 144, %v10070_v47 }
 0x368   :  { %8137 = vmatprep.subr.msk.mxu0 %vm10087_vm5, %v502_v61  ;;  %8485 = vmatprep.subr.msk.mxu1 %vm663_vm6, %v12589_v16  ;;  %v501_v0 = vsel %vm498_vm4, %v495_v59, %v491_v48  ;;  %v499_v4 = vsel %vm498_vm4, %v491_v48, %v495_v59  ;;  %v12655_v30 = vsel %vm10224_vm3, 4294967295, %v12654_v30  ;;  %vm657_vm4 = vcmp.eq.s32.totalorder %v624_v27, %v10073_v50 }
 0x369   :  { %8138 = vmatpush1.msk.msra.mxu0 %vm503_vm7, %v500_v60  ;;  %v10321_v48 = vadd.s32 32, %v10070_v47  ;;  %v10390_v58 = vadd.s32 8, %v10070_v47  ;;  %v615_v12 = vadd.s32 128, %v10070_v47  ;;  %v12683_v59 = vmov 0 }
 0x36a   :  { %8139 = vmatprep.subr.msk.mxu0 %vm10087_vm5, %v501_v0  ;;  %v406_v5 = vpop.permute.xlu0 %405  ;;  %vm10247_vm5 = vcmp.eq.s32.totalorder %v10208_v29, %v10073_v50  ;;  %v12688_v60 = vmov 0 }
 0x36b   :  { %8135 = vmatmul.mubr.msk.f32.vlgmr.msra.gmra.mxu1 %vm12538_vm0, %v406_v5  ;;  %8140 = vmatpush1.msk.msra.mxu0 %vm503_vm7, %v499_v4  ;;  %v510_v15 = vpop.permute.xlu1 %509  ;;  %v12657_v33 = vsel %vm10247_vm5, 4294967295, %v12656_v33  ;;  %vm10270_vm7 = vcmp.eq.s32.totalorder %v10229_v31, %v10073_v50  ;;  %12667 = vst [vmem:[#allocation5_spill] sm:$0xff] %v10321_v48  ;;  %12676 = vst [vmem:[#allocation8_spill] sm:$0xff] %v10390_v58 }
 0x36c   :  { %8486 = vmatpush3.msk.msra.mxu1 %vm10128_vm8, %v12589_v16  ;;  %8141 = vmatmul.mubr.msk.f32.vlgmr.msra.gmra.mxu0 %vm12538_vm0, %v510_v15  ;;  %v12660_v38 = vsel %vm10270_vm7, 4294967295, %v12659_v38 }
 0x36d   :  { %8487 = vmatprep.subr.msk.mxu1 %vm662_vm9, %v12589_v16  ;;  %483 = vmatprep.mubr.f32.mxu1 %v12593_v2 }
 0x36e   :  { %8488 = vmatpush3.msk.msra.mxu1 %vm10146_vm10, %v12589_v16  ;;  %v408_v22 = vpop.permute.xlu0 %407  ;;  %587 = vmatprep.mubr.f32.mxu0 %v12593_v2 }
 0x36f   :  { %8489 = vmatprep.subr.msk.mxu1 %vm661_vm11, %v12589_v16  ;;  %8136 = vmatmul.mubr.msk.f32.gmra.mxu1 %vm12538_vm0, %v408_v22  ;;  %v512_v24 = vpop.permute.xlu1 %511 }
 0x370   :  { %8490 = vmatpush3.msk.msra.mxu1 %vm10165_vm12, %v12589_v16  ;;  %760 = vmatprep.mubr.f32.mxu1 %v10017_v36  ;;  %v623_v36 = vadd.s32 192, %v10070_v47 }
 0x371   :  { %8491 = vmatprep.subr.msk.mxu1 %vm660_vm13, %v12589_v16  ;;  %8142 = vmatmul.mubr.msk.f32.gmra.mxu0 %vm12538_vm0, %v512_v24  ;;  %vm10316_vm0 = vcmp.eq.s32.totalorder %v10275_v39, %v10073_v50 }
 0x372   :  { %8492 = vmatpush3.msk.msra.mxu1 %vm10184_vm14, %v12589_v16  ;;  %8523 = vmatprep.subr.msk.mxu0 %vm663_vm6, %v12589_v16  ;;  %vm656_vm6 = vcmp.eq.s32.totalorder %v623_v36, %v10073_v50  ;;  %v12666_v46 = vsel %vm10316_vm0, 4294967295, %v12665_v46 }
 0x373   :  { %8493 = vmatprep.subr.msk.mxu1 %vm659_vm15, %v12589_v16  ;;  %8524 = vmatpush3.msk.msra.mxu0 %vm10128_vm8, %v12589_v16 }
 0x374   :  { %8494 = vmatpush3.msk.msra.mxu1 %vm10203_vm1, %v12589_v16  ;;  %8525 = vmatprep.subr.msk.mxu0 %vm662_vm9, %v12589_v16  ;;  %vm12539_vm9 = vcmp.eq.s32.totalorder %v622_v32, %v10073_v50 }
 0x375   :  { %8495 = vmatprep.subr.msk.mxu1 %vm658_vm2, %v12589_v16  ;;  %8526 = vmatpush3.msk.msra.mxu0 %vm10146_vm10, %v12589_v16 }
 0x376   :  { %8496 = vmatpush3.msk.msra.mxu1 %vm10224_vm3, %v12589_v16  ;;  %8527 = vmatprep.subr.msk.mxu0 %vm661_vm11, %v12589_v16  ;;  %vm10293_vm11 = vcmp.eq.s32.totalorder %v10252_v34, %v10073_v50 }
 0x377   :  { %8497 = vmatprep.subr.msk.mxu1 %vm657_vm4, %v12589_v16  ;;  %8528 = vmatpush3.msk.msra.mxu0 %vm10165_vm12, %v12589_v16  ;;  %v12663_v42 = vsel %vm10293_vm11, 4294967295, %v12662_v42 }
 0x378   :  { %8498 = vmatpush3.msk.msra.mxu1 %vm10247_vm5, %v12589_v16  ;;  %8529 = vmatprep.subr.msk.mxu0 %vm660_vm13, %v12589_v16  ;;  %vm12540_vm13 = vcmp.eq.s32.totalorder %v621_v37, %v10073_v50 }
 0x379   :  { %8499 = vmatprep.subr.msk.mxu1 %vm656_vm6, %v12589_v16  ;;  %8530 = vmatpush3.msk.msra.mxu0 %vm10184_vm14, %v12589_v16 }
 0x37a   :  { %8500 = vmatpush3.msk.msra.mxu1 %vm10270_vm7, %v12589_v16  ;;  %8531 = vmatprep.subr.msk.mxu0 %vm659_vm15, %v12589_v16  ;;  %vm12541_vm15 = vcmp.eq.s32.totalorder %v620_v41, %v10073_v50 }
 0x37b   :  { %8501 = vmatprep.subr.msk.mxu1 %vm12539_vm9, %v12589_v16  ;;  %8532 = vmatpush3.msk.msra.mxu0 %vm10203_vm1, %v12589_v16  ;;  %vm10339_vm9 = vcmp.eq.s32.totalorder %v10298_v44, %v10073_v50  ;;  %vm12710_vm1 = vcmask 130048  }
 0x37c   :  { %8502 = vmatpush3.msk.msra.mxu1 %vm10293_vm11, %v12589_v16  ;;  %8533 = vmatprep.subr.msk.mxu0 %vm658_vm2, %v12589_v16  ;;  %v12669_v51 = vsel %vm10339_vm9, 4294967295, %v12668_v51  ;;  %vm12542_vm2 = vcmp.eq.s32.totalorder %v619_v45, %v10073_v50 }
 0x37d   :  { %8503 = vmatprep.subr.msk.mxu1 %vm12540_vm13, %v12589_v16  ;;  %8534 = vmatpush3.msk.msra.mxu0 %vm10224_vm3, %v12589_v16  ;;  %vm10362_vm13 = vcmp.eq.s32.totalorder %v10321_v48, %v10073_v50 }
 0x37e   :  { %8504 = vmatpush3.msk.msra.mxu1 %vm10316_vm0, %v12589_v16  ;;  %8535 = vmatprep.subr.msk.mxu0 %vm657_vm4, %v12589_v16  ;;  %v12672_v54 = vsel %vm10362_vm13, 4294967295, %v12671_v54  ;;  %vm12545_vm4 = vcmp.eq.s32.totalorder %v618_v49, %v10073_v50 }
 0x37f   :  { %8505 = vmatprep.subr.msk.mxu1 %vm12541_vm15, %v12589_v16  ;;  %8536 = vmatpush3.msk.msra.mxu0 %vm10247_vm5, %v12589_v16  ;;  %vm10385_vm15 = vcmp.eq.s32.totalorder %v10344_v52, %v10073_v50  ;;  %vm10408_vm5 = vcmp.eq.s32.totalorder %v10367_v55, %v10073_v50 }
 0x380   :  { %8506 = vmatpush3.msk.msra.mxu1 %vm10339_vm9, %v12589_v16  ;;  %8537 = vmatprep.subr.msk.mxu0 %vm656_vm6, %v12589_v16  ;;  %v12675_v56 = vsel %vm10385_vm15, 4294967295, %v12674_v56  ;;  %v12679_v13 = vsel %vm10408_vm5, 4294967295, %v12678_v13  ;;  %vm12681_vm6 = vcmp.eq.s32.totalorder %v621_v37, %v10073_v50 }
 0x381   :  { %8507 = vmatprep.subr.msk.mxu1 %vm12542_vm2, %v12589_v16  ;;  %8538 = vmatpush3.msk.msra.mxu0 %vm10270_vm7, %v12589_v16  ;;  %vm12677_vm2 = vcmp.eq.s32.totalorder %v622_v32, %v10073_v50  ;;  %12680 = vst [vmem:[#allocation9_spill] sm:$0xff] %v12679_v13  ;;  %vm10427_vm7 = vcmp.eq.s32.totalorder %v10390_v58, %v10073_v50 }
 0x382   :  { %8508 = vmatpush3.msk.msra.mxu1 %vm10362_vm13, %v12589_v16  ;;  %8539 = vmatprep.subr.msk.mxu0 %vm12677_vm2, %v12589_v16  ;;  %v12684_v59 = vsel %vm10427_vm7, 4294967295, %v12683_v59  ;;  %vm12686_vm2 = vcmp.eq.s32.totalorder %v620_v41, %v10073_v50 }
 0x383   :  { %8509 = vmatprep.subr.msk.mxu1 %vm12545_vm4, %v12589_v16  ;;  %8540 = vmatpush3.msk.msra.mxu0 %vm10293_vm11, %v12589_v16  ;;  %vm12682_vm4 = vcmp.eq.s32.totalorder %v617_v53, %v10073_v50  ;;  %12685 = vst [vmem:[#allocation10_spill] sm:$0xff] %v12684_v59  ;;  %vm10446_vm11 = vcmp.eq.s32.totalorder %v10070_v47, %v10073_v50 }
 0x384   :  { %8510 = vmatpush3.msk.msra.mxu1 %vm10385_vm15, %v12589_v16  ;;  %8541 = vmatprep.subr.msk.mxu0 %vm12681_vm6, %v12589_v16  ;;  %vm12550_vm6 = vcmp.eq.s32.totalorder %v615_v12, %v10073_v50  ;;  %v12689_v60 = vsel %vm10446_vm11, 4294967295, %v12688_v60 }
 0x385   :  { %8511 = vmatprep.subr.msk.mxu1 %vm12682_vm4, %v12589_v16  ;;  %8542 = vmatpush3.msk.msra.mxu0 %vm10316_vm0, %v12589_v16  ;;  %vm12687_vm4 = vcmp.eq.s32.totalorder %v616_v10, %v10073_v50  ;;  %12690 = vst [vmem:[#allocation11_spill] sm:$0xff] %v12689_v60  ;;  %vm12705_vm0 = vcmask 130048  }
 0x386   :  { %8512 = vmatpush3.msk.msra.mxu1 %vm10408_vm5, %v12589_v16  ;;  %8543 = vmatprep.subr.msk.mxu0 %vm12686_vm2, %v12589_v16  ;;  %vm12691_vm2 = vcmp.eq.s32.totalorder %v619_v45, %v10073_v50 }
 0x387   :  { %8513 = vmatprep.subr.msk.mxu1 %vm12687_vm4, %v12589_v16  ;;  %8544 = vmatpush3.msk.msra.mxu0 %vm10339_vm9, %v12589_v16  ;;  %vm12692_vm4 = vcmp.eq.s32.totalorder %v618_v49, %v10073_v50 }
 0x388   :  { %8514 = vmatpush3.msk.msra.mxu1 %vm10427_vm7, %v12589_v16  ;;  %8545 = vmatprep.subr.msk.mxu0 %vm12691_vm2, %v12589_v16  ;;  %vm12693_vm2 = vcmp.eq.s32.totalorder %v617_v53, %v10073_v50 }
 0x389   :  { %8515 = vmatprep.subr.msk.mxu1 %vm12550_vm6, %v12589_v16  ;;  %8546 = vmatpush3.msk.msra.mxu0 %vm10362_vm13, %v12589_v16  ;;  %vm12694_vm6 = vcmp.eq.s32.totalorder %v616_v10, %v10073_v50 }
 0x38a   :  { %8516 = vmatpush3.msk.msra.mxu1 %vm10446_vm11, %v12589_v16  ;;  %8547 = vmatprep.subr.msk.mxu0 %vm12692_vm4, %v12589_v16  ;;  %vm12695_vm4 = vcmp.eq.s32.totalorder %v615_v12, %v10073_v50 }
 0x38b   :  { %761 = vmatmul.mubr.f32.vlgmr.msra.gmra.mxu1 %v10015_v35  ;;  %8548 = vmatpush3.msk.msra.mxu0 %vm10385_vm15, %v12589_v16  ;;  %v9840_v35 = vmov 3  }
 0x38c   :  { %765 = vmatprep.mubr.f32.mxu1 %v10023_v43  ;;  %8549 = vmatprep.subr.msk.mxu0 %vm12693_vm2, %v12589_v16 }
 0x38d   :  { %8550 = vmatpush3.msk.msra.mxu0 %vm10408_vm5, %v12589_v16  ;;  %9592 = vset.pattern.permute.xlu1 %v9840_v35 }
 0x38e   :  { %8551 = vmatprep.subr.msk.mxu0 %vm12694_vm6, %v12589_v16  ;;  %9591 = vset.pattern.permute.xlu0 %v9840_v35  ;;  %vm12696_vm6 = vcmask 130048  }
 0x38f   :  { %766 = vmatmul.mubr.f32.gmra.mxu1 %v10019_v40  ;;  %8552 = vmatpush3.msk.msra.mxu0 %vm10427_vm7, %v12589_v16  ;;  %vm12697_vm2 = vmmov %vm12696_vm6 }
 0x390   :  { %8553 = vmatprep.subr.msk.mxu0 %vm12695_vm4, %v12589_v16  ;;  %772 = vperm.xlu1 %9592, %v9968_v8   ;;  %vm12698_vm4 = vmmov %vm12697_vm2 }
 0x391   :  { %8554 = vmatpush3.msk.msra.mxu0 %vm10446_vm11, %v12589_v16  ;;  %776 = vperm.xlu0 %9591, %v9973_v9  }
 0x3aa   :  { %v394_v40 = vpop.f32.mrf.mxu0 }
 0x3ac   :  { %v396_v43 = vpop.f32.mrf.mxu0 }
 0x3ae   :  { %v400_v61 = vpop.f32.mrf.mxu0 }
 0x3b0   :  { %v402_v63 = vpop.f32.mrf.mxu0 }
 0x42b   :  { %v479_v0 = vpop.f32.mrf.mxu1 }
 0x42c   :  { %v583_v4 = vpop.f32.mrf.mxu0  ;;  %v480_v5 = vadd.f32 %v479_v0, %v394_v40  ;;  %v773_v40 = vpop.permute.xlu1 %772 }
 0x42d   :  { %v481_v50 = vpop.f32.mrf.mxu1 }
 0x42e   :  { %v482_v14 = vadd.f32 %v481_v50, %v396_v43  ;;  %v585_v15 = vpop.f32.mrf.mxu0  ;;  %v594_v23 = vadd.f32 %v583_v4, %v480_v5  ;;  %v777_v5 = vpop.permute.xlu0 %776 }
 0x42f   :  { %v485_v19 = vpop.f32.mrf.mxu1 }
 0x430   :  { %v595_v22 = vadd.f32 %v585_v15, %v482_v14  ;;  %v486_v24 = vadd.f32 %v485_v19, %v400_v61  ;;  %v9841_v19 = vmov 4  }
 0x431   :  { %v487_v27 = vpop.f32.mrf.mxu1  ;;  %v589_v36 = vpop.f32.mrf.mxu0  ;;  %9594 = vset.pattern.permute.xlu0 %v9841_v19  ;;  %9593 = vset.pattern.permute.xlu1 %v9841_v19 }
 0x432   :  { %v488_v32 = vadd.f32 %v487_v27, %v402_v63  ;;  %843 = vmatprep.mubr.f32.mxu0 %v595_v22  ;;  %v596_v45 = vadd.f32 %v589_v36, %v486_v24 }
 0x433   :  { %v591_v37 = vpop.f32.mrf.mxu0  ;;  %844 = vmatmul.mubr.f32.vlgmr.msra.gmra.mxu0 %v594_v23 }
 0x434   :  { %v597_v41 = vadd.f32 %v591_v37, %v488_v32 }
 0x436   :  { %848 = vmatprep.mubr.f32.mxu0 %v597_v41 }
 0x437   :  { %849 = vmatmul.mubr.f32.gmra.mxu0 %v596_v45 }
 0x44b   :  { %v8517_v49 = vpop.f32.mrf.mxu1 }
 0x44d   :  { %v8518_v53 = vpop.f32.mrf.mxu1 }
 0x44e   :  { %v10497_v10 = vadd.f32 %v8518_v53, %v8517_v49 }
 0x4f3   :  { %v8555_v12 = vpop.f32.mrf.mxu0 }
 0x4f5   :  { %v8556_v35 = vpop.f32.mrf.mxu0 }
 0x4f6   :  { %v8557_v43 = vadd.f32 %v8556_v35, %v8555_v12 }
 0x4f7   :  { %v8558_v0 = vpop.f32.mrf.mxu0 }
 0x4f8   :  { %v846_v61 = vadd.f32 %v8557_v43, %v773_v40 }
 0x4f9   :  { %v8559_v4 = vpop.f32.mrf.mxu0 }
 0x4fa   :  { %v8560_v63 = vadd.f32 %v8559_v4, %v8558_v0  ;;  %854 = vadd.xlane.f32.xlu0 %v846_v61  ;;  %v861_v15 = vmul.f32 %v846_v61, %v846_v61 }
 0x4fc   :  { %v851_v50 = vadd.f32 %v8560_v63, %v777_v5 }
 0x4fe   :  { %856 = vadd.xlane.f32.xlu1 %v851_v50  ;;  %v862_v14 = vmul.f32 %v851_v50, %v851_v50 }
 0x500   :  { %865 = vadd.xlane.f32.xlu0 %v862_v14 }
 0x502   :  { %863 = vadd.xlane.f32.xlu1 %v861_v15  ;;  %v9843_v15 = vmov 5  }
 0x583   :  { %v855_v22 = vpop.xlane.xlu0 %854 }
 0x584   :  { %v859_v24 = vmul.f32 0.0078125, %v855_v22 }
 0x586   :  { %v869_v45 = vmul.f32 %v859_v24, %v859_v24 }
 0x587   :  { %v857_v23 = vpop.xlane.xlu1 %856 }
 0x588   :  { %v860_v27 = vmul.f32 0.0078125, %v857_v23 }
 0x589   :  { %v866_v36 = vpop.xlane.xlu0 %865 }
 0x58a   :  { %v870_v32 = vmul.f32 %v860_v27, %v860_v27  ;;  %v868_v37 = vmul.f32 0.0078125, %v866_v36 }
 0x58b   :  { %v864_v41 = vpop.xlane.xlu1 %863 }
 0x58c   :  { %v872_v49 = vsub.f32 %v868_v37, %v870_v32  ;;  %v867_v53 = vmul.f32 0.0078125, %v864_v41 }
 0x58e   :  { %v874_v12 = vadd.f32 1e-05, %v872_v49  ;;  %v871_v35 = vsub.f32 %v867_v53, %v869_v45 }
 0x590   :  { %9695 = vrsqrt.f32 %v874_v12  ;;  %v873_v40 = vadd.f32 1e-05, %v871_v35 }
 0x592   :  { %9697 = vrsqrt.f32 %v873_v40 }
 0x59d   :  { %v9696_v43 = vpop.eup %9695 }
 0x59e   :  { %v878_v0 = vmul.f32 %v9696_v43, %v9973_v9 }
 0x59f   :  { %v9698_v4 = vpop.eup %9697 }
 0x5a0   :  { %v892_v5 = vmul.f32 %v878_v0, %v860_v27  ;;  %v877_v63 = vmul.f32 %v9698_v4, %v9968_v8 }
 0x5a2   :  { %897 = vrot.lane.b32.xlu0 %v892_v5, %s9830_s16  ;;  %v891_v14 = vmul.f32 %v877_v63, %v859_v24 }
 0x5a4   :  { %895 = vrot.lane.b32.xlu1 %v891_v14, %s9830_s16 }
 0x5a6   :  { %881 = vperm.xlu0 %9594, %v877_v63   ;;  %v10532_v63 = vmul.u32 64, %v9981_v11 }
 0x5a8   :  { %886 = vperm.xlu1 %9593, %v878_v0   ;;  %v921_v0 = vand.u32 63, %v9981_v11  ;;  %vm1211_vm11 = vcmp.ge.s32.totalorder %v10098_v57, %v10532_v63  ;;  %vm1210_vm5 = vcmp.ge.s32.totalorder %v10113_v62, %v10532_v63  ;;  %vm1209_vm13 = vcmp.ge.s32.totalorder %v10133_v3, %v10532_v63 }
 0x5aa   :  { %925 = vrot.lane.b32.xlu0 %v9951_v6, %s9842_s6 }
 0x5ac   :  { %9595 = vset.pattern.permute.xlu1 %v9843_v15 }
 0x5ae   :  { %927 = vrot.lane.b32.xlu0 %v9956_v7, %s9842_s6 }
 0x5b2   :  { %1010 = vrot.lane.b32.xlu0 %v9956_v7, %s9844_s7 }
 0x614   :  { %v898_v19 = vpop.permute.xlu0 %897 }
 0x615   :  { %v902_v22 = vsub.f32 %v9973_v9, %v898_v19 }
 0x616   :  { %v896_v23 = vpop.permute.xlu1 %895 }
 0x617   :  { %910 = vperm.xlu1 %9595, %v902_v22   ;;  %v901_v24 = vsub.f32 %v9968_v8, %v896_v23  ;;  %v12591_v22 = vmov 0.015625  }
 0x61b   :  { %905 = vperm.xlu1 %9595, %v901_v24   ;;  %v12721_v24 = vmov 0 }
 0x61f   :  { %1008 = vrot.lane.b32.xlu1 %v9951_v6, %s9844_s7 }
 0x621   :  { %v882_v27 = vpop.permute.xlu0 %881 }
 0x622   :  { %v889_v49 = vmul.f32 %v882_v27, %v846_v61  ;;  %v9846_v61 = vmov 6   ;;  %v12723_v27 = vmov 0 }
 0x623   :  { %v887_v32 = vpop.permute.xlu1 %886  ;;  %9597 = vset.pattern.permute.xlu1 %v9846_v61  ;;  %9596 = vset.pattern.permute.xlu0 %v9846_v61 }
 0x624   :  { %v890_v37 = vmul.f32 %v887_v32, %v851_v50  ;;  %v12727_v32 = vmov 0 }
 0x625   :  { %v926_v36 = vpop.permute.xlu0 %925 }
 0x626   :  { %8901 = vmatprep.mubr.msk.f32.mxu1 %vm12696_vm6, %v926_v36  ;;  %vm10527_vm6 = vcmp.ne.s32.totalorder %v921_v0, 63  ;;  %v12725_v36 = vmov 0 }
 0x629   :  { %v928_v50 = vpop.permute.xlu0 %927 }
 0x692   :  { %v911_v41 = vpop.permute.xlu1 %910 }
 0x693   :  { %v914_v45 = vadd.f32 %v911_v41, %v890_v37  ;;  %v12729_v37 = vmov 0 }
 0x695   :  { %v916_v53 = vmax.f32 %v914_v45, 0.0  ;;  %v12733_v45 = vmov 0 }
 0x696   :  { %v906_v12 = vpop.permute.xlu1 %905 }
 0x697   :  { %v913_v35 = vadd.f32 %v906_v12, %v889_v49  ;;  %1093 = vrot.lane.b32.xlu0 %v916_v53, %s9836_s30  ;;  %8897 = vmatprep.subr.mxu1 %v916_v53  ;;  %v12735_v49 = vmov 0 }
 0x698   :  { %8898 = vmatpush3.msra.mxu1 %v916_v53 }
 0x699   :  { %v915_v40 = vmax.f32 %v913_v35, 0.0 }
 0x69a   :  { %v1009_v43 = vpop.permute.xlu1 %1008 }
 0x69b   :  { %917 = vrot.lane.b32.xlu1 %v915_v40, %s9830_s16  ;;  %8899 = vmatprep.subr.mxu1 %v915_v40 }
 0x69c   :  { %8900 = vmatpush3.msra.mxu1 %v915_v40  ;;  %1098 = vrot.lane.b32.xlu0 %v9951_v6, %s9845_s8  ;;  %v1011_v6 = vpop.permute.xlu0 %1010 }
 0x69d   :  { %8902 = vmatmul.mubr.msk.f32.vlgmr.msra.gmra.mxu1 %vm12697_vm2, %v928_v50  ;;  %vm10541_vm2 = vcmp.ne.s32.totalorder %v921_v0, 0 }
 0x69e   :  { %8908 = vmatprep.mubr.msk.f32.mxu1 %vm12698_vm4, %v1009_v43 }
 0x69f   :  { %919 = vrot.lane.b32.xlu1 %v916_v53, %s9830_s16  ;;  %v10784_v53 = vpop.f32.mrf.mxu1 }
 0x6a0   :  { %1184 = vperm.xlu0 %9596, %v9968_v8   ;;  %v10539_v8 = vadd.s32 64, %v10532_v63 }
 0x6a1   :  { %v10786_v12 = vpop.f32.mrf.mxu1 }
 0x6a2   :  { %vm1228_vm7 = vcmp.lt.s32.totalorder %v10098_v57, %v10539_v8  ;;  %vm1227_vm15 = vcmp.lt.s32.totalorder %v10113_v62, %v10539_v8  ;;  %vm1226_vm9 = vcmp.lt.s32.totalorder %v10133_v3, %v10539_v8  ;;  %vm1223_vm14 = vcmp.lt.s32.totalorder %v10189_v26, %v10539_v8 }
 0x6a3   :  { %1091 = vrot.lane.b32.xlu1 %v915_v40, %s9836_s30  ;;  %vm10573_vm3 = vmand %vm1210_vm5, %vm1227_vm15  ;;  %vm1224_vm15 = vcmp.lt.s32.totalorder %v10170_v21, %v10539_v8  ;;  %v12762_v62 = vmov 1.0  }
 0x6a4   :  { %vm10589_vm5 = vmand %vm1209_vm13, %vm1226_vm9  ;;  %vm1206_vm13 = vcmp.ge.s32.totalorder %v10189_v26, %v10532_v63 }
 0x6a5   :  { %vm10632_vm12 = vmand %vm1206_vm13, %vm1223_vm14  ;;  %vm1203_vm14 = vcmp.ge.s32.totalorder %v10252_v34, %v10532_v63  ;;  %vm1220_vm13 = vcmp.lt.s32.totalorder %v10252_v34, %v10539_v8 }
 0x6a7   :  { %1100 = vrot.lane.b32.xlu1 %v9956_v7, %s9845_s8 }
 0x6ab   :  { %1188 = vperm.xlu1 %9597, %v9973_v9  }
 0x709   :  { %v1094_v5 = vpop.permute.xlu0 %1093 }
 0x70a   :  { %8911 = vmatprep.subr.msk.mxu0 %vm10527_vm6, %v1094_v5 }
 0x70b   :  { %8912 = vmatpush3.msk.msra.mxu0 %vm10527_vm6, %v1094_v5 }
 0x70d   :  { %v918_v7 = vpop.permute.xlu1 %917 }
 0x70e   :  { %v1099_v9 = vpop.permute.xlu0 %1098 }
 0x70f   :  { %8915 = vmatprep.mubr.msk.f32.mxu0 %vm12698_vm4, %v1099_v9  ;;  %vm10560_vm4 = vmand %vm1211_vm11, %vm1228_vm7  ;;  %vm1208_vm7 = vcmp.ge.s32.totalorder %v10151_v18, %v10532_v63  ;;  %vm1207_vm11 = vcmp.ge.s32.totalorder %v10170_v21, %v10532_v63 }
 0x711   :  { %v920_v15 = vpop.permute.xlu1 %919 }
 0x712   :  { %8904 = vmatprep.subr.msk.mxu1 %vm10541_vm2, %v920_v15 }
 0x713   :  { %8905 = vmatpush3.msk.msra.mxu1 %vm10541_vm2, %v920_v15 }
 0x714   :  { %8906 = vmatprep.subr.msk.mxu1 %vm10541_vm2, %v918_v7 }
 0x715   :  { %v1092_v57 = vpop.permute.xlu1 %1091  ;;  %8907 = vmatpush3.msk.msra.mxu1 %vm10541_vm2, %v918_v7 }
 0x716   :  { %8909 = vmatmul.mubr.msk.f32.vlgmr.msra.gmra.mxu1 %vm12705_vm0, %v1011_v6  ;;  %8913 = vmatprep.subr.msk.mxu0 %vm10527_vm6, %v1092_v57  ;;  %vm1225_vm0 = vcmp.lt.s32.totalorder %v10151_v18, %v10539_v8 }
 0x717   :  { %8914 = vmatpush3.msk.msra.mxu0 %vm10527_vm6, %v1092_v57  ;;  %8918 = vmatprep.subr.msk.mxu1 %vm10560_vm4, %v12591_v22  ;;  %vm10604_vm9 = vmand %vm1208_vm7, %vm1225_vm0  ;;  %vm1205_vm7 = vcmp.ge.s32.totalorder %v10208_v29, %v10532_v63  ;;  %vm1222_vm0 = vcmp.lt.s32.totalorder %v10208_v29, %v10539_v8 }
 0x718   :  { %8919 = vmatpush3.msk.msra.mxu1 %vm10560_vm4, %v12591_v22  ;;  %vm10646_vm10 = vmand %vm1205_vm7, %vm1222_vm0  ;;  %vm1202_vm0 = vcmp.ge.s32.totalorder %v10275_v39, %v10532_v63 }
 0x719   :  { %v1101_v23 = vpop.permute.xlu1 %1100  ;;  %8920 = vmatprep.subr.msk.mxu1 %vm10573_vm3, %v12591_v22  ;;  %vm10670_vm7 = vmand %vm1203_vm14, %vm1220_vm13  ;;  %vm1201_vm14 = vcmp.ge.s32.totalorder %v10298_v44, %v10532_v63  ;;  %vm1218_vm13 = vcmp.lt.s32.totalorder %v10298_v44, %v10539_v8 }
 0x71a   :  { %8916 = vmatmul.mubr.msk.f32.vlgmr.msra.gmra.mxu0 %vm12710_vm1, %v1101_v23  ;;  %8921 = vmatpush3.msk.msra.mxu1 %vm10573_vm3, %v12591_v22  ;;  %vm10618_vm1 = vmand %vm1207_vm11, %vm1224_vm15  ;;  %vm1204_vm11 = vcmp.ge.s32.totalorder %v10229_v31, %v10532_v63  ;;  %vm1221_vm15 = vcmp.lt.s32.totalorder %v10229_v31, %v10539_v8  ;;  %v12719_v31 = vmov 0  ;;  %v12722_v24 = vsel %vm10670_vm7, 4294967295, %v12721_v24 }
 0x71b   :  { %8922 = vmatprep.subr.msk.mxu1 %vm10589_vm5, %v12591_v22  ;;  %vm10660_vm8 = vmand %vm1204_vm11, %vm1221_vm15  ;;  %vm1219_vm11 = vcmp.lt.s32.totalorder %v10275_v39, %v10539_v8 }
 0x71c   :  { %8923 = vmatpush3.msk.msra.mxu1 %vm10589_vm5, %v12591_v22  ;;  %v12720_v31 = vsel %vm10660_vm8, 4294967295, %v12719_v31  ;;  %vm10690_vm15 = vmand %vm1202_vm0, %vm1219_vm11  ;;  %vm1200_vm0 = vcmp.ge.s32.totalorder %v10321_v48, %v10532_v63  ;;  %vm1217_vm11 = vcmp.lt.s32.totalorder %v10321_v48, %v10539_v8 }
 0x71d   :  { %8924 = vmatprep.subr.msk.mxu1 %vm10604_vm9, %v12591_v22  ;;  %v12724_v27 = vsel %vm10690_vm15, 4294967295, %v12723_v27 }
 0x71e   :  { %8925 = vmatpush3.msk.msra.mxu1 %vm10604_vm9, %v12591_v22 }
 0x71f   :  { %8926 = vmatprep.subr.msk.mxu1 %vm10618_vm1, %v12591_v22 }
 0x720   :  { %8927 = vmatpush3.msk.msra.mxu1 %vm10618_vm1, %v12591_v22 }
 0x721   :  { %8928 = vmatprep.subr.msk.mxu1 %vm10632_vm12, %v12591_v22 }
 0x722   :  { %8929 = vmatpush3.msk.msra.mxu1 %vm10632_vm12, %v12591_v22 }
 0x723   :  { %8930 = vmatprep.subr.msk.mxu1 %vm10646_vm10, %v12591_v22 }
 0x724   :  { %8931 = vmatpush3.msk.msra.mxu1 %vm10646_vm10, %v12591_v22 }
 0x725   :  { %8932 = vmatprep.subr.msk.mxu1 %vm10660_vm8, %v12591_v22 }
 0x726   :  { %8933 = vmatpush3.msk.msra.mxu1 %vm10660_vm8, %v12591_v22  ;;  %vm10718_vm8 = vmand %vm1200_vm0, %vm1217_vm11  ;;  %vm1198_vm0 = vcmp.ge.s32.totalorder %v10367_v55, %v10532_v63  ;;  %vm1215_vm11 = vcmp.lt.s32.totalorder %v10367_v55, %v10539_v8 }
 0x727   :  { %8934 = vmatprep.subr.msk.mxu1 %vm10670_vm7, %v12591_v22  ;;  %v12728_v32 = vsel %vm10718_vm8, 4294967295, %v12727_v32 }
 0x728   :  { %8935 = vmatpush3.msk.msra.mxu1 %vm10670_vm7, %v12591_v22  ;;  %vm10704_vm7 = vmand %vm1201_vm14, %vm1218_vm13  ;;  %vm1199_vm14 = vcmp.ge.s32.totalorder %v10344_v52, %v10532_v63  ;;  %vm1216_vm13 = vcmp.lt.s32.totalorder %v10344_v52, %v10539_v8  ;;  %v9849_v52 = vmov 8  }
 0x729   :  { %8936 = vmatprep.subr.msk.mxu1 %vm10690_vm15, %v12591_v22  ;;  %v12726_v36 = vsel %vm10704_vm7, 4294967295, %v12725_v36 }
 0x72a   :  { %8937 = vmatpush3.msk.msra.mxu1 %vm10690_vm15, %v12591_v22  ;;  %vm10732_vm15 = vmand %vm1199_vm14, %vm1216_vm13  ;;  %vm1197_vm14 = vcmp.ge.s32.totalorder %v10390_v58, %v10532_v63  ;;  %vm1214_vm13 = vcmp.lt.s32.totalorder %v10390_v58, %v10539_v8 }
 0x72b   :  { %8938 = vmatprep.subr.msk.mxu1 %vm10704_vm7, %v12591_v22  ;;  %v12730_v37 = vsel %vm10732_vm15, 4294967295, %v12729_v37 }
 0x72c   :  { %8939 = vmatpush3.msk.msra.mxu1 %vm10704_vm7, %v12591_v22  ;;  %vm10746_vm7 = vmand %vm1198_vm0, %vm1215_vm11 }
 0x72d   :  { %8940 = vmatprep.subr.msk.mxu1 %vm10718_vm8, %v12591_v22  ;;  %vm10764_vm0 = vmand %vm1197_vm14, %vm1214_vm13  ;;  %vm12615_vm14 = vcmask 15360  }
 0x72e   :  { %8941 = vmatpush3.msk.msra.mxu1 %vm10718_vm8, %v12591_v22  ;;  %vm1196_vm8 = vcmp.ge.s32.totalorder %v10070_v47, %v10532_v63  ;;  %v12734_v45 = vsel %vm10764_vm0, 4294967295, %v12733_v45  ;;  %v1189_v63 = vpop.permute.xlu1 %1188 }
 0x72f   :  { %8942 = vmatprep.subr.msk.mxu1 %vm10732_vm15, %v12591_v22 }
 0x730   :  { %8943 = vmatpush3.msk.msra.mxu1 %vm10732_vm15, %v12591_v22  ;;  %vm1213_vm15 = vcmp.lt.s32.totalorder %v10070_v47, %v10539_v8  ;;  %v1185_v8 = vpop.permute.xlu0 %1184 }
 0x731   :  { %8944 = vmatprep.subr.msk.mxu1 %vm10746_vm7, %v12591_v22  ;;  %vm10771_vm11 = vmand %vm1196_vm8, %vm1213_vm15  ;;  %vm12737_vm8 = vcmask 130048  }
 0x732   :  { %8945 = vmatpush3.msk.msra.mxu1 %vm10746_vm7, %v12591_v22  ;;  %v12736_v49 = vsel %vm10771_vm11, 4294967295, %v12735_v49  ;;  %vm12738_vm15 = vmmov %vm12737_vm8 }
 0x733   :  { %8946 = vmatprep.subr.msk.mxu1 %vm10764_vm0, %v12591_v22  ;;  %vm12739_vm13 = vmmov %vm12737_vm8 }
 0x734   :  { %8947 = vmatpush3.msk.msra.mxu1 %vm10764_vm0, %v12591_v22 }
 0x735   :  { %8948 = vmatprep.subr.msk.mxu1 %vm10771_vm11, %v12591_v22 }
 0x736   :  { %8949 = vmatpush3.msk.msra.mxu1 %vm10771_vm11, %v12591_v22  ;;  %vm12620_vm11 = vcmask 1041408  }
 0x75d   :  { %v8903_v35 = vpop.f32.mrf.mxu1 }
 0x75f   :  { %v999_v40 = vpop.f32.mrf.mxu1 }
 0x7d6   :  { %v8910_v43 = vpop.f32.mrf.mxu1 }
 0x7d7   :  { %v1088_v61 = vadd.f32 %v8910_v43, %v8903_v35  ;;  %v10797_v35 = vld [vmem:[%s12535_s2 + $0x8] sm:$0xff] }
 0x7d8   :  { %v1082_v50 = vpop.f32.mrf.mxu1  ;;  %8957 = vmatprep.mubr.msk.f32.mxu0 %vm12737_vm8, %v10797_v35  ;;  %v10804_v43 = vld [vmem:[%s12536_s1 + $0x8] sm:$0xff] }
 0x7d9   :  { %v1083_v0 = vadd.f32 %v1082_v50, %v999_v40  ;;  %v9848_v40 = vmov 7  }
 0x7da   :  { %v8917_v6 = vpop.f32.mrf.mxu0  ;;  %9598 = vset.pattern.permute.xlu1 %v9848_v40  ;;  %9599 = vset.pattern.permute.xlu0 %v9848_v40 }
 0x7db   :  { %v1182_v5 = vadd.f32 %v8917_v6, %v1088_v61  ;;  %1343 = vperm.xlu1 %9598, %v10804_v43   ;;  %v10822_v6 = vld [vmem:[%s12535_s2 + $0x40] sm:$0xff] }
 0x7dc   :  { %v1172_v7 = vpop.f32.mrf.mxu0 }
 0x7dd   :  { %v1181_v9 = vadd.f32 %v1172_v7, %v1083_v0  ;;  %v10788_v15 = vadd.f32 %v1189_v63, %v1182_v5 }
 0x7df   :  { %v10790_v57 = vadd.f32 %v1185_v8, %v1181_v9  ;;  %v1194_v16 = vand.u32 2147483647, %v10788_v15  ;;  %9600 = vset.pattern.permute.xlu1 %v9849_v52 }
 0x7e1   :  { %v1193_v23 = vand.u32 2147483647, %v10790_v57 }
 0x7e3   :  { %8950 = vmatprep.mubr.f32.mxu1 %v1193_v23 }
 0x7e4   :  { %8951 = vmatmul.mubr.f32.vlgmr.msra.gmra.mxu1 %v1194_v16  ;;  %v10810_v16 = vld [vmem:[%s12536_s1] sm:$0xff] }
 0x7e5   :  { %1339 = vperm.xlu0 %9599, %v10810_v16  }
 0x856   :  { %v1344_v0 = vpop.permute.xlu1 %1343 }
 0x860   :  { %v1340_v63 = vpop.permute.xlu0 %1339 }
 0x8a4   :  { %v10813_v50 = vpop.f32.mrf.mxu1 }
 0x8a5   :  { %8953 = vmatprep.subr.mxu0 %v10813_v50 }
 0x8a6   :  { %v10816_v61 = vpop.f32.mrf.mxu1  ;;  %8954 = vmatpush3.msra.mxu0 %v10813_v50 }
 0x8a7   :  { %8955 = vmatprep.subr.mxu0 %v10816_v61 }
 0x8a8   :  { %8956 = vmatpush3.msra.mxu0 %v10816_v61 }
 0x8a9   :  { %8958 = vmatmul.mubr.msk.f32.vlgmr.msra.gmra.mxu0 %vm12738_vm15, %v10822_v6 }
 0x969   :  { %v8959_v5 = vpop.f32.mrf.mxu0 }
 0x96a   :  { %v1424_v7 = vadd.f32 %v8959_v5, %v1344_v0 }
 0x96b   :  { %v1418_v8 = vpop.f32.mrf.mxu0 }
 0x96c   :  { %v1419_v9 = vadd.f32 %v1418_v8, %v1340_v63  ;;  %v1431_v23 = vsel %vm12615_vm14, %v1424_v7, 0.0  ;;  %v1438_v40 = vmul.f32 %v1424_v7, %v1424_v7 }
 0x96d   :  { %1432 = vadd.xlane.f32.xlu1 %v1431_v23 }
 0x96e   :  { %v1428_v22 = vsel %vm12615_vm14, %v1419_v9, 0.0  ;;  %v1437_v2 = vmul.f32 %v1419_v9, %v1419_v9  ;;  %v1442_v58 = vsel %vm12615_vm14, %v1438_v40, 0.0 }
 0x96f   :  { %1429 = vadd.xlane.f32.xlu0 %v1428_v22 }
 0x970   :  { %v1439_v55 = vsel %vm12615_vm14, %v1437_v2, 0.0  ;;  %v9850_v2 = vmov 9  }
 0x971   :  { %1443 = vadd.xlane.f32.xlu1 %v1442_v58  ;;  %9601 = vset.pattern.permute.xlu0 %v9850_v2 }
 0x973   :  { %1440 = vadd.xlane.f32.xlu0 %v1439_v55 }
 0x9f6   :  { %v1433_v48 = vpop.xlane.xlu1 %1432 }
 0x9f7   :  { %v1436_v0 = vmul.f32 0.5, %v1433_v48 }
 0x9f8   :  { %v1430_v5 = vpop.xlane.xlu0 %1429 }
 0x9f9   :  { %v1435_v63 = vmul.f32 0.5, %v1430_v5  ;;  %v1448_v44 = vmul.f32 %v1436_v0, %v1436_v0 }
 0x9fa   :  { %v1444_v8 = vpop.xlane.xlu1 %1443 }
 0x9fb   :  { %v1446_v39 = vmul.f32 0.5, %v1444_v8  ;;  %v1447_v34 = vmul.f32 %v1435_v63, %v1435_v63 }
 0x9fc   :  { %v1441_v23 = vpop.xlane.xlu0 %1440 }
 0x9fd   :  { %v1450_v60 = vsub.f32 %v1446_v39, %v1448_v44  ;;  %v1445_v59 = vmul.f32 0.5, %v1441_v23 }
 0x9ff   :  { %v1452_v22 = vadd.f32 1e-05, %v1450_v60  ;;  %v1449_v13 = vsub.f32 %v1445_v59, %v1447_v34  ;;  %v9851_v59 = vmov 10  }
 0xa01   :  { %9699 = vrsqrt.f32 %v1452_v22  ;;  %v1451_v58 = vadd.f32 1e-05, %v1449_v13 }
 0xa03   :  { %9701 = vrsqrt.f32 %v1451_v58 }
 0xa0e   :  { %v9700_v55 = vpop.eup %9699 }
 0xa0f   :  { %v1456_v52 = vmul.f32 %v10804_v43, %v9700_v55 }
 0xa10   :  { %v9702_v48 = vpop.eup %9701 }
 0xa11   :  { %v1470_v40 = vmul.f32 %v1456_v52, %v1436_v0  ;;  %v1455_v5 = vmul.f32 %v10810_v16, %v9702_v48 }
 0xa13   :  { %1475 = vrot.lane.b32.xlu1 %v1470_v40, %s9830_s16  ;;  %v1469_v8 = vmul.f32 %v1455_v5, %v1435_v63 }
 0xa15   :  { %1473 = vrot.lane.b32.xlu0 %v1469_v8, %s9830_s16  ;;  %v1600_v8 = vmul.u32 64, %v10070_v47 }
 0xa17   :  { %1464 = vperm.xlu1 %9600, %v1456_v52   ;;  %vm1601_vm15 = vcmp.ge.s32.totalorder %v9981_v11, %v1600_v8 }
 0xa1b   :  { %1459 = vperm.xlu1 %9600, %v1455_v5  }
 0xa1f   :  { %9602 = vset.pattern.permute.xlu1 %v9850_v2 }
 0xa85   :  { %v1476_v34 = vpop.permute.xlu1 %1475 }
 0xa86   :  { %v1480_v39 = vsub.f32 %v10804_v43, %v1476_v34 }
 0xa87   :  { %v1474_v44 = vpop.permute.xlu0 %1473 }
 0xa88   :  { %v1479_v13 = vsub.f32 %v10810_v16, %v1474_v44  ;;  %1488 = vperm.xlu0 %9601, %v1480_v39  }
 0xa8a   :  { %1483 = vperm.xlu1 %9602, %v1479_v13  }
 0xa8c   :  { %1505 = vrot.lane.b32.xlu0 %v10822_v6, %s9832_s0 }
 0xa8d   :  { %9604 = vset.pattern.permute.xlu0 %v9851_v59 }
 0xa8e   :  { %1503 = vrot.lane.b32.xlu1 %v10797_v35, %s9832_s0 }
 0xa8f   :  { %9603 = vset.pattern.permute.xlu1 %v9851_v59 }
 0xa90   :  { %1500 = vperm.xlu0 %9604, %v10804_v43  }
 0xa92   :  { %1496 = vperm.xlu1 %9603, %v10810_v16   ;;  %v1465_v60 = vpop.permute.xlu1 %1464 }
 0xa93   :  { %v1468_v63 = vmul.f32 %v1465_v60, %v1424_v7  ;;  %v1602_v7 = vadd.s32 64, %v1600_v8 }
 0xa95   :  { %vm1603_vm14 = vcmp.lt.s32.totalorder %v9981_v11, %v1602_v7 }
 0xa96   :  { %v1460_v0 = vpop.permute.xlu1 %1459  ;;  %vm1604_vm0 = vmand %vm1601_vm15, %vm1603_vm14 }
 0xa97   :  { %v1467_v22 = vmul.f32 %v1460_v0, %v1419_v9  ;;  %v12740_v9 = vmov 0.0   ;;  %vm12744_vm15 = vmmov %vm12737_vm8 }
 0xa98   :  { %v10850_v34 = vsel %vm1604_vm0, 1.0, %v12740_v9  ;;  %vm12741_vm0 = vcmask 15360  }
 0xa99   :  { %vm12742_vm14 = vmmov %vm12741_vm0 }
 0xb03   :  { %v1489_v23 = vpop.permute.xlu0 %1488 }
 0xb04   :  { %v1492_v58 = vadd.f32 %v1489_v23, %v1468_v63 }
 0xb05   :  { %v1484_v2 = vpop.permute.xlu1 %1483 }
 0xb06   :  { %v1494_v55 = vmax.f32 %v1492_v58, 0.0  ;;  %v1491_v52 = vadd.f32 %v1484_v2, %v1467_v22 }
 0xb07   :  { %v1506_v5 = vpop.permute.xlu0 %1505 }
 0xb08   :  { %v1493_v48 = vmax.f32 %v1491_v52, 0.0  ;;  %8960 = vmatprep.subr.mxu0 %v1494_v55 }
 0xb09   :  { %8961 = vmatpush3.msra.mxu0 %v1494_v55  ;;  %v1504_v40 = vpop.permute.xlu1 %1503 }
 0xb0a   :  { %8962 = vmatprep.subr.mxu0 %v1493_v48  ;;  %8964 = vmatprep.mubr.msk.f32.mxu0 %vm12739_vm13, %v1504_v40  ;;  %vm12743_vm13 = vmmov %vm12737_vm8 }
 0xb0b   :  { %8963 = vmatpush3.msra.mxu0 %v1493_v48  ;;  %v1501_v39 = vpop.permute.xlu0 %1500 }
 0xb0c   :  { %8965 = vmatmul.mubr.msk.f32.vlgmr.msra.gmra.mxu0 %vm12737_vm8, %v1506_v5  ;;  %8967 = vmatprep.subr.msk.mxu0 %vm12620_vm11, %v10850_v34 }
 0xb0d   :  { %8968 = vmatpush3.msk.msra.mxu0 %vm12620_vm11, %v10850_v34  ;;  %v1497_v13 = vpop.permute.xlu1 %1496 }
 0xbcc   :  { %v8966_v44 = vpop.f32.mrf.mxu0 }
 0xbcd   :  { %v1583_v59 = vadd.f32 %v8966_v44, %v1501_v39 }
 0xbce   :  { %v1577_v60 = vpop.f32.mrf.mxu0 }
 0xbcf   :  { %v1587_v0 = vsub.f32 0.0, %v1583_v59  ;;  %v1578_v63 = vadd.f32 %v1577_v60, %v1497_v13 }
 0xbd1   :  { %v1590_v23 = vmul.f32 1.442695, %v1587_v0  ;;  %v1586_v22 = vsub.f32 0.0, %v1578_v63 }
 0xbd3   :  { %9703 = vpow2.f32 %v1590_v23  ;;  %v1588_v58 = vmul.f32 1.442695, %v1586_v22  ;;  %v8522_v23 = vadd.f32 %v10786_v12, %v10784_v53  ;;  %v9852_v12 = vmov 11  }
 0xbd4   :  { %9605 = vset.pattern.permute.xlu1 %v9852_v12 }
 0xbd5   :  { %9705 = vpow2.f32 %v1588_v58 }
 0xbe0   :  { %v9704_v2 = vpop.eup %9703 }
 0xbe1   :  { %v1593_v55 = vadd.f32 1.0, %v9704_v2 }
 0xbe2   :  { %v9706_v52 = vpop.eup %9705 }
 0xbe3   :  { %v1592_v48 = vadd.f32 1.0, %v9706_v52  ;;  %9707 = vrcp.f32 %v1593_v55 }
 0xbe5   :  { %9709 = vrcp.f32 %v1592_v48 }
 0xbf0   :  { %v9708_v40 = vpop.eup %9707 }
 0xbf1   :  { %v1599_v7 = vmul.f32 %v9708_v40, %v10813_v50 }
 0xbf2   :  { %v9710_v5 = vpop.eup %9709 }
 0xbf3   :  { %v1598_v8 = vmul.f32 %v9710_v5, %v10816_v61 }
 0xbf5   :  { %8969 = vmatprep.mubr.msk.f32.mxu0 %vm12741_vm0, %v1598_v8  ;;  %vm12745_vm0 = vmmov %vm12737_vm8 }
 0xbf6   :  { %8970 = vmatmul.mubr.msk.f32.vlgmr.msra.gmra.mxu0 %vm12742_vm14, %v1599_v7  ;;  %vm12746_vm14 = vmmov %vm12745_vm0 }
 0xcb6   :  { %v8971_v39 = vpop.f32.mrf.mxu0 }
 0xcb7   :  { %v1692_v44 = vsub.f32 0.0, %v8971_v39 }
 0xcb8   :  { %v1682_v13 = vpop.f32.mrf.mxu0 }
 0xcb9   :  { %v1694_v59 = vmax.f32 %v10788_v15, %v1692_v44  ;;  %v1691_v60 = vsub.f32 0.0, %v1682_v13 }
 0xcbb   :  { %v1696_v0 = vmin.f32 %v1694_v59, %v8971_v39  ;;  %v1693_v63 = vmax.f32 %v10790_v57, %v1691_v60 }
 0xcbd   :  { %v1698_v61 = vsub.f32 %v10788_v15, %v1696_v0  ;;  %v1695_v22 = vmin.f32 %v1693_v63, %v1682_v13  ;;  %v9853_v0 = vmov 12  }
 0xcbe   :  { %9606 = vset.pattern.permute.xlu0 %v9853_v0 }
 0xcbf   :  { %v10865_v50 = vadd.f32 %v8522_v23, %v1698_v61  ;;  %v1697_v58 = vsub.f32 %v10790_v57, %v1695_v22 }
 0xcc1   :  { %v10869_v2 = vadd.f32 %v10497_v10, %v1697_v58  ;;  %1703 = vadd.xlane.f32.xlu1 %v10865_v50  ;;  %v1708_v55 = vmul.f32 %v10865_v50, %v10865_v50 }
 0xcc3   :  { %1701 = vadd.xlane.f32.xlu0 %v10869_v2  ;;  %v1707_v53 = vmul.f32 %v10869_v2, %v10869_v2 }
 0xcc5   :  { %1711 = vadd.xlane.f32.xlu1 %v1708_v55 }
 0xcc7   :  { %1709 = vadd.xlane.f32.xlu0 %v1707_v53 }
 0xd4a   :  { %v1704_v15 = vpop.xlane.xlu1 %1703 }
 0xd4b   :  { %v1706_v52 = vmul.f32 0.0078125, %v1704_v15 }
 0xd4c   :  { %v1702_v57 = vpop.xlane.xlu0 %1701 }
 0xd4d   :  { %v1705_v48 = vmul.f32 0.0078125, %v1702_v57  ;;  %v1716_v40 = vmul.f32 %v1706_v52, %v1706_v52 }
 0xd4e   :  { %v1712_v10 = vpop.xlane.xlu1 %1711 }
 0xd4f   :  { %v1714_v5 = vmul.f32 0.0078125, %v1712_v10  ;;  %v1715_v7 = vmul.f32 %v1705_v48, %v1705_v48 }
 0xd50   :  { %v1710_v8 = vpop.xlane.xlu0 %1709 }
 0xd51   :  { %v1718_v39 = vsub.f32 %v1714_v5, %v1716_v40  ;;  %v1713_v44 = vmul.f32 0.0078125, %v1710_v8 }
 0xd53   :  { %v1720_v13 = vadd.f32 1e-05, %v1718_v39  ;;  %v1717_v59 = vsub.f32 %v1713_v44, %v1715_v7 }
 0xd55   :  { %9711 = vrsqrt.f32 %v1720_v13  ;;  %v1719_v60 = vadd.f32 1e-05, %v1717_v59 }
 0xd57   :  { %9713 = vrsqrt.f32 %v1719_v60  ;;  %v9854_v60 = vmov 13  }
 0xd62   :  { %v9712_v63 = vpop.eup %9711 }
 0xd63   :  { %v1724_v23 = vmul.f32 %v10804_v43, %v9712_v63 }
 0xd64   :  { %v9714_v61 = vpop.eup %9713 }
 0xd65   :  { %v1738_v22 = vmul.f32 %v1724_v23, %v1706_v52  ;;  %v1723_v58 = vmul.f32 %v10810_v16, %v9714_v61 }
 0xd67   :  { %1743 = vrot.lane.b32.xlu1 %v1738_v22, %s9830_s16  ;;  %v1737_v55 = vmul.f32 %v1723_v58, %v1705_v48 }
 0xd69   :  { %1741 = vrot.lane.b32.xlu0 %v1737_v55, %s9830_s16 }
 0xd6b   :  { %1732 = vperm.xlu1 %9605, %v1724_v23  }
 0xd6f   :  { %1727 = vperm.xlu1 %9605, %v1723_v58  }
 0xd73   :  { %9607 = vset.pattern.permute.xlu1 %v9853_v0 }
 0xdd9   :  { %v1744_v53 = vpop.permute.xlu1 %1743 }
 0xdda   :  { %v1748_v12 = vsub.f32 %v10804_v43, %v1744_v53 }
 0xddb   :  { %v1742_v15 = vpop.permute.xlu0 %1741 }
 0xddc   :  { %v1747_v57 = vsub.f32 %v10810_v16, %v1742_v15  ;;  %1756 = vperm.xlu0 %9606, %v1748_v12  }
 0xdde   :  { %1751 = vperm.xlu1 %9607, %v1747_v57  }
 0xde0   :  { %1854 = vrot.lane.b32.xlu0 %v10822_v6, %s9837_s4 }
 0xde1   :  { %9609 = vset.pattern.permute.xlu0 %v9854_v60 }
 0xde2   :  { %1769 = vrot.lane.b32.xlu1 %v10797_v35, %s9835_s29 }
 0xde3   :  { %9608 = vset.pattern.permute.xlu1 %v9854_v60 }
 0xde6   :  { %1771 = vrot.lane.b32.xlu1 %v10822_v6, %s9835_s29  ;;  %v1733_v52 = vpop.permute.xlu1 %1732 }
 0xde7   :  { %v1736_v10 = vmul.f32 %v1733_v52, %v10865_v50 }
 0xdea   :  { %1852 = vrot.lane.b32.xlu1 %v10797_v35, %s9837_s4  ;;  %v1728_v48 = vpop.permute.xlu1 %1727 }
 0xdeb   :  { %v1735_v5 = vmul.f32 %v1728_v48, %v10869_v2 }
 0xe57   :  { %v1757_v40 = vpop.permute.xlu0 %1756 }
 0xe58   :  { %v1760_v8 = vadd.f32 %v1757_v40, %v1736_v10 }
 0xe59   :  { %v1752_v7 = vpop.permute.xlu1 %1751 }
 0xe5a   :  { %v1762_v39 = vmax.f32 %v1760_v8, 0.0  ;;  %v1759_v44 = vadd.f32 %v1752_v7, %v1735_v5 }
 0xe5b   :  { %v1855_v23 = vpop.permute.xlu0 %1854 }
 0xe5c   :  { %v1761_v13 = vmax.f32 %v1759_v44, 0.0  ;;  %1937 = vrot.lane.b32.xlu1 %v1762_v39, %s9836_s30  ;;  %1765 = vrot.lane.b32.xlu0 %v1762_v39, %s9830_s16 }
 0xe5d   :  { %8972 = vmatprep.subr.mxu0 %v1762_v39  ;;  %v1770_v59 = vpop.permute.xlu1 %1769 }
 0xe5e   :  { %8973 = vmatpush3.msra.mxu0 %v1762_v39  ;;  %8976 = vmatprep.mubr.msk.f32.mxu0 %vm12743_vm13, %v1770_v59  ;;  %vm12747_vm13 = vmmov %vm12745_vm0 }
 0xe5f   :  { %8974 = vmatprep.subr.mxu0 %v1761_v13 }
 0xe60   :  { %8975 = vmatpush3.msra.mxu0 %v1761_v13  ;;  %1763 = vrot.lane.b32.xlu0 %v1761_v13, %s9830_s16 }
 0xe61   :  { %1941 = vrot.lane.b32.xlu1 %v10797_v35, %s9838_s5  ;;  %v1772_v0 = vpop.permute.xlu1 %1771 }
 0xe62   :  { %8977 = vmatmul.mubr.msk.f32.vlgmr.msra.gmra.mxu0 %vm12737_vm8, %v1772_v0  ;;  %vm12748_vm8 = vmmov %vm12745_vm0 }
 0xe64   :  { %1935 = vrot.lane.b32.xlu0 %v1761_v13, %s9836_s30 }
 0xe65   :  { %v1853_v63 = vpop.permute.xlu1 %1852  ;;  %2031 = vperm.xlu1 %9608, %v10804_v43  }
 0xe66   :  { %8983 = vmatprep.mubr.msk.f32.mxu0 %vm12744_vm15, %v1853_v63  ;;  %vm12749_vm15 = vmmov %vm12745_vm0 }
 0xe68   :  { %1943 = vrot.lane.b32.xlu0 %v10822_v6, %s9838_s5 }
 0xe6c   :  { %2027 = vperm.xlu0 %9609, %v10810_v16  }
 0xece   :  { %v1766_v61 = vpop.permute.xlu0 %1765  ;;  %v1938_v22 = vpop.permute.xlu1 %1937 }
 0xecf   :  { %8979 = vmatprep.subr.msk.mxu0 %vm10541_vm2, %v1766_v61 }
 0xed0   :  { %8980 = vmatpush3.msk.msra.mxu0 %vm10541_vm2, %v1766_v61 }
 0xed2   :  { %v1764_v58 = vpop.permute.xlu0 %1763 }
 0xed3   :  { %8981 = vmatprep.subr.msk.mxu0 %vm10541_vm2, %v1764_v58  ;;  %v1942_v55 = vpop.permute.xlu1 %1941 }
 0xed4   :  { %8982 = vmatpush3.msk.msra.mxu0 %vm10541_vm2, %v1764_v58 }
 0xed5   :  { %8984 = vmatmul.mubr.msk.f32.vlgmr.msra.gmra.mxu0 %vm12745_vm0, %v1855_v23  ;;  %8986 = vmatprep.subr.msk.mxu0 %vm10527_vm6, %v1938_v22  ;;  %v9855_v23 = vmov 14  }
 0xed6   :  { %8987 = vmatpush3.msk.msra.mxu0 %vm10527_vm6, %v1938_v22  ;;  %v1936_v53 = vpop.permute.xlu0 %1935  ;;  %8990 = vmatprep.mubr.msk.f32.mxu0 %vm12746_vm14, %v1942_v55  ;;  %vm12750_vm14 = vmmov %vm12745_vm0 }
 0xed7   :  { %8988 = vmatprep.subr.msk.mxu0 %vm10527_vm6, %v1936_v53  ;;  %9610 = vset.pattern.permute.xlu1 %v9855_v23 }
 0xed8   :  { %8989 = vmatpush3.msk.msra.mxu0 %vm10527_vm6, %v1936_v53 }
 0xeda   :  { %v1944_v12 = vpop.permute.xlu0 %1943 }
 0xedb   :  { %8991 = vmatmul.mubr.msk.f32.vlgmr.msra.gmra.mxu0 %vm12747_vm13, %v1944_v12  ;;  %vm12751_vm13 = vmmov %vm12745_vm0 }
 0xee0   :  { %v2032_v5 = vpop.permute.xlu1 %2031 }
 0xee7   :  { %v2028_v44 = vpop.permute.xlu0 %2027 }
 0xf22   :  { %v8978_v15 = vpop.f32.mrf.mxu0 }
 0xf24   :  { %v1843_v57 = vpop.f32.mrf.mxu0 }
 0xf95   :  { %v8985_v52 = vpop.f32.mrf.mxu0 }
 0xf96   :  { %v1932_v10 = vadd.f32 %v8985_v52, %v8978_v15 }
 0xf97   :  { %v1926_v48 = vpop.f32.mrf.mxu0 }
 0xf98   :  { %v1927_v8 = vadd.f32 %v1926_v48, %v1843_v57 }
 0xf9b   :  { %v8992_v40 = vpop.f32.mrf.mxu0 }
 0xf9c   :  { %v2025_v7 = vadd.f32 %v8992_v40, %v1932_v10 }
 0xf9d   :  { %v2015_v39 = vpop.f32.mrf.mxu0 }
 0xf9e   :  { %v2035_v13 = vadd.f32 %v2032_v5, %v2025_v7  ;;  %v2024_v59 = vadd.f32 %v2015_v39, %v1927_v8  ;;  %v9856_v7 = vmov 15  }
 0xf9f   :  { %9611 = vset.pattern.permute.xlu0 %v9856_v7 }
 0xfa0   :  { %v2034_v60 = vadd.f32 %v2028_v44, %v2024_v59  ;;  %2038 = vadd.xlane.f32.xlu1 %v2035_v13  ;;  %v2043_v0 = vmul.f32 %v2035_v13, %v2035_v13 }
 0xfa2   :  { %2036 = vadd.xlane.f32.xlu0 %v2034_v60  ;;  %v2042_v63 = vmul.f32 %v2034_v60, %v2034_v60 }
 0xfa4   :  { %2046 = vadd.xlane.f32.xlu1 %v2043_v0 }
 0xfa6   :  { %2044 = vadd.xlane.f32.xlu0 %v2042_v63 }
0x1029   :  { %v2039_v61 = vpop.xlane.xlu1 %2038 }
0x102a   :  { %v2041_v22 = vmul.f32 0.0078125, %v2039_v61 }
0x102b   :  { %v2037_v58 = vpop.xlane.xlu0 %2036 }
0x102c   :  { %v2040_v55 = vmul.f32 0.0078125, %v2037_v58  ;;  %v2051_v12 = vmul.f32 %v2041_v22, %v2041_v22 }
0x102d   :  { %v2047_v53 = vpop.xlane.xlu1 %2046 }
0x102e   :  { %v2049_v15 = vmul.f32 0.0078125, %v2047_v53  ;;  %v2050_v52 = vmul.f32 %v2040_v55, %v2040_v55 }
0x102f   :  { %v2045_v57 = vpop.xlane.xlu0 %2044 }
0x1030   :  { %v2053_v48 = vsub.f32 %v2049_v15, %v2051_v12  ;;  %v2048_v10 = vmul.f32 0.0078125, %v2045_v57 }
0x1032   :  { %v2055_v40 = vadd.f32 1e-05, %v2053_v48  ;;  %v2052_v5 = vsub.f32 %v2048_v10, %v2050_v52 }
0x1034   :  { %9715 = vrsqrt.f32 %v2055_v40  ;;  %v2054_v8 = vadd.f32 1e-05, %v2052_v5 }
0x1036   :  { %9717 = vrsqrt.f32 %v2054_v8 }
0x1041   :  { %v9716_v39 = vpop.eup %9715 }
0x1042   :  { %v2059_v44 = vmul.f32 %v10804_v43, %v9716_v39  ;;  %v9857_v39 = vmov 16  }
0x1043   :  { %v9718_v59 = vpop.eup %9717 }
0x1044   :  { %v2073_v0 = vmul.f32 %v2059_v44, %v2041_v22  ;;  %v2058_v63 = vmul.f32 %v10810_v16, %v9718_v59 }
0x1046   :  { %2078 = vrot.lane.b32.xlu1 %v2073_v0, %s9830_s16  ;;  %v2072_v23 = vmul.f32 %v2058_v63, %v2040_v55 }
0x1048   :  { %2076 = vrot.lane.b32.xlu0 %v2072_v23, %s9830_s16 }
0x104a   :  { %2067 = vperm.xlu1 %9610, %v2059_v44  }
0x104e   :  { %2062 = vperm.xlu1 %9610, %v2058_v63   ;;  %v12752_v63 = vmov 0.015625  }
0x1052   :  { %9612 = vset.pattern.permute.xlu1 %v9856_v7 }
0x10b8   :  { %v2079_v61 = vpop.permute.xlu1 %2078 }
0x10b9   :  { %v2083_v58 = vsub.f32 %v10804_v43, %v2079_v61 }
0x10ba   :  { %v2077_v53 = vpop.permute.xlu0 %2076 }
0x10bb   :  { %v2082_v12 = vsub.f32 %v10810_v16, %v2077_v53  ;;  %2091 = vperm.xlu0 %9611, %v2083_v58   ;;  %v12776_v53 = vld [vmem:[#allocation9_spill] sm:$0xff] }
0x10bc   :  { %vm12777_vm11 = vnez %v12776_v53 }
0x10bd   :  { %2086 = vperm.xlu1 %9612, %v2082_v12   ;;  %v12778_v12 = vld [vmem:[#allocation10_spill] sm:$0xff] }
0x10bf   :  { %2187 = vrot.lane.b32.xlu0 %v10797_v35, %s9844_s7 }
0x10c0   :  { %9614 = vset.pattern.permute.xlu0 %v9857_v39 }
0x10c1   :  { %2104 = vrot.lane.b32.xlu1 %v10797_v35, %s9842_s6 }
0x10c2   :  { %9613 = vset.pattern.permute.xlu1 %v9857_v39 }
0x10c5   :  { %2106 = vrot.lane.b32.xlu1 %v10822_v6, %s9842_s6  ;;  %v2068_v22 = vpop.permute.xlu1 %2067 }
0x10c6   :  { %v2071_v15 = vmul.f32 %v2068_v22, %v2035_v13  ;;  %v12780_v22 = vld [vmem:[#allocation11_spill] sm:$0xff] }
0x10c9   :  { %2189 = vrot.lane.b32.xlu1 %v10822_v6, %s9844_s7  ;;  %v2063_v55 = vpop.permute.xlu1 %2062 }
0x10ca   :  { %v2070_v52 = vmul.f32 %v2063_v55, %v2034_v60  ;;  %v11172_v55 = vld [vmem:[%s12535_s2 + $0x10] sm:$0xff] }
0x1136   :  { %v2092_v57 = vpop.permute.xlu0 %2091 }
0x1137   :  { %v2095_v48 = vadd.f32 %v2092_v57, %v2071_v15  ;;  %v9858_v15 = vmov 17  }
0x1138   :  { %v2087_v10 = vpop.permute.xlu1 %2086 }
0x1139   :  { %v2097_v40 = vmax.f32 %v2095_v48, 0.0  ;;  %v2094_v5 = vadd.f32 %v2087_v10, %v2070_v52  ;;  %v11187_v48 = vld [vmem:[%s12535_s2 + $0x48] sm:$0xff] }
0x113a   :  { %v2188_v13 = vpop.permute.xlu0 %2187 }
0x113b   :  { %v2096_v8 = vmax.f32 %v2094_v5, 0.0  ;;  %2272 = vrot.lane.b32.xlu1 %v2097_v40, %s9836_s30  ;;  %2100 = vrot.lane.b32.xlu0 %v2097_v40, %s9830_s16 }
0x113c   :  { %8993 = vmatprep.subr.mxu0 %v2097_v40  ;;  %v2105_v7 = vpop.permute.xlu1 %2104 }
0x113d   :  { %8994 = vmatpush3.msra.mxu0 %v2097_v40  ;;  %8997 = vmatprep.mubr.msk.f32.mxu0 %vm12748_vm8, %v2105_v7  ;;  %vm12760_vm8 = vnez %v12734_v45 }
0x113e   :  { %8995 = vmatprep.subr.mxu0 %v2096_v8 }
0x113f   :  { %8996 = vmatpush3.msra.mxu0 %v2096_v8  ;;  %2098 = vrot.lane.b32.xlu0 %v2096_v8, %s9830_s16 }
0x1140   :  { %2276 = vrot.lane.b32.xlu1 %v10797_v35, %s9845_s8  ;;  %v2107_v60 = vpop.permute.xlu1 %2106 }
0x1141   :  { %8998 = vmatmul.mubr.msk.f32.vlgmr.msra.gmra.mxu0 %vm12749_vm15, %v2107_v60  ;;  %vm12761_vm15 = vnez %v12736_v49 }
0x1142   :  { %9004 = vmatprep.mubr.msk.f32.mxu0 %vm12745_vm0, %v2188_v13 }
0x1143   :  { %2270 = vrot.lane.b32.xlu0 %v2096_v8, %s9836_s30 }
0x1144   :  { %2362 = vperm.xlu1 %9613, %v10810_v16   ;;  %v2190_v44 = vpop.permute.xlu1 %2189 }
0x1147   :  { %2278 = vrot.lane.b32.xlu0 %v10822_v6, %s9845_s8 }
0x1148   :  { %9615 = vset.pattern.permute.xlu1 %v9858_v15 }
0x1149   :  { %2455 = vperm.xlu1 %9615, %v10804_v43  }
0x114b   :  { %2366 = vperm.xlu0 %9614, %v10804_v43  }
0x114d   :  { %2451 = vperm.xlu1 %9615, %v10810_v16  }
0x11ad   :  { %v2273_v59 = vpop.permute.xlu1 %2272  ;;  %v2101_v0 = vpop.permute.xlu0 %2100 }
0x11ae   :  { %9000 = vmatprep.subr.msk.mxu0 %vm10541_vm2, %v2101_v0  ;;  %9007 = vmatprep.subr.msk.mxu1 %vm10527_vm6, %v2273_v59 }
0x11af   :  { %9001 = vmatpush3.msk.msra.mxu0 %vm10541_vm2, %v2101_v0  ;;  %9008 = vmatpush3.msk.msra.mxu1 %vm10527_vm6, %v2273_v59 }
0x11b1   :  { %v2099_v35 = vpop.permute.xlu0 %2098 }
0x11b2   :  { %9002 = vmatprep.subr.msk.mxu0 %vm10541_vm2, %v2099_v35  ;;  %v2277_v6 = vpop.permute.xlu1 %2276 }
0x11b3   :  { %9003 = vmatpush3.msk.msra.mxu0 %vm10541_vm2, %v2099_v35  ;;  %9011 = vmatprep.mubr.msk.f32.mxu1 %vm12750_vm14, %v2277_v6  ;;  %vm12765_vm14 = vnez %v12649_v20  ;;  %v9859_v6 = vmov 18  }
0x11b4   :  { %9005 = vmatmul.mubr.msk.f32.vlgmr.msra.gmra.mxu0 %vm12751_vm13, %v2190_v44  ;;  %9014 = vmatprep.subr.msk.mxu0 %vm10560_vm4, %v12752_v63  ;;  %vm12766_vm13 = vnez %v12651_v25 }
0x11b5   :  { %v2271_v23 = vpop.permute.xlu0 %2270  ;;  %9015 = vmatpush3.msk.msra.mxu0 %vm10560_vm4, %v12752_v63  ;;  %vm12753_vm4 = vmmov %vm12745_vm0  ;;  %vm12763_vm0 = vnez %v12645_v1  ;;  %9616 = vset.pattern.permute.xlu1 %v9859_v6  ;;  %v9864_v1 = vmov 23  }
0x11b6   :  { %9009 = vmatprep.subr.msk.mxu1 %vm10527_vm6, %v2271_v23  ;;  %9016 = vmatprep.subr.msk.mxu0 %vm10573_vm3, %v12752_v63 }
0x11b7   :  { %9010 = vmatpush3.msk.msra.mxu1 %vm10527_vm6, %v2271_v23  ;;  %9017 = vmatpush3.msk.msra.mxu0 %vm10573_vm3, %v12752_v63  ;;  %vm12754_vm3 = vnez %v12720_v31 }
0x11b8   :  { %9018 = vmatprep.subr.msk.mxu0 %vm10589_vm5, %v12752_v63 }
0x11b9   :  { %v2279_v19 = vpop.permute.xlu0 %2278  ;;  %9019 = vmatpush3.msk.msra.mxu0 %vm10589_vm5, %v12752_v63  ;;  %vm12755_vm5 = vnez %v12722_v24 }
0x11ba   :  { %9012 = vmatmul.mubr.msk.f32.vlgmr.msra.gmra.mxu1 %vm12753_vm4, %v2279_v19  ;;  %9020 = vmatprep.subr.msk.mxu0 %vm10604_vm9, %v12752_v63  ;;  %vm12767_vm4 = vnez %v12653_v28 }
0x11bb   :  { %9021 = vmatpush3.msk.msra.mxu0 %vm10604_vm9, %v12752_v63  ;;  %vm12758_vm9 = vnez %v12728_v32 }
0x11bc   :  { %9022 = vmatprep.subr.msk.mxu0 %vm10618_vm1, %v12752_v63 }
0x11bd   :  { %9023 = vmatpush3.msk.msra.mxu0 %vm10618_vm1, %v12752_v63  ;;  %vm12759_vm1 = vnez %v12730_v37 }
0x11be   :  { %9024 = vmatprep.subr.msk.mxu0 %vm10632_vm12, %v12752_v63 }
0x11bf   :  { %9025 = vmatpush3.msk.msra.mxu0 %vm10632_vm12, %v12752_v63  ;;  %vm12756_vm12 = vnez %v12724_v27  ;;  %v2363_v37 = vpop.permute.xlu1 %2362 }
0x11c0   :  { %9026 = vmatprep.subr.msk.mxu0 %vm10646_vm10, %v12752_v63 }
0x11c1   :  { %9027 = vmatpush3.msk.msra.mxu0 %vm10646_vm10, %v12752_v63  ;;  %vm12757_vm10 = vnez %v12726_v36 }
0x11c2   :  { %9028 = vmatprep.subr.msk.mxu0 %vm12754_vm3, %v12752_v63 }
0x11c3   :  { %9029 = vmatpush3.msk.msra.mxu0 %vm12754_vm3, %v12752_v63  ;;  %vm12768_vm3 = vnez %v12655_v30 }
0x11c4   :  { %9030 = vmatprep.subr.msk.mxu0 %vm12755_vm5, %v12752_v63  ;;  %v2456_v10 = vpop.permute.xlu1 %2455 }
0x11c5   :  { %9031 = vmatpush3.msk.msra.mxu0 %vm12755_vm5, %v12752_v63  ;;  %vm12769_vm5 = vnez %v12657_v33 }
0x11c6   :  { %9032 = vmatprep.subr.msk.mxu0 %vm12756_vm12, %v12752_v63  ;;  %v2367_v36 = vpop.permute.xlu0 %2366 }
0x11c7   :  { %9033 = vmatpush3.msk.msra.mxu0 %vm12756_vm12, %v12752_v63  ;;  %vm12770_vm12 = vnez %v12660_v38 }
0x11c8   :  { %9034 = vmatprep.subr.msk.mxu0 %vm12757_vm10, %v12752_v63  ;;  %v2452_v8 = vpop.permute.xlu1 %2451 }
0x11c9   :  { %9035 = vmatpush3.msk.msra.mxu0 %vm12757_vm10, %v12752_v63  ;;  %vm12771_vm10 = vnez %v12663_v42 }
0x11ca   :  { %9036 = vmatprep.subr.msk.mxu0 %vm12758_vm9, %v12752_v63 }
0x11cb   :  { %9037 = vmatpush3.msk.msra.mxu0 %vm12758_vm9, %v12752_v63  ;;  %vm12772_vm9 = vnez %v12666_v46 }
0x11cc   :  { %9038 = vmatprep.subr.msk.mxu0 %vm12759_vm1, %v12752_v63 }
0x11cd   :  { %9039 = vmatpush3.msk.msra.mxu0 %vm12759_vm1, %v12752_v63  ;;  %vm12773_vm1 = vnez %v12669_v51 }
0x11ce   :  { %9040 = vmatprep.subr.msk.mxu0 %vm10746_vm7, %v12752_v63 }
0x11cf   :  { %9041 = vmatpush3.msk.msra.mxu0 %vm10746_vm7, %v12752_v63  ;;  %vm12764_vm7 = vnez %v12647_v17 }
0x11d0   :  { %9042 = vmatprep.subr.msk.mxu0 %vm12760_vm8, %v12752_v63 }
0x11d1   :  { %9043 = vmatpush3.msk.msra.mxu0 %vm12760_vm8, %v12752_v63  ;;  %vm12774_vm8 = vnez %v12672_v54 }
0x11d2   :  { %9044 = vmatprep.subr.msk.mxu0 %vm12761_vm15, %v12752_v63 }
0x11d3   :  { %9045 = vmatpush3.msk.msra.mxu0 %vm12761_vm15, %v12752_v63  ;;  %vm12775_vm15 = vnez %v12675_v56 }
0x11d4   :  { %9124 = vmatprep.subr.msk.mxu0 %vm12763_vm0, %v12762_v62 }
0x1201   :  { %v8999_v3 = vpop.f32.mrf.mxu0 }
0x1203   :  { %v2178_v18 = vpop.f32.mrf.mxu0 }
0x1274   :  { %v9006_v21 = vpop.f32.mrf.mxu0 }
0x1275   :  { %v2267_v29 = vadd.f32 %v9006_v21, %v8999_v3 }
0x1276   :  { %v2261_v26 = vpop.f32.mrf.mxu0 }
0x1277   :  { %v2262_v24 = vadd.f32 %v2261_v26, %v2178_v18 }
0x127a   :  { %v9013_v31 = vpop.f32.mrf.mxu1 }
0x127b   :  { %v2360_v27 = vadd.f32 %v9013_v31, %v2267_v29 }
0x127c   :  { %v2350_v32 = vpop.f32.mrf.mxu1 }
0x127d   :  { %v2359_v41 = vadd.f32 %v2350_v32, %v2262_v24  ;;  %v11070_v45 = vadd.f32 %v2367_v36, %v2360_v27 }
0x127f   :  { %v11072_v49 = vadd.f32 %v2363_v37, %v2359_v41  ;;  %v2372_v58 = vand.u32 2147483647, %v11070_v45  ;;  %v9860_v41 = vmov 19  }
0x1280   :  { %9617 = vset.pattern.permute.xlu0 %v9860_v41 }
0x1281   :  { %v2371_v61 = vand.u32 2147483647, %v11072_v49 }
0x1283   :  { %9046 = vmatprep.mubr.f32.mxu0 %v2371_v61 }
0x1284   :  { %9047 = vmatmul.mubr.f32.vlgmr.msra.gmra.mxu0 %v2372_v58 }
0x1285   :  { %9125 = vmatpush3.msk.msra.mxu0 %vm12763_vm0, %v12762_v62 }
0x1286   :  { %9126 = vmatprep.subr.msk.mxu0 %vm12764_vm7, %v12762_v62 }
0x1287   :  { %9127 = vmatpush3.msk.msra.mxu0 %vm12764_vm7, %v12762_v62 }
0x1288   :  { %9128 = vmatprep.subr.msk.mxu0 %vm12765_vm14, %v12762_v62 }
0x1289   :  { %9129 = vmatpush3.msk.msra.mxu0 %vm12765_vm14, %v12762_v62 }
0x128a   :  { %9130 = vmatprep.subr.msk.mxu0 %vm12766_vm13, %v12762_v62 }
0x128b   :  { %9131 = vmatpush3.msk.msra.mxu0 %vm12766_vm13, %v12762_v62 }
0x128c   :  { %9132 = vmatprep.subr.msk.mxu0 %vm12767_vm4, %v12762_v62 }
0x128d   :  { %9133 = vmatpush3.msk.msra.mxu0 %vm12767_vm4, %v12762_v62 }
0x128e   :  { %9134 = vmatprep.subr.msk.mxu0 %vm12768_vm3, %v12762_v62 }
0x128f   :  { %9135 = vmatpush3.msk.msra.mxu0 %vm12768_vm3, %v12762_v62 }
0x1290   :  { %9136 = vmatprep.subr.msk.mxu0 %vm12769_vm5, %v12762_v62 }
0x1291   :  { %9137 = vmatpush3.msk.msra.mxu0 %vm12769_vm5, %v12762_v62 }
0x1292   :  { %9138 = vmatprep.subr.msk.mxu0 %vm12770_vm12, %v12762_v62 }
0x1293   :  { %9139 = vmatpush3.msk.msra.mxu0 %vm12770_vm12, %v12762_v62 }
0x1294   :  { %9140 = vmatprep.subr.msk.mxu0 %vm12771_vm10, %v12762_v62 }
0x1295   :  { %9141 = vmatpush3.msk.msra.mxu0 %vm12771_vm10, %v12762_v62 }
0x1296   :  { %9142 = vmatprep.subr.msk.mxu0 %vm12772_vm9, %v12762_v62 }
0x1297   :  { %9143 = vmatpush3.msk.msra.mxu0 %vm12772_vm9, %v12762_v62 }
0x1298   :  { %9144 = vmatprep.subr.msk.mxu0 %vm12773_vm1, %v12762_v62 }
0x1299   :  { %9145 = vmatpush3.msk.msra.mxu0 %vm12773_vm1, %v12762_v62  ;;  %vm12779_vm1 = vnez %v12778_v12 }
0x129a   :  { %9146 = vmatprep.subr.msk.mxu0 %vm12774_vm8, %v12762_v62 }
0x129b   :  { %9147 = vmatpush3.msk.msra.mxu0 %vm12774_vm8, %v12762_v62  ;;  %vm12781_vm8 = vnez %v12780_v22 }
0x129c   :  { %9148 = vmatprep.subr.msk.mxu0 %vm12775_vm15, %v12762_v62 }
0x129d   :  { %9149 = vmatpush3.msk.msra.mxu0 %vm12775_vm15, %v12762_v62 }
0x129e   :  { %9150 = vmatprep.subr.msk.mxu0 %vm12777_vm11, %v12762_v62 }
0x129f   :  { %9151 = vmatpush3.msk.msra.mxu0 %vm12777_vm11, %v12762_v62  ;;  %vm12782_vm11 = vcmask 130048  }
0x12a0   :  { %9152 = vmatprep.subr.msk.mxu0 %vm12779_vm1, %v12762_v62  ;;  %9053 = vmatprep.mubr.msk.f32.mxu1 %vm12782_vm11, %v11172_v55 }
0x12a1   :  { %9153 = vmatpush3.msk.msra.mxu0 %vm12779_vm1, %v12762_v62 }
0x12a2   :  { %9154 = vmatprep.subr.msk.mxu0 %vm12781_vm8, %v12762_v62 }
0x12a3   :  { %9155 = vmatpush3.msk.msra.mxu0 %vm12781_vm8, %v12762_v62  ;;  %vm12783_vm8 = vcmask 15360  }
0x12a4   :  { %vm12784_vm1 = vmmov %vm12783_vm8 }
0x12a5   :  { %vm12785_vm15 = vmmov %vm12784_vm1 }
0x12a6   :  { %vm12786_vm9 = vmmov %vm12784_vm1 }
0x1344   :  { %v11178_v57 = vpop.f32.mrf.mxu0 }
0x1345   :  { %9049 = vmatprep.subr.mxu1 %v11178_v57 }
0x1346   :  { %v11181_v52 = vpop.f32.mrf.mxu0  ;;  %9050 = vmatpush3.msra.mxu1 %v11178_v57 }
0x1347   :  { %9051 = vmatprep.subr.mxu1 %v11181_v52 }
0x1348   :  { %9052 = vmatpush3.msra.mxu1 %v11181_v52 }
0x1349   :  { %9054 = vmatmul.mubr.msk.f32.vlgmr.msra.gmra.mxu1 %vm12782_vm11, %v11187_v48 }
0x1409   :  { %v9055_v40 = vpop.f32.mrf.mxu1 }
0x140a   :  { %v2536_v5 = vadd.f32 %v9055_v40, %v2456_v10 }
0x140b   :  { %v2530_v7 = vpop.f32.mrf.mxu1 }
0x140c   :  { %v2531_v39 = vadd.f32 %v2530_v7, %v2452_v8  ;;  %v2542_v13 = vsel %vm12783_vm8, %v2536_v5, 0.0  ;;  %v2548_v60 = vmul.f32 %v2536_v5, %v2536_v5  ;;  %vm12789_vm8 = vcmask 1041408  }
0x140d   :  { %2543 = vadd.xlane.f32.xlu0 %v2542_v13 }
0x140e   :  { %v2539_v44 = vsel %vm12784_vm1, %v2531_v39, 0.0  ;;  %v2552_v59 = vsel %vm12785_vm15, %v2548_v60, 0.0  ;;  %v2547_v0 = vmul.f32 %v2531_v39, %v2531_v39  ;;  %vm12790_vm15 = vmmov %vm12789_vm8 }
0x140f   :  { %2540 = vadd.xlane.f32.xlu1 %v2539_v44 }
0x1410   :  { %v2549_v35 = vsel %vm12786_vm9, %v2547_v0, 0.0  ;;  %vm12787_vm9 = vmmov %vm12782_vm11  ;;  %vm12791_vm11 = vcmask 15360  }
0x1411   :  { %2553 = vadd.xlane.f32.xlu0 %v2552_v59  ;;  %v9861_v59 = vmov 20   ;;  %vm12788_vm1 = vmmov %vm12787_vm9 }
0x1415   :  { %2550 = vadd.xlane.f32.xlu0 %v2549_v35 }
0x1496   :  { %v2544_v63 = vpop.xlane.xlu0 %2543 }
0x1497   :  { %v2546_v23 = vmul.f32 0.5, %v2544_v63 }
0x1498   :  { %v2541_v19 = vpop.xlane.xlu1 %2540 }
0x1499   :  { %v2558_v18 = vmul.f32 %v2546_v23, %v2546_v23  ;;  %v2545_v21 = vmul.f32 0.5, %v2541_v19 }
0x149a   :  { %v2554_v3 = vpop.xlane.xlu0 %2553 }
0x149b   :  { %v2556_v26 = vmul.f32 0.5, %v2554_v3  ;;  %v2557_v24 = vmul.f32 %v2545_v21, %v2545_v21 }
0x149d   :  { %v2560_v29 = vsub.f32 %v2556_v26, %v2558_v18 }
0x149e   :  { %v2551_v31 = vpop.xlane.xlu0 %2550 }
0x149f   :  { %v2562_v27 = vadd.f32 1e-05, %v2560_v29  ;;  %v2555_v36 = vmul.f32 0.5, %v2551_v31 }
0x14a1   :  { %9719 = vrsqrt.f32 %v2562_v27  ;;  %v2559_v32 = vsub.f32 %v2555_v36, %v2557_v24 }
0x14a3   :  { %v2561_v37 = vadd.f32 1e-05, %v2559_v32 }
0x14a5   :  { %9721 = vrsqrt.f32 %v2561_v37 }
0x14ae   :  { %v9720_v61 = vpop.eup %9719 }
0x14af   :  { %v2566_v58 = vmul.f32 %v10804_v43, %v9720_v61 }
0x14b1   :  { %v2580_v15 = vmul.f32 %v2566_v58, %v2546_v23 }
0x14b2   :  { %v9722_v10 = vpop.eup %9721 }
0x14b3   :  { %2585 = vrot.lane.b32.xlu1 %v2580_v15, %s9830_s16  ;;  %v2565_v40 = vmul.f32 %v10810_v16, %v9722_v10 }
0x14b5   :  { %v2579_v8 = vmul.f32 %v2565_v40, %v2545_v21 }
0x14b7   :  { %2574 = vperm.xlu1 %9616, %v2566_v58   ;;  %2583 = vrot.lane.b32.xlu0 %v2579_v8, %s9830_s16 }
0x14bb   :  { %2569 = vperm.xlu1 %9616, %v2565_v40  }
0x14bf   :  { %9618 = vset.pattern.permute.xlu1 %v9860_v41 }
0x1525   :  { %v2586_v7 = vpop.permute.xlu1 %2585 }
0x1526   :  { %v2590_v13 = vsub.f32 %v10804_v43, %v2586_v7 }
0x1528   :  { %2598 = vperm.xlu0 %9617, %v2590_v13  }
0x1529   :  { %v2584_v60 = vpop.permute.xlu0 %2583 }
0x152a   :  { %v2589_v44 = vsub.f32 %v10810_v16, %v2584_v60 }
0x152c   :  { %2593 = vperm.xlu1 %9618, %v2589_v44   ;;  %2615 = vrot.lane.b32.xlu0 %v11187_v48, %s9832_s0 }
0x152d   :  { %9620 = vset.pattern.permute.xlu0 %v9861_v59 }
0x1530   :  { %2613 = vrot.lane.b32.xlu1 %v11172_v55, %s9832_s0  ;;  %2610 = vperm.xlu0 %9620, %v10804_v43  }
0x1531   :  { %9619 = vset.pattern.permute.xlu1 %v9861_v59 }
0x1532   :  { %v2575_v0 = vpop.permute.xlu1 %2574 }
0x1533   :  { %v2578_v35 = vmul.f32 %v2575_v0, %v2536_v5 }
0x1534   :  { %2606 = vperm.xlu1 %9619, %v10810_v16  }
0x1536   :  { %v2570_v6 = vpop.permute.xlu1 %2569 }
0x1537   :  { %v2577_v19 = vmul.f32 %v2570_v6, %v2531_v39 }
0x15a3   :  { %v2599_v63 = vpop.permute.xlu0 %2598 }
0x15a4   :  { %v2602_v23 = vadd.f32 %v2599_v63, %v2578_v35 }
0x15a6   :  { %v2604_v3 = vmax.f32 %v2602_v23, 0.0 }
0x15a7   :  { %v2594_v18 = vpop.permute.xlu1 %2593  ;;  %v2616_v31 = vpop.permute.xlu0 %2615 }
0x15a8   :  { %v2601_v21 = vadd.f32 %v2594_v18, %v2577_v19  ;;  %9056 = vmatprep.subr.mxu1 %v2604_v3  ;;  %v9862_v18 = vmov 21  }
0x15a9   :  { %9057 = vmatpush3.msra.mxu1 %v2604_v3  ;;  %9621 = vset.pattern.permute.xlu1 %v9862_v18 }
0x15aa   :  { %v2603_v26 = vmax.f32 %v2601_v21, 0.0 }
0x15ab   :  { %v2614_v29 = vpop.permute.xlu1 %2613  ;;  %v2611_v43 = vpop.permute.xlu0 %2610 }
0x15ac   :  { %9058 = vmatprep.subr.mxu1 %v2603_v26  ;;  %9060 = vmatprep.mubr.msk.f32.mxu1 %vm12787_vm9, %v2614_v29  ;;  %vm12792_vm9 = vmmov %vm12791_vm11 }
0x15ad   :  { %9059 = vmatpush3.msra.mxu1 %v2603_v26 }
0x15ae   :  { %9061 = vmatmul.mubr.msk.f32.vlgmr.msra.gmra.mxu1 %vm12788_vm1, %v2616_v31  ;;  %9063 = vmatprep.subr.msk.mxu1 %vm12789_vm8, %v10850_v34  ;;  %vm12793_vm8 = vmmov %vm12788_vm1 }
0x15af   :  { %9064 = vmatpush3.msk.msra.mxu1 %vm12790_vm15, %v10850_v34  ;;  %v2607_v5 = vpop.permute.xlu1 %2606  ;;  %vm12794_vm15 = vmmov %vm12788_vm1 }
0x166e   :  { %v9062_v16 = vpop.f32.mrf.mxu1 }
0x166f   :  { %v2693_v39 = vadd.f32 %v9062_v16, %v2611_v43 }
0x1670   :  { %v2687_v24 = vpop.f32.mrf.mxu1 }
0x1671   :  { %v2697_v27 = vsub.f32 0.0, %v2693_v39  ;;  %v2688_v36 = vadd.f32 %v2687_v24, %v2607_v5 }
0x1673   :  { %v2700_v32 = vmul.f32 1.442695, %v2697_v27  ;;  %v2696_v37 = vsub.f32 0.0, %v2688_v36 }
0x1675   :  { %9723 = vpow2.f32 %v2700_v32  ;;  %v2698_v41 = vmul.f32 1.442695, %v2696_v37  ;;  %v9863_v32 = vmov 22  }
0x1676   :  { %9622 = vset.pattern.permute.xlu0 %v9863_v32 }
0x1677   :  { %9725 = vpow2.f32 %v2698_v41  ;;  %v11238_v41 = vld [vmem:[%s12536_s1 + $0x8] sm:$0xff] }
0x1682   :  { %v9724_v61 = vpop.eup %9723 }
0x1683   :  { %v2703_v58 = vadd.f32 1.0, %v9724_v61 }
0x1684   :  { %v9726_v15 = vpop.eup %9725 }
0x1685   :  { %v2702_v10 = vadd.f32 1.0, %v9726_v15  ;;  %9727 = vrcp.f32 %v2703_v58 }
0x1687   :  { %9729 = vrcp.f32 %v2702_v10  ;;  %v11244_v10 = vld [vmem:[%s12536_s1] sm:$0xff] }
0x1692   :  { %v9728_v40 = vpop.eup %9727 }
0x1693   :  { %v2709_v7 = vmul.f32 %v9728_v40, %v11178_v57 }
0x1694   :  { %v9730_v34 = vpop.eup %9729 }
0x1695   :  { %v2708_v8 = vmul.f32 %v9730_v34, %v11181_v52 }
0x1697   :  { %9065 = vmatprep.mubr.msk.f32.mxu1 %vm12791_vm11, %v2708_v8  ;;  %vm12795_vm11 = vmmov %vm12788_vm1 }
0x1698   :  { %9066 = vmatmul.mubr.msk.f32.vlgmr.msra.gmra.mxu1 %vm12792_vm9, %v2709_v7  ;;  %vm12796_vm9 = vmmov %vm12788_vm1 }
0x1758   :  { %v9067_v13 = vpop.f32.mrf.mxu1 }
0x1759   :  { %v2792_v60 = vsub.f32 0.0, %v9067_v13 }
0x175a   :  { %v2782_v44 = vpop.f32.mrf.mxu1 }
0x175b   :  { %v2794_v59 = vmax.f32 %v11070_v45, %v2792_v60  ;;  %v2791_v0 = vsub.f32 0.0, %v2782_v44 }
0x175d   :  { %v2796_v35 = vmin.f32 %v2794_v59, %v9067_v13  ;;  %v2793_v6 = vmax.f32 %v11072_v49, %v2791_v0 }
0x175f   :  { %v2798_v63 = vsub.f32 %v11070_v45, %v2796_v35  ;;  %v2795_v23 = vmin.f32 %v2793_v6, %v2782_v44 }
0x1761   :  { %v11223_v52 = vadd.f32 %v2798_v63, %v10865_v50  ;;  %v2797_v57 = vsub.f32 %v11072_v49, %v2795_v23 }
0x1763   :  { %v11227_v19 = vadd.f32 %v2797_v57, %v10869_v2  ;;  %2803 = vadd.xlane.f32.xlu1 %v11223_v52  ;;  %v2808_v3 = vmul.f32 %v11223_v52, %v11223_v52 }
0x1765   :  { %2801 = vadd.xlane.f32.xlu0 %v11227_v19  ;;  %v2807_v45 = vmul.f32 %v11227_v19, %v11227_v19 }
0x1767   :  { %2811 = vadd.xlane.f32.xlu1 %v2808_v3 }
0x1769   :  { %2809 = vadd.xlane.f32.xlu0 %v2807_v45 }
0x17ec   :  { %v2804_v50 = vpop.xlane.xlu1 %2803 }
0x17ed   :  { %v2806_v21 = vmul.f32 0.0078125, %v2804_v50 }
0x17ee   :  { %v2802_v49 = vpop.xlane.xlu0 %2801 }
0x17ef   :  { %v2805_v26 = vmul.f32 0.0078125, %v2802_v49  ;;  %v2816_v29 = vmul.f32 %v2806_v21, %v2806_v21 }
0x17f0   :  { %v2812_v2 = vpop.xlane.xlu1 %2811 }
0x17f1   :  { %v2814_v31 = vmul.f32 0.0078125, %v2812_v2  ;;  %v2815_v16 = vmul.f32 %v2805_v26, %v2805_v26 }
0x17f2   :  { %v2810_v43 = vpop.xlane.xlu0 %2809 }
0x17f3   :  { %v2818_v5 = vsub.f32 %v2814_v31, %v2816_v29  ;;  %v2813_v39 = vmul.f32 0.0078125, %v2810_v43 }
0x17f5   :  { %v2820_v24 = vadd.f32 1e-05, %v2818_v5  ;;  %v2817_v27 = vsub.f32 %v2813_v39, %v2815_v16 }
0x17f7   :  { %9731 = vrsqrt.f32 %v2820_v24  ;;  %v2819_v36 = vadd.f32 1e-05, %v2817_v27 }
0x17f9   :  { %9733 = vrsqrt.f32 %v2819_v36 }
0x1804   :  { %v9732_v37 = vpop.eup %9731 }
0x1805   :  { %v2824_v61 = vmul.f32 %v11238_v41, %v9732_v37 }
0x1806   :  { %v9734_v58 = vpop.eup %9733 }
0x1807   :  { %v2838_v15 = vmul.f32 %v2824_v61, %v2806_v21  ;;  %v2823_v40 = vmul.f32 %v11244_v10, %v9734_v58 }
0x1809   :  { %2843 = vrot.lane.b32.xlu1 %v2838_v15, %s9830_s16  ;;  %v2837_v34 = vmul.f32 %v2823_v40, %v2805_v26 }
0x180b   :  { %2841 = vrot.lane.b32.xlu0 %v2837_v34, %s9830_s16  ;;  %v9865_v34 = vmov 24  }
0x180d   :  { %2832 = vperm.xlu1 %9621, %v2824_v61  }
0x1811   :  { %2827 = vperm.xlu1 %9621, %v2823_v40  }
0x1815   :  { %9623 = vset.pattern.permute.xlu1 %v9863_v32 }
0x187b   :  { %v2844_v8 = vpop.permute.xlu1 %2843 }
0x187c   :  { %v2848_v7 = vsub.f32 %v11238_v41, %v2844_v8 }
0x187d   :  { %v2842_v13 = vpop.permute.xlu0 %2841 }
0x187e   :  { %v2847_v60 = vsub.f32 %v11244_v10, %v2842_v13  ;;  %2856 = vperm.xlu0 %9622, %v2848_v7  }
0x1880   :  { %2851 = vperm.xlu1 %9623, %v2847_v60  }
0x1882   :  { %2954 = vrot.lane.b32.xlu0 %v11187_v48, %s9837_s4 }
0x1883   :  { %9625 = vset.pattern.permute.xlu0 %v9864_v1 }
0x1884   :  { %2869 = vrot.lane.b32.xlu1 %v11172_v55, %s9835_s29 }
0x1885   :  { %9624 = vset.pattern.permute.xlu1 %v9864_v1 }
0x1888   :  { %2871 = vrot.lane.b32.xlu1 %v11187_v48, %s9835_s29  ;;  %v2833_v44 = vpop.permute.xlu1 %2832 }
0x1889   :  { %v2836_v0 = vmul.f32 %v2833_v44, %v11223_v52 }
0x188c   :  { %2952 = vrot.lane.b32.xlu1 %v11172_v55, %s9837_s4  ;;  %v2828_v59 = vpop.permute.xlu1 %2827 }
0x188d   :  { %v2835_v6 = vmul.f32 %v2828_v59, %v11227_v19 }
0x18f9   :  { %v2857_v35 = vpop.permute.xlu0 %2856 }
0x18fa   :  { %v2860_v63 = vadd.f32 %v2857_v35, %v2836_v0 }
0x18fb   :  { %v2852_v23 = vpop.permute.xlu1 %2851 }
0x18fc   :  { %v2862_v57 = vmax.f32 %v2860_v63, 0.0  ;;  %v2859_v3 = vadd.f32 %v2852_v23, %v2835_v6 }
0x18fd   :  { %v2955_v49 = vpop.permute.xlu0 %2954 }
0x18fe   :  { %v2861_v45 = vmax.f32 %v2859_v3, 0.0  ;;  %3037 = vrot.lane.b32.xlu1 %v2862_v57, %s9836_s30  ;;  %2865 = vrot.lane.b32.xlu0 %v2862_v57, %s9830_s16 }
0x18ff   :  { %9068 = vmatprep.subr.mxu1 %v2862_v57  ;;  %v2870_v18 = vpop.permute.xlu1 %2869 }
0x1900   :  { %9069 = vmatpush3.msra.mxu1 %v2862_v57  ;;  %9072 = vmatprep.mubr.msk.f32.mxu1 %vm12788_vm1, %v2870_v18  ;;  %v9866_v18 = vmov 25  }
0x1901   :  { %9070 = vmatprep.subr.mxu1 %v2861_v45 }
0x1902   :  { %9071 = vmatpush3.msra.mxu1 %v2861_v45  ;;  %2863 = vrot.lane.b32.xlu0 %v2861_v45, %s9830_s16 }
0x1903   :  { %3041 = vrot.lane.b32.xlu1 %v11172_v55, %s9838_s5  ;;  %v2872_v50 = vpop.permute.xlu1 %2871 }
0x1904   :  { %9073 = vmatmul.mubr.msk.f32.vlgmr.msra.gmra.mxu1 %vm12793_vm8, %v2872_v50  ;;  %vm12805_vm8 = vmmov %vm12788_vm1 }
0x1906   :  { %3035 = vrot.lane.b32.xlu0 %v2861_v45, %s9836_s30 }
0x1907   :  { %v2953_v21 = vpop.permute.xlu1 %2952  ;;  %3206 = vperm.xlu1 %9624, %v11238_v41  }
0x1908   :  { %9079 = vmatprep.mubr.msk.f32.mxu1 %vm12794_vm15, %v2953_v21  ;;  %vm12806_vm15 = vmmov %vm12788_vm1 }
0x190a   :  { %3043 = vrot.lane.b32.xlu0 %v11187_v48, %s9838_s5 }
0x190b   :  { %9626 = vset.pattern.permute.xlu1 %v9865_v34 }
0x190e   :  { %3202 = vperm.xlu0 %9625, %v11244_v10  }
0x1912   :  { %9627 = vset.pattern.permute.xlu0 %v9866_v18 }
0x1970   :  { %v2866_v26 = vpop.permute.xlu0 %2865  ;;  %v3038_v2 = vpop.permute.xlu1 %3037 }
0x1971   :  { %9075 = vmatprep.subr.msk.mxu1 %vm10541_vm2, %v2866_v26 }
0x1972   :  { %9076 = vmatpush3.msk.msra.mxu1 %vm10541_vm2, %v2866_v26 }
0x1974   :  { %v2864_v29 = vpop.permute.xlu0 %2863 }
0x1975   :  { %9077 = vmatprep.subr.msk.mxu1 %vm10541_vm2, %v2864_v29  ;;  %v3042_v31 = vpop.permute.xlu1 %3041 }
0x1976   :  { %9078 = vmatpush3.msk.msra.mxu1 %vm10541_vm2, %v2864_v29  ;;  %vm12797_vm2 = vmmov %vm12788_vm1 }
0x1977   :  { %9080 = vmatmul.mubr.msk.f32.vlgmr.msra.gmra.mxu1 %vm12795_vm11, %v2955_v49  ;;  %9082 = vmatprep.subr.msk.mxu1 %vm10527_vm6, %v3038_v2 }
0x1978   :  { %9083 = vmatpush3.msk.msra.mxu1 %vm10527_vm6, %v3038_v2  ;;  %v3036_v43 = vpop.permute.xlu0 %3035  ;;  %9086 = vmatprep.mubr.msk.f32.mxu1 %vm12796_vm9, %v3042_v31 }
0x1979   :  { %9084 = vmatprep.subr.msk.mxu1 %vm10527_vm6, %v3036_v43 }
0x197a   :  { %9085 = vmatpush3.msk.msra.mxu1 %vm10527_vm6, %v3036_v43  ;;  %vm12798_vm6 = vnez %v12666_v46 }
0x197b   :  { %9089 = vmatprep.subr.msk.mxu1 %vm12763_vm0, %v12762_v62 }
0x197c   :  { %v3044_v14 = vpop.permute.xlu0 %3043 }
0x197d   :  { %9087 = vmatmul.mubr.msk.f32.vlgmr.msra.gmra.mxu1 %vm12797_vm2, %v3044_v14  ;;  %vm12811_vm2 = vmmov %vm12788_vm1 }
0x197e   :  { %9090 = vmatpush3.msk.msra.mxu1 %vm12763_vm0, %v12762_v62  ;;  %9121 = vmatprep.mubr.f32.mxu1 %v11227_v19  ;;  %vm12799_vm0 = vnez %v12669_v51 }
0x197f   :  { %9091 = vmatprep.subr.msk.mxu1 %vm12764_vm7, %v12762_v62 }
0x1980   :  { %9092 = vmatpush3.msk.msra.mxu1 %vm12764_vm7, %v12762_v62  ;;  %vm12800_vm7 = vnez %v12672_v54 }
0x1981   :  { %9093 = vmatprep.subr.msk.mxu1 %vm12765_vm14, %v12762_v62 }
0x1982   :  { %9094 = vmatpush3.msk.msra.mxu1 %vm12765_vm14, %v12762_v62  ;;  %vm12801_vm14 = vnez %v12675_v56 }
0x1983   :  { %9095 = vmatprep.subr.msk.mxu1 %vm12766_vm13, %v12762_v62 }
0x1984   :  { %9096 = vmatpush3.msk.msra.mxu1 %vm12766_vm13, %v12762_v62  ;;  %vm12802_vm13 = vnez %v12776_v53 }
0x1985   :  { %9097 = vmatprep.subr.msk.mxu1 %vm12767_vm4, %v12762_v62 }
0x1986   :  { %9098 = vmatpush3.msk.msra.mxu1 %vm12767_vm4, %v12762_v62  ;;  %vm12803_vm4 = vnez %v12778_v12 }
0x1987   :  { %9099 = vmatprep.subr.msk.mxu1 %vm12768_vm3, %v12762_v62 }
0x1988   :  { %9100 = vmatpush3.msk.msra.mxu1 %vm12768_vm3, %v12762_v62  ;;  %vm12804_vm3 = vnez %v12780_v22 }
0x1989   :  { %9101 = vmatprep.subr.msk.mxu1 %vm12769_vm5, %v12762_v62  ;;  %v3203_v39 = vpop.permute.xlu0 %3202 }
0x198a   :  { %9102 = vmatpush3.msk.msra.mxu1 %vm12769_vm5, %v12762_v62  ;;  %vm12629_vm5 = vcmask 523264  }
0x198b   :  { %9103 = vmatprep.subr.msk.mxu1 %vm12770_vm12, %v12762_v62 }
0x198c   :  { %9104 = vmatpush3.msk.msra.mxu1 %vm12770_vm12, %v12762_v62  ;;  %vm12628_vm12 = vcmask 1048064  }
0x198d   :  { %9105 = vmatprep.subr.msk.mxu1 %vm12771_vm10, %v12762_v62 }
0x198e   :  { %9106 = vmatpush3.msk.msra.mxu1 %vm12771_vm10, %v12762_v62  ;;  %vm12846_vm10 = vcmask 1041408  }
0x198f   :  { %9107 = vmatprep.subr.msk.mxu1 %vm12798_vm6, %v12762_v62 }
0x1990   :  { %9108 = vmatpush3.msk.msra.mxu1 %vm12798_vm6, %v12762_v62 }
0x1991   :  { %9109 = vmatprep.subr.msk.mxu1 %vm12799_vm0, %v12762_v62 }
0x1992   :  { %9110 = vmatpush3.msk.msra.mxu1 %vm12799_vm0, %v12762_v62 }
0x1993   :  { %9111 = vmatprep.subr.msk.mxu1 %vm12800_vm7, %v12762_v62 }
0x1994   :  { %9112 = vmatpush3.msk.msra.mxu1 %vm12800_vm7, %v12762_v62 }
0x1995   :  { %9113 = vmatprep.subr.msk.mxu1 %vm12801_vm14, %v12762_v62 }
0x1996   :  { %9114 = vmatpush3.msk.msra.mxu1 %vm12801_vm14, %v12762_v62 }
0x1997   :  { %9115 = vmatprep.subr.msk.mxu1 %vm12802_vm13, %v12762_v62 }
0x1998   :  { %9116 = vmatpush3.msk.msra.mxu1 %vm12802_vm13, %v12762_v62 }
0x1999   :  { %9117 = vmatprep.subr.msk.mxu1 %vm12803_vm4, %v12762_v62 }
0x199a   :  { %9118 = vmatpush3.msk.msra.mxu1 %vm12803_vm4, %v12762_v62 }
0x199b   :  { %9119 = vmatprep.subr.msk.mxu1 %vm12804_vm3, %v12762_v62 }
0x199c   :  { %9120 = vmatpush3.msk.msra.mxu1 %vm12804_vm3, %v12762_v62 }
0x199d   :  { %9122 = vmatmul.mubr.f32.vlgmr.msra.gmra.mxu1 %v11223_v52  ;;  %v3207_v52 = vpop.permute.xlu1 %3206 }
0x19c4   :  { %v9074_v17 = vpop.f32.mrf.mxu1 }
0x19c6   :  { %v2943_v20 = vpop.f32.mrf.mxu1 }
0x1a37   :  { %v9081_v25 = vpop.f32.mrf.mxu1 }
0x1a38   :  { %v3032_v38 = vadd.f32 %v9081_v25, %v9074_v17 }
0x1a39   :  { %v3026_v28 = vpop.f32.mrf.mxu1 }
0x1a3a   :  { %v3027_v33 = vadd.f32 %v3026_v28, %v2943_v20 }
0x1a3d   :  { %v9088_v30 = vpop.f32.mrf.mxu1 }
0x1a3e   :  { %v3125_v16 = vadd.f32 %v9088_v30, %v3032_v38 }
0x1a3f   :  { %v3115_v4 = vpop.f32.mrf.mxu1 }
0x1a40   :  { %v3124_v19 = vadd.f32 %v3115_v4, %v3027_v33 }
0x1a42   :  { %9156 = vmatprep.mubr.f32.mxu0 %v3124_v19 }
0x1a43   :  { %9157 = vmatmul.mubr.f32.vlgmr.msra.gmra.mxu0 %v3125_v16 }
0x1b03   :  { %v9158_v5 = vpop.f32.mrf.mxu0 }
0x1b04   :  { %v3281_v24 = vadd.f32 %v9158_v5, %v3207_v52 }
0x1b05   :  { %v3275_v27 = vpop.f32.mrf.mxu0 }
0x1b06   :  { %v3276_v36 = vadd.f32 %v3275_v27, %v3203_v39  ;;  %v3288_v32 = vsel %vm12629_vm5, %v3281_v24, 0.0  ;;  %v3295_v37 = vmul.f32 %v3281_v24, %v3281_v24 }
0x1b07   :  { %3289 = vadd.xlane.f32.xlu1 %v3288_v32 }
0x1b08   :  { %v3285_v61 = vsel %vm12629_vm5, %v3276_v36, 0.0  ;;  %v3294_v58 = vmul.f32 %v3276_v36, %v3276_v36  ;;  %v3299_v15 = vsel %vm12629_vm5, %v3295_v37, 0.0  ;;  %v9868_v37 = vmov 26  }
0x1b09   :  { %3286 = vadd.xlane.f32.xlu0 %v3285_v61 }
0x1b0a   :  { %v3296_v40 = vsel %vm12629_vm5, %v3294_v58, 0.0 }
0x1b0b   :  { %3300 = vadd.xlane.f32.xlu1 %v3299_v15 }
0x1b0d   :  { %3297 = vadd.xlane.f32.xlu0 %v3296_v40 }
0x1b90   :  { %v3290_v8 = vpop.xlane.xlu1 %3289 }
0x1b91   :  { %v3293_v7 = vmul.f32 0.015625, %v3290_v8  ;;  %v3365_v8 = vand.u32 31, %v9981_v11 }
0x1b92   :  { %v3287_v13 = vpop.xlane.xlu0 %3286 }
0x1b93   :  { %v3292_v60 = vmul.f32 0.015625, %v3287_v13  ;;  %v3305_v59 = vmul.f32 %v3293_v7, %v3293_v7  ;;  %vm11431_vm11 = vcmp.ne.s32.totalorder %v3365_v8, 0  ;;  %vm11435_vm9 = vcmp.ne.s32.totalorder %v3365_v8, 31 }
0x1b94   :  { %v3301_v44 = vpop.xlane.xlu1 %3300 }
0x1b95   :  { %v3303_v0 = vmul.f32 0.015625, %v3301_v44  ;;  %v3304_v6 = vmul.f32 %v3292_v60, %v3292_v60 }
0x1b96   :  { %v3298_v35 = vpop.xlane.xlu0 %3297 }
0x1b97   :  { %v3307_v63 = vsub.f32 %v3303_v0, %v3305_v59  ;;  %v3302_v23 = vmul.f32 0.015625, %v3298_v35  ;;  %v3649_v35 = vmul.u32 32, %v9981_v11 }
0x1b99   :  { %v3309_v57 = vadd.f32 1e-05, %v3307_v63  ;;  %v3306_v3 = vsub.f32 %v3302_v23, %v3304_v6  ;;  %v3658_v6 = vadd.s32 32, %v3649_v35  ;;  %v12813_v63 = vld [vmem:[#allocation2_spill] sm:$0xff] }
0x1b9b   :  { %9735 = vrsqrt.f32 %v3309_v57  ;;  %v3308_v45 = vadd.f32 1e-05, %v3306_v3  ;;  %v9869_v57 = vmov 0.03125   ;;  %v12816_v3 = vld [vmem:[#allocation3_spill] sm:$0xff] }
0x1b9d   :  { %9737 = vrsqrt.f32 %v3308_v45 }
0x1ba8   :  { %v9736_v50 = vpop.eup %9735 }
0x1ba9   :  { %v3313_v21 = vmul.f32 %v11238_v41, %v9736_v50 }
0x1baa   :  { %v9738_v49 = vpop.eup %9737 }
0x1bab   :  { %v3327_v26 = vmul.f32 %v3313_v21, %v3293_v7  ;;  %v3312_v2 = vmul.f32 %v11244_v10, %v9738_v49 }
0x1bad   :  { %3332 = vrot.lane.b32.xlu1 %v3327_v26, %s9830_s16  ;;  %v3326_v29 = vmul.f32 %v3312_v2, %v3292_v60  ;;  %v12825_v26 = vld [vmem:[#allocation6_spill] sm:$0xff] }
0x1baf   :  { %3330 = vrot.lane.b32.xlu0 %v3326_v29, %s9830_s16  ;;  %v12828_v29 = vld [vmem:[#allocation7_spill] sm:$0xff] }
0x1bb1   :  { %3321 = vperm.xlu1 %9626, %v3313_v21   ;;  %v12822_v21 = vld [vmem:[#allocation5_spill] sm:$0xff] }
0x1bb5   :  { %3316 = vperm.xlu1 %9626, %v3312_v2  }
0x1bb9   :  { %9628 = vset.pattern.permute.xlu1 %v9866_v18  ;;  %v12819_v18 = vld [vmem:[#allocation4_spill] sm:$0xff] }
0x1c1f   :  { %v3333_v31 = vpop.permute.xlu1 %3332 }
0x1c20   :  { %v3337_v43 = vsub.f32 %v11238_v41, %v3333_v31 }
0x1c21   :  { %v3331_v14 = vpop.permute.xlu0 %3330 }
0x1c22   :  { %v3336_v1 = vsub.f32 %v11244_v10, %v3331_v14  ;;  %3345 = vperm.xlu0 %9627, %v3337_v43   ;;  %v12831_v43 = vld [vmem:[#allocation8_spill] sm:$0xff] }
0x1c24   :  { %3340 = vperm.xlu1 %9628, %v3336_v1   ;;  %v12834_v1 = vmov 0 }
0x1c26   :  { %9630 = vset.pattern.permute.xlu0 %v9868_v37 }
0x1c28   :  { %9629 = vset.pattern.permute.xlu1 %v9868_v37 }
0x1c2c   :  { %v3322_v17 = vpop.permute.xlu1 %3321 }
0x1c2d   :  { %v3325_v25 = vmul.f32 %v3322_v17, %v3281_v24  ;;  %v11555_v17 = vpop.f32.mrf.mxu1 }
0x1c30   :  { %v3317_v20 = vpop.permute.xlu1 %3316 }
0x1c31   :  { %v3324_v30 = vmul.f32 %v3317_v20, %v3276_v36  ;;  %v11557_v20 = vpop.f32.mrf.mxu1 }
0x1c9d   :  { %v3346_v28 = vpop.permute.xlu0 %3345 }
0x1c9e   :  { %v3349_v33 = vadd.f32 %v3346_v28, %v3325_v25 }
0x1c9f   :  { %v3341_v38 = vpop.permute.xlu1 %3340 }
0x1ca0   :  { %v3351_v4 = vmax.f32 %v3349_v33, 0.0  ;;  %v3348_v19 = vadd.f32 %v3341_v38, %v3324_v30 }
0x1ca2   :  { %v3350_v16 = vmax.f32 %v3348_v19, 0.0  ;;  %3356 = vrot.lane.b32.xlu1 %v3351_v4, %s9838_s5  ;;  %9159 = vmatprep.subr.mxu1 %v3351_v4 }
0x1ca3   :  { %9160 = vmatpush3.msra.mxu1 %v3351_v4 }
0x1ca4   :  { %3353 = vrot.lane.b32.xlu0 %v3350_v16, %s9838_s5  ;;  %9161 = vmatprep.subr.mxu1 %v3350_v16 }
0x1ca5   :  { %9162 = vmatpush3.msra.mxu1 %v3350_v16 }
0x1d14   :  { %v3357_v52 = vpop.permute.xlu1 %3356 }
0x1d15   :  { %v3358_v5 = vsel %vm12628_vm12, %v3357_v52, %v3351_v4 }
0x1d16   :  { %3361 = vrot.lane.b32.xlu1 %v3358_v5, %s9838_s5  ;;  %v3354_v39 = vpop.permute.xlu0 %3353 }
0x1d17   :  { %v3355_v24 = vsel %vm12628_vm12, %v3354_v39, %v3350_v16 }
0x1d18   :  { %3359 = vrot.lane.b32.xlu0 %v3355_v24, %s9838_s5 }
0x1d1a   :  { %3377 = vrot.lane.b32.xlu1 %v11172_v55, %s9842_s6 }
0x1d1c   :  { %3460 = vrot.lane.b32.xlu0 %v11172_v55, %s9844_s7 }
0x1d1e   :  { %3379 = vrot.lane.b32.xlu1 %v11187_v48, %s9842_s6 }
0x1d22   :  { %3462 = vrot.lane.b32.xlu1 %v11187_v48, %s9844_s7 }
0x1d88   :  { %v3362_v27 = vpop.permute.xlu1 %3361 }
0x1d89   :  { %v3364_v36 = vsel %vm12628_vm12, %v3362_v27, %v3351_v4 }
0x1d8a   :  { %3546 = vrot.lane.b32.xlu1 %v3364_v36, %s9836_s30  ;;  %3371 = vrot.lane.b32.xlu0 %v3364_v36, %s9867_s26  ;;  %v3360_v32 = vpop.permute.xlu0 %3359 }
0x1d8b   :  { %v3363_v58 = vsel %vm12628_vm12, %v3360_v32, %v3350_v16 }
0x1d8c   :  { %v3378_v61 = vpop.permute.xlu1 %3377 }
0x1d8d   :  { %9163 = vmatprep.mubr.msk.f32.mxu1 %vm12788_vm1, %v3378_v61  ;;  %v11570_v61 = vld [vmem:[%s12535_s2 + $0x18] sm:$0xff] }
0x1d8e   :  { %3369 = vrot.lane.b32.xlu0 %v3363_v58, %s9867_s26  ;;  %3552 = vrot.lane.b32.xlu1 %v11172_v55, %s9845_s8  ;;  %v3461_v15 = vpop.permute.xlu0 %3460 }
0x1d90   :  { %v3380_v40 = vpop.permute.xlu1 %3379 }
0x1d91   :  { %9164 = vmatmul.mubr.msk.f32.vlgmr.msra.gmra.mxu1 %vm12805_vm8, %v3380_v40  ;;  %vm12812_vm8 = vmmov %vm12788_vm1 }
0x1d92   :  { %3544 = vrot.lane.b32.xlu0 %v3363_v58, %s9836_s30  ;;  %9170 = vmatprep.mubr.msk.f32.mxu1 %vm12806_vm15, %v3461_v15  ;;  %vm3657_vm15 = vcmp.ge.s32.totalorder %v12813_v63, %v3649_v35  ;;  %v9870_v58 = vmov 27  }
0x1d93   :  { %3638 = vperm.xlu1 %9629, %v11244_v10  }
0x1d94   :  { %v3463_v34 = vpop.permute.xlu1 %3462 }
0x1d96   :  { %3554 = vrot.lane.b32.xlu0 %v11187_v48, %s9845_s8 }
0x1d97   :  { %9631 = vset.pattern.permute.xlu1 %v9870_v58  ;;  %v9872_v58 = vmov 29  }
0x1d98   :  { %3771 = vperm.xlu1 %9631, %v11238_v41  }
0x1d9a   :  { %3642 = vperm.xlu0 %9630, %v11238_v41  }
0x1d9c   :  { %3767 = vperm.xlu1 %9631, %v11244_v10  }
0x1d9e   :  { %9633 = vset.pattern.permute.xlu0 %v9872_v58 }
0x1dfc   :  { %v3547_v13 = vpop.permute.xlu1 %3546  ;;  %v3372_v60 = vpop.permute.xlu0 %3371 }
0x1dfd   :  { %9166 = vmatprep.subr.msk.mxu1 %vm11431_vm11, %v3372_v60  ;;  %9173 = vmatprep.subr.msk.mxu0 %vm11435_vm9, %v3547_v13 }
0x1dfe   :  { %9167 = vmatpush3.msk.msra.mxu1 %vm11431_vm11, %v3372_v60  ;;  %9174 = vmatpush3.msk.msra.mxu0 %vm11435_vm9, %v3547_v13 }
0x1e00   :  { %v3370_v48 = vpop.permute.xlu0 %3369  ;;  %v3553_v44 = vpop.permute.xlu1 %3552 }
0x1e01   :  { %9168 = vmatprep.subr.msk.mxu1 %vm11431_vm11, %v3370_v48  ;;  %9177 = vmatprep.mubr.msk.f32.mxu0 %vm12811_vm2, %v3553_v44  ;;  %vm3666_vm2 = vcmp.lt.s32.totalorder %v12813_v63, %v3658_v6 }
0x1e02   :  { %9169 = vmatpush3.msk.msra.mxu1 %vm11431_vm11, %v3370_v48  ;;  %vm11461_vm12 = vmand %vm3657_vm15, %vm3666_vm2  ;;  %vm3655_vm15 = vcmp.ge.s32.totalorder %v12819_v18, %v3649_v35  ;;  %vm3664_vm2 = vcmp.lt.s32.totalorder %v12819_v18, %v3658_v6 }
0x1e03   :  { %9171 = vmatmul.mubr.msk.f32.vlgmr.msra.gmra.mxu1 %vm12788_vm1, %v3463_v34  ;;  %9180 = vmatprep.subr.msk.mxu1 %vm11461_vm12, %v9869_v57  ;;  %vm3656_vm1 = vcmp.ge.s32.totalorder %v12816_v3, %v3649_v35  ;;  %vm11485_vm3 = vmand %vm3655_vm15, %vm3664_vm2  ;;  %vm3653_vm15 = vcmp.ge.s32.totalorder %v12825_v26, %v3649_v35  ;;  %vm3662_vm2 = vcmp.lt.s32.totalorder %v12825_v26, %v3658_v6  ;;  %v11585_v34 = vld [vmem:[%s12535_s2 + $0x50] sm:$0xff] }
0x1e04   :  { %v3545_v59 = vpop.permute.xlu0 %3544  ;;  %9181 = vmatpush3.msk.msra.mxu1 %vm11461_vm12, %v9869_v57  ;;  %vm11509_vm13 = vmand %vm3653_vm15, %vm3662_vm2  ;;  %vm3651_vm15 = vcmp.ge.s32.totalorder %v12831_v43, %v3649_v35  ;;  %vm3660_vm2 = vcmp.lt.s32.totalorder %v12831_v43, %v3658_v6 }
0x1e05   :  { %9175 = vmatprep.subr.msk.mxu0 %vm11435_vm9, %v3545_v59  ;;  %vm11533_vm7 = vmand %vm3651_vm15, %vm3660_vm2  ;;  %vm12836_vm15 = vcmask 523264  }
0x1e06   :  { %9176 = vmatpush3.msk.msra.mxu0 %vm11435_vm9, %v3545_v59  ;;  %vm12837_vm2 = vmmov %vm12836_vm15 }
0x1e08   :  { %v3555_v0 = vpop.permute.xlu0 %3554 }
0x1e09   :  { %9178 = vmatmul.mubr.msk.f32.vlgmr.msra.gmra.mxu0 %vm12812_vm8, %v3555_v0  ;;  %vm3665_vm8 = vcmp.lt.s32.totalorder %v12816_v3, %v3658_v6 }
0x1e0a   :  { %vm11473_vm5 = vmand %vm3656_vm1, %vm3665_vm8  ;;  %vm3654_vm1 = vcmp.ge.s32.totalorder %v12822_v21, %v3649_v35  ;;  %vm3663_vm8 = vcmp.lt.s32.totalorder %v12822_v21, %v3658_v6  ;;  %v9871_v21 = vmov 28  }
0x1e0b   :  { %9182 = vmatprep.subr.msk.mxu1 %vm11473_vm5, %v9869_v57  ;;  %vm11497_vm4 = vmand %vm3654_vm1, %vm3663_vm8  ;;  %vm3652_vm1 = vcmp.ge.s32.totalorder %v12828_v29, %v3649_v35  ;;  %vm3661_vm8 = vcmp.lt.s32.totalorder %v12828_v29, %v3658_v6  ;;  %9632 = vset.pattern.permute.xlu1 %v9871_v21  ;;  %v9873_v21 = vmov 30  }
0x1e0c   :  { %9183 = vmatpush3.msk.msra.mxu1 %vm11473_vm5, %v9869_v57  ;;  %vm11521_vm14 = vmand %vm3652_vm1, %vm3661_vm8  ;;  %vm3650_vm1 = vcmp.ge.s32.totalorder %v10070_v47, %v3649_v35  ;;  %vm3659_vm8 = vcmp.lt.s32.totalorder %v10070_v47, %v3658_v6 }
0x1e0d   :  { %9184 = vmatprep.subr.msk.mxu1 %vm11485_vm3, %v9869_v57  ;;  %vm11545_vm0 = vmand %vm3650_vm1, %vm3659_vm8  ;;  %vm12838_vm1 = vcmask 130048  }
0x1e0e   :  { %9185 = vmatpush3.msk.msra.mxu1 %vm11485_vm3, %v9869_v57  ;;  %v12835_v1 = vsel %vm11545_vm0, 4294967295, %v12834_v1  ;;  %v3639_v39 = vpop.permute.xlu1 %3638  ;;  %9203 = vmatprep.mubr.msk.f32.mxu0 %vm12838_vm1, %v11570_v61  ;;  %vm12839_vm8 = vmmov %vm12838_vm1 }
0x1e0f   :  { %9186 = vmatprep.subr.msk.mxu1 %vm11497_vm4, %v9869_v57 }
0x1e10   :  { %9187 = vmatpush3.msk.msra.mxu1 %vm11497_vm4, %v9869_v57 }
0x1e11   :  { %9188 = vmatprep.subr.msk.mxu1 %vm11509_vm13, %v9869_v57 }
0x1e12   :  { %9189 = vmatpush3.msk.msra.mxu1 %vm11509_vm13, %v9869_v57 }
0x1e13   :  { %9190 = vmatprep.subr.msk.mxu1 %vm11521_vm14, %v9869_v57  ;;  %v3772_v8 = vpop.permute.xlu1 %3771 }
0x1e14   :  { %9191 = vmatpush3.msk.msra.mxu1 %vm11521_vm14, %v9869_v57 }
0x1e15   :  { %9192 = vmatprep.subr.msk.mxu1 %vm11533_vm7, %v9869_v57  ;;  %v3643_v52 = vpop.permute.xlu0 %3642 }
0x1e16   :  { %9193 = vmatpush3.msk.msra.mxu1 %vm11533_vm7, %v9869_v57 }
0x1e17   :  { %9194 = vmatprep.subr.msk.mxu1 %vm11545_vm0, %v9869_v57  ;;  %v3768_v48 = vpop.permute.xlu1 %3767 }
0x1e18   :  { %9195 = vmatpush3.msk.msra.mxu1 %vm11545_vm0, %v9869_v57  ;;  %vm12847_vm0 = vmmov %vm12846_vm10 }
0x1e51   :  { %v9165_v25 = vpop.f32.mrf.mxu1 }
0x1e53   :  { %v3451_v28 = vpop.f32.mrf.mxu1 }
0x1ec3   :  { %v9172_v30 = vpop.f32.mrf.mxu1 }
0x1ec4   :  { %v3540_v38 = vadd.f32 %v9172_v30, %v9165_v25 }
0x1ec5   :  { %v3534_v33 = vpop.f32.mrf.mxu1 }
0x1ec6   :  { %v3535_v19 = vadd.f32 %v3534_v33, %v3451_v28 }
0x1ec9   :  { %v9179_v4 = vpop.f32.mrf.mxu0 }
0x1eca   :  { %v3636_v16 = vadd.f32 %v9179_v4, %v3540_v38 }
0x1ecb   :  { %v3626_v5 = vpop.f32.mrf.mxu0 }
0x1ecc   :  { %v3635_v24 = vadd.f32 %v3626_v5, %v3535_v19  ;;  %v11559_v27 = vadd.f32 %v3643_v52, %v3636_v16 }
0x1ece   :  { %v11561_v36 = vadd.f32 %v3639_v39, %v3635_v24  ;;  %v3648_v37 = vand.u32 2147483647, %v11559_v27 }
0x1ed0   :  { %v3647_v32 = vand.u32 2147483647, %v11561_v36 }
0x1ed2   :  { %9196 = vmatprep.mubr.msk.f32.mxu1 %vm12836_vm15, %v3647_v32  ;;  %vm12840_vm15 = vcmask 15360  }
0x1ed3   :  { %9197 = vmatmul.mubr.msk.f32.vlgmr.msra.gmra.mxu1 %vm12837_vm2, %v3648_v37  ;;  %vm12841_vm2 = vmmov %vm12840_vm15 }
0x1ed4   :  { %vm12842_vm1 = vmmov %vm12841_vm2 }
0x1ed5   :  { %vm12843_vm6 = vmmov %vm12842_vm1 }
0x1f93   :  { %v11576_v15 = vpop.f32.mrf.mxu1 }
0x1f94   :  { %9199 = vmatprep.subr.mxu0 %v11576_v15 }
0x1f95   :  { %v11579_v40 = vpop.f32.mrf.mxu1  ;;  %9200 = vmatpush3.msra.mxu0 %v11576_v15 }
0x1f96   :  { %9201 = vmatprep.subr.mxu0 %v11579_v40 }
0x1f97   :  { %9202 = vmatpush3.msra.mxu0 %v11579_v40 }
0x1f98   :  { %9204 = vmatmul.mubr.msk.f32.vlgmr.msra.gmra.mxu0 %vm12839_vm8, %v11585_v34 }
0x2058   :  { %v9205_v13 = vpop.f32.mrf.mxu0 }
0x2059   :  { %v3852_v60 = vadd.f32 %v9205_v13, %v3772_v8 }
0x205a   :  { %v3846_v44 = vpop.f32.mrf.mxu0 }
0x205b   :  { %v3847_v59 = vadd.f32 %v3846_v44, %v3768_v48  ;;  %v3858_v0 = vsel %vm12840_vm15, %v3852_v60, 0.0  ;;  %v3864_v35 = vmul.f32 %v3852_v60, %v3852_v60 }
0x205c   :  { %3859 = vadd.xlane.f32.xlu0 %v3858_v0 }
0x205d   :  { %v3855_v6 = vsel %vm12841_vm2, %v3847_v59, 0.0  ;;  %v3868_v63 = vsel %vm12842_vm1, %v3864_v35, 0.0  ;;  %v3863_v3 = vmul.f32 %v3847_v59, %v3847_v59 }
0x205e   :  { %3856 = vadd.xlane.f32.xlu1 %v3855_v6 }
0x205f   :  { %v3865_v18 = vsel %vm12843_vm6, %v3863_v3, 0.0  ;;  %vm12844_vm6 = vmmov %vm12839_vm8 }
0x2060   :  { %3869 = vadd.xlane.f32.xlu0 %v3868_v63  ;;  %vm12845_vm8 = vmmov %vm12844_vm6 }
0x2064   :  { %3866 = vadd.xlane.f32.xlu0 %v3865_v18 }
0x20e5   :  { %v3860_v25 = vpop.xlane.xlu0 %3859 }
0x20e6   :  { %v3862_v28 = vmul.f32 0.5, %v3860_v25 }
0x20e7   :  { %v3857_v30 = vpop.xlane.xlu1 %3856 }
0x20e8   :  { %v3874_v38 = vmul.f32 %v3862_v28, %v3862_v28  ;;  %v3861_v4 = vmul.f32 0.5, %v3857_v30 }
0x20e9   :  { %v3870_v33 = vpop.xlane.xlu0 %3869 }
0x20ea   :  { %v3872_v19 = vmul.f32 0.5, %v3870_v33  ;;  %v3873_v5 = vmul.f32 %v3861_v4, %v3861_v4 }
0x20ec   :  { %v3876_v16 = vsub.f32 %v3872_v19, %v3874_v38 }
0x20ed   :  { %v3867_v52 = vpop.xlane.xlu0 %3866 }
0x20ee   :  { %v3878_v39 = vadd.f32 1e-05, %v3876_v16  ;;  %v3871_v24 = vmul.f32 0.5, %v3867_v52 }
0x20f0   :  { %9739 = vrsqrt.f32 %v3878_v39  ;;  %v3875_v32 = vsub.f32 %v3871_v24, %v3873_v5 }
0x20f2   :  { %v3877_v37 = vadd.f32 1e-05, %v3875_v32 }
0x20f4   :  { %9741 = vrsqrt.f32 %v3877_v37 }
0x20fd   :  { %v9740_v8 = vpop.eup %9739 }
0x20fe   :  { %v3882_v13 = vmul.f32 %v11238_v41, %v9740_v8 }
0x2100   :  { %v3896_v48 = vmul.f32 %v3882_v13, %v3862_v28 }
0x2101   :  { %v9742_v44 = vpop.eup %9741 }
0x2102   :  { %3901 = vrot.lane.b32.xlu1 %v3896_v48, %s9830_s16  ;;  %v3881_v0 = vmul.f32 %v11244_v10, %v9742_v44 }
0x2104   :  { %v3895_v35 = vmul.f32 %v3881_v0, %v3861_v4 }
0x2106   :  { %3890 = vperm.xlu1 %9632, %v3882_v13   ;;  %3899 = vrot.lane.b32.xlu0 %v3895_v35, %s9830_s16 }
0x210a   :  { %3885 = vperm.xlu1 %9632, %v3881_v0  }
0x210e   :  { %9634 = vset.pattern.permute.xlu1 %v9872_v58 }
0x2174   :  { %v3902_v6 = vpop.permute.xlu1 %3901 }
0x2175   :  { %v3906_v63 = vsub.f32 %v11238_v41, %v3902_v6 }
0x2177   :  { %3914 = vperm.xlu0 %9633, %v3906_v63  }
0x2178   :  { %v3900_v3 = vpop.permute.xlu0 %3899 }
0x2179   :  { %v3905_v18 = vsub.f32 %v11244_v10, %v3900_v3 }
0x217b   :  { %3909 = vperm.xlu1 %9634, %v3905_v18   ;;  %3931 = vrot.lane.b32.xlu0 %v11585_v34, %s9832_s0 }
0x217c   :  { %9636 = vset.pattern.permute.xlu0 %v9873_v21 }
0x217f   :  { %3929 = vrot.lane.b32.xlu1 %v11570_v61, %s9832_s0  ;;  %3926 = vperm.xlu0 %9636, %v11238_v41  }
0x2180   :  { %9635 = vset.pattern.permute.xlu1 %v9873_v21 }
0x2181   :  { %v3891_v25 = vpop.permute.xlu1 %3890 }
0x2182   :  { %v3894_v28 = vmul.f32 %v3891_v25, %v3852_v60  ;;  %v4026_v60 = vmul.u32 32, %v10070_v47 }
0x2183   :  { %3922 = vperm.xlu1 %9635, %v11244_v10  }
0x2184   :  { %vm4027_vm15 = vcmp.ge.s32.totalorder %v9981_v11, %v4026_v60  ;;  %v4028_v32 = vadd.s32 32, %v4026_v60 }
0x2185   :  { %v3886_v30 = vpop.permute.xlu1 %3885 }
0x2186   :  { %v3893_v4 = vmul.f32 %v3886_v30, %v3847_v59  ;;  %vm4029_vm2 = vcmp.lt.s32.totalorder %v9981_v11, %v4028_v32 }
0x2187   :  { %vm4030_vm1 = vmand %vm4027_vm15, %vm4029_vm2 }
0x2188   :  { %v11613_v59 = vsel %vm4030_vm1, 1.0, %v12740_v9  ;;  %vm12854_vm1 = vcmask 1048064  }
0x21f2   :  { %v3915_v33 = vpop.permute.xlu0 %3914 }
0x21f3   :  { %v3918_v38 = vadd.f32 %v3915_v33, %v3894_v28 }
0x21f5   :  { %v3920_v19 = vmax.f32 %v3918_v38, 0.0 }
0x21f6   :  { %v3910_v16 = vpop.permute.xlu1 %3909  ;;  %v3932_v24 = vpop.permute.xlu0 %3931 }
0x21f7   :  { %v3917_v52 = vadd.f32 %v3910_v16, %v3893_v4  ;;  %9206 = vmatprep.subr.mxu0 %v3920_v19 }
0x21f8   :  { %9207 = vmatpush3.msra.mxu0 %v3920_v19 }
0x21f9   :  { %v3919_v5 = vmax.f32 %v3917_v52, 0.0 }
0x21fa   :  { %v3930_v39 = vpop.permute.xlu1 %3929  ;;  %v3927_v37 = vpop.permute.xlu0 %3926 }
0x21fb   :  { %9208 = vmatprep.subr.mxu0 %v3919_v5  ;;  %9210 = vmatprep.mubr.msk.f32.mxu0 %vm12844_vm6, %v3930_v39  ;;  %vm12850_vm6 = vcmask 523264  }
0x21fc   :  { %9209 = vmatpush3.msra.mxu0 %v3919_v5  ;;  %vm12852_vm15 = vmmov %vm12850_vm6 }
0x21fd   :  { %9211 = vmatmul.mubr.msk.f32.vlgmr.msra.gmra.mxu0 %vm12845_vm8, %v3932_v24  ;;  %9213 = vmatprep.subr.msk.mxu0 %vm12846_vm10, %v11613_v59  ;;  %vm12848_vm10 = vcmask 15360   ;;  %vm12851_vm8 = vmmov %vm12850_vm6 }
0x21fe   :  { %9214 = vmatpush3.msk.msra.mxu0 %vm12847_vm0, %v11613_v59  ;;  %v3923_v8 = vpop.permute.xlu1 %3922  ;;  %vm12849_vm0 = vmmov %vm12848_vm10 }
0x21ff   :  { %vm12853_vm2 = vmmov %vm12850_vm6 }
0x22bd   :  { %v9212_v58 = vpop.f32.mrf.mxu0 }
0x22be   :  { %v4009_v13 = vadd.f32 %v9212_v58, %v3927_v37 }
0x22bf   :  { %v4003_v48 = vpop.f32.mrf.mxu0 }
0x22c0   :  { %v4013_v44 = vsub.f32 0.0, %v4009_v13  ;;  %v4004_v0 = vadd.f32 %v4003_v48, %v3923_v8 }
0x22c2   :  { %v4016_v35 = vmul.f32 1.442695, %v4013_v44  ;;  %v4012_v6 = vsub.f32 0.0, %v4004_v0 }
0x22c4   :  { %9743 = vpow2.f32 %v4016_v35  ;;  %v4014_v63 = vmul.f32 1.442695, %v4012_v6 }
0x22c6   :  { %9745 = vpow2.f32 %v4014_v63 }
0x22d1   :  { %v9744_v3 = vpop.eup %9743 }
0x22d2   :  { %v4019_v18 = vadd.f32 1.0, %v9744_v3 }
0x22d3   :  { %v9746_v21 = vpop.eup %9745 }
0x22d4   :  { %v4018_v25 = vadd.f32 1.0, %v9746_v21  ;;  %9747 = vrcp.f32 %v4019_v18 }
0x22d6   :  { %9749 = vrcp.f32 %v4018_v25 }
0x22e1   :  { %v9748_v28 = vpop.eup %9747 }
0x22e2   :  { %v4025_v38 = vmul.f32 %v9748_v28, %v11576_v15 }
0x22e3   :  { %v9750_v30 = vpop.eup %9749 }
0x22e4   :  { %v4024_v33 = vmul.f32 %v9750_v30, %v11579_v40 }
0x22e6   :  { %9215 = vmatprep.mubr.msk.f32.mxu0 %vm12848_vm10, %v4024_v33  ;;  %vm12855_vm10 = vmmov %vm12854_vm1 }
0x22e7   :  { %9216 = vmatmul.mubr.msk.f32.vlgmr.msra.gmra.mxu0 %vm12849_vm0, %v4025_v38  ;;  %vm12856_vm0 = vmmov %vm12854_vm1 }
0x23a7   :  { %v9217_v4 = vpop.f32.mrf.mxu0 }
0x23a8   :  { %v4117_v19 = vsub.f32 0.0, %v9217_v4 }
0x23a9   :  { %v4107_v16 = vpop.f32.mrf.mxu0 }
0x23aa   :  { %v4119_v52 = vmax.f32 %v11559_v27, %v4117_v19  ;;  %v4116_v5 = vsub.f32 0.0, %v4107_v16 }
0x23ac   :  { %v4121_v39 = vmin.f32 %v4119_v52, %v9217_v4  ;;  %v4118_v24 = vmax.f32 %v11561_v36, %v4116_v5  ;;  %v9875_v4 = vmov 32  }
0x23ad   :  { %9638 = vset.pattern.permute.xlu0 %v9875_v4 }
0x23ae   :  { %v4123_v60 = vsub.f32 %v11559_v27, %v4121_v39  ;;  %v4120_v32 = vmin.f32 %v4118_v24, %v4107_v16 }
0x23b0   :  { %v11627_v40 = vadd.f32 %v11555_v17, %v4123_v60  ;;  %v4122_v15 = vsub.f32 %v11561_v36, %v4120_v32  ;;  %v9874_v36 = vmov 31  }
0x23b1   :  { %9637 = vset.pattern.permute.xlu1 %v9874_v36 }
0x23b2   :  { %v11631_v37 = vadd.f32 %v4122_v15, %v11557_v20  ;;  %v4129_v58 = vsel %vm12850_vm6, %v11627_v40, 0.0  ;;  %v4135_v8 = vmul.f32 %v11627_v40, %v11627_v40  ;;  %vm12857_vm6 = vmmov %vm12856_vm0 }
0x23b3   :  { %4130 = vadd.xlane.f32.xlu1 %v4129_v58 }
0x23b4   :  { %v4126_v13 = vsel %vm12851_vm8, %v11631_v37, 0.0  ;;  %v4134_v27 = vmul.f32 %v11631_v37, %v11631_v37  ;;  %v4139_v17 = vsel %vm12852_vm15, %v4135_v8, 0.0  ;;  %vm12858_vm8 = vcmask 130048  }
0x23b5   :  { %4127 = vadd.xlane.f32.xlu0 %v4126_v13  ;;  %vm12859_vm15 = vmmov %vm12858_vm8 }
0x23b6   :  { %v4136_v20 = vsel %vm12853_vm2, %v4134_v27, 0.0  ;;  %vm12860_vm2 = vmmov %vm12858_vm8 }
0x23b7   :  { %4140 = vadd.xlane.f32.xlu1 %v4139_v17 }
0x23b9   :  { %4137 = vadd.xlane.f32.xlu0 %v4136_v20 }
0x243c   :  { %v4131_v48 = vpop.xlane.xlu1 %4130 }
0x243d   :  { %v4133_v44 = vmul.f32 0.015625, %v4131_v48 }
0x243e   :  { %v4128_v0 = vpop.xlane.xlu0 %4127 }
0x243f   :  { %v4132_v35 = vmul.f32 0.015625, %v4128_v0  ;;  %v4145_v63 = vmul.f32 %v4133_v44, %v4133_v44 }
0x2440   :  { %v4141_v6 = vpop.xlane.xlu1 %4140 }
0x2441   :  { %v4143_v3 = vmul.f32 0.015625, %v4141_v6  ;;  %v4144_v21 = vmul.f32 %v4132_v35, %v4132_v35 }
0x2442   :  { %v4138_v18 = vpop.xlane.xlu0 %4137 }
0x2443   :  { %v4147_v25 = vsub.f32 %v4143_v3, %v4145_v63  ;;  %v4142_v28 = vmul.f32 0.015625, %v4138_v18 }
0x2445   :  { %v4149_v30 = vadd.f32 1e-05, %v4147_v25  ;;  %v4146_v33 = vsub.f32 %v4142_v28, %v4144_v21  ;;  %v9876_v28 = vmov 33  }
0x2447   :  { %9751 = vrsqrt.f32 %v4149_v30  ;;  %v4148_v38 = vadd.f32 1e-05, %v4146_v33 }
0x2449   :  { %9753 = vrsqrt.f32 %v4148_v38  ;;  %v11678_v38 = vld [vmem:[%s12536_s1] sm:$0xff] }
0x2454   :  { %v9752_v19 = vpop.eup %9751 }
0x2455   :  { %v4153_v16 = vmul.f32 %v11238_v41, %v9752_v19  ;;  %v11687_v19 = vld [vmem:[%s12536_s1 + $0x8] sm:$0xff] }
0x2456   :  { %v9754_v52 = vpop.eup %9753 }
0x2457   :  { %v4167_v5 = vmul.f32 %v4153_v16, %v4133_v44  ;;  %v4152_v39 = vmul.f32 %v11244_v10, %v9754_v52 }
0x2459   :  { %4172 = vrot.lane.b32.xlu1 %v4167_v5, %s9830_s16  ;;  %v4166_v24 = vmul.f32 %v4152_v39, %v4132_v35 }
0x245b   :  { %4170 = vrot.lane.b32.xlu0 %v4166_v24, %s9830_s16 }
0x245d   :  { %4161 = vperm.xlu1 %9637, %v4153_v16  }
0x2461   :  { %4156 = vperm.xlu1 %9637, %v4152_v39  }
0x2465   :  { %9639 = vset.pattern.permute.xlu1 %v9875_v4 }
0x24cb   :  { %v4173_v60 = vpop.permute.xlu1 %4172 }
0x24cc   :  { %v4177_v32 = vsub.f32 %v11238_v41, %v4173_v60 }
0x24cd   :  { %v4171_v15 = vpop.permute.xlu0 %4170 }
0x24ce   :  { %v4176_v58 = vsub.f32 %v11244_v10, %v4171_v15  ;;  %4185 = vperm.xlu0 %9638, %v4177_v32  }
0x24d0   :  { %4180 = vperm.xlu1 %9639, %v4176_v58  }
0x24d2   :  { %9641 = vset.pattern.permute.xlu0 %v9876_v28 }
0x24d4   :  { %9640 = vset.pattern.permute.xlu1 %v9876_v28  ;;  %v9877_v28 = vmov 34  }
0x24d8   :  { %v4162_v8 = vpop.permute.xlu1 %4161 }
0x24d9   :  { %v4165_v27 = vmul.f32 %v4162_v8, %v11627_v40 }
0x24dc   :  { %v4157_v13 = vpop.permute.xlu1 %4156 }
0x24dd   :  { %v4164_v20 = vmul.f32 %v4157_v13, %v11631_v37 }
0x2549   :  { %v4186_v17 = vpop.permute.xlu0 %4185 }
0x254a   :  { %v4189_v36 = vadd.f32 %v4186_v17, %v4165_v27 }
0x254b   :  { %v4181_v48 = vpop.permute.xlu1 %4180 }
0x254c   :  { %v4191_v44 = vmax.f32 %v4189_v36, 0.0  ;;  %v4188_v0 = vadd.f32 %v4181_v48, %v4164_v20 }
0x254e   :  { %v4190_v35 = vmax.f32 %v4188_v0, 0.0  ;;  %4195 = vrot.lane.b32.xlu1 %v4191_v44, %s9838_s5  ;;  %9218 = vmatprep.subr.mxu0 %v4191_v44 }
0x254f   :  { %9219 = vmatpush3.msra.mxu0 %v4191_v44 }
0x2550   :  { %4192 = vrot.lane.b32.xlu0 %v4190_v35, %s9838_s5  ;;  %9220 = vmatprep.subr.mxu0 %v4190_v35 }
0x2551   :  { %9221 = vmatpush3.msra.mxu0 %v4190_v35 }
0x25c0   :  { %v4196_v41 = vpop.permute.xlu1 %4195 }
0x25c1   :  { %v4197_v10 = vsel %vm12854_vm1, %v4196_v41, %v4191_v44  ;;  %vm12861_vm1 = vmmov %vm12860_vm2 }
0x25c2   :  { %4200 = vrot.lane.b32.xlu1 %v4197_v10, %s9838_s5  ;;  %v4193_v6 = vpop.permute.xlu0 %4192 }
0x25c3   :  { %v4194_v63 = vsel %vm12855_vm10, %v4193_v6, %v4190_v35  ;;  %vm12862_vm10 = vmmov %vm12861_vm1 }
0x25c4   :  { %4198 = vrot.lane.b32.xlu0 %v4194_v63, %s9838_s5 }
0x25c6   :  { %4299 = vrot.lane.b32.xlu1 %v11585_v34, %s9837_s4 }
0x25c8   :  { %4214 = vrot.lane.b32.xlu0 %v11570_v61, %s9835_s29 }
0x25cc   :  { %4216 = vrot.lane.b32.xlu0 %v11585_v34, %s9835_s29 }
0x25d0   :  { %4297 = vrot.lane.b32.xlu0 %v11570_v61, %s9837_s4 }
0x2634   :  { %v4201_v3 = vpop.permute.xlu1 %4200 }
0x2635   :  { %v4203_v18 = vsel %vm12856_vm0, %v4201_v3, %v4191_v44  ;;  %vm12863_vm0 = vmmov %vm12861_vm1 }
0x2636   :  { %4208 = vrot.lane.b32.xlu1 %v4203_v18, %s9867_s26  ;;  %v4199_v21 = vpop.permute.xlu0 %4198 }
0x2637   :  { %v4202_v25 = vsel %vm12857_vm6, %v4199_v21, %v4190_v35  ;;  %vm12864_vm6 = vcmask 523264  }
0x2638   :  { %4380 = vrot.lane.b32.xlu0 %v4202_v25, %s9836_s30  ;;  %v4300_v16 = vpop.permute.xlu1 %4299 }
0x263a   :  { %4382 = vrot.lane.b32.xlu1 %v4203_v18, %s9836_s30  ;;  %v4215_v30 = vpop.permute.xlu0 %4214 }
0x263b   :  { %9222 = vmatprep.mubr.msk.f32.mxu0 %vm12858_vm8, %v4215_v30  ;;  %vm12865_vm8 = vmmov %vm12864_vm6 }
0x263c   :  { %4390 = vrot.lane.b32.xlu0 %v11585_v34, %s9838_s5 }
0x263e   :  { %4206 = vrot.lane.b32.xlu1 %v4202_v25, %s9867_s26  ;;  %v4217_v33 = vpop.permute.xlu0 %4216 }
0x263f   :  { %9223 = vmatmul.mubr.msk.f32.vlgmr.msra.gmra.mxu0 %vm12859_vm15, %v4217_v33  ;;  %vm12866_vm15 = vmmov %vm12864_vm6 }
0x2640   :  { %4474 = vperm.xlu0 %9641, %v11678_v38  }
0x2642   :  { %4388 = vrot.lane.b32.xlu1 %v11570_v61, %s9838_s5  ;;  %v4298_v4 = vpop.permute.xlu0 %4297 }
0x2643   :  { %9229 = vmatprep.mubr.msk.f32.mxu1 %vm12860_vm2, %v4298_v4  ;;  %vm12867_vm2 = vmmov %vm12864_vm6 }
0x2646   :  { %4478 = vperm.xlu1 %9640, %v11687_v19  }
0x264a   :  { %9642 = vset.pattern.permute.xlu1 %v9877_v28 }
0x26a8   :  { %v4209_v52 = vpop.permute.xlu1 %4208 }
0x26a9   :  { %9225 = vmatprep.subr.msk.mxu1 %vm11431_vm11, %v4209_v52 }
0x26aa   :  { %9226 = vmatpush3.msk.msra.mxu1 %vm11431_vm11, %v4209_v52  ;;  %v4381_v39 = vpop.permute.xlu0 %4380 }
0x26ac   :  { %v4383_v5 = vpop.permute.xlu1 %4382 }
0x26ad   :  { %9232 = vmatprep.subr.msk.mxu0 %vm11435_vm9, %v4383_v5 }
0x26ae   :  { %9233 = vmatpush3.msk.msra.mxu0 %vm11435_vm9, %v4383_v5  ;;  %v4391_v60 = vpop.permute.xlu0 %4390 }
0x26af   :  { %9234 = vmatprep.subr.msk.mxu0 %vm11435_vm9, %v4381_v39 }
0x26b0   :  { %v4207_v24 = vpop.permute.xlu1 %4206  ;;  %9235 = vmatpush3.msk.msra.mxu0 %vm11435_vm9, %v4381_v39 }
0x26b1   :  { %9227 = vmatprep.subr.msk.mxu1 %vm11431_vm11, %v4207_v24 }
0x26b2   :  { %9228 = vmatpush3.msk.msra.mxu1 %vm11431_vm11, %v4207_v24 }
0x26b3   :  { %9230 = vmatmul.mubr.msk.f32.vlgmr.msra.gmra.mxu1 %vm12861_vm1, %v4300_v16  ;;  %vm12868_vm1 = vcmask 1048064  }
0x26b4   :  { %v4389_v32 = vpop.permute.xlu1 %4388 }
0x26b5   :  { %9236 = vmatprep.mubr.msk.f32.mxu0 %vm12862_vm10, %v4389_v32  ;;  %vm12869_vm10 = vmmov %vm12868_vm1 }
0x26b6   :  { %9237 = vmatmul.mubr.msk.f32.vlgmr.msra.gmra.mxu0 %vm12863_vm0, %v4391_v60  ;;  %vm12870_vm0 = vmmov %vm12868_vm1 }
0x26bb   :  { %v4475_v0 = vpop.permute.xlu0 %4474 }
0x26c1   :  { %v4479_v36 = vpop.permute.xlu1 %4478 }
0x26ff   :  { %v9224_v15 = vpop.f32.mrf.mxu0 }
0x2701   :  { %v4288_v8 = vpop.f32.mrf.mxu0 }
0x2773   :  { %v9231_v58 = vpop.f32.mrf.mxu1 }
0x2774   :  { %v4377_v13 = vadd.f32 %v9231_v58, %v9224_v15 }
0x2775   :  { %v4371_v27 = vpop.f32.mrf.mxu1 }
0x2776   :  { %v4372_v17 = vadd.f32 %v4371_v27, %v4288_v8  ;;  %v9238_v20 = vpop.f32.mrf.mxu0  ;;  %v9878_v27 = vmov 35  }
0x2777   :  { %v4472_v48 = vadd.f32 %v9238_v20, %v4377_v13  ;;  %9643 = vset.pattern.permute.xlu0 %v9878_v27 }
0x2778   :  { %v4462_v44 = vpop.f32.mrf.mxu0 }
0x2779   :  { %v4482_v35 = vadd.f32 %v4479_v36, %v4472_v48  ;;  %v4471_v41 = vadd.f32 %v4462_v44, %v4372_v17 }
0x277b   :  { %v4481_v10 = vadd.f32 %v4475_v0, %v4471_v41  ;;  %v4486_v6 = vsel %vm12864_vm6, %v4482_v35, 0.0  ;;  %v4492_v63 = vmul.f32 %v4482_v35, %v4482_v35  ;;  %vm12871_vm6 = vmmov %vm12870_vm0 }
0x277c   :  { %4487 = vadd.xlane.f32.xlu1 %v4486_v6 }
0x277d   :  { %v4483_v3 = vsel %vm12865_vm8, %v4481_v10, 0.0  ;;  %v4491_v18 = vmul.f32 %v4481_v10, %v4481_v10  ;;  %v4496_v21 = vsel %vm12866_vm15, %v4492_v63, 0.0  ;;  %vm12872_vm8 = vcmask 130048  }
0x277e   :  { %4484 = vadd.xlane.f32.xlu0 %v4483_v3  ;;  %vm12873_vm15 = vmmov %vm12872_vm8 }
0x277f   :  { %v4493_v25 = vsel %vm12867_vm2, %v4491_v18, 0.0  ;;  %vm12874_vm2 = vmmov %vm12872_vm8 }
0x2780   :  { %4497 = vadd.xlane.f32.xlu1 %v4496_v21 }
0x2782   :  { %4494 = vadd.xlane.f32.xlu0 %v4493_v25 }
0x2805   :  { %v4488_v30 = vpop.xlane.xlu1 %4487 }
0x2806   :  { %v4490_v33 = vmul.f32 0.015625, %v4488_v30 }
0x2807   :  { %v4485_v4 = vpop.xlane.xlu0 %4484 }
0x2808   :  { %v4489_v16 = vmul.f32 0.015625, %v4485_v4  ;;  %v4502_v5 = vmul.f32 %v4490_v33, %v4490_v33 }
0x2809   :  { %v4498_v52 = vpop.xlane.xlu1 %4497 }
0x280a   :  { %v4500_v39 = vmul.f32 0.015625, %v4498_v52  ;;  %v4501_v60 = vmul.f32 %v4489_v16, %v4489_v16 }
0x280b   :  { %v4495_v24 = vpop.xlane.xlu0 %4494 }
0x280c   :  { %v4504_v32 = vsub.f32 %v4500_v39, %v4502_v5  ;;  %v4499_v15 = vmul.f32 0.015625, %v4495_v24 }
0x280e   :  { %v4506_v58 = vadd.f32 1e-05, %v4504_v32  ;;  %v4503_v8 = vsub.f32 %v4499_v15, %v4501_v60 }
0x2810   :  { %9755 = vrsqrt.f32 %v4506_v58  ;;  %v4505_v13 = vadd.f32 1e-05, %v4503_v8  ;;  %v9879_v8 = vmov 36  }
0x2812   :  { %9757 = vrsqrt.f32 %v4505_v13 }
0x281d   :  { %v9756_v17 = vpop.eup %9755 }
0x281e   :  { %v4510_v20 = vmul.f32 %v11687_v19, %v9756_v17 }
0x281f   :  { %v9758_v36 = vpop.eup %9757 }
0x2820   :  { %v4524_v48 = vmul.f32 %v4510_v20, %v4490_v33  ;;  %v4509_v44 = vmul.f32 %v11678_v38, %v9758_v36 }
0x2822   :  { %4529 = vrot.lane.b32.xlu1 %v4524_v48, %s9830_s16  ;;  %v4523_v0 = vmul.f32 %v4509_v44, %v4489_v16 }
0x2824   :  { %4527 = vrot.lane.b32.xlu0 %v4523_v0, %s9830_s16 }
0x2826   :  { %4518 = vperm.xlu1 %9642, %v4510_v20  }
0x282a   :  { %4513 = vperm.xlu1 %9642, %v4509_v44  }
0x282e   :  { %9644 = vset.pattern.permute.xlu1 %v9878_v27 }
0x2894   :  { %v4530_v41 = vpop.permute.xlu1 %4529 }
0x2895   :  { %v4534_v6 = vsub.f32 %v11687_v19, %v4530_v41 }
0x2896   :  { %v4528_v63 = vpop.permute.xlu0 %4527 }
0x2897   :  { %v4533_v3 = vsub.f32 %v11678_v38, %v4528_v63  ;;  %4542 = vperm.xlu0 %9643, %v4534_v6  }
0x2899   :  { %4537 = vperm.xlu1 %9644, %v4533_v3  }
0x289b   :  { %9646 = vset.pattern.permute.xlu0 %v9879_v8 }
0x289d   :  { %9645 = vset.pattern.permute.xlu1 %v9879_v8 }
0x28a1   :  { %v4519_v18 = vpop.permute.xlu1 %4518 }
0x28a2   :  { %v4522_v25 = vmul.f32 %v4519_v18, %v4482_v35 }
0x28a5   :  { %v4514_v21 = vpop.permute.xlu1 %4513 }
0x28a6   :  { %v4521_v30 = vmul.f32 %v4514_v21, %v4481_v10 }
0x2912   :  { %v4543_v28 = vpop.permute.xlu0 %4542 }
0x2913   :  { %v4546_v33 = vadd.f32 %v4543_v28, %v4522_v25 }
0x2914   :  { %v4538_v4 = vpop.permute.xlu1 %4537 }
0x2915   :  { %v4548_v16 = vmax.f32 %v4546_v33, 0.0  ;;  %v4545_v52 = vadd.f32 %v4538_v4, %v4521_v30  ;;  %v9880_v30 = vmov 37  }
0x2917   :  { %v4547_v5 = vmax.f32 %v4545_v52, 0.0  ;;  %4552 = vrot.lane.b32.xlu1 %v4548_v16, %s9838_s5  ;;  %9239 = vmatprep.subr.mxu1 %v4548_v16 }
0x2918   :  { %9240 = vmatpush3.msra.mxu1 %v4548_v16 }
0x2919   :  { %4549 = vrot.lane.b32.xlu0 %v4547_v5, %s9838_s5  ;;  %9241 = vmatprep.subr.mxu1 %v4547_v5 }
0x291a   :  { %9242 = vmatpush3.msra.mxu1 %v4547_v5 }
0x2989   :  { %v4553_v39 = vpop.permute.xlu1 %4552 }
0x298a   :  { %v4554_v24 = vsel %vm12868_vm1, %v4553_v39, %v4548_v16  ;;  %vm12875_vm1 = vmmov %vm12874_vm2 }
0x298b   :  { %4557 = vrot.lane.b32.xlu1 %v4554_v24, %s9838_s5  ;;  %v4550_v35 = vpop.permute.xlu0 %4549 }
0x298c   :  { %v4551_v10 = vsel %vm12869_vm10, %v4550_v35, %v4547_v5  ;;  %vm12876_vm10 = vmmov %vm12875_vm1 }
0x298d   :  { %4555 = vrot.lane.b32.xlu0 %v4551_v10, %s9838_s5 }
0x298f   :  { %4656 = vrot.lane.b32.xlu1 %v11585_v34, %s9844_s7 }
0x2991   :  { %4571 = vrot.lane.b32.xlu0 %v11570_v61, %s9842_s6 }
0x2995   :  { %4573 = vrot.lane.b32.xlu0 %v11585_v34, %s9842_s6 }
0x2999   :  { %4654 = vrot.lane.b32.xlu0 %v11570_v61, %s9844_s7 }
0x29fd   :  { %v4558_v60 = vpop.permute.xlu1 %4557 }
0x29fe   :  { %v4560_v32 = vsel %vm12870_vm0, %v4558_v60, %v4548_v16  ;;  %vm12877_vm0 = vmmov %vm12875_vm1  ;;  %v11841_v16 = vld [vmem:[%s12535_s2 + $0x58] sm:$0xff] }
0x29ff   :  { %4565 = vrot.lane.b32.xlu1 %v4560_v32, %s9867_s26  ;;  %v4556_v15 = vpop.permute.xlu0 %4555 }
0x2a00   :  { %v4559_v58 = vsel %vm12871_vm6, %v4556_v15, %v4547_v5 }
0x2a01   :  { %4737 = vrot.lane.b32.xlu0 %v4559_v58, %s9836_s30  ;;  %v4657_v20 = vpop.permute.xlu1 %4656 }
0x2a03   :  { %4739 = vrot.lane.b32.xlu1 %v4560_v32, %s9836_s30  ;;  %v4572_v13 = vpop.permute.xlu0 %4571 }
0x2a04   :  { %9243 = vmatprep.mubr.msk.f32.mxu1 %vm12872_vm8, %v4572_v13 }
0x2a05   :  { %4747 = vrot.lane.b32.xlu0 %v11585_v34, %s9845_s8 }
0x2a07   :  { %4563 = vrot.lane.b32.xlu1 %v4559_v58, %s9867_s26  ;;  %v4574_v27 = vpop.permute.xlu0 %4573 }
0x2a08   :  { %9244 = vmatmul.mubr.msk.f32.vlgmr.msra.gmra.mxu1 %vm12873_vm15, %v4574_v27  ;;  %v9881_v27 = vmov 38   ;;  %vm12887_vm15 = vmmov %vm12877_vm0 }
0x2a09   :  { %4835 = vperm.xlu0 %9646, %v11687_v19  }
0x2a0b   :  { %4745 = vrot.lane.b32.xlu1 %v11570_v61, %s9845_s8  ;;  %v4655_v17 = vpop.permute.xlu0 %4654 }
0x2a0c   :  { %9250 = vmatprep.mubr.msk.f32.mxu0 %vm12874_vm2, %v4655_v17  ;;  %vm12888_vm2 = vmmov %vm12877_vm0 }
0x2a0f   :  { %4831 = vperm.xlu1 %9645, %v11678_v38  }
0x2a13   :  { %9647 = vset.pattern.permute.xlu1 %v9880_v30 }
0x2a14   :  { %4930 = vperm.xlu1 %9647, %v11687_v19  }
0x2a18   :  { %4926 = vperm.xlu1 %9647, %v11678_v38  }
0x2a1c   :  { %9648 = vset.pattern.permute.xlu1 %v9881_v27 }
0x2a71   :  { %v4566_v36 = vpop.permute.xlu1 %4565 }
0x2a72   :  { %9246 = vmatprep.subr.msk.mxu0 %vm11431_vm11, %v4566_v36 }
0x2a73   :  { %9247 = vmatpush3.msk.msra.mxu0 %vm11431_vm11, %v4566_v36  ;;  %v4738_v48 = vpop.permute.xlu0 %4737 }
0x2a75   :  { %v4740_v34 = vpop.permute.xlu1 %4739 }
0x2a76   :  { %9253 = vmatprep.subr.msk.mxu1 %vm11435_vm9, %v4740_v34 }
0x2a77   :  { %9254 = vmatpush3.msk.msra.mxu1 %vm11435_vm9, %v4740_v34  ;;  %v4748_v44 = vpop.permute.xlu0 %4747 }
0x2a78   :  { %9255 = vmatprep.subr.msk.mxu1 %vm11435_vm9, %v4738_v48 }
0x2a79   :  { %v4564_v61 = vpop.permute.xlu1 %4563  ;;  %9256 = vmatpush3.msk.msra.mxu1 %vm11435_vm9, %v4738_v48 }
0x2a7a   :  { %9248 = vmatprep.subr.msk.mxu0 %vm11431_vm11, %v4564_v61 }
0x2a7b   :  { %9249 = vmatpush3.msk.msra.mxu0 %vm11431_vm11, %v4564_v61 }
0x2a7c   :  { %9251 = vmatmul.mubr.msk.f32.vlgmr.msra.gmra.mxu0 %vm12875_vm1, %v4657_v20  ;;  %9260 = vmatprep.subr.msk.mxu0 %vm11461_vm12, %v9869_v57  ;;  %vm12889_vm1 = vcmask 1041408  }
0x2a7d   :  { %v4746_v0 = vpop.permute.xlu1 %4745  ;;  %9261 = vmatpush3.msk.msra.mxu0 %vm11461_vm12, %v9869_v57 }
0x2a7e   :  { %9257 = vmatprep.mubr.msk.f32.mxu1 %vm12876_vm10, %v4746_v0  ;;  %9262 = vmatprep.subr.msk.mxu0 %vm11473_vm5, %v9869_v57  ;;  %vm12890_vm10 = vmmov %vm12889_vm1 }
0x2a7f   :  { %9258 = vmatmul.mubr.msk.f32.vlgmr.msra.gmra.mxu1 %vm12877_vm0, %v4748_v44  ;;  %9263 = vmatpush3.msk.msra.mxu0 %vm11473_vm5, %v9869_v57  ;;  %vm12883_vm5 = vcmask 15360  }
0x2a80   :  { %9264 = vmatprep.subr.msk.mxu0 %vm11485_vm3, %v9869_v57  ;;  %vm12884_vm12 = vmmov %vm12883_vm5 }
0x2a81   :  { %9265 = vmatpush3.msk.msra.mxu0 %vm11485_vm3, %v9869_v57  ;;  %vm12882_vm3 = vmmov %vm12877_vm0 }
0x2a82   :  { %9266 = vmatprep.subr.msk.mxu0 %vm11497_vm4, %v9869_v57  ;;  %vm12885_vm6 = vmmov %vm12883_vm5 }
0x2a83   :  { %9267 = vmatpush3.msk.msra.mxu0 %vm11497_vm4, %v9869_v57  ;;  %vm12878_vm4 = vnez %v12835_v1  ;;  %v11826_v1 = vld [vmem:[%s12535_s2 + $0x20] sm:$0xff]  ;;  %vm12886_vm8 = vmmov %vm12883_vm5 }
0x2a84   :  { %9268 = vmatprep.subr.msk.mxu0 %vm11509_vm13, %v9869_v57  ;;  %v4836_v63 = vpop.permute.xlu0 %4835 }
0x2a85   :  { %9269 = vmatpush3.msk.msra.mxu0 %vm11509_vm13, %v9869_v57  ;;  %vm12881_vm13 = vmmov %vm12877_vm0 }
0x2a86   :  { %9270 = vmatprep.subr.msk.mxu0 %vm11521_vm14, %v9869_v57  ;;  %9283 = vmatprep.mubr.msk.f32.mxu1 %vm12881_vm13, %v11826_v1  ;;  %vm12891_vm0 = vmmov %vm12883_vm5 }
0x2a87   :  { %9271 = vmatpush3.msk.msra.mxu0 %vm11521_vm14, %v9869_v57 }
0x2a88   :  { %9272 = vmatprep.subr.msk.mxu0 %vm11533_vm7, %v9869_v57 }
0x2a89   :  { %9273 = vmatpush3.msk.msra.mxu0 %vm11533_vm7, %v9869_v57  ;;  %vm12879_vm7 = vcmask 523264  }
0x2a8a   :  { %9274 = vmatprep.subr.msk.mxu0 %vm12878_vm4, %v9869_v57  ;;  %v4832_v14 = vpop.permute.xlu1 %4831  ;;  %vm12880_vm14 = vmmov %vm12879_vm7 }
0x2a8b   :  { %9275 = vmatpush3.msk.msra.mxu0 %vm12878_vm4, %v9869_v57  ;;  %vm12892_vm4 = vmmov %vm12891_vm0 }
0x2a8c   :  { %vm12894_vm13 = vmmov %vm12879_vm7 }
0x2a8f   :  { %v4931_v52 = vpop.permute.xlu1 %4930 }
0x2a93   :  { %v4927_v24 = vpop.permute.xlu1 %4926 }
0x2ac8   :  { %v9245_v23 = vpop.f32.mrf.mxu1 }
0x2aca   :  { %v4645_v50 = vpop.f32.mrf.mxu1 }
0x2b3c   :  { %v9252_v45 = vpop.f32.mrf.mxu0 }
0x2b3d   :  { %v4734_v49 = vadd.f32 %v9252_v45, %v9245_v23 }
0x2b3e   :  { %v4728_v2 = vpop.f32.mrf.mxu0 }
0x2b3f   :  { %v4729_v31 = vadd.f32 %v4728_v2, %v4645_v50  ;;  %v9259_v41 = vpop.f32.mrf.mxu1 }
0x2b40   :  { %v4829_v6 = vadd.f32 %v9259_v41, %v4734_v49  ;;  %v9882_v41 = vmov 39  }
0x2b41   :  { %v4819_v3 = vpop.f32.mrf.mxu1  ;;  %9649 = vset.pattern.permute.xlu0 %v9882_v41 }
0x2b42   :  { %v4828_v18 = vadd.f32 %v4819_v3, %v4729_v31  ;;  %v11815_v21 = vadd.f32 %v4836_v63, %v4829_v6 }
0x2b44   :  { %v11817_v25 = vadd.f32 %v4832_v14, %v4828_v18  ;;  %v4841_v57 = vand.u32 2147483647, %v11815_v21 }
0x2b46   :  { %v4840_v28 = vand.u32 2147483647, %v11817_v25 }
0x2b48   :  { %9276 = vmatprep.mubr.msk.f32.mxu0 %vm12879_vm7, %v4840_v28 }
0x2b49   :  { %9277 = vmatmul.mubr.msk.f32.vlgmr.msra.gmra.mxu0 %vm12880_vm14, %v4841_v57  ;;  %vm12893_vm14 = vmmov %vm12879_vm7 }
0x2c09   :  { %v11832_v33 = vpop.f32.mrf.mxu0 }
0x2c0a   :  { %9279 = vmatprep.subr.mxu1 %v11832_v33 }
0x2c0b   :  { %v11835_v4 = vpop.f32.mrf.mxu0  ;;  %9280 = vmatpush3.msra.mxu1 %v11832_v33 }
0x2c0c   :  { %9281 = vmatprep.subr.mxu1 %v11835_v4 }
0x2c0d   :  { %9282 = vmatpush3.msra.mxu1 %v11835_v4 }
0x2c0e   :  { %9284 = vmatmul.mubr.msk.f32.vlgmr.msra.gmra.mxu1 %vm12882_vm3, %v11841_v16  ;;  %vm12895_vm3 = vmmov %vm12879_vm7 }
0x2cce   :  { %v9285_v5 = vpop.f32.mrf.mxu1 }
0x2ccf   :  { %v5011_v39 = vadd.f32 %v9285_v5, %v4931_v52 }
0x2cd0   :  { %v5005_v35 = vpop.f32.mrf.mxu1 }
0x2cd1   :  { %v5006_v10 = vadd.f32 %v5005_v35, %v4927_v24  ;;  %v5017_v60 = vsel %vm12883_vm5, %v5011_v39, 0.0  ;;  %v5023_v32 = vmul.f32 %v5011_v39, %v5011_v39  ;;  %v9883_v24 = vmov 40  }
0x2cd2   :  { %5018 = vadd.xlane.f32.xlu0 %v5017_v60  ;;  %vm12896_vm5 = vcmask 1048064  }
0x2cd3   :  { %v5014_v15 = vsel %vm12884_vm12, %v5006_v10, 0.0  ;;  %v5027_v58 = vsel %vm12885_vm6, %v5023_v32, 0.0  ;;  %v5022_v8 = vmul.f32 %v5006_v10, %v5006_v10  ;;  %vm12897_vm12 = vmmov %vm12896_vm5 }
0x2cd4   :  { %5015 = vadd.xlane.f32.xlu1 %v5014_v15  ;;  %vm12898_vm6 = vmmov %vm12896_vm5 }
0x2cd5   :  { %v5024_v13 = vsel %vm12886_vm8, %v5022_v8, 0.0  ;;  %vm12899_vm8 = vmmov %vm12896_vm5 }
0x2cd6   :  { %5028 = vadd.xlane.f32.xlu0 %v5027_v58 }
0x2cda   :  { %5025 = vadd.xlane.f32.xlu0 %v5024_v13 }
0x2d5b   :  { %v5019_v17 = vpop.xlane.xlu0 %5018 }
0x2d5c   :  { %v5021_v20 = vmul.f32 0.5, %v5019_v17 }
0x2d5d   :  { %v5016_v36 = vpop.xlane.xlu1 %5015 }
0x2d5e   :  { %v5033_v48 = vmul.f32 %v5021_v20, %v5021_v20  ;;  %v5020_v61 = vmul.f32 0.5, %v5016_v36 }
0x2d5f   :  { %v5029_v34 = vpop.xlane.xlu0 %5028 }
0x2d60   :  { %v5031_v44 = vmul.f32 0.5, %v5029_v34  ;;  %v5032_v45 = vmul.f32 %v5020_v61, %v5020_v61 }
0x2d62   :  { %v5035_v0 = vsub.f32 %v5031_v44, %v5033_v48 }
0x2d63   :  { %v5026_v23 = vpop.xlane.xlu0 %5025 }
0x2d64   :  { %v5037_v50 = vadd.f32 1e-05, %v5035_v0  ;;  %v5030_v49 = vmul.f32 0.5, %v5026_v23 }
0x2d66   :  { %9759 = vrsqrt.f32 %v5037_v50  ;;  %v5034_v2 = vsub.f32 %v5030_v49, %v5032_v45 }
0x2d68   :  { %v5036_v31 = vadd.f32 1e-05, %v5034_v2 }
0x2d6a   :  { %9761 = vrsqrt.f32 %v5036_v31 }
0x2d73   :  { %v9760_v6 = vpop.eup %9759 }
0x2d74   :  { %v5041_v63 = vmul.f32 %v11687_v19, %v9760_v6 }
0x2d76   :  { %v5055_v3 = vmul.f32 %v5041_v63, %v5021_v20 }
0x2d77   :  { %v9762_v14 = vpop.eup %9761 }
0x2d78   :  { %5060 = vrot.lane.b32.xlu1 %v5055_v3, %s9830_s16  ;;  %v5040_v18 = vmul.f32 %v11678_v38, %v9762_v14 }
0x2d7a   :  { %v5054_v28 = vmul.f32 %v5040_v18, %v5020_v61 }
0x2d7c   :  { %5049 = vperm.xlu1 %9648, %v5041_v63   ;;  %5058 = vrot.lane.b32.xlu0 %v5054_v28, %s9830_s16 }
0x2d80   :  { %5044 = vperm.xlu1 %9648, %v5040_v18  }
0x2d84   :  { %9650 = vset.pattern.permute.xlu1 %v9882_v41 }
0x2dea   :  { %v5061_v57 = vpop.permute.xlu1 %5060 }
0x2deb   :  { %v5065_v30 = vsub.f32 %v11687_v19, %v5061_v57 }
0x2ded   :  { %5073 = vperm.xlu0 %9649, %v5065_v30  }
0x2dee   :  { %v5059_v52 = vpop.permute.xlu0 %5058 }
0x2def   :  { %v5064_v5 = vsub.f32 %v11678_v38, %v5059_v52 }
0x2df1   :  { %5068 = vperm.xlu1 %9650, %v5064_v5   ;;  %5090 = vrot.lane.b32.xlu0 %v11841_v16, %s9832_s0 }
0x2df2   :  { %9652 = vset.pattern.permute.xlu0 %v9883_v24 }
0x2df5   :  { %5088 = vrot.lane.b32.xlu1 %v11826_v1, %s9832_s0  ;;  %5085 = vperm.xlu0 %9652, %v11687_v19  }
0x2df6   :  { %9651 = vset.pattern.permute.xlu1 %v9883_v24 }
0x2df7   :  { %v5050_v35 = vpop.permute.xlu1 %5049 }
0x2df8   :  { %v5053_v60 = vmul.f32 %v5050_v35, %v5011_v39 }
0x2df9   :  { %5081 = vperm.xlu1 %9651, %v11678_v38  }
0x2dfb   :  { %v5045_v32 = vpop.permute.xlu1 %5044 }
0x2dfc   :  { %v5052_v8 = vmul.f32 %v5045_v32, %v5006_v10 }
0x2e68   :  { %v5074_v15 = vpop.permute.xlu0 %5073 }
0x2e69   :  { %v5077_v58 = vadd.f32 %v5074_v15, %v5053_v60 }
0x2e6b   :  { %v5079_v13 = vmax.f32 %v5077_v58, 0.0 }
0x2e6c   :  { %v5069_v27 = vpop.permute.xlu1 %5068  ;;  %v5091_v34 = vpop.permute.xlu0 %5090 }
0x2e6d   :  { %v5076_v17 = vadd.f32 %v5069_v27, %v5052_v8  ;;  %9286 = vmatprep.subr.mxu1 %v5079_v13 }
0x2e6e   :  { %9287 = vmatpush3.msra.mxu1 %v5079_v13 }
0x2e6f   :  { %v5078_v20 = vmax.f32 %v5076_v17, 0.0 }
0x2e70   :  { %v5089_v36 = vpop.permute.xlu1 %5088  ;;  %v5086_v39 = vpop.permute.xlu0 %5085 }
0x2e71   :  { %9288 = vmatprep.subr.mxu1 %v5078_v20  ;;  %9290 = vmatprep.mubr.msk.f32.mxu1 %vm12887_vm15, %v5089_v36  ;;  %vm12900_vm15 = vmmov %vm12888_vm2 }
0x2e72   :  { %9289 = vmatpush3.msra.mxu1 %v5078_v20 }
0x2e73   :  { %9291 = vmatmul.mubr.msk.f32.vlgmr.msra.gmra.mxu1 %vm12888_vm2, %v5091_v34  ;;  %9293 = vmatprep.subr.msk.mxu1 %vm12889_vm1, %v11613_v59  ;;  %vm12901_vm1 = vmmov %vm12888_vm2 }
0x2e74   :  { %9294 = vmatpush3.msk.msra.mxu1 %vm12890_vm10, %v11613_v59  ;;  %v5082_v48 = vpop.permute.xlu1 %5081  ;;  %vm12902_vm10 = vnez %v12663_v42  ;;  %v9886_v42 = vmov 43  }
0x2f33   :  { %v9292_v10 = vpop.f32.mrf.mxu1 }
0x2f34   :  { %v5168_v61 = vadd.f32 %v9292_v10, %v5086_v39 }
0x2f35   :  { %v5162_v44 = vpop.f32.mrf.mxu1 }
0x2f36   :  { %v5172_v0 = vsub.f32 0.0, %v5168_v61  ;;  %v5163_v23 = vadd.f32 %v5162_v44, %v5082_v48 }
0x2f38   :  { %v5175_v45 = vmul.f32 1.442695, %v5172_v0  ;;  %v5171_v50 = vsub.f32 0.0, %v5163_v23 }
0x2f3a   :  { %9763 = vpow2.f32 %v5175_v45  ;;  %v5173_v49 = vmul.f32 1.442695, %v5171_v50  ;;  %v9885_v50 = vmov 42  }
0x2f3b   :  { %9654 = vset.pattern.permute.xlu0 %v9885_v50 }
0x2f3c   :  { %9765 = vpow2.f32 %v5173_v49 }
0x2f47   :  { %v9764_v2 = vpop.eup %9763 }
0x2f48   :  { %v5178_v31 = vadd.f32 1.0, %v9764_v2 }
0x2f49   :  { %v9766_v41 = vpop.eup %9765 }
0x2f4a   :  { %v5177_v6 = vadd.f32 1.0, %v9766_v41  ;;  %9767 = vrcp.f32 %v5178_v31 }
0x2f4c   :  { %9769 = vrcp.f32 %v5177_v6 }
0x2f57   :  { %v9768_v63 = vpop.eup %9767 }
0x2f58   :  { %v5184_v14 = vmul.f32 %v9768_v63, %v11832_v33 }
0x2f59   :  { %v9770_v59 = vpop.eup %9769 }
0x2f5a   :  { %v5183_v3 = vmul.f32 %v9770_v59, %v11835_v4 }
0x2f5c   :  { %9295 = vmatprep.mubr.msk.f32.mxu1 %vm12891_vm0, %v5183_v3  ;;  %vm12903_vm0 = vmmov %vm12901_vm1 }
0x2f5d   :  { %9296 = vmatmul.mubr.msk.f32.vlgmr.msra.gmra.mxu1 %vm12892_vm4, %v5184_v14  ;;  %vm12905_vm4 = vmmov %vm12903_vm0 }
0x301d   :  { %v9297_v18 = vpop.f32.mrf.mxu1 }
0x301e   :  { %v5267_v28 = vsub.f32 0.0, %v9297_v18 }
0x301f   :  { %v5257_v57 = vpop.f32.mrf.mxu1 }
0x3020   :  { %v5269_v30 = vmax.f32 %v11815_v21, %v5267_v28  ;;  %v5266_v52 = vsub.f32 0.0, %v5257_v57 }
0x3022   :  { %v5271_v5 = vmin.f32 %v5269_v30, %v9297_v18  ;;  %v5268_v24 = vmax.f32 %v11817_v25, %v5266_v52 }
0x3024   :  { %v5273_v35 = vsub.f32 %v11815_v21, %v5271_v5  ;;  %v5270_v60 = vmin.f32 %v5268_v24, %v5257_v57 }
0x3026   :  { %v11877_v4 = vadd.f32 %v5273_v35, %v11627_v40  ;;  %v5272_v33 = vsub.f32 %v11817_v25, %v5270_v60  ;;  %v9884_v25 = vmov 41  }
0x3027   :  { %9653 = vset.pattern.permute.xlu1 %v9884_v25 }
0x3028   :  { %v11881_v32 = vadd.f32 %v5272_v33, %v11631_v37  ;;  %v5279_v15 = vsel %vm12879_vm7, %v11877_v4, 0.0  ;;  %v5285_v58 = vmul.f32 %v11877_v4, %v11877_v4  ;;  %vm12907_vm7 = vmmov %vm12903_vm0 }
0x3029   :  { %5280 = vadd.xlane.f32.xlu1 %v5279_v15 }
0x302a   :  { %v5276_v8 = vsel %vm12893_vm14, %v11881_v32, 0.0  ;;  %v5284_v21 = vmul.f32 %v11881_v32, %v11881_v32  ;;  %v5289_v40 = vsel %vm12894_vm13, %v5285_v58, 0.0  ;;  %vm12908_vm14 = vnez %v12669_v51 }
0x302b   :  { %5277 = vadd.xlane.f32.xlu0 %v5276_v8  ;;  %vm12909_vm13 = vnez %v12672_v54 }
0x302c   :  { %v5286_v37 = vsel %vm12895_vm3, %v5284_v21, 0.0 }
0x302d   :  { %5290 = vadd.xlane.f32.xlu1 %v5289_v40 }
0x302f   :  { %5287 = vadd.xlane.f32.xlu0 %v5286_v37 }
0x30b2   :  { %v5281_v13 = vpop.xlane.xlu1 %5280 }
0x30b3   :  { %v5283_v27 = vmul.f32 0.015625, %v5281_v13 }
0x30b4   :  { %v5278_v17 = vpop.xlane.xlu0 %5277 }
0x30b5   :  { %v5282_v20 = vmul.f32 0.015625, %v5278_v17  ;;  %v5295_v34 = vmul.f32 %v5283_v27, %v5283_v27 }
0x30b6   :  { %v5291_v36 = vpop.xlane.xlu1 %5290 }
0x30b7   :  { %v5293_v39 = vmul.f32 0.015625, %v5291_v36  ;;  %v5294_v48 = vmul.f32 %v5282_v20, %v5282_v20 }
0x30b8   :  { %v5288_v10 = vpop.xlane.xlu0 %5287 }
0x30b9   :  { %v5297_v61 = vsub.f32 %v5293_v39, %v5295_v34  ;;  %v5292_v44 = vmul.f32 0.015625, %v5288_v10 }
0x30bb   :  { %v5299_v0 = vadd.f32 1e-05, %v5297_v61  ;;  %v5296_v23 = vsub.f32 %v5292_v44, %v5294_v48 }
0x30bd   :  { %9771 = vrsqrt.f32 %v5299_v0  ;;  %v5298_v45 = vadd.f32 1e-05, %v5296_v23 }
0x30bf   :  { %9773 = vrsqrt.f32 %v5298_v45 }
0x30ca   :  { %v9772_v49 = vpop.eup %9771 }
0x30cb   :  { %v5303_v2 = vmul.f32 %v11687_v19, %v9772_v49 }
0x30cc   :  { %v9774_v31 = vpop.eup %9773 }
0x30cd   :  { %v5317_v41 = vmul.f32 %v5303_v2, %v5283_v27  ;;  %v5302_v6 = vmul.f32 %v11678_v38, %v9774_v31 }
0x30cf   :  { %5322 = vrot.lane.b32.xlu1 %v5317_v41, %s9830_s16  ;;  %v5316_v63 = vmul.f32 %v5302_v6, %v5282_v20 }
0x30d1   :  { %5320 = vrot.lane.b32.xlu0 %v5316_v63, %s9830_s16 }
0x30d3   :  { %5311 = vperm.xlu1 %9653, %v5303_v2  }
0x30d7   :  { %5306 = vperm.xlu1 %9653, %v5302_v6  }
0x30db   :  { %9655 = vset.pattern.permute.xlu1 %v9885_v50 }
0x3141   :  { %v5323_v59 = vpop.permute.xlu1 %5322 }
0x3142   :  { %v5327_v3 = vsub.f32 %v11687_v19, %v5323_v59  ;;  %v9887_v59 = vmov 44  }
0x3143   :  { %v5321_v14 = vpop.permute.xlu0 %5320 }
0x3144   :  { %v5326_v18 = vsub.f32 %v11678_v38, %v5321_v14  ;;  %5335 = vperm.xlu0 %9654, %v5327_v3  }
0x3146   :  { %5330 = vperm.xlu1 %9655, %v5326_v18  }
0x3148   :  { %9657 = vset.pattern.permute.xlu0 %v9886_v42 }
0x314a   :  { %9656 = vset.pattern.permute.xlu1 %v9886_v42 }
0x314e   :  { %v5312_v28 = vpop.permute.xlu1 %5311 }
0x314f   :  { %v5315_v30 = vmul.f32 %v5312_v28, %v11877_v4 }
0x3152   :  { %v5307_v57 = vpop.permute.xlu1 %5306 }
0x3153   :  { %v5314_v5 = vmul.f32 %v5307_v57, %v11881_v32 }
0x31bf   :  { %v5336_v52 = vpop.permute.xlu0 %5335 }
0x31c0   :  { %v5339_v24 = vadd.f32 %v5336_v52, %v5315_v30 }
0x31c1   :  { %v5331_v35 = vpop.permute.xlu1 %5330 }
0x31c2   :  { %v5341_v60 = vmax.f32 %v5339_v24, 0.0  ;;  %v5338_v33 = vadd.f32 %v5331_v35, %v5314_v5 }
0x31c4   :  { %v5340_v15 = vmax.f32 %v5338_v33, 0.0  ;;  %5345 = vrot.lane.b32.xlu1 %v5341_v60, %s9838_s5  ;;  %9298 = vmatprep.subr.mxu1 %v5341_v60 }
0x31c5   :  { %9299 = vmatpush3.msra.mxu1 %v5341_v60 }
0x31c6   :  { %5342 = vrot.lane.b32.xlu0 %v5340_v15, %s9838_s5  ;;  %9300 = vmatprep.subr.mxu1 %v5340_v15 }
0x31c7   :  { %9301 = vmatpush3.msra.mxu1 %v5340_v15 }
0x3236   :  { %v5346_v58 = vpop.permute.xlu1 %5345 }
0x3237   :  { %v5347_v8 = vsel %vm12896_vm5, %v5346_v58, %v5341_v60  ;;  %vm12911_vm5 = vnez %v12776_v53 }
0x3238   :  { %5350 = vrot.lane.b32.xlu1 %v5347_v8, %s9838_s5  ;;  %v5343_v21 = vpop.permute.xlu0 %5342  ;;  %v9888_v8 = vmov 45  }
0x3239   :  { %v5344_v40 = vsel %vm12897_vm12, %v5343_v21, %v5340_v15  ;;  %vm12912_vm12 = vnez %v12778_v12 }
0x323a   :  { %5348 = vrot.lane.b32.xlu0 %v5344_v40, %s9838_s5 }
0x323c   :  { %5449 = vrot.lane.b32.xlu1 %v11841_v16, %s9837_s4 }
0x323e   :  { %5364 = vrot.lane.b32.xlu0 %v11826_v1, %s9835_s29 }
0x3242   :  { %5366 = vrot.lane.b32.xlu0 %v11841_v16, %s9835_s29 }
0x3246   :  { %5447 = vrot.lane.b32.xlu0 %v11826_v1, %s9837_s4 }
0x32aa   :  { %v5351_v37 = vpop.permute.xlu1 %5350 }
0x32ab   :  { %v5353_v25 = vsel %vm12898_vm6, %v5351_v37, %v5341_v60  ;;  %vm12913_vm6 = vnez %v12780_v22 }
0x32ac   :  { %5358 = vrot.lane.b32.xlu1 %v5353_v25, %s9867_s26  ;;  %v5349_v13 = vpop.permute.xlu0 %5348 }
0x32ad   :  { %v5352_v27 = vsel %vm12899_vm8, %v5349_v13, %v5340_v15  ;;  %v12059_v13 = vld [vmem:[%s12536_s1] sm:$0xff] }
0x32ae   :  { %5530 = vrot.lane.b32.xlu0 %v5352_v27, %s9836_s30  ;;  %v5450_v34 = vpop.permute.xlu1 %5449 }
0x32b0   :  { %5532 = vrot.lane.b32.xlu1 %v5353_v25, %s9836_s30  ;;  %v5365_v17 = vpop.permute.xlu0 %5364 }
0x32b1   :  { %9302 = vmatprep.mubr.msk.f32.mxu1 %vm12900_vm15, %v5365_v17 }
0x32b2   :  { %5540 = vrot.lane.b32.xlu0 %v11841_v16, %s9838_s5 }
0x32b4   :  { %5356 = vrot.lane.b32.xlu1 %v5352_v27, %s9867_s26  ;;  %v5367_v20 = vpop.permute.xlu0 %5366 }
0x32b5   :  { %9303 = vmatmul.mubr.msk.f32.vlgmr.msra.gmra.mxu1 %vm12888_vm2, %v5367_v20 }
0x32b6   :  { %5705 = vperm.xlu0 %9657, %v11678_v38  }
0x32b8   :  { %5538 = vrot.lane.b32.xlu1 %v11826_v1, %s9838_s5  ;;  %v5448_v36 = vpop.permute.xlu0 %5447 }
0x32b9   :  { %9309 = vmatprep.mubr.msk.f32.mxu0 %vm12901_vm1, %v5448_v36  ;;  %vm5793_vm1 = vcmask 261120  }
0x32ba   :  { %9659 = vset.pattern.permute.xlu0 %v9888_v8 }
0x32bc   :  { %5709 = vperm.xlu1 %9656, %v11687_v19  }
0x32c0   :  { %9658 = vset.pattern.permute.xlu1 %v9887_v59 }
0x331e   :  { %v5359_v39 = vpop.permute.xlu1 %5358 }
0x331f   :  { %9305 = vmatprep.subr.msk.mxu0 %vm11431_vm11, %v5359_v39 }
0x3320   :  { %9306 = vmatpush3.msk.msra.mxu0 %vm11431_vm11, %v5359_v39  ;;  %v5531_v48 = vpop.permute.xlu0 %5530 }
0x3322   :  { %v5533_v10 = vpop.permute.xlu1 %5532 }
0x3323   :  { %9312 = vmatprep.subr.msk.mxu1 %vm11435_vm9, %v5533_v10 }
0x3324   :  { %9313 = vmatpush3.msk.msra.mxu1 %vm11435_vm9, %v5533_v10  ;;  %v5541_v44 = vpop.permute.xlu0 %5540 }
0x3325   :  { %9314 = vmatprep.subr.msk.mxu1 %vm11435_vm9, %v5531_v48 }
0x3326   :  { %v5357_v61 = vpop.permute.xlu1 %5356  ;;  %9315 = vmatpush3.msk.msra.mxu1 %vm11435_vm9, %v5531_v48  ;;  %vm12904_vm9 = vmmov %vm12895_vm3  ;;  %vm12910_vm3 = vnez %v12675_v56 }
0x3327   :  { %9307 = vmatprep.subr.msk.mxu0 %vm11431_vm11, %v5357_v61  ;;  %9338 = vmatprep.subr.msk.mxu1 %vm12902_vm10, %v12762_v62  ;;  %vm12914_vm8 = vmmov %vm12904_vm9 }
0x3328   :  { %9308 = vmatpush3.msk.msra.mxu0 %vm11431_vm11, %v5357_v61  ;;  %vm12906_vm11 = vnez %v12666_v46  ;;  %vm12915_vm15 = vmmov %vm12914_vm8 }
0x3329   :  { %9310 = vmatmul.mubr.msk.f32.vlgmr.msra.gmra.mxu0 %vm12903_vm0, %v5450_v34  ;;  %9319 = vmatprep.subr.msk.mxu0 %vm12902_vm10, %v12762_v62  ;;  %vm12916_vm2 = vmmov %vm12914_vm8 }
0x332a   :  { %v5539_v0 = vpop.permute.xlu1 %5538  ;;  %9320 = vmatpush3.msk.msra.mxu0 %vm12902_vm10, %v12762_v62  ;;  %9335 = vmatprep.mubr.msk.f32.mxu0 %vm12904_vm9, %v11881_v32  ;;  %vm12917_vm9 = vmmov %vm12903_vm0 }
0x332b   :  { %9316 = vmatprep.mubr.msk.f32.mxu1 %vm12905_vm4, %v5539_v0  ;;  %9321 = vmatprep.subr.msk.mxu0 %vm12906_vm11, %v12762_v62  ;;  %vm12918_vm4 = vmmov %vm12903_vm0 }
0x332c   :  { %9317 = vmatmul.mubr.msk.f32.vlgmr.msra.gmra.mxu1 %vm12907_vm7, %v5541_v44  ;;  %9322 = vmatpush3.msk.msra.mxu0 %vm12906_vm11, %v12762_v62 }
0x332d   :  { %9323 = vmatprep.subr.msk.mxu0 %vm12908_vm14, %v12762_v62  ;;  %9339 = vmatpush3.msk.msra.mxu1 %vm12902_vm10, %v12762_v62  ;;  %vm5861_vm10 = vcmask 1047808  }
0x332e   :  { %9324 = vmatpush3.msk.msra.mxu0 %vm12908_vm14, %v12762_v62  ;;  %9340 = vmatprep.subr.msk.mxu1 %vm12906_vm11, %v12762_v62 }
0x332f   :  { %9325 = vmatprep.subr.msk.mxu0 %vm12909_vm13, %v12762_v62  ;;  %9341 = vmatpush3.msk.msra.mxu1 %vm12906_vm11, %v12762_v62 }
0x3330   :  { %9326 = vmatpush3.msk.msra.mxu0 %vm12909_vm13, %v12762_v62  ;;  %9342 = vmatprep.subr.msk.mxu1 %vm12908_vm14, %v12762_v62 }
0x3331   :  { %9327 = vmatprep.subr.msk.mxu0 %vm12910_vm3, %v12762_v62  ;;  %9343 = vmatpush3.msk.msra.mxu1 %vm12908_vm14, %v12762_v62  ;;  %v5706_v23 = vpop.permute.xlu0 %5705  ;;  %vm12923_vm14 = vmmov %vm12903_vm0 }
0x3332   :  { %9328 = vmatpush3.msk.msra.mxu0 %vm12910_vm3, %v12762_v62  ;;  %9344 = vmatprep.subr.msk.mxu1 %vm12909_vm13, %v12762_v62 }
0x3333   :  { %9329 = vmatprep.subr.msk.mxu0 %vm12911_vm5, %v12762_v62  ;;  %9345 = vmatpush3.msk.msra.mxu1 %vm12909_vm13, %v12762_v62  ;;  %vm12924_vm13 = vmmov %vm12903_vm0 }
0x3334   :  { %9330 = vmatpush3.msk.msra.mxu0 %vm12911_vm5, %v12762_v62  ;;  %9346 = vmatprep.subr.msk.mxu1 %vm12910_vm3, %v12762_v62 }
0x3335   :  { %9331 = vmatprep.subr.msk.mxu0 %vm12912_vm12, %v12762_v62  ;;  %9347 = vmatpush3.msk.msra.mxu1 %vm12910_vm3, %v12762_v62  ;;  %vm12925_vm3 = vmmov %vm12903_vm0 }
0x3336   :  { %9332 = vmatpush3.msk.msra.mxu0 %vm12912_vm12, %v12762_v62  ;;  %9348 = vmatprep.subr.msk.mxu1 %vm12911_vm5, %v12762_v62 }
0x3337   :  { %9333 = vmatprep.subr.msk.mxu0 %vm12913_vm6, %v12762_v62  ;;  %9349 = vmatpush3.msk.msra.mxu1 %vm12911_vm5, %v12762_v62 }
0x3338   :  { %9334 = vmatpush3.msk.msra.mxu0 %vm12913_vm6, %v12762_v62  ;;  %9350 = vmatprep.subr.msk.mxu1 %vm12912_vm12, %v12762_v62 }
0x3339   :  { %9336 = vmatmul.mubr.msk.f32.vlgmr.msra.gmra.mxu0 %vm12914_vm8, %v11877_v4  ;;  %9351 = vmatpush3.msk.msra.mxu1 %vm12912_vm12, %v12762_v62 }
0x333a   :  { %9352 = vmatprep.subr.msk.mxu1 %vm12913_vm6, %v12762_v62 }
0x333b   :  { %9353 = vmatpush3.msk.msra.mxu1 %vm12913_vm6, %v12762_v62  ;;  %v5710_v62 = vpop.permute.xlu1 %5709 }
0x3375   :  { %v9304_v46 = vpop.f32.mrf.mxu1 }
0x3377   :  { %v5438_v54 = vpop.f32.mrf.mxu1 }
0x33e9   :  { %v9311_v51 = vpop.f32.mrf.mxu0 }
0x33ea   :  { %v5527_v53 = vadd.f32 %v9311_v51, %v9304_v46 }
0x33eb   :  { %v5521_v56 = vpop.f32.mrf.mxu0 }
0x33ec   :  { %v5522_v12 = vadd.f32 %v5521_v56, %v5438_v54  ;;  %v9318_v55 = vpop.f32.mrf.mxu1 }
0x33ed   :  { %v5622_v32 = vadd.f32 %v9318_v55, %v5527_v53 }
0x33ee   :  { %v5612_v7 = vpop.f32.mrf.mxu1 }
0x33ef   :  { %v5621_v4 = vadd.f32 %v5612_v7, %v5522_v12 }
0x33f1   :  { %9354 = vmatprep.mubr.msk.f32.mxu1 %vm12915_vm15, %v5621_v4 }
0x33f2   :  { %9355 = vmatmul.mubr.msk.f32.vlgmr.msra.gmra.mxu1 %vm12916_vm2, %v5622_v32 }
0x34b2   :  { %v9356_v22 = vpop.f32.mrf.mxu1 }
0x34b3   :  { %v5790_v45 = vadd.f32 %v9356_v22, %v5710_v62 }
0x34b4   :  { %v5784_v38 = vpop.f32.mrf.mxu1 }
0x34b5   :  { %v5785_v50 = vadd.f32 %v5784_v38, %v5706_v23  ;;  %v5797_v49 = vsel %vm5793_vm1, %v5790_v45, 0.0  ;;  %v5804_v2 = vmul.f32 %v5790_v45, %v5790_v45  ;;  %v9890_v23 = vmov 46  }
0x34b6   :  { %5798 = vadd.xlane.f32.xlu1 %v5797_v49 }
0x34b7   :  { %v5794_v31 = vsel %vm5793_vm1, %v5785_v50, 0.0  ;;  %v5803_v41 = vmul.f32 %v5785_v50, %v5785_v50  ;;  %v5808_v6 = vsel %vm5793_vm1, %v5804_v2, 0.0  ;;  %v5874_v2 = vand.u32 15, %v9981_v11 }
0x34b8   :  { %5795 = vadd.xlane.f32.xlu0 %v5794_v31 }
0x34b9   :  { %v5805_v63 = vsel %vm5793_vm1, %v5803_v41, 0.0  ;;  %vm12101_vm11 = vcmp.ne.s32.totalorder %v5874_v2, 0  ;;  %vm12109_vm7 = vcmp.ne.s32.totalorder %v5874_v2, 15 }
0x34ba   :  { %5809 = vadd.xlane.f32.xlu1 %v5808_v6 }
0x34bc   :  { %5806 = vadd.xlane.f32.xlu0 %v5805_v63 }
0x353f   :  { %v5799_v3 = vpop.xlane.xlu1 %5798 }
0x3540   :  { %v5802_v14 = vmul.f32 0.03125, %v5799_v3 }
0x3541   :  { %v5796_v18 = vpop.xlane.xlu0 %5795 }
0x3542   :  { %v5801_v28 = vmul.f32 0.03125, %v5796_v18  ;;  %v5814_v30 = vmul.f32 %v5802_v14, %v5802_v14 }
0x3543   :  { %v5810_v57 = vpop.xlane.xlu1 %5809 }
0x3544   :  { %v5812_v52 = vmul.f32 0.03125, %v5810_v57  ;;  %v5813_v24 = vmul.f32 %v5801_v28, %v5801_v28  ;;  %v9891_v57 = vmov 0.0625  }
0x3545   :  { %v5807_v5 = vpop.xlane.xlu0 %5806 }
0x3546   :  { %v5816_v35 = vsub.f32 %v5812_v52, %v5814_v30  ;;  %v5811_v60 = vmul.f32 0.03125, %v5807_v5 }
0x3548   :  { %v5818_v33 = vadd.f32 1e-05, %v5816_v35  ;;  %v5815_v15 = vsub.f32 %v5811_v60, %v5813_v24 }
0x354a   :  { %9775 = vrsqrt.f32 %v5818_v33  ;;  %v5817_v58 = vadd.f32 1e-05, %v5815_v15 }
0x354c   :  { %9777 = vrsqrt.f32 %v5817_v58 }
0x3557   :  { %v9776_v21 = vpop.eup %9775 }
0x3558   :  { %v5822_v40 = vmul.f32 %v11687_v19, %v9776_v21  ;;  %v12067_v19 = vld [vmem:[%s12536_s1 + $0x8] sm:$0xff] }
0x3559   :  { %v9778_v37 = vpop.eup %9777 }
0x355a   :  { %v5836_v25 = vmul.f32 %v5822_v40, %v5802_v14  ;;  %v5821_v27 = vmul.f32 %v12059_v13, %v9778_v37  ;;  %v6158_v14 = vmul.u32 16, %v9981_v11 }
0x355c   :  { %5841 = vrot.lane.b32.xlu1 %v5836_v25, %s9830_s16  ;;  %v5835_v17 = vmul.f32 %v5821_v27, %v5801_v28  ;;  %v6163_v18 = vadd.s32 16, %v6158_v14  ;;  %vm6162_vm5 = vcmp.ge.s32.totalorder %v12825_v26, %v6158_v14  ;;  %vm6161_vm8 = vcmp.ge.s32.totalorder %v12828_v29, %v6158_v14 }
0x355e   :  { %5839 = vrot.lane.b32.xlu0 %v5835_v17, %s9830_s16  ;;  %vm6167_vm12 = vcmp.lt.s32.totalorder %v12825_v26, %v6163_v18  ;;  %vm6166_vm15 = vcmp.lt.s32.totalorder %v12828_v29, %v6163_v18 }
0x355f   :  { %vm12131_vm6 = vmand %vm6162_vm5, %vm6167_vm12  ;;  %vm12934_vm5 = vcmask 130048  }
0x3560   :  { %5830 = vperm.xlu1 %9658, %v5822_v40   ;;  %vm12143_vm2 = vmand %vm6161_vm8, %vm6166_vm15  ;;  %vm12936_vm8 = vcmask 15360  }
0x3561   :  { %vm12935_vm12 = vmmov %vm12934_vm5 }
0x3562   :  { %vm12937_vm15 = vmmov %vm12936_vm8 }
0x3564   :  { %5825 = vperm.xlu1 %9658, %v5821_v27  }
0x3568   :  { %9660 = vset.pattern.permute.xlu1 %v9888_v8 }
0x35ce   :  { %v5842_v20 = vpop.permute.xlu1 %5841 }
0x35cf   :  { %v5846_v36 = vsub.f32 %v12067_v19, %v5842_v20 }
0x35d0   :  { %v5840_v34 = vpop.permute.xlu0 %5839 }
0x35d1   :  { %v5845_v39 = vsub.f32 %v12059_v13, %v5840_v34  ;;  %5854 = vperm.xlu0 %9659, %v5846_v36   ;;  %v12192_v34 = vld [vmem:[%s12535_s2 + $0x28] sm:$0xff] }
0x35d3   :  { %5849 = vperm.xlu1 %9660, %v5845_v39   ;;  %v9892_v39 = vmov 47  }
0x35d5   :  { %9662 = vset.pattern.permute.xlu0 %v9890_v23 }
0x35d7   :  { %9661 = vset.pattern.permute.xlu1 %v9890_v23 }
0x35db   :  { %v5831_v10 = vpop.permute.xlu1 %5830 }
0x35dc   :  { %v5834_v61 = vmul.f32 %v5831_v10, %v5790_v45 }
0x35df   :  { %v5826_v48 = vpop.permute.xlu1 %5825 }
0x35e0   :  { %v5833_v0 = vmul.f32 %v5826_v48, %v5785_v50 }
0x364c   :  { %v5855_v44 = vpop.permute.xlu0 %5854 }
0x364d   :  { %v5858_v42 = vadd.f32 %v5855_v44, %v5834_v61  ;;  %v12207_v61 = vld [vmem:[%s12535_s2 + $0x60] sm:$0xff] }
0x364e   :  { %v5850_v46 = vpop.permute.xlu1 %5849 }
0x364f   :  { %v5860_v51 = vmax.f32 %v5858_v42, 0.0  ;;  %v5857_v54 = vadd.f32 %v5850_v46, %v5833_v0 }
0x3651   :  { %v5859_v56 = vmax.f32 %v5857_v54, 0.0  ;;  %5865 = vrot.lane.b32.xlu1 %v5860_v51, %s9842_s6  ;;  %9357 = vmatprep.subr.mxu0 %v5860_v51 }
0x3652   :  { %9358 = vmatpush3.msra.mxu0 %v5860_v51 }
0x3653   :  { %5862 = vrot.lane.b32.xlu0 %v5859_v56, %s9842_s6  ;;  %9359 = vmatprep.subr.mxu0 %v5859_v56 }
0x3654   :  { %9360 = vmatpush3.msra.mxu0 %v5859_v56 }
0x36c3   :  { %v5866_v53 = vpop.permute.xlu1 %5865 }
0x36c4   :  { %v5867_v12 = vsel %vm5861_vm10, %v5866_v53, %v5860_v51 }
0x36c5   :  { %5870 = vrot.lane.b32.xlu1 %v5867_v12, %s9842_s6  ;;  %v5863_v55 = vpop.permute.xlu0 %5862 }
0x36c6   :  { %v5864_v7 = vsel %vm5861_vm10, %v5863_v55, %v5859_v56 }
0x36c7   :  { %5868 = vrot.lane.b32.xlu0 %v5864_v7, %s9842_s6 }
0x36c9   :  { %5971 = vrot.lane.b32.xlu1 %v11841_v16, %s9844_s7 }
0x36cb   :  { %5886 = vrot.lane.b32.xlu0 %v11826_v1, %s9842_s6 }
0x36cf   :  { %5888 = vrot.lane.b32.xlu0 %v11841_v16, %s9842_s6 }
0x36d3   :  { %5969 = vrot.lane.b32.xlu0 %v11826_v1, %s9844_s7 }
0x3737   :  { %v5871_v4 = vpop.permute.xlu1 %5870 }
0x3738   :  { %v5873_v32 = vsel %vm5861_vm10, %v5871_v4, %v5860_v51 }
0x3739   :  { %5880 = vrot.lane.b32.xlu1 %v5873_v32, %s9889_s24  ;;  %v5869_v62 = vpop.permute.xlu0 %5868 }
0x373a   :  { %v5872_v22 = vsel %vm5861_vm10, %v5869_v62, %v5859_v56 }
0x373b   :  { %6053 = vrot.lane.b32.xlu0 %v5872_v22, %s9836_s30  ;;  %v5972_v49 = vpop.permute.xlu1 %5971 }
0x373d   :  { %6055 = vrot.lane.b32.xlu1 %v5873_v32, %s9836_s30  ;;  %v5887_v45 = vpop.permute.xlu0 %5886  ;;  %v9893_v32 = vmov 48  }
0x373e   :  { %9361 = vmatprep.mubr.msk.f32.mxu0 %vm12903_vm0, %v5887_v45  ;;  %vm6160_vm0 = vcmp.ge.s32.totalorder %v12831_v43, %v6158_v14 }
0x373f   :  { %6063 = vrot.lane.b32.xlu0 %v11841_v16, %s9845_s8 }
0x3741   :  { %5878 = vrot.lane.b32.xlu1 %v5872_v22, %s9889_s24  ;;  %v5889_v38 = vpop.permute.xlu0 %5888 }
0x3742   :  { %9362 = vmatmul.mubr.msk.f32.vlgmr.msra.gmra.mxu0 %vm12917_vm9, %v5889_v38  ;;  %vm6165_vm9 = vcmp.lt.s32.totalorder %v12831_v43, %v6163_v18  ;;  %v12177_v43 = vpop.f32.mrf.mxu0 }
0x3743   :  { %6151 = vperm.xlu0 %9662, %v12067_v19  }
0x3744   :  { %v12179_v52 = vpop.f32.mrf.mxu0 }
0x3745   :  { %6061 = vrot.lane.b32.xlu1 %v11826_v1, %s9845_s8  ;;  %v5970_v50 = vpop.permute.xlu0 %5969 }
0x3746   :  { %9368 = vmatprep.mubr.msk.f32.mxu1 %vm12918_vm4, %v5970_v50  ;;  %vm12155_vm4 = vmand %vm6160_vm0, %vm6165_vm9 }
0x3747   :  { %vm12938_vm0 = vmmov %vm12936_vm8 }
0x3748   :  { %vm12939_vm9 = vmmov %vm12938_vm0 }
0x3749   :  { %6147 = vperm.xlu1 %9661, %v12059_v13  }
0x374d   :  { %9663 = vset.pattern.permute.xlu1 %v9892_v39 }
0x374e   :  { %6264 = vperm.xlu1 %9663, %v12067_v19  }
0x3752   :  { %6260 = vperm.xlu1 %9663, %v12059_v13  }
0x3756   :  { %9664 = vset.pattern.permute.xlu1 %v9893_v32 }
0x37ab   :  { %v5881_v31 = vpop.permute.xlu1 %5880 }
0x37ac   :  { %9364 = vmatprep.subr.msk.mxu1 %vm12101_vm11, %v5881_v31 }
0x37ad   :  { %9365 = vmatpush3.msk.msra.mxu1 %vm12101_vm11, %v5881_v31  ;;  %v6054_v6 = vpop.permute.xlu0 %6053 }
0x37af   :  { %v6056_v41 = vpop.permute.xlu1 %6055 }
0x37b0   :  { %9371 = vmatprep.subr.msk.mxu0 %vm12109_vm7, %v6056_v41 }
0x37b1   :  { %9372 = vmatpush3.msk.msra.mxu0 %vm12109_vm7, %v6056_v41  ;;  %v6064_v59 = vpop.permute.xlu0 %6063 }
0x37b2   :  { %9373 = vmatprep.subr.msk.mxu0 %vm12109_vm7, %v6054_v6 }
0x37b3   :  { %v5879_v63 = vpop.permute.xlu1 %5878  ;;  %9374 = vmatpush3.msk.msra.mxu0 %vm12109_vm7, %v6054_v6 }
0x37b4   :  { %9366 = vmatprep.subr.msk.mxu1 %vm12101_vm11, %v5879_v63 }
0x37b5   :  { %9367 = vmatpush3.msk.msra.mxu1 %vm12101_vm11, %v5879_v63 }
0x37b6   :  { %9369 = vmatmul.mubr.msk.f32.vlgmr.msra.gmra.mxu1 %vm12923_vm14, %v5972_v49  ;;  %9378 = vmatprep.subr.msk.mxu1 %vm12131_vm6, %v9891_v57  ;;  %vm6159_vm14 = vcmp.ge.s32.totalorder %v10070_v47, %v6158_v14  ;;  %v9894_v14 = vmov 49  }
0x37b7   :  { %v6062_v3 = vpop.permute.xlu1 %6061  ;;  %9379 = vmatpush3.msk.msra.mxu1 %vm12131_vm6, %v9891_v57  ;;  %9665 = vset.pattern.permute.xlu0 %v9894_v14 }
0x37b8   :  { %9375 = vmatprep.mubr.msk.f32.mxu0 %vm12924_vm13, %v6062_v3  ;;  %9380 = vmatprep.subr.msk.mxu1 %vm12143_vm2, %v9891_v57  ;;  %vm6164_vm13 = vcmp.lt.s32.totalorder %v10070_v47, %v6163_v18 }
0x37b9   :  { %9376 = vmatmul.mubr.msk.f32.vlgmr.msra.gmra.mxu0 %vm12925_vm3, %v6064_v59  ;;  %9381 = vmatpush3.msk.msra.mxu1 %vm12143_vm2, %v9891_v57  ;;  %vm12167_vm3 = vmand %vm6159_vm14, %vm6164_vm13 }
0x37ba   :  { %9382 = vmatprep.subr.msk.mxu1 %vm12155_vm4, %v9891_v57  ;;  %9393 = vmatprep.mubr.msk.f32.mxu0 %vm12934_vm5, %v12192_v34  ;;  %vm12940_vm14 = vmmov %vm12934_vm5 }
0x37bb   :  { %9383 = vmatpush3.msk.msra.mxu1 %vm12155_vm4, %v9891_v57  ;;  %vm12941_vm13 = vmmov %vm12934_vm5 }
0x37bc   :  { %9384 = vmatprep.subr.msk.mxu1 %vm12167_vm3, %v9891_v57 }
0x37bd   :  { %9385 = vmatpush3.msk.msra.mxu1 %vm12167_vm3, %v9891_v57 }
0x37be   :  { %v6152_v21 = vpop.permute.xlu0 %6151 }
0x37c4   :  { %v6148_v37 = vpop.permute.xlu1 %6147 }
0x37c9   :  { %v6265_v44 = vpop.permute.xlu1 %6264 }
0x37cd   :  { %v6261_v46 = vpop.permute.xlu1 %6260 }
0x3802   :  { %v9363_v5 = vpop.f32.mrf.mxu0 }
0x3804   :  { %v5960_v35 = vpop.f32.mrf.mxu0 }
0x3876   :  { %v9370_v24 = vpop.f32.mrf.mxu1 }
0x3877   :  { %v6049_v60 = vadd.f32 %v9370_v24, %v9363_v5 }
0x3878   :  { %v6043_v33 = vpop.f32.mrf.mxu1 }
0x3879   :  { %v6044_v15 = vadd.f32 %v6043_v33, %v5960_v35  ;;  %v9377_v58 = vpop.f32.mrf.mxu0 }
0x387a   :  { %v6145_v8 = vadd.f32 %v9377_v58, %v6049_v60 }
0x387b   :  { %v6135_v40 = vpop.f32.mrf.mxu0 }
0x387c   :  { %v6144_v25 = vadd.f32 %v6135_v40, %v6044_v15  ;;  %v12181_v27 = vadd.f32 %v6152_v21, %v6145_v8  ;;  %v9895_v40 = vmov 50  }
0x387e   :  { %v12183_v17 = vadd.f32 %v6148_v37, %v6144_v25  ;;  %v6157_v36 = vand.u32 2147483647, %v12181_v27 }
0x3880   :  { %v6156_v20 = vand.u32 2147483647, %v12183_v17 }
0x3882   :  { %9386 = vmatprep.mubr.msk.f32.mxu1 %vm5793_vm1, %v6156_v20 }
0x3883   :  { %9387 = vmatmul.mubr.msk.f32.vlgmr.msra.gmra.mxu1 %vm5793_vm1, %v6157_v36 }
0x3943   :  { %v12198_v10 = vpop.f32.mrf.mxu1 }
0x3944   :  { %9389 = vmatprep.subr.mxu0 %v12198_v10 }
0x3945   :  { %v12201_v48 = vpop.f32.mrf.mxu1  ;;  %9390 = vmatpush3.msra.mxu0 %v12198_v10 }
0x3946   :  { %9391 = vmatprep.subr.mxu0 %v12201_v48 }
0x3947   :  { %9392 = vmatpush3.msra.mxu0 %v12201_v48 }
0x3948   :  { %9394 = vmatmul.mubr.msk.f32.vlgmr.msra.gmra.mxu0 %vm12935_vm12, %v12207_v61 }
0x3a08   :  { %v9395_v0 = vpop.f32.mrf.mxu0 }
0x3a09   :  { %v6345_v42 = vadd.f32 %v9395_v0, %v6265_v44 }
0x3a0a   :  { %v6339_v51 = vpop.f32.mrf.mxu0 }
0x3a0b   :  { %v6340_v54 = vadd.f32 %v6339_v51, %v6261_v46  ;;  %v6351_v56 = vsel %vm12936_vm8, %v6345_v42, 0.0  ;;  %v6357_v53 = vmul.f32 %v6345_v42, %v6345_v42 }
0x3a0c   :  { %6352 = vadd.xlane.f32.xlu0 %v6351_v56 }
0x3a0d   :  { %v6348_v12 = vsel %vm12937_vm15, %v6340_v54, 0.0  ;;  %v6361_v55 = vsel %vm12938_vm0, %v6357_v53, 0.0  ;;  %v6356_v7 = vmul.f32 %v6340_v54, %v6340_v54  ;;  %vm12942_vm15 = vcmask 1041408  }
0x3a0e   :  { %6349 = vadd.xlane.f32.xlu1 %v6348_v12  ;;  %vm12943_vm0 = vmmov %vm12942_vm15 }
0x3a0f   :  { %v6358_v4 = vsel %vm12939_vm9, %v6356_v7, 0.0 }
0x3a10   :  { %6362 = vadd.xlane.f32.xlu0 %v6361_v55 }
0x3a14   :  { %6359 = vadd.xlane.f32.xlu0 %v6358_v4 }
0x3a95   :  { %v6353_v62 = vpop.xlane.xlu0 %6352 }
0x3a96   :  { %v6355_v22 = vmul.f32 0.5, %v6353_v62 }
0x3a97   :  { %v6350_v23 = vpop.xlane.xlu1 %6349 }
0x3a98   :  { %v6367_v38 = vmul.f32 %v6355_v22, %v6355_v22  ;;  %v6354_v50 = vmul.f32 0.5, %v6350_v23 }
0x3a99   :  { %v6363_v45 = vpop.xlane.xlu0 %6362 }
0x3a9a   :  { %v6365_v49 = vmul.f32 0.5, %v6363_v45  ;;  %v6366_v41 = vmul.f32 %v6354_v50, %v6354_v50 }
0x3a9c   :  { %v6369_v2 = vsub.f32 %v6365_v49, %v6367_v38 }
0x3a9d   :  { %v6360_v31 = vpop.xlane.xlu0 %6359 }
0x3a9e   :  { %v6371_v6 = vadd.f32 1e-05, %v6369_v2  ;;  %v6364_v63 = vmul.f32 0.5, %v6360_v31 }
0x3aa0   :  { %9779 = vrsqrt.f32 %v6371_v6  ;;  %v6368_v59 = vsub.f32 %v6364_v63, %v6366_v41 }
0x3aa2   :  { %v6370_v3 = vadd.f32 1e-05, %v6368_v59 }
0x3aa4   :  { %9781 = vrsqrt.f32 %v6370_v3 }
0x3aad   :  { %v9780_v18 = vpop.eup %9779 }
0x3aae   :  { %v6375_v5 = vmul.f32 %v12067_v19, %v9780_v18 }
0x3ab0   :  { %v6389_v24 = vmul.f32 %v6375_v5, %v6355_v22 }
0x3ab1   :  { %v9782_v35 = vpop.eup %9781 }
0x3ab2   :  { %6394 = vrot.lane.b32.xlu1 %v6389_v24, %s9830_s16  ;;  %v6374_v60 = vmul.f32 %v12059_v13, %v9782_v35 }
0x3ab4   :  { %v6388_v33 = vmul.f32 %v6374_v60, %v6354_v50 }
0x3ab6   :  { %6383 = vperm.xlu1 %9664, %v6375_v5   ;;  %6392 = vrot.lane.b32.xlu0 %v6388_v33, %s9830_s16 }
0x3aba   :  { %6378 = vperm.xlu1 %9664, %v6374_v60  }
0x3abe   :  { %9666 = vset.pattern.permute.xlu1 %v9894_v14 }
0x3b24   :  { %v6395_v15 = vpop.permute.xlu1 %6394 }
0x3b25   :  { %v6399_v58 = vsub.f32 %v12067_v19, %v6395_v15 }
0x3b27   :  { %6407 = vperm.xlu0 %9665, %v6399_v58  }
0x3b28   :  { %v6393_v8 = vpop.permute.xlu0 %6392 }
0x3b29   :  { %v6398_v21 = vsub.f32 %v12059_v13, %v6393_v8 }
0x3b2b   :  { %6402 = vperm.xlu1 %9666, %v6398_v21   ;;  %6424 = vrot.lane.b32.xlu0 %v12207_v61, %s9832_s0 }
0x3b2c   :  { %9668 = vset.pattern.permute.xlu0 %v9895_v40 }
0x3b2f   :  { %6422 = vrot.lane.b32.xlu1 %v12192_v34, %s9832_s0  ;;  %6419 = vperm.xlu0 %9668, %v12067_v19  }
0x3b30   :  { %9667 = vset.pattern.permute.xlu1 %v9895_v40 }
0x3b31   :  { %v6384_v37 = vpop.permute.xlu1 %6383 }
0x3b32   :  { %v6387_v25 = vmul.f32 %v6384_v37, %v6345_v42  ;;  %v6519_v42 = vmul.u32 16, %v10070_v47 }
0x3b33   :  { %6415 = vperm.xlu1 %9667, %v12059_v13  }
0x3b34   :  { %vm6520_vm5 = vcmp.ge.s32.totalorder %v9981_v11, %v6519_v42  ;;  %v6521_v55 = vadd.s32 16, %v6519_v42 }
0x3b35   :  { %v6379_v20 = vpop.permute.xlu1 %6378 }
0x3b36   :  { %v6386_v44 = vmul.f32 %v6379_v20, %v6340_v54  ;;  %vm6522_vm12 = vcmp.lt.s32.totalorder %v9981_v11, %v6521_v55  ;;  %v9897_v55 = vmov 52  }
0x3b37   :  { %vm6523_vm8 = vmand %vm6520_vm5, %vm6522_vm12  ;;  %9670 = vset.pattern.permute.xlu0 %v9897_v55 }
0x3b38   :  { %v12235_v54 = vsel %vm6523_vm8, 1.0, %v12740_v9  ;;  %vm12945_vm5 = vmmov %vm12941_vm13 }
0x3b39   :  { %9403 = vmatprep.subr.msk.mxu1 %vm12942_vm15, %v12235_v54  ;;  %vm12946_vm12 = vmmov %vm12945_vm5 }
0x3b3a   :  { %9404 = vmatpush3.msk.msra.mxu1 %vm12943_vm0, %v12235_v54  ;;  %vm12947_vm8 = vmmov %vm12945_vm5 }
0x3b3b   :  { %vm12948_vm15 = vmmov %vm12945_vm5 }
0x3b3c   :  { %vm12949_vm0 = vmmov %vm12945_vm5 }
0x3ba2   :  { %v6408_v36 = vpop.permute.xlu0 %6407 }
0x3ba3   :  { %v6411_v39 = vadd.f32 %v6408_v36, %v6387_v25 }
0x3ba5   :  { %v6413_v0 = vmax.f32 %v6411_v39, 0.0 }
0x3ba6   :  { %v6403_v46 = vpop.permute.xlu1 %6402  ;;  %v6425_v12 = vpop.permute.xlu0 %6424 }
0x3ba7   :  { %v6410_v51 = vadd.f32 %v6403_v46, %v6386_v44  ;;  %9396 = vmatprep.subr.mxu0 %v6413_v0 }
0x3ba8   :  { %9397 = vmatpush3.msra.mxu0 %v6413_v0 }
0x3ba9   :  { %v6412_v56 = vmax.f32 %v6410_v51, 0.0 }
0x3baa   :  { %v6423_v53 = vpop.permute.xlu1 %6422  ;;  %v6420_v7 = vpop.permute.xlu0 %6419 }
0x3bab   :  { %9398 = vmatprep.subr.mxu0 %v6412_v56  ;;  %9400 = vmatprep.mubr.msk.f32.mxu0 %vm12940_vm14, %v6423_v53  ;;  %vm12944_vm14 = vmmov %vm12939_vm9 }
0x3bac   :  { %9399 = vmatpush3.msra.mxu0 %v6412_v56 }
0x3bad   :  { %9401 = vmatmul.mubr.msk.f32.vlgmr.msra.gmra.mxu0 %vm12941_vm13, %v6425_v12 }
0x3bae   :  { %v6416_v32 = vpop.permute.xlu1 %6415 }
0x3c6d   :  { %v9402_v4 = vpop.f32.mrf.mxu0 }
0x3c6e   :  { %v6502_v62 = vadd.f32 %v9402_v4, %v6420_v7 }
0x3c6f   :  { %v6496_v47 = vpop.f32.mrf.mxu0 }
0x3c70   :  { %v6506_v22 = vsub.f32 0.0, %v6502_v62  ;;  %v6497_v23 = vadd.f32 %v6496_v47, %v6416_v32 }
0x3c72   :  { %v6509_v45 = vmul.f32 1.442695, %v6506_v22  ;;  %v6505_v38 = vsub.f32 0.0, %v6497_v23 }
0x3c74   :  { %9783 = vpow2.f32 %v6509_v45  ;;  %v6507_v11 = vmul.f32 1.442695, %v6505_v38 }
0x3c76   :  { %9785 = vpow2.f32 %v6507_v11 }
0x3c81   :  { %v9784_v9 = vpop.eup %9783 }
0x3c82   :  { %v6512_v50 = vadd.f32 1.0, %v9784_v9 }
0x3c83   :  { %v9786_v49 = vpop.eup %9785 }
0x3c84   :  { %v6511_v2 = vadd.f32 1.0, %v9786_v49  ;;  %9787 = vrcp.f32 %v6512_v50 }
0x3c86   :  { %9789 = vrcp.f32 %v6511_v2 }
0x3c91   :  { %v9788_v31 = vpop.eup %9787 }
0x3c92   :  { %v6518_v63 = vmul.f32 %v9788_v31, %v12198_v10 }
0x3c93   :  { %v9790_v41 = vpop.eup %9789 }
0x3c94   :  { %v6517_v6 = vmul.f32 %v9790_v41, %v12201_v48 }
0x3c96   :  { %9405 = vmatprep.mubr.msk.f32.mxu1 %vm12939_vm9, %v6517_v6  ;;  %vm12950_vm9 = vmmov %vm12949_vm0 }
0x3c97   :  { %9406 = vmatmul.mubr.msk.f32.vlgmr.msra.gmra.mxu1 %vm12944_vm14, %v6518_v63  ;;  %vm12951_vm14 = vmmov %vm12949_vm0 }
0x3d57   :  { %v9407_v59 = vpop.f32.mrf.mxu1 }
0x3d58   :  { %v6610_v3 = vsub.f32 0.0, %v9407_v59 }
0x3d59   :  { %v6600_v14 = vpop.f32.mrf.mxu1 }
0x3d5a   :  { %v6612_v18 = vmax.f32 %v12181_v27, %v6610_v3  ;;  %v6609_v5 = vsub.f32 0.0, %v6600_v14 }
0x3d5c   :  { %v6614_v24 = vmin.f32 %v6612_v18, %v9407_v59  ;;  %v6611_v35 = vmax.f32 %v12183_v17, %v6609_v5 }
0x3d5e   :  { %v6616_v60 = vsub.f32 %v12181_v27, %v6614_v24  ;;  %v6613_v33 = vmin.f32 %v6611_v35, %v6600_v14 }
0x3d60   :  { %v12249_v48 = vadd.f32 %v12177_v43, %v6616_v60  ;;  %v6615_v10 = vsub.f32 %v12183_v17, %v6613_v33  ;;  %v9896_v17 = vmov 51  }
0x3d61   :  { %9669 = vset.pattern.permute.xlu1 %v9896_v17 }
0x3d62   :  { %v12253_v15 = vadd.f32 %v6615_v10, %v12179_v52  ;;  %v6622_v58 = vsel %vm5793_vm1, %v12249_v48, 0.0  ;;  %v6628_v8 = vmul.f32 %v12249_v48, %v12249_v48 }
0x3d63   :  { %6623 = vadd.xlane.f32.xlu1 %v6622_v58  ;;  %v9898_v58 = vmov 53  }
0x3d64   :  { %v6619_v21 = vsel %vm5793_vm1, %v12253_v15, 0.0  ;;  %v6627_v27 = vmul.f32 %v12253_v15, %v12253_v15  ;;  %v6632_v43 = vsel %vm5793_vm1, %v6628_v8, 0.0 }
0x3d65   :  { %6620 = vadd.xlane.f32.xlu0 %v6619_v21 }
0x3d66   :  { %v6629_v52 = vsel %vm5793_vm1, %v6627_v27, 0.0 }
0x3d67   :  { %6633 = vadd.xlane.f32.xlu1 %v6632_v43 }
0x3d69   :  { %6630 = vadd.xlane.f32.xlu0 %v6629_v52 }
0x3dec   :  { %v6624_v40 = vpop.xlane.xlu1 %6623 }
0x3ded   :  { %v6626_v37 = vmul.f32 0.03125, %v6624_v40 }
0x3dee   :  { %v6621_v25 = vpop.xlane.xlu0 %6620 }
0x3def   :  { %v6625_v20 = vmul.f32 0.03125, %v6621_v25  ;;  %v6638_v39 = vmul.f32 %v6626_v37, %v6626_v37 }
0x3df0   :  { %v6634_v36 = vpop.xlane.xlu1 %6633 }
0x3df1   :  { %v6636_v44 = vmul.f32 0.03125, %v6634_v36  ;;  %v6637_v46 = vmul.f32 %v6625_v20, %v6625_v20 }
0x3df2   :  { %v6631_v0 = vpop.xlane.xlu0 %6630 }
0x3df3   :  { %v6640_v51 = vsub.f32 %v6636_v44, %v6638_v39  ;;  %v6635_v56 = vmul.f32 0.03125, %v6631_v0 }
0x3df5   :  { %v6642_v53 = vadd.f32 1e-05, %v6640_v51  ;;  %v6639_v12 = vsub.f32 %v6635_v56, %v6637_v46 }
0x3df7   :  { %9791 = vrsqrt.f32 %v6642_v53  ;;  %v6641_v42 = vadd.f32 1e-05, %v6639_v12 }
0x3df9   :  { %9793 = vrsqrt.f32 %v6641_v42 }
0x3e04   :  { %v9792_v7 = vpop.eup %9791 }
0x3e05   :  { %v6646_v4 = vmul.f32 %v12067_v19, %v9792_v7 }
0x3e06   :  { %v9794_v32 = vpop.eup %9793 }
0x3e07   :  { %v6660_v62 = vmul.f32 %v6646_v4, %v6626_v37  ;;  %v6645_v47 = vmul.f32 %v12059_v13, %v9794_v32 }
0x3e09   :  { %6665 = vrot.lane.b32.xlu1 %v6660_v62, %s9830_s16  ;;  %v6659_v22 = vmul.f32 %v6645_v47, %v6625_v20 }
0x3e0b   :  { %6663 = vrot.lane.b32.xlu0 %v6659_v22, %s9830_s16 }
0x3e0d   :  { %6654 = vperm.xlu1 %9669, %v6646_v4  }
0x3e11   :  { %6649 = vperm.xlu1 %9669, %v6645_v47  }
0x3e15   :  { %9671 = vset.pattern.permute.xlu1 %v9897_v55 }
0x3e7b   :  { %v6666_v23 = vpop.permute.xlu1 %6665 }
0x3e7c   :  { %v6670_v45 = vsub.f32 %v12067_v19, %v6666_v23 }
0x3e7d   :  { %v6664_v38 = vpop.permute.xlu0 %6663 }
0x3e7e   :  { %v6669_v11 = vsub.f32 %v12059_v13, %v6664_v38  ;;  %6678 = vperm.xlu0 %9670, %v6670_v45  }
0x3e80   :  { %6673 = vperm.xlu1 %9671, %v6669_v11   ;;  %v9899_v11 = vmov 54  }
0x3e82   :  { %9673 = vset.pattern.permute.xlu0 %v9898_v58 }
0x3e84   :  { %9672 = vset.pattern.permute.xlu1 %v9898_v58 }
0x3e88   :  { %v6655_v9 = vpop.permute.xlu1 %6654 }
0x3e89   :  { %v6658_v49 = vmul.f32 %v6655_v9, %v12249_v48 }
0x3e8c   :  { %v6650_v50 = vpop.permute.xlu1 %6649 }
0x3e8d   :  { %v6657_v31 = vmul.f32 %v6650_v50, %v12253_v15 }
0x3ef9   :  { %v6679_v2 = vpop.permute.xlu0 %6678 }
0x3efa   :  { %v6682_v41 = vadd.f32 %v6679_v2, %v6658_v49 }
0x3efb   :  { %v6674_v6 = vpop.permute.xlu1 %6673 }
0x3efc   :  { %v6684_v63 = vmax.f32 %v6682_v41, 0.0  ;;  %v6681_v59 = vadd.f32 %v6674_v6, %v6657_v31 }
0x3efe   :  { %v6683_v3 = vmax.f32 %v6681_v59, 0.0  ;;  %6688 = vrot.lane.b32.xlu1 %v6684_v63, %s9842_s6  ;;  %9408 = vmatprep.subr.mxu0 %v6684_v63 }
0x3eff   :  { %9409 = vmatpush3.msra.mxu0 %v6684_v63 }
0x3f00   :  { %6685 = vrot.lane.b32.xlu0 %v6683_v3, %s9842_s6  ;;  %9410 = vmatprep.subr.mxu0 %v6683_v3 }
0x3f01   :  { %9411 = vmatpush3.msra.mxu0 %v6683_v3 }
0x3f70   :  { %v6689_v14 = vpop.permute.xlu1 %6688 }
0x3f71   :  { %v6690_v18 = vsel %vm5861_vm10, %v6689_v14, %v6684_v63 }
0x3f72   :  { %6693 = vrot.lane.b32.xlu1 %v6690_v18, %s9842_s6  ;;  %v6686_v5 = vpop.permute.xlu0 %6685 }
0x3f73   :  { %v6687_v24 = vsel %vm5861_vm10, %v6686_v5, %v6683_v3 }
0x3f74   :  { %6691 = vrot.lane.b32.xlu0 %v6687_v24, %s9842_s6 }
0x3f76   :  { %6792 = vrot.lane.b32.xlu1 %v12207_v61, %s9837_s4 }
0x3f78   :  { %6707 = vrot.lane.b32.xlu0 %v12192_v34, %s9835_s29 }
0x3f7c   :  { %6709 = vrot.lane.b32.xlu0 %v12207_v61, %s9835_s29 }
0x3f80   :  { %6790 = vrot.lane.b32.xlu0 %v12192_v34, %s9837_s4 }
0x3fe4   :  { %v6694_v35 = vpop.permute.xlu1 %6693 }
0x3fe5   :  { %v6696_v60 = vsel %vm5861_vm10, %v6694_v35, %v6684_v63  ;;  %v9900_v35 = vmov 55  }
0x3fe6   :  { %6701 = vrot.lane.b32.xlu1 %v6696_v60, %s9889_s24  ;;  %v6692_v33 = vpop.permute.xlu0 %6691 }
0x3fe7   :  { %v6695_v10 = vsel %vm5861_vm10, %v6692_v33, %v6683_v3 }
0x3fe8   :  { %6873 = vrot.lane.b32.xlu0 %v6695_v10, %s9836_s30  ;;  %v6793_v43 = vpop.permute.xlu1 %6792 }
0x3fea   :  { %6875 = vrot.lane.b32.xlu1 %v6696_v60, %s9836_s30  ;;  %v6708_v8 = vpop.permute.xlu0 %6707 }
0x3feb   :  { %9412 = vmatprep.mubr.msk.f32.mxu0 %vm12941_vm13, %v6708_v8  ;;  %vm12953_vm13 = vmmov %vm12949_vm0 }
0x3fec   :  { %6883 = vrot.lane.b32.xlu0 %v12207_v61, %s9838_s5 }
0x3fee   :  { %6699 = vrot.lane.b32.xlu1 %v6695_v10, %s9889_s24  ;;  %v6710_v21 = vpop.permute.xlu0 %6709 }
0x3fef   :  { %9413 = vmatmul.mubr.msk.f32.vlgmr.msra.gmra.mxu0 %vm12945_vm5, %v6710_v21  ;;  %vm12954_vm5 = vmmov %vm12949_vm0 }
0x3ff0   :  { %6967 = vperm.xlu0 %9673, %v12059_v13  }
0x3ff2   :  { %6881 = vrot.lane.b32.xlu1 %v12192_v34, %s9838_s5  ;;  %v6791_v27 = vpop.permute.xlu0 %6790 }
0x3ff3   :  { %9419 = vmatprep.mubr.msk.f32.mxu1 %vm12946_vm12, %v6791_v27 }
0x3ff4   :  { %9675 = vset.pattern.permute.xlu0 %v9900_v35 }
0x3ff6   :  { %6971 = vperm.xlu1 %9672, %v12067_v19  }
0x3ffa   :  { %9674 = vset.pattern.permute.xlu1 %v9899_v11 }
0x4058   :  { %v6702_v52 = vpop.permute.xlu1 %6701 }
0x4059   :  { %9415 = vmatprep.subr.msk.mxu1 %vm12101_vm11, %v6702_v52 }
0x405a   :  { %9416 = vmatpush3.msk.msra.mxu1 %vm12101_vm11, %v6702_v52  ;;  %v6874_v40 = vpop.permute.xlu0 %6873 }
0x405c   :  { %v6876_v17 = vpop.permute.xlu1 %6875 }
0x405d   :  { %9422 = vmatprep.subr.msk.mxu0 %vm12109_vm7, %v6876_v17 }
0x405e   :  { %9423 = vmatpush3.msk.msra.mxu0 %vm12109_vm7, %v6876_v17  ;;  %v6884_v25 = vpop.permute.xlu0 %6883 }
0x405f   :  { %9424 = vmatprep.subr.msk.mxu0 %vm12109_vm7, %v6874_v40 }
0x4060   :  { %v6700_v37 = vpop.permute.xlu1 %6699  ;;  %9425 = vmatpush3.msk.msra.mxu0 %vm12109_vm7, %v6874_v40 }
0x4061   :  { %9417 = vmatprep.subr.msk.mxu1 %vm12101_vm11, %v6700_v37 }
0x4062   :  { %9418 = vmatpush3.msk.msra.mxu1 %vm12101_vm11, %v6700_v37 }
0x4063   :  { %9420 = vmatmul.mubr.msk.f32.vlgmr.msra.gmra.mxu1 %vm12947_vm8, %v6793_v43  ;;  %vm12958_vm8 = vmmov %vm12949_vm0 }
0x4064   :  { %v6882_v20 = vpop.permute.xlu1 %6881 }
0x4065   :  { %9426 = vmatprep.mubr.msk.f32.mxu0 %vm12948_vm15, %v6882_v20  ;;  %vm12959_vm15 = vmmov %vm12949_vm0 }
0x4066   :  { %9427 = vmatmul.mubr.msk.f32.vlgmr.msra.gmra.mxu0 %vm12949_vm0, %v6884_v25 }
0x406b   :  { %v6968_v55 = vpop.permute.xlu0 %6967 }
0x4071   :  { %v6972_v53 = vpop.permute.xlu1 %6971 }
0x40af   :  { %v9414_v36 = vpop.f32.mrf.mxu0 }
0x40b1   :  { %v6781_v44 = vpop.f32.mrf.mxu0 }
0x4123   :  { %v9421_v39 = vpop.f32.mrf.mxu1 }
0x4124   :  { %v6870_v0 = vadd.f32 %v9421_v39, %v9414_v36 }
0x4125   :  { %v6864_v46 = vpop.f32.mrf.mxu1 }
0x4126   :  { %v6865_v51 = vadd.f32 %v6864_v46, %v6781_v44  ;;  %v9428_v56 = vpop.f32.mrf.mxu0 }
0x4127   :  { %v6965_v12 = vadd.f32 %v9428_v56, %v6870_v0 }
0x4128   :  { %v6955_v42 = vpop.f32.mrf.mxu0 }
0x4129   :  { %v6975_v7 = vadd.f32 %v6972_v53, %v6965_v12  ;;  %v6964_v4 = vadd.f32 %v6955_v42, %v6865_v51 }
0x412b   :  { %v6974_v32 = vadd.f32 %v6968_v55, %v6964_v4  ;;  %v6979_v62 = vsel %vm5793_vm1, %v6975_v7, 0.0  ;;  %v6985_v47 = vmul.f32 %v6975_v7, %v6975_v7 }
0x412c   :  { %6980 = vadd.xlane.f32.xlu1 %v6979_v62  ;;  %v9901_v62 = vmov 56  }
0x412d   :  { %v6976_v22 = vsel %vm5793_vm1, %v6974_v32, 0.0  ;;  %v6984_v23 = vmul.f32 %v6974_v32, %v6974_v32  ;;  %v6989_v45 = vsel %vm5793_vm1, %v6985_v47, 0.0 }
0x412e   :  { %6977 = vadd.xlane.f32.xlu0 %v6976_v22 }
0x412f   :  { %v6986_v38 = vsel %vm5793_vm1, %v6984_v23, 0.0 }
0x4130   :  { %6990 = vadd.xlane.f32.xlu1 %v6989_v45 }
0x4132   :  { %6987 = vadd.xlane.f32.xlu0 %v6986_v38 }
0x41b5   :  { %v6981_v9 = vpop.xlane.xlu1 %6980 }
0x41b6   :  { %v6983_v50 = vmul.f32 0.03125, %v6981_v9 }
0x41b7   :  { %v6978_v49 = vpop.xlane.xlu0 %6977 }
0x41b8   :  { %v6982_v2 = vmul.f32 0.03125, %v6978_v49  ;;  %v6995_v41 = vmul.f32 %v6983_v50, %v6983_v50 }
0x41b9   :  { %v6991_v31 = vpop.xlane.xlu1 %6990 }
0x41ba   :  { %v6993_v6 = vmul.f32 0.03125, %v6991_v31  ;;  %v6994_v59 = vmul.f32 %v6982_v2, %v6982_v2 }
0x41bb   :  { %v6988_v63 = vpop.xlane.xlu0 %6987 }
0x41bc   :  { %v6997_v3 = vsub.f32 %v6993_v6, %v6995_v41  ;;  %v6992_v14 = vmul.f32 0.03125, %v6988_v63 }
0x41be   :  { %v6999_v18 = vadd.f32 1e-05, %v6997_v3  ;;  %v6996_v5 = vsub.f32 %v6992_v14, %v6994_v59 }
0x41c0   :  { %9795 = vrsqrt.f32 %v6999_v18  ;;  %v6998_v24 = vadd.f32 1e-05, %v6996_v5 }
0x41c2   :  { %9797 = vrsqrt.f32 %v6998_v24 }
0x41cd   :  { %v9796_v60 = vpop.eup %9795 }
0x41ce   :  { %v7003_v33 = vmul.f32 %v12067_v19, %v9796_v60  ;;  %v9902_v60 = vmov 57  }
0x41cf   :  { %v9798_v10 = vpop.eup %9797 }
0x41d0   :  { %v7017_v58 = vmul.f32 %v7003_v33, %v6983_v50  ;;  %v7002_v8 = vmul.f32 %v12059_v13, %v9798_v10 }
0x41d2   :  { %7022 = vrot.lane.b32.xlu1 %v7017_v58, %s9830_s16  ;;  %v7016_v21 = vmul.f32 %v7002_v8, %v6982_v2 }
0x41d4   :  { %7020 = vrot.lane.b32.xlu0 %v7016_v21, %s9830_s16 }
0x41d6   :  { %7011 = vperm.xlu1 %9674, %v7003_v33   ;;  %v12425_v33 = vld [vmem:[%s12536_s1 + $0x8] sm:$0xff] }
0x41da   :  { %7006 = vperm.xlu1 %9674, %v7002_v8   ;;  %v12443_v8 = vld [vmem:[%s12535_s2 + $0x68] sm:$0xff] }
0x41de   :  { %9676 = vset.pattern.permute.xlu1 %v9900_v35  ;;  %v12418_v35 = vld [vmem:[%s12535_s2 + $0x30] sm:$0xff] }
0x4244   :  { %v7023_v27 = vpop.permute.xlu1 %7022 }
0x4245   :  { %v7027_v43 = vsub.f32 %v12067_v19, %v7023_v27 }
0x4246   :  { %v7021_v52 = vpop.permute.xlu0 %7020 }
0x4247   :  { %v7026_v17 = vsub.f32 %v12059_v13, %v7021_v52  ;;  %7035 = vperm.xlu0 %9675, %v7027_v43  }
0x4249   :  { %7030 = vperm.xlu1 %9676, %v7026_v17  }
0x424b   :  { %9678 = vset.pattern.permute.xlu0 %v9901_v62 }
0x424d   :  { %9677 = vset.pattern.permute.xlu1 %v9901_v62 }
0x4251   :  { %v7012_v40 = vpop.permute.xlu1 %7011 }
0x4252   :  { %v7015_v25 = vmul.f32 %v7012_v40, %v6975_v7 }
0x4255   :  { %v7007_v37 = vpop.permute.xlu1 %7006 }
0x4256   :  { %v7014_v36 = vmul.f32 %v7007_v37, %v6974_v32 }
0x42c2   :  { %v7036_v20 = vpop.permute.xlu0 %7035 }
0x42c3   :  { %v7039_v39 = vadd.f32 %v7036_v20, %v7015_v25 }
0x42c4   :  { %v7031_v44 = vpop.permute.xlu1 %7030 }
0x42c5   :  { %v7041_v0 = vmax.f32 %v7039_v39, 0.0  ;;  %v7038_v46 = vadd.f32 %v7031_v44, %v7014_v36 }
0x42c7   :  { %v7040_v51 = vmax.f32 %v7038_v46, 0.0  ;;  %7045 = vrot.lane.b32.xlu1 %v7041_v0, %s9842_s6  ;;  %9429 = vmatprep.subr.mxu1 %v7041_v0 }
0x42c8   :  { %9430 = vmatpush3.msra.mxu1 %v7041_v0 }
0x42c9   :  { %7042 = vrot.lane.b32.xlu0 %v7040_v51, %s9842_s6  ;;  %9431 = vmatprep.subr.mxu1 %v7040_v51 }
0x42ca   :  { %9432 = vmatpush3.msra.mxu1 %v7040_v51 }
0x4339   :  { %v7046_v56 = vpop.permute.xlu1 %7045 }
0x433a   :  { %v7047_v53 = vsel %vm5861_vm10, %v7046_v56, %v7041_v0 }
0x433b   :  { %7050 = vrot.lane.b32.xlu1 %v7047_v53, %s9842_s6  ;;  %v7043_v12 = vpop.permute.xlu0 %7042 }
0x433c   :  { %v7044_v42 = vsel %vm5861_vm10, %v7043_v12, %v7040_v51 }
0x433d   :  { %7048 = vrot.lane.b32.xlu0 %v7044_v42, %s9842_s6 }
0x433f   :  { %7149 = vrot.lane.b32.xlu1 %v12207_v61, %s9844_s7 }
0x4341   :  { %7064 = vrot.lane.b32.xlu0 %v12192_v34, %s9842_s6 }
0x4345   :  { %7066 = vrot.lane.b32.xlu0 %v12207_v61, %s9842_s6 }
0x4349   :  { %7147 = vrot.lane.b32.xlu0 %v12192_v34, %s9844_s7 }
0x43ad   :  { %v7051_v55 = vpop.permute.xlu1 %7050 }
0x43ae   :  { %v7053_v7 = vsel %vm5861_vm10, %v7051_v55, %v7041_v0  ;;  %v9903_v0 = vmov 58  }
0x43af   :  { %7058 = vrot.lane.b32.xlu1 %v7053_v7, %s9889_s24  ;;  %v7049_v4 = vpop.permute.xlu0 %7048 }
0x43b0   :  { %v7052_v32 = vsel %vm5861_vm10, %v7049_v4, %v7040_v51  ;;  %vm12952_vm10 = vmmov %vm12949_vm0 }
0x43b1   :  { %7230 = vrot.lane.b32.xlu0 %v7052_v32, %s9836_s30  ;;  %v7150_v45 = vpop.permute.xlu1 %7149 }
0x43b3   :  { %7232 = vrot.lane.b32.xlu1 %v7053_v7, %s9836_s30  ;;  %v7065_v47 = vpop.permute.xlu0 %7064 }
0x43b4   :  { %9433 = vmatprep.mubr.msk.f32.mxu1 %vm12950_vm9, %v7065_v47 }
0x43b5   :  { %7240 = vrot.lane.b32.xlu0 %v12207_v61, %s9845_s8 }
0x43b7   :  { %7056 = vrot.lane.b32.xlu1 %v7052_v32, %s9889_s24  ;;  %v7067_v22 = vpop.permute.xlu0 %7066 }
0x43b8   :  { %9434 = vmatmul.mubr.msk.f32.vlgmr.msra.gmra.mxu1 %vm12951_vm14, %v7067_v22 }
0x43b9   :  { %7328 = vperm.xlu0 %9678, %v12067_v19  }
0x43bb   :  { %7238 = vrot.lane.b32.xlu1 %v12192_v34, %s9845_s8  ;;  %v7148_v23 = vpop.permute.xlu0 %7147 }
0x43bc   :  { %9440 = vmatprep.mubr.msk.f32.mxu0 %vm12952_vm10, %v7148_v23 }
0x43bf   :  { %7324 = vperm.xlu1 %9677, %v12059_v13  }
0x43c3   :  { %9679 = vset.pattern.permute.xlu1 %v9902_v60 }
0x43c4   :  { %7423 = vperm.xlu1 %9679, %v12425_v33  }
0x4421   :  { %v7059_v38 = vpop.permute.xlu1 %7058 }
0x4422   :  { %9436 = vmatprep.subr.msk.mxu0 %vm12101_vm11, %v7059_v38 }
0x4423   :  { %9437 = vmatpush3.msk.msra.mxu0 %vm12101_vm11, %v7059_v38  ;;  %v7231_v19 = vpop.permute.xlu0 %7230 }
0x4425   :  { %v7233_v61 = vpop.permute.xlu1 %7232 }
0x4426   :  { %9443 = vmatprep.subr.msk.mxu1 %vm12109_vm7, %v7233_v61 }
0x4427   :  { %9444 = vmatpush3.msk.msra.mxu1 %vm12109_vm7, %v7233_v61  ;;  %v7241_v34 = vpop.permute.xlu0 %7240 }
0x4428   :  { %9445 = vmatprep.subr.msk.mxu1 %vm12109_vm7, %v7231_v19 }
0x4429   :  { %v7057_v13 = vpop.permute.xlu1 %7056  ;;  %9446 = vmatpush3.msk.msra.mxu1 %vm12109_vm7, %v7231_v19  ;;  %vm12955_vm7 = vmmov %vm12949_vm0  ;;  %vm12960_vm0 = vcmask 15360  }
0x442a   :  { %9438 = vmatprep.subr.msk.mxu0 %vm12101_vm11, %v7057_v13  ;;  %vm12961_vm9 = vmmov %vm12960_vm0 }
0x442b   :  { %9439 = vmatpush3.msk.msra.mxu0 %vm12101_vm11, %v7057_v13  ;;  %vm12956_vm11 = vcmask 1041408   ;;  %vm12962_vm14 = vmmov %vm12960_vm0 }
0x442c   :  { %9441 = vmatmul.mubr.msk.f32.vlgmr.msra.gmra.mxu0 %vm12953_vm13, %v7150_v45  ;;  %9450 = vmatprep.subr.msk.mxu0 %vm12131_vm6, %v9891_v57  ;;  %vm12957_vm12 = vmmov %vm12956_vm11  ;;  %v9904_v45 = vmov 59  }
0x442d   :  { %v7239_v11 = vpop.permute.xlu1 %7238  ;;  %9451 = vmatpush3.msk.msra.mxu0 %vm12131_vm6, %v9891_v57  ;;  %vm12963_vm10 = vmmov %vm12960_vm0  ;;  %9681 = vset.pattern.permute.xlu0 %v9904_v45 }
0x442e   :  { %9447 = vmatprep.mubr.msk.f32.mxu1 %vm12954_vm5, %v7239_v11  ;;  %9452 = vmatprep.subr.msk.mxu0 %vm12143_vm2, %v9891_v57  ;;  %vm12964_vm13 = vmmov %vm12954_vm5 }
0x442f   :  { %9448 = vmatmul.mubr.msk.f32.vlgmr.msra.gmra.mxu1 %vm12955_vm7, %v7241_v34  ;;  %9453 = vmatpush3.msk.msra.mxu0 %vm12143_vm2, %v9891_v57 }
0x4430   :  { %9454 = vmatprep.subr.msk.mxu0 %vm12155_vm4, %v9891_v57  ;;  %9465 = vmatprep.mubr.msk.f32.mxu1 %vm12958_vm8, %v12418_v35 }
0x4431   :  { %9455 = vmatpush3.msk.msra.mxu0 %vm12155_vm4, %v9891_v57 }
0x4432   :  { %9456 = vmatprep.subr.msk.mxu0 %vm12167_vm3, %v9891_v57 }
0x4433   :  { %9457 = vmatpush3.msk.msra.mxu0 %vm12167_vm3, %v9891_v57 }
0x4434   :  { %9475 = vmatprep.subr.msk.mxu0 %vm12956_vm11, %v12235_v54  ;;  %v7329_v6 = vpop.permute.xlu0 %7328  ;;  %vm8096_vm11 = vcmask 10240  }
0x443a   :  { %v7325_v59 = vpop.permute.xlu1 %7324 }
0x443f   :  { %v7424_v21 = vpop.permute.xlu1 %7423 }
0x4478   :  { %v9435_v16 = vpop.f32.mrf.mxu1 }
0x447a   :  { %v7138_v9 = vpop.f32.mrf.mxu1 }
0x44ec   :  { %v9442_v1 = vpop.f32.mrf.mxu0 }
0x44ed   :  { %v7227_v50 = vadd.f32 %v9442_v1, %v9435_v16 }
0x44ee   :  { %v7221_v49 = vpop.f32.mrf.mxu0 }
0x44ef   :  { %v7222_v2 = vadd.f32 %v7221_v49, %v7138_v9  ;;  %v9449_v31 = vpop.f32.mrf.mxu1  ;;  %v9905_v49 = vmov 60  }
0x44f0   :  { %v7322_v41 = vadd.f32 %v9449_v31, %v7227_v50 }
0x44f1   :  { %v7312_v63 = vpop.f32.mrf.mxu1 }
0x44f2   :  { %v7321_v3 = vadd.f32 %v7312_v63, %v7222_v2  ;;  %v12405_v14 = vadd.f32 %v7329_v6, %v7322_v41 }
0x44f4   :  { %v12407_v18 = vadd.f32 %v7325_v59, %v7321_v3  ;;  %v7334_v24 = vand.u32 2147483647, %v12405_v14 }
0x44f6   :  { %v7333_v5 = vand.u32 2147483647, %v12407_v18 }
0x44f8   :  { %9458 = vmatprep.mubr.msk.f32.mxu0 %vm5793_vm1, %v7333_v5 }
0x44f9   :  { %9459 = vmatmul.mubr.msk.f32.vlgmr.msra.gmra.mxu0 %vm5793_vm1, %v7334_v24 }
0x44fa   :  { %9476 = vmatpush3.msk.msra.mxu0 %vm12957_vm12, %v12235_v54  ;;  %v12431_v54 = vld [vmem:[%s12536_s1] sm:$0xff] }
0x44fb   :  { %7419 = vperm.xlu1 %9679, %v12431_v54  }
0x44ff   :  { %9680 = vset.pattern.permute.xlu1 %v9903_v0 }
0x4576   :  { %v7420_v52 = vpop.permute.xlu1 %7419 }
0x45b9   :  { %v12434_v10 = vpop.f32.mrf.mxu0 }
0x45ba   :  { %9461 = vmatprep.subr.mxu1 %v12434_v10 }
0x45bb   :  { %v12437_v58 = vpop.f32.mrf.mxu0  ;;  %9462 = vmatpush3.msra.mxu1 %v12434_v10 }
0x45bc   :  { %9463 = vmatprep.subr.mxu1 %v12437_v58 }
0x45bd   :  { %9464 = vmatpush3.msra.mxu1 %v12437_v58 }
0x45be   :  { %9466 = vmatmul.mubr.msk.f32.vlgmr.msra.gmra.mxu1 %vm12959_vm15, %v12443_v8 }
0x467e   :  { %v9467_v27 = vpop.f32.mrf.mxu1 }
0x467f   :  { %v7504_v43 = vadd.f32 %v9467_v27, %v7424_v21 }
0x4680   :  { %v7498_v17 = vpop.f32.mrf.mxu1 }
0x4681   :  { %v7499_v40 = vadd.f32 %v7498_v17, %v7420_v52  ;;  %v7510_v37 = vsel %vm12960_vm0, %v7504_v43, 0.0  ;;  %v7516_v25 = vmul.f32 %v7504_v43, %v7504_v43 }
0x4682   :  { %7511 = vadd.xlane.f32.xlu0 %v7510_v37 }
0x4683   :  { %v7507_v20 = vsel %vm12961_vm9, %v7499_v40, 0.0  ;;  %v7520_v36 = vsel %vm12962_vm14, %v7516_v25, 0.0  ;;  %v7515_v39 = vmul.f32 %v7499_v40, %v7499_v40 }
0x4684   :  { %7508 = vadd.xlane.f32.xlu1 %v7507_v20 }
0x4685   :  { %v7517_v44 = vsel %vm12963_vm10, %v7515_v39, 0.0 }
0x4686   :  { %7521 = vadd.xlane.f32.xlu0 %v7520_v36 }
0x468a   :  { %7518 = vadd.xlane.f32.xlu0 %v7517_v44 }
0x470b   :  { %v7512_v46 = vpop.xlane.xlu0 %7511 }
0x470c   :  { %v7514_v51 = vmul.f32 0.5, %v7512_v46 }
0x470d   :  { %v7509_v56 = vpop.xlane.xlu1 %7508 }
0x470e   :  { %v7526_v12 = vmul.f32 %v7514_v51, %v7514_v51  ;;  %v7513_v42 = vmul.f32 0.5, %v7509_v56 }
0x470f   :  { %v7522_v53 = vpop.xlane.xlu0 %7521 }
0x4710   :  { %v7524_v55 = vmul.f32 0.5, %v7522_v53  ;;  %v7525_v32 = vmul.f32 %v7513_v42, %v7513_v42 }
0x4712   :  { %v7528_v7 = vsub.f32 %v7524_v55, %v7526_v12 }
0x4713   :  { %v7519_v4 = vpop.xlane.xlu0 %7518 }
0x4714   :  { %v7530_v62 = vadd.f32 1e-05, %v7528_v7  ;;  %v7523_v47 = vmul.f32 0.5, %v7519_v4 }
0x4716   :  { %9799 = vrsqrt.f32 %v7530_v62  ;;  %v7527_v22 = vsub.f32 %v7523_v47, %v7525_v32 }
0x4718   :  { %v7529_v23 = vadd.f32 1e-05, %v7527_v22 }
0x471a   :  { %9801 = vrsqrt.f32 %v7529_v23 }
0x4723   :  { %v9800_v38 = vpop.eup %9799 }
0x4724   :  { %v7534_v61 = vmul.f32 %v12425_v33, %v9800_v38 }
0x4726   :  { %v7548_v19 = vmul.f32 %v7534_v61, %v7514_v51 }
0x4727   :  { %v9802_v13 = vpop.eup %9801 }
0x4728   :  { %7553 = vrot.lane.b32.xlu1 %v7548_v19, %s9830_s16  ;;  %v7533_v34 = vmul.f32 %v12431_v54, %v9802_v13  ;;  %v9906_v19 = vmov 61  }
0x472a   :  { %v7547_v11 = vmul.f32 %v7533_v34, %v7513_v42 }
0x472c   :  { %7542 = vperm.xlu1 %9680, %v7534_v61   ;;  %7551 = vrot.lane.b32.xlu0 %v7547_v11, %s9830_s16 }
0x4730   :  { %7537 = vperm.xlu1 %9680, %v7533_v34  }
0x4734   :  { %9682 = vset.pattern.permute.xlu1 %v9904_v45 }
0x479a   :  { %v7554_v16 = vpop.permute.xlu1 %7553 }
0x479b   :  { %v7558_v1 = vsub.f32 %v12425_v33, %v7554_v16 }
0x479d   :  { %7566 = vperm.xlu0 %9681, %v7558_v1  }
0x479e   :  { %v7552_v9 = vpop.permute.xlu0 %7551 }
0x479f   :  { %v7557_v50 = vsub.f32 %v12431_v54, %v7552_v9 }
0x47a1   :  { %7561 = vperm.xlu1 %9682, %v7557_v50   ;;  %7583 = vrot.lane.b32.xlu0 %v12443_v8, %s9832_s0 }
0x47a2   :  { %9684 = vset.pattern.permute.xlu0 %v9905_v49 }
0x47a5   :  { %7581 = vrot.lane.b32.xlu1 %v12418_v35, %s9832_s0  ;;  %7578 = vperm.xlu0 %9684, %v12425_v33  }
0x47a6   :  { %9683 = vset.pattern.permute.xlu1 %v9905_v49 }
0x47a7   :  { %v7543_v2 = vpop.permute.xlu1 %7542 }
0x47a8   :  { %v7546_v31 = vmul.f32 %v7543_v2, %v7504_v43 }
0x47a9   :  { %7574 = vperm.xlu1 %9683, %v12431_v54  }
0x47ab   :  { %v7538_v41 = vpop.permute.xlu1 %7537 }
0x47ac   :  { %v7545_v59 = vmul.f32 %v7538_v41, %v7499_v40 }
0x47ad   :  { %9685 = vset.pattern.permute.xlu1 %v9906_v19 }
0x4818   :  { %v7567_v6 = vpop.permute.xlu0 %7566 }
0x4819   :  { %v7570_v63 = vadd.f32 %v7567_v6, %v7546_v31  ;;  %v9907_v6 = vmov 62  }
0x481a   :  { %9686 = vset.pattern.permute.xlu0 %v9907_v6 }
0x481b   :  { %v7572_v3 = vmax.f32 %v7570_v63, 0.0 }
0x481c   :  { %v7562_v5 = vpop.permute.xlu1 %7561  ;;  %v7584_v27 = vpop.permute.xlu0 %7583 }
0x481d   :  { %v7569_v24 = vadd.f32 %v7562_v5, %v7545_v59  ;;  %9468 = vmatprep.subr.mxu1 %v7572_v3 }
0x481e   :  { %9469 = vmatpush3.msra.mxu1 %v7572_v3 }
0x481f   :  { %v7571_v60 = vmax.f32 %v7569_v24, 0.0 }
0x4820   :  { %v7582_v21 = vpop.permute.xlu1 %7581  ;;  %v7579_v28 = vpop.permute.xlu0 %7578 }
0x4821   :  { %9470 = vmatprep.subr.mxu1 %v7571_v60  ;;  %9472 = vmatprep.mubr.msk.f32.mxu1 %vm12964_vm13, %v7582_v21 }
0x4822   :  { %9471 = vmatpush3.msra.mxu1 %v7571_v60 }
0x4823   :  { %9473 = vmatmul.mubr.msk.f32.vlgmr.msra.gmra.mxu1 %vm12954_vm5, %v7584_v27  ;;  %9480 = vmatprep.subr.msk.mxu1 %vm12131_vm6, %v9891_v57 }
0x4824   :  { %9481 = vmatpush3.msk.msra.mxu1 %vm12131_vm6, %v9891_v57  ;;  %v7575_v30 = vpop.permute.xlu1 %7574  ;;  %vm12965_vm6 = vmmov %vm12960_vm0 }
0x4825   :  { %9482 = vmatprep.subr.msk.mxu1 %vm12143_vm2, %v9891_v57 }
0x4826   :  { %9483 = vmatpush3.msk.msra.mxu1 %vm12143_vm2, %v9891_v57  ;;  %vm12966_vm2 = vmmov %vm12960_vm0 }
0x4827   :  { %9484 = vmatprep.subr.msk.mxu1 %vm12155_vm4, %v9891_v57 }
0x4828   :  { %9485 = vmatpush3.msk.msra.mxu1 %vm12155_vm4, %v9891_v57  ;;  %vm12967_vm4 = vmmov %vm12954_vm5 }
0x4829   :  { %9486 = vmatprep.subr.msk.mxu1 %vm12167_vm3, %v9891_v57 }
0x482a   :  { %9487 = vmatpush3.msk.msra.mxu1 %vm12167_vm3, %v9891_v57 }
0x48e3   :  { %v9474_v43 = vpop.f32.mrf.mxu1 }
0x48e4   :  { %v7661_v52 = vadd.f32 %v9474_v43, %v7579_v28 }
0x48e5   :  { %v7655_v17 = vpop.f32.mrf.mxu1 }
0x48e6   :  { %v7665_v40 = vsub.f32 0.0, %v7661_v52  ;;  %v7656_v37 = vadd.f32 %v7655_v17, %v7575_v30 }
0x48e8   :  { %v7668_v25 = vmul.f32 1.442695, %v7665_v40  ;;  %v7664_v20 = vsub.f32 0.0, %v7656_v37 }
0x48ea   :  { %9803 = vpow2.f32 %v7668_v25  ;;  %v7666_v26 = vmul.f32 1.442695, %v7664_v20 }
0x48ec   :  { %9805 = vpow2.f32 %v7666_v26 }
0x48f7   :  { %v9804_v36 = vpop.eup %9803 }
0x48f8   :  { %v7671_v39 = vadd.f32 1.0, %v9804_v36 }
0x48f9   :  { %v9806_v44 = vpop.eup %9805 }
0x48fa   :  { %v7670_v0 = vadd.f32 1.0, %v9806_v44  ;;  %9807 = vrcp.f32 %v7671_v39 }
0x48fc   :  { %9809 = vrcp.f32 %v7670_v0  ;;  %v9908_v0 = vmov 63  }
0x4907   :  { %v9808_v29 = vpop.eup %9807 }
0x4908   :  { %v7677_v51 = vmul.f32 %v9808_v29, %v12434_v10 }
0x4909   :  { %v9810_v57 = vpop.eup %9809 }
0x490a   :  { %v7676_v46 = vmul.f32 %v9810_v57, %v12437_v58 }
0x490c   :  { %9477 = vmatprep.mubr.msk.f32.mxu0 %vm12965_vm6, %v7676_v46 }
0x490d   :  { %9478 = vmatmul.mubr.msk.f32.vlgmr.msra.gmra.mxu0 %vm12966_vm2, %v7677_v51 }
0x49cd   :  { %v9479_v56 = vpop.f32.mrf.mxu0 }
0x49ce   :  { %v7760_v53 = vsub.f32 0.0, %v9479_v56 }
0x49cf   :  { %v7750_v12 = vpop.f32.mrf.mxu0 }
0x49d0   :  { %v7762_v42 = vmax.f32 %v12405_v14, %v7760_v53  ;;  %v7759_v55 = vsub.f32 0.0, %v7750_v12 }
0x49d2   :  { %v7764_v7 = vmin.f32 %v7762_v42, %v9479_v56  ;;  %v7761_v4 = vmax.f32 %v12407_v18, %v7759_v55 }
0x49d4   :  { %v7766_v32 = vsub.f32 %v12405_v14, %v7764_v7  ;;  %v7763_v62 = vmin.f32 %v7761_v4, %v7750_v12 }
0x49d6   :  { %v7768_v58 = vadd.f32 %v7766_v32, %v12249_v48  ;;  %v7765_v10 = vsub.f32 %v12407_v18, %v7763_v62 }
0x49d8   :  { %v7767_v47 = vadd.f32 %v7765_v10, %v12253_v15  ;;  %v7772_v22 = vsel %vm5793_vm1, %v7768_v58, 0.0  ;;  %v7778_v23 = vmul.f32 %v7768_v58, %v7768_v58 }
0x49d9   :  { %7773 = vadd.xlane.f32.xlu0 %v7772_v22 }
0x49da   :  { %v7769_v45 = vsel %vm5793_vm1, %v7767_v47, 0.0  ;;  %v7777_v38 = vmul.f32 %v7767_v47, %v7767_v47  ;;  %v7782_v61 = vsel %vm5793_vm1, %v7778_v23, 0.0 }
0x49db   :  { %7770 = vadd.xlane.f32.xlu1 %v7769_v45 }
0x49dc   :  { %v7779_v14 = vsel %vm5793_vm1, %v7777_v38, 0.0 }
0x49dd   :  { %7783 = vadd.xlane.f32.xlu0 %v7782_v61 }
0x49df   :  { %7780 = vadd.xlane.f32.xlu1 %v7779_v14 }
0x4a62   :  { %v7774_v48 = vpop.xlane.xlu0 %7773 }
0x4a63   :  { %v7776_v18 = vmul.f32 0.03125, %v7774_v48 }
0x4a64   :  { %v7771_v13 = vpop.xlane.xlu1 %7770 }
0x4a65   :  { %v7775_v15 = vmul.f32 0.03125, %v7771_v13  ;;  %v7788_v11 = vmul.f32 %v7776_v18, %v7776_v18 }
0x4a66   :  { %v7784_v34 = vpop.xlane.xlu0 %7783 }
0x4a67   :  { %v7786_v16 = vmul.f32 0.03125, %v7784_v34  ;;  %v7787_v9 = vmul.f32 %v7775_v15, %v7775_v15 }
0x4a68   :  { %v7781_v1 = vpop.xlane.xlu1 %7780 }
0x4a69   :  { %v7790_v50 = vsub.f32 %v7786_v16, %v7788_v11  ;;  %v7785_v49 = vmul.f32 0.03125, %v7781_v1 }
0x4a6b   :  { %v7792_v2 = vadd.f32 1e-05, %v7790_v50  ;;  %v7789_v31 = vsub.f32 %v7785_v49, %v7787_v9 }
0x4a6d   :  { %9811 = vrsqrt.f32 %v7792_v2  ;;  %v7791_v41 = vadd.f32 1e-05, %v7789_v31 }
0x4a6f   :  { %9813 = vrsqrt.f32 %v7791_v41 }
0x4a7a   :  { %v9812_v63 = vpop.eup %9811 }
0x4a7b   :  { %v7796_v59 = vmul.f32 %v12425_v33, %v9812_v63 }
0x4a7c   :  { %v9814_v3 = vpop.eup %9813 }
0x4a7d   :  { %v7810_v5 = vmul.f32 %v7796_v59, %v7776_v18  ;;  %v7795_v24 = vmul.f32 %v12431_v54, %v9814_v3 }
0x4a7f   :  { %7815 = vrot.lane.b32.xlu0 %v7810_v5, %s9830_s16  ;;  %v7809_v60 = vmul.f32 %v7795_v24, %v7775_v15 }
0x4a81   :  { %7813 = vrot.lane.b32.xlu1 %v7809_v60, %s9830_s16 }
0x4a85   :  { %7799 = vperm.xlu1 %9685, %v7795_v24  }
0x4a89   :  { %7804 = vperm.xlu1 %9685, %v7796_v59  }
0x4a8d   :  { %9687 = vset.pattern.permute.xlu1 %v9907_v6 }
0x4af1   :  { %v7816_v21 = vpop.permute.xlu0 %7815 }
0x4af2   :  { %v7820_v27 = vsub.f32 %v12425_v33, %v7816_v21 }
0x4af3   :  { %v7814_v28 = vpop.permute.xlu1 %7813 }
0x4af4   :  { %v7819_v43 = vsub.f32 %v12431_v54, %v7814_v28  ;;  %7828 = vperm.xlu1 %9687, %v7820_v27  }
0x4af6   :  { %7823 = vperm.xlu0 %9686, %v7819_v43  }
0x4af8   :  { %7924 = vrot.lane.b32.xlu1 %v12418_v35, %s9837_s4 }
0x4af9   :  { %9688 = vset.pattern.permute.xlu1 %v9908_v0 }
0x4afa   :  { %7926 = vrot.lane.b32.xlu0 %v12443_v8, %s9837_s4 }
0x4afb   :  { %9689 = vset.pattern.permute.xlu0 %v9908_v0 }
0x4afc   :  { %7921 = vperm.xlu1 %9688, %v12425_v33   ;;  %v9909_v33 = vmov 64  }
0x4afe   :  { %7917 = vperm.xlu0 %9689, %v12431_v54  }
0x4b00   :  { %v7800_v30 = vpop.permute.xlu1 %7799  ;;  %8014 = vrot.lane.b32.xlu1 %v12418_v35, %s9835_s29 }
0x4b01   :  { %v7807_v37 = vmul.f32 %v7800_v30, %v7767_v47 }
0x4b02   :  { %9690 = vset.pattern.permute.xlu0 %v9909_v33 }
0x4b03   :  { %8008 = vperm.xlu0 %9690, %v12431_v54  }
0x4b04   :  { %v7805_v52 = vpop.permute.xlu1 %7804  ;;  %8016 = vrot.lane.b32.xlu1 %v12443_v8, %s9835_s29 }
0x4b05   :  { %v7808_v17 = vmul.f32 %v7805_v52, %v7768_v58 }
0x4b6f   :  { %v7829_v40 = vpop.permute.xlu1 %7828 }
0x4b70   :  { %v7832_v25 = vadd.f32 %v7829_v40, %v7808_v17 }
0x4b71   :  { %v7824_v20 = vpop.permute.xlu0 %7823 }
0x4b72   :  { %v7831_v26 = vadd.f32 %v7824_v20, %v7807_v37  ;;  %v7834_v39 = vmax.f32 %v7832_v25, 0.0 }
0x4b73   :  { %v7925_v44 = vpop.permute.xlu1 %7924 }
0x4b74   :  { %v7833_v36 = vmax.f32 %v7831_v26, 0.0  ;;  %9495 = vmatprep.mubr.msk.f32.mxu0 %vm12967_vm4, %v7925_v44 }
0x4b75   :  { %v7927_v46 = vpop.permute.xlu0 %7926 }
0x4b76   :  { %9488 = vmatprep.mubr.msk.f32.mxu1 %vm5793_vm1, %v7833_v36 }
0x4b77   :  { %9489 = vmatmul.mubr.msk.f32.vlgmr.msra.gmra.mxu1 %vm5793_vm1, %v7834_v39  ;;  %vm12968_vm1 = vmmov %vm12967_vm4  ;;  %v7922_v51 = vpop.permute.xlu1 %7921 }
0x4b78   :  { %vm12969_vm3 = vmmov %vm12968_vm1 }
0x4b79   :  { %v7918_v53 = vpop.permute.xlu0 %7917  ;;  %vm12970_vm7 = vmmov %vm12968_vm1 }
0x4b7b   :  { %v8015_v56 = vpop.permute.xlu1 %8014 }
0x4b7e   :  { %v8009_v4 = vpop.permute.xlu0 %8008 }
0x4b7f   :  { %v8017_v55 = vpop.permute.xlu1 %8016 }
0x4c37   :  { %v9490_v29 = vpop.f32.mrf.mxu1 }
0x4c38   :  { %9491 = vmatprep.subr.mxu0 %v9490_v29 }
0x4c39   :  { %v7907_v57 = vpop.f32.mrf.mxu1  ;;  %9492 = vmatpush3.msra.mxu0 %v9490_v29 }
0x4c3a   :  { %9493 = vmatprep.subr.mxu0 %v7907_v57 }
0x4c3b   :  { %9494 = vmatpush3.msra.mxu0 %v7907_v57 }
0x4c3c   :  { %9496 = vmatmul.mubr.msk.f32.vlgmr.msra.gmra.mxu0 %vm12968_vm1, %v7927_v46 }
0x4c3d   :  { %9502 = vmatprep.mubr.msk.f32.mxu0 %vm12969_vm3, %v8015_v56 }
0x4cfc   :  { %v9497_v35 = vpop.f32.mrf.mxu0 }
0x4cfd   :  { %v8004_v8 = vadd.f32 %v9497_v35, %v7922_v51 }
0x4cfe   :  { %v7998_v12 = vpop.f32.mrf.mxu0 }
0x4cff   :  { %v7999_v42 = vadd.f32 %v7998_v12, %v7918_v53  ;;  %9498 = vmatprep.subr.mxu0 %v8004_v8 }
0x4d00   :  { %9499 = vmatpush3.msra.mxu0 %v8004_v8 }
0x4d01   :  { %9500 = vmatprep.subr.mxu0 %v7999_v42 }
0x4d02   :  { %9501 = vmatpush3.msra.mxu0 %v7999_v42 }
0x4d03   :  { %9503 = vmatmul.mubr.msk.f32.vlgmr.msra.gmra.mxu0 %vm12970_vm7, %v8017_v55 }
0x4dc3   :  { %v9504_v7 = vpop.f32.mrf.mxu0 }
0x4dc5   :  { %v8088_v32 = vpop.f32.mrf.mxu0 }
0x4dc6   :  { %v8089_v62 = vadd.f32 %v8088_v32, %v8009_v4 }
0x4dc8   :  { %v8097_v58 = vsel %vm8096_vm11, %v8089_v62, -inf }
0x4dc9   :  { %v8098_v54 = vrot.slane %v8097_v58, 4 }
0x4dcb   :  { %v8099_v10 = vmax.f32 %v8097_v58, %v8098_v54 }
0x4dcd   :  { %v8100_v47 = vrot.slane %v8099_v10, 2 }
0x4dcf   :  { %v8101_v22 = vmax.f32 %v8099_v10, %v8100_v47 }
0x4dd1   :  { %v8102_v23 = vrot.slane %v8101_v22, 1 }
0x4dd3   :  { %v8103_v45 = vmax.f32 %v8101_v22, %v8102_v23 }
0x4dd5   :  { %v8104_v38 = vsub.f32 %v8089_v62, %v8103_v45 }
0x4dd7   :  { %v8105_v61 = vmul.f32 1.442695, %v8104_v38 }
0x4dd9   :  { %9815 = vpow2.f32 %v8105_v61 }
0x4de6   :  { %v9816_v14 = vpop.eup %9815 }
0x4de7   :  { %v8107_v19 = vsel %vm8096_vm11, %v9816_v14, 0.0 }
0x4de8   :  { %v8108_v48 = vrot.slane %v8107_v19, 4 }
0x4dea   :  { %v8109_v18 = vadd.f32 %v8108_v48, %v8107_v19 }
0x4dec   :  { %v8110_v13 = vrot.slane %v8109_v18, 2 }
0x4dee   :  { %v8111_v15 = vadd.f32 %v8110_v13, %v8109_v18 }
0x4df0   :  { %v8112_v34 = vrot.slane %v8111_v15, 1 }
0x4df2   :  { %v8113_v11 = vadd.f32 %v8112_v34, %v8111_v15 }
0x4df4   :  { %9817 = vrcp.f32 %v8113_v11 }
0x4e01   :  { %v9818_v16 = vpop.eup %9817 }
0x4e02   :  { %v8115_v1 = vmul.f32 %v9818_v16, %v9816_v14 }
0x4e04   :  { %8116 = vst.msk [vmem:[%s12537_s3] sm:$0x7] %vm8096_vm11, %v8115_v1 }

</bundles_post_ra>
